<compile_context>
chip_gen: v7x
topology: tpu7x:2x2x1
jax: 0.10.0
libtpu: 0.0.40
codegen_flags: <defaults>
</compile_context>

<pallas_src>
import functools
import math

import jax
import jax.numpy as jnp
from jax.experimental import pallas as pl
from jax.experimental.pallas import tpu as pltpu


# Set to jnp.bfloat16 on v6e/v7x for ~2-4x MXU throughput (accumulation stays
# f32 via preferred_element_type).  Default f32 keeps the strict 2e-3 allclose
# against the pure-JAX reference; bf16 needs the tolerance loosened (~3e-2).
MXU_DTYPE = jnp.float32


# --------------------------- in-kernel building blocks ----------------------

def _mm(a, b):
    """MXU matmul with f32 accumulation (operands optionally cast to bf16)."""
    if MXU_DTYPE != jnp.float32:
        a = a.astype(MXU_DTYPE)
        b = b.astype(MXU_DTYPE)
    return jnp.dot(a, b, preferred_element_type=jnp.float32)


def _bmm(a, b, pattern):
    """Batched MXU matmul (one batch dim) with f32 accumulation."""
    if MXU_DTYPE != jnp.float32:
        a = a.astype(MXU_DTYPE)
        b = b.astype(MXU_DTYPE)
    return jnp.einsum(pattern, a, b, preferred_element_type=jnp.float32)


def _add_layernorm(x, resid, g, b, eps):
    """LayerNorm(x + resid) over the last dim (values, not refs); f32 VPU math."""
    z = x + resid
    m = jnp.mean(z, axis=-1, keepdims=True)
    zc = z - m
    v = jnp.mean(zc * zc, axis=-1, keepdims=True)
    return zc * jax.lax.rsqrt(v + eps) * g + b


def _softmax_lastdim(s):
    s = s - jnp.max(s, axis=-1, keepdims=True)
    p = jnp.exp(s)
    l = jnp.sum(p, axis=-1, keepdims=True)
    inv = pl.reciprocal(l, approx=True)     # EUP slot (free vs VALU divide)
    inv = inv * (2.0 - l * inv)             # one Newton step -> ~f32 exact
    return p * inv


def _mha_core(q2d, kv2d, *, bb, sq, sk, nhead):
    """Attention core on pre-projected activations; all heads, batch collapsed.

    q2d : (bb*sq, D)    query projections (head-major lanes)
    kv2d: (bb*sk, 2*D)  packed [K | V] projections
    Returns merged-head context, (bb*sq, D) (ready for one (D,D) out-proj).
    """
    d = q2d.shape[-1]
    dh = d // nhead
    q = (q2d * (1.0 / math.sqrt(dh))).reshape(bb, sq, d)   # scale folded into q
    k = kv2d[:, :d].reshape(bb, sk, d)
    v = kv2d[:, d:].reshape(bb, sk, d)
    ctx = []
    for h in range(nhead):                                  # static unroll over heads
        sl = slice(h * dh, (h + 1) * dh)
        s = _bmm(q[..., sl], k[..., sl], "bqd,bkd->bqk")    # (bb, sq, sk)
        p = _softmax_lastdim(s)
        ctx.append(_bmm(p, v[..., sl], "bqk,bkd->bqd"))     # (bb, sq, dh)
    # Merge heads along lanes -> single (bb*sq, D) slab (no per-head out-proj).
    return jnp.concatenate(ctx, axis=-1).reshape(bb * sq, d)


# ------------------------------ fused model kernel --------------------------

def _transformer_kernel(
    src_ref, tgt_ref,
    e_qkv_w, e_qkv_b, e_o_w, e_o_b, e_ln1_g, e_ln1_b,
    e_f1_w, e_f1_b, e_f2_w, e_f2_b, e_ln2_g, e_ln2_b,
    d_sa_qkv_w, d_sa_qkv_b, d_sa_o_w, d_sa_o_b, d_ln1_g, d_ln1_b,
    d_ca_q_w, d_ca_q_b, d_ca_kv_w, d_ca_kv_b, d_ca_o_w, d_ca_o_b,
    d_ln2_g, d_ln2_b,
    d_f1_w, d_f1_b, d_f2_w, d_f2_b, d_ln3_g, d_ln3_b,
    dense_w, dense_b,
    out_ref,
    *, bb, s_src, s_tgt, nhead, n_enc, n_dec, eps):
    dm = dense_w.shape[0]                                  # d_model

    mem = src_ref[...].reshape(bb * s_src, dm)             # (B*Ss, D) rows
    x = tgt_ref[...].reshape(bb * s_tgt, dm)               # (B*St, D) rows

    # ---------------- encoder stack (activations never leave VMEM) ----------
    for l in range(n_enc):                                  # static unroll
        qkv = _mm(mem, e_qkv_w[l]) + e_qkv_b[l]             # fused (D,3D) QKV
        ctx = _mha_core(qkv[:, :dm], qkv[:, dm:],
                        bb=bb, sq=s_src, sk=s_src, nhead=nhead)
        sa = _mm(ctx, e_o_w[l]) + e_o_b[l]                  # single out-proj
        x1 = _add_layernorm(mem, sa, e_ln1_g[l], e_ln1_b[l], eps)
        h = jnp.maximum(_mm(x1, e_f1_w[l]) + e_f1_b[l], 0.0)
        ff = _mm(h, e_f2_w[l]) + e_f2_b[l]
        mem = _add_layernorm(x1, ff, e_ln2_g[l], e_ln2_b[l], eps)

    # ---------------- decoder stack ------------------------------------------
    for l in range(n_dec):                                  # static unroll
        qkv = _mm(x, d_sa_qkv_w[l]) + d_sa_qkv_b[l]
        ctx = _mha_core(qkv[:, :dm], qkv[:, dm:],
                        bb=bb, sq=s_tgt, sk=s_tgt, nhead=nhead)
        sa = _mm(ctx, d_sa_o_w[l]) + d_sa_o_b[l]
        x1 = _add_layernorm(x, sa, d_ln1_g[l], d_ln1_b[l], eps)

        q = _mm(x1, d_ca_q_w[l]) + d_ca_q_b[l]               # cross-attention
        kv = _mm(mem, d_ca_kv_w[l]) + d_ca_kv_b[l]           # fused (D,2D) KV
        ctx = _mha_core(q, kv, bb=bb, sq=s_tgt, sk=s_src, nhead=nhead)
        ca = _mm(ctx, d_ca_o_w[l]) + d_ca_o_b[l]
        x2 = _add_layernorm(x1, ca, d_ln2_g[l], d_ln2_b[l], eps)

        h = jnp.maximum(_mm(x2, d_f1_w[l]) + d_f1_b[l], 0.0)
        ff = _mm(h, d_f2_w[l]) + d_f2_b[l]
        x = _add_layernorm(x2, ff, d_ln3_g[l], d_ln3_b[l], eps)

    # ---------------- fused vocab projection: only logits hit HBM ------------
    logits = _mm(x, dense_w[...]) + dense_b[...]             # (B*St, V)
    out_ref[...] = logits.reshape(bb, s_tgt, -1).astype(out_ref.dtype)


# ------------------------------- host-side wrapper ---------------------------

_WEIGHT_ORDER = (
    "enc_qkv_w", "enc_qkv_b", "enc_o_w", "enc_o_b", "enc_ln1_g", "enc_ln1_b",
    "enc_ff1_w", "enc_ff1_b", "enc_ff2_w", "enc_ff2_b", "enc_ln2_g", "enc_ln2_b",
    "dec_sa_qkv_w", "dec_sa_qkv_b", "dec_sa_o_w", "dec_sa_o_b",
    "dec_ln1_g", "dec_ln1_b",
    "dec_ca_q_w", "dec_ca_q_b", "dec_ca_kv_w", "dec_ca_kv_b",
    "dec_ca_o_w", "dec_ca_o_b", "dec_ln2_g", "dec_ln2_b",
    "dec_ff1_w", "dec_ff1_b", "dec_ff2_w", "dec_ff2_b", "dec_ln3_g", "dec_ln3_b",
    "dense_w", "dense_b",
)


def _rep_spec(shape):
    """BlockSpec for a weight that is the same full block at every grid step."""
    zeros = (0,) * len(shape)
    return pl.BlockSpec(shape, lambda i, z=zeros: z)


def transformer_forward(packed, src_ids, tgt_ids, pe, *, nhead,
                        batch_block=None, eps=1e-5):
    """Embedding + PE in XLA (tiny gather), then ONE fused Pallas kernel."""
    emb = packed["embedding"]
    B, Ss = src_ids.shape
    St = tgt_ids.shape[1]
    V, D = emb.shape
    n_enc = packed["enc_qkv_w"].shape[0]
    n_dec = packed["dec_sa_qkv_w"].shape[0]

    src = jnp.take(emb, src_ids, axis=0) + pe[None, :Ss]
    tgt = jnp.take(emb, tgt_ids, axis=0) + pe[None, :St]

    bb = B if batch_block is None else batch_block
    assert B % bb == 0, (B, bb)
    grid = (B // bb,)

    weights = [packed[name] for name in _WEIGHT_ORDER]
    in_specs = ([pl.BlockSpec((bb, Ss, D), lambda i: (i, 0, 0)),
                 pl.BlockSpec((bb, St, D), lambda i: (i, 0, 0))]
                + [_rep_spec(w.shape) for w in weights])

    kernel = functools.partial(
        _transformer_kernel, bb=bb, s_src=Ss, s_tgt=St,
        nhead=nhead, n_enc=n_enc, n_dec=n_dec, eps=eps)

    return pl.pallas_call(
        kernel,
        out_shape=jax.ShapeDtypeStruct((B, St, V), jnp.float32),
        grid=grid,
        in_specs=in_specs,
        out_specs=pl.BlockSpec((bb, St, V), lambda i: (i, 0, 0)),
        compiler_params=pltpu.CompilerParams(
            dimension_semantics=("parallel",),       # batch-block shard (v7x 2-TC)
            vmem_limit_bytes=32 * 1024 * 1024),      # safe on v5e/v6e/v7x; model <1 MiB
    )(src, tgt, *weights)


# ----------------------- one-time weight packing (outside jit) ---------------

def pack_params(params):
    enc, dec = params["encoder"], params["decoder"]
    row = lambda v: v[None, :]

    def stack(layers, fn):
        return jnp.stack([fn(p) for p in layers])

    def qkv_w(att):
        return jnp.concatenate([att["q"]["w"], att["k"]["w"], att["v"]["w"]], axis=1)

    def qkv_b(att):
        return jnp.concatenate([att["q"]["b"], att["k"]["b"], att["v"]["b"]])[None, :]

    def kv_w(att):
        return jnp.concatenate([att["k"]["w"], att["v"]["w"]], axis=1)

    def kv_b(att):
        return jnp.concatenate([att["k"]["b"], att["v"]["b"]])[None, :]

    return {
        "embedding": params["embedding"],
        "dense_w": params["dense"]["w"],
        "dense_b": row(params["dense"]["b"]),
        # encoder stack
        "enc_qkv_w": stack(enc, lambda p: qkv_w(p["self_attn"])),
        "enc_qkv_b": stack(enc, lambda p: qkv_b(p["self_attn"])),
        "enc_o_w":   stack(enc, lambda p: p["self_attn"]["o"]["w"]),
        "enc_o_b":   stack(enc, lambda p: row(p["self_attn"]["o"]["b"])),
        "enc_ln1_g": stack(enc, lambda p: row(p["norm1"]["g"])),
        "enc_ln1_b": stack(enc, lambda p: row(p["norm1"]["b"])),
        "enc_ff1_w": stack(enc, lambda p: p["ff1"]["w"]),
        "enc_ff1_b": stack(enc, lambda p: row(p["ff1"]["b"])),
        "enc_ff2_w": stack(enc, lambda p: p["ff2"]["w"]),
        "enc_ff2_b": stack(enc, lambda p: row(p["ff2"]["b"])),
        "enc_ln2_g": stack(enc, lambda p: row(p["norm2"]["g"])),
        "enc_ln2_b": stack(enc, lambda p: row(p["norm2"]["b"])),
        # decoder stack
        "dec_sa_qkv_w": stack(dec, lambda p: qkv_w(p["self_attn"])),
        "dec_sa_qkv_b": stack(dec, lambda p: qkv_b(p["self_attn"])),
        "dec_sa_o_w":   stack(dec, lambda p: p["self_attn"]["o"]["w"]),
        "dec_sa_o_b":   stack(dec, lambda p: row(p["self_attn"]["o"]["b"])),
        "dec_ln1_g":    stack(dec, lambda p: row(p["norm1"]["g"])),
        "dec_ln1_b":    stack(dec, lambda p: row(p["norm1"]["b"])),
        "dec_ca_q_w":   stack(dec, lambda p: p["cross_attn"]["q"]["w"]),
        "dec_ca_q_b":   stack(dec, lambda p: row(p["cross_attn"]["q"]["b"])),
        "dec_ca_kv_w":  stack(dec, lambda p: kv_w(p["cross_attn"])),
        "dec_ca_kv_b":  stack(dec, lambda p: kv_b(p["cross_attn"])),
        "dec_ca_o_w":   stack(dec, lambda p: p["cross_attn"]["o"]["w"]),
        "dec_ca_o_b":   stack(dec, lambda p: row(p["cross_attn"]["o"]["b"])),
        "dec_ln2_g":    stack(dec, lambda p: row(p["norm2"]["g"])),
        "dec_ln2_b":    stack(dec, lambda p: row(p["norm2"]["b"])),
        "dec_ff1_w":    stack(dec, lambda p: p["ff1"]["w"]),
        "dec_ff1_b":    stack(dec, lambda p: row(p["ff1"]["b"])),
        "dec_ff2_w":    stack(dec, lambda p: p["ff2"]["w"]),
        "dec_ff2_b":    stack(dec, lambda p: row(p["ff2"]["b"])),
        "dec_ln3_g":    stack(dec, lambda p: row(p["norm3"]["g"])),
        "dec_ln3_b":    stack(dec, lambda p: row(p["norm3"]["b"])),
    }


# ----------------------------- model pieces / init ---------------------------

def positional_encoding_table(max_seq_len, d_model):
    pos = jnp.arange(max_seq_len, dtype=jnp.float32)[:, None]
    div = jnp.exp(jnp.arange(0, d_model, 2, dtype=jnp.float32)
                  * (-math.log(10000.0) / d_model))
    pe = jnp.zeros((max_seq_len, d_model), jnp.float32)
    pe = pe.at[:, 0::2].set(jnp.sin(pos * div))
    pe = pe.at[:, 1::2].set(jnp.cos(pos * div))
    return pe


def init_params(key, vocab, d_model, nhead, dff, n_enc, n_dec):
    def dense_p(k, fan_in, fan_out):
        k1, k2 = jax.random.split(k)
        w = jax.random.normal(k1, (fan_in, fan_out), jnp.float32) / math.sqrt(fan_in)
        b = jax.random.normal(k2, (fan_out,), jnp.float32) * 0.01
        return {"w": w, "b": b}

    def mha_p(k, d):
        ks = jax.random.split(k, 4)
        return {"q": dense_p(ks[0], d, d), "k": dense_p(ks[1], d, d),
                "v": dense_p(ks[2], d, d), "o": dense_p(ks[3], d, d)}

    def ln_p(d):
        return {"g": jnp.ones((d,), jnp.float32), "b": jnp.zeros((d,), jnp.float32)}

    keys = jax.random.split(key, 2 + n_enc + n_dec)
    params = {
        "embedding": jax.random.normal(keys[0], (vocab, d_model), jnp.float32),
        "dense": dense_p(keys[1], d_model, vocab),
        "encoder": [],
        "decoder": [],
    }
    for i in range(n_enc):
        ks = jax.random.split(keys[2 + i], 3)
        params["encoder"].append({
            "self_attn": mha_p(ks[0], d_model),
            "ff1": dense_p(ks[1], d_model, dff),
            "ff2": dense_p(ks[2], dff, d_model),
            "norm1": ln_p(d_model), "norm2": ln_p(d_model),
        })
    for i in range(n_dec):
        ks = jax.random.split(keys[2 + n_enc + i], 4)
        params["decoder"].append({
            "self_attn": mha_p(ks[0], d_model),
            "cross_attn": mha_p(ks[1], d_model),
            "ff1": dense_p(ks[2], d_model, dff),
            "ff2": dense_p(ks[3], dff, d_model),
            "norm1": ln_p(d_model), "norm2": ln_p(d_model), "norm3": ln_p(d_model),
        })
    return params


# ------------------------- pure-JAX reference check ------------------------

def _ref_ln(x, g, b, eps=1e-5):
    m = x.mean(-1, keepdims=True)
    v = ((x - m) ** 2).mean(-1, keepdims=True)
    return (x - m) / jnp.sqrt(v + eps) * g + b


def _ref_mha(q_in, k_in, v_in, p, nhead):
    B, Sq, D = q_in.shape
    Sk = k_in.shape[1]
    dh = D // nhead
    q = q_in @ p["q"]["w"] + p["q"]["b"]
    k = k_in @ p["k"]["w"] + p["k"]["b"]
    v = v_in @ p["v"]["w"] + p["v"]["b"]
    q = q.reshape(B, Sq, nhead, dh).transpose(0, 2, 1, 3)
    k = k.reshape(B, Sk, nhead, dh).transpose(0, 2, 1, 3)
    v = v.reshape(B, Sk, nhead, dh).transpose(0, 2, 1, 3)
    s = jnp.einsum("bhqd,bhkd->bhqk", q, k) / math.sqrt(dh)
    a = jax.nn.softmax(s, axis=-1)
    o = jnp.einsum("bhqk,bhkd->bhqd", a, v).transpose(0, 2, 1, 3).reshape(B, Sq, D)
    return o @ p["o"]["w"] + p["o"]["b"]


def ref_forward(params, src_ids, tgt_ids, pe, nhead):
    emb = params["embedding"]
    Ss, St = src_ids.shape[1], tgt_ids.shape[1]
    src = jnp.take(emb, src_ids, axis=0) + pe[None, :Ss]
    tgt = jnp.take(emb, tgt_ids, axis=0) + pe[None, :St]

    mem = src
    for p in params["encoder"]:
        sa = _ref_mha(mem, mem, mem, p["self_attn"], nhead)
        x1 = _ref_ln(mem + sa, p["norm1"]["g"], p["norm1"]["b"])
        ff = jnp.maximum(x1 @ p["ff1"]["w"] + p["ff1"]["b"], 0.0) @ p["ff2"]["w"] + p["ff2"]["b"]
        mem = _ref_ln(x1 + ff, p["norm2"]["g"], p["norm2"]["b"])

    out = tgt
    for p in params["decoder"]:
        sa = _ref_mha(out, out, out, p["self_attn"], nhead)
        x1 = _ref_ln(out + sa, p["norm1"]["g"], p["norm1"]["b"])
        ca = _ref_mha(x1, mem, mem, p["cross_attn"], nhead)
        x2 = _ref_ln(x1 + ca, p["norm2"]["g"], p["norm2"]["b"])
        ff = jnp.maximum(x2 @ p["ff1"]["w"] + p["ff1"]["b"], 0.0) @ p["ff2"]["w"] + p["ff2"]["b"]
        out = _ref_ln(x2 + ff, p["norm3"]["g"], p["norm3"]["b"])

    return out @ params["dense"]["w"] + params["dense"]["b"]


# ----------------------------------- main -----------------------------------

if __name__ == "__main__":
    B, S_SRC, S_TGT = 2, 8, 8
    VOCAB, D_MODEL, NHEAD, DFF = 64, 32, 4, 64
    N_ENC, N_DEC, MAX_SEQ = 2, 2, 16

    key = jax.random.PRNGKey(0)
    kp, ks, kt = jax.random.split(key, 3)
    params = init_params(kp, VOCAB, D_MODEL, NHEAD, DFF, N_ENC, N_DEC)
    packed = pack_params(params)            # one-time weight packing (outside jit)
    pe = positional_encoding_table(MAX_SEQ, D_MODEL)

    src_ids = jax.random.randint(ks, (B, S_SRC), 0, VOCAB, dtype=jnp.int32)
    tgt_ids = jax.random.randint(kt, (B, S_TGT), 0, VOCAB, dtype=jnp.int32)

    fwd = jax.jit(functools.partial(transformer_forward, nhead=NHEAD))
    logits = jax.block_until_ready(fwd(packed, src_ids, tgt_ids, pe))
    assert logits.shape == (B, S_TGT, VOCAB), logits.shape

    ref = jax.block_until_ready(ref_forward(params, src_ids, tgt_ids, pe, NHEAD))
    tol = 2e-3 if MXU_DTYPE == jnp.float32 else 3e-2
    if not bool(jnp.allclose(logits, ref, atol=tol, rtol=tol)):
        raise AssertionError("Pallas output does not match pure-JAX reference")

    print("KERNEL_OK")
</pallas_src>

<mosaic_0001>
module attributes {stable_mosaic.version = 11 : i64} {
  func.func @_transformer_kernel(%arg0: i32, %arg1: memref<2x8x32xf32, #tpu.memory_space<vmem>>, %arg2: memref<2x8x32xf32, #tpu.memory_space<vmem>>, %arg3: memref<2x32x96xf32, #tpu.memory_space<vmem>>, %arg4: memref<2x1x96xf32, #tpu.memory_space<vmem>>, %arg5: memref<2x32x32xf32, #tpu.memory_space<vmem>>, %arg6: memref<2x1x32xf32, #tpu.memory_space<vmem>>, %arg7: memref<2x1x32xf32, #tpu.memory_space<vmem>>, %arg8: memref<2x1x32xf32, #tpu.memory_space<vmem>>, %arg9: memref<2x32x64xf32, #tpu.memory_space<vmem>>, %arg10: memref<2x1x64xf32, #tpu.memory_space<vmem>>, %arg11: memref<2x64x32xf32, #tpu.memory_space<vmem>>, %arg12: memref<2x1x32xf32, #tpu.memory_space<vmem>>, %arg13: memref<2x1x32xf32, #tpu.memory_space<vmem>>, %arg14: memref<2x1x32xf32, #tpu.memory_space<vmem>>, %arg15: memref<2x32x96xf32, #tpu.memory_space<vmem>>, %arg16: memref<2x1x96xf32, #tpu.memory_space<vmem>>, %arg17: memref<2x32x32xf32, #tpu.memory_space<vmem>>, %arg18: memref<2x1x32xf32, #tpu.memory_space<vmem>>, %arg19: memref<2x1x32xf32, #tpu.memory_space<vmem>>, %arg20: memref<2x1x32xf32, #tpu.memory_space<vmem>>, %arg21: memref<2x32x32xf32, #tpu.memory_space<vmem>>, %arg22: memref<2x1x32xf32, #tpu.memory_space<vmem>>, %arg23: memref<2x32x64xf32, #tpu.memory_space<vmem>>, %arg24: memref<2x1x64xf32, #tpu.memory_space<vmem>>, %arg25: memref<2x32x32xf32, #tpu.memory_space<vmem>>, %arg26: memref<2x1x32xf32, #tpu.memory_space<vmem>>, %arg27: memref<2x1x32xf32, #tpu.memory_space<vmem>>, %arg28: memref<2x1x32xf32, #tpu.memory_space<vmem>>, %arg29: memref<2x32x64xf32, #tpu.memory_space<vmem>>, %arg30: memref<2x1x64xf32, #tpu.memory_space<vmem>>, %arg31: memref<2x64x32xf32, #tpu.memory_space<vmem>>, %arg32: memref<2x1x32xf32, #tpu.memory_space<vmem>>, %arg33: memref<2x1x32xf32, #tpu.memory_space<vmem>>, %arg34: memref<2x1x32xf32, #tpu.memory_space<vmem>>, %arg35: memref<32x64xf32, #tpu.memory_space<vmem>>, %arg36: memref<1x64xf32, #tpu.memory_space<vmem>>, %arg37: memref<2x8x64xf32, #tpu.memory_space<vmem>>) attributes {dimension_semantics = [#tpu.dimension_semantics<parallel>], iteration_bounds = array<i64: 1>, scalar_prefetch = 0 : i64, scratch_operands = 0 : i64, tpu.core_type = #tpu.core_type<tc>, window_params = [{transform_indices = @transform_0, window_bounds = array<i64: 2, 8, 32>}, {transform_indices = @transform_1, window_bounds = array<i64: 2, 8, 32>}, {pipeline_mode = #tpu.pipeline_mode<synchronous>, transform_indices = @transform_2, window_bounds = array<i64: 2, 32, 96>}, {pipeline_mode = #tpu.pipeline_mode<synchronous>, transform_indices = @transform_3, window_bounds = array<i64: 2, 1, 96>}, {pipeline_mode = #tpu.pipeline_mode<synchronous>, transform_indices = @transform_4, window_bounds = array<i64: 2, 32, 32>}, {pipeline_mode = #tpu.pipeline_mode<synchronous>, transform_indices = @transform_5, window_bounds = array<i64: 2, 1, 32>}, {pipeline_mode = #tpu.pipeline_mode<synchronous>, transform_indices = @transform_6, window_bounds = array<i64: 2, 1, 32>}, {pipeline_mode = #tpu.pipeline_mode<synchronous>, transform_indices = @transform_7, window_bounds = array<i64: 2, 1, 32>}, {pipeline_mode = #tpu.pipeline_mode<synchronous>, transform_indices = @transform_8, window_bounds = array<i64: 2, 32, 64>}, {pipeline_mode = #tpu.pipeline_mode<synchronous>, transform_indices = @transform_9, window_bounds = array<i64: 2, 1, 64>}, {pipeline_mode = #tpu.pipeline_mode<synchronous>, transform_indices = @transform_10, window_bounds = array<i64: 2, 64, 32>}, {pipeline_mode = #tpu.pipeline_mode<synchronous>, transform_indices = @transform_11, window_bounds = array<i64: 2, 1, 32>}, {pipeline_mode = #tpu.pipeline_mode<synchronous>, transform_indices = @transform_12, window_bounds = array<i64: 2, 1, 32>}, {pipeline_mode = #tpu.pipeline_mode<synchronous>, transform_indices = @transform_13, window_bounds = array<i64: 2, 1, 32>}, {pipeline_mode = #tpu.pipeline_mode<synchronous>, transform_indices = @transform_14, window_bounds = array<i64: 2, 32, 96>}, {pipeline_mode = #tpu.pipeline_mode<synchronous>, transform_indices = @transform_15, window_bounds = array<i64: 2, 1, 96>}, {pipeline_mode = #tpu.pipeline_mode<synchronous>, transform_indices = @transform_16, window_bounds = array<i64: 2, 32, 32>}, {pipeline_mode = #tpu.pipeline_mode<synchronous>, transform_indices = @transform_17, window_bounds = array<i64: 2, 1, 32>}, {pipeline_mode = #tpu.pipeline_mode<synchronous>, transform_indices = @transform_18, window_bounds = array<i64: 2, 1, 32>}, {pipeline_mode = #tpu.pipeline_mode<synchronous>, transform_indices = @transform_19, window_bounds = array<i64: 2, 1, 32>}, {pipeline_mode = #tpu.pipeline_mode<synchronous>, transform_indices = @transform_20, window_bounds = array<i64: 2, 32, 32>}, {pipeline_mode = #tpu.pipeline_mode<synchronous>, transform_indices = @transform_21, window_bounds = array<i64: 2, 1, 32>}, {pipeline_mode = #tpu.pipeline_mode<synchronous>, transform_indices = @transform_22, window_bounds = array<i64: 2, 32, 64>}, {pipeline_mode = #tpu.pipeline_mode<synchronous>, transform_indices = @transform_23, window_bounds = array<i64: 2, 1, 64>}, {pipeline_mode = #tpu.pipeline_mode<synchronous>, transform_indices = @transform_24, window_bounds = array<i64: 2, 32, 32>}, {pipeline_mode = #tpu.pipeline_mode<synchronous>, transform_indices = @transform_25, window_bounds = array<i64: 2, 1, 32>}, {pipeline_mode = #tpu.pipeline_mode<synchronous>, transform_indices = @transform_26, window_bounds = array<i64: 2, 1, 32>}, {pipeline_mode = #tpu.pipeline_mode<synchronous>, transform_indices = @transform_27, window_bounds = array<i64: 2, 1, 32>}, {pipeline_mode = #tpu.pipeline_mode<synchronous>, transform_indices = @transform_28, window_bounds = array<i64: 2, 32, 64>}, {pipeline_mode = #tpu.pipeline_mode<synchronous>, transform_indices = @transform_29, window_bounds = array<i64: 2, 1, 64>}, {pipeline_mode = #tpu.pipeline_mode<synchronous>, transform_indices = @transform_30, window_bounds = array<i64: 2, 64, 32>}, {pipeline_mode = #tpu.pipeline_mode<synchronous>, transform_indices = @transform_31, window_bounds = array<i64: 2, 1, 32>}, {pipeline_mode = #tpu.pipeline_mode<synchronous>, transform_indices = @transform_32, window_bounds = array<i64: 2, 1, 32>}, {pipeline_mode = #tpu.pipeline_mode<synchronous>, transform_indices = @transform_33, window_bounds = array<i64: 2, 1, 32>}, {pipeline_mode = #tpu.pipeline_mode<synchronous>, transform_indices = @transform_34, window_bounds = array<i64: 32, 64>}, {pipeline_mode = #tpu.pipeline_mode<synchronous>, transform_indices = @transform_35, window_bounds = array<i64: 1, 64>}, {transform_indices = @transform_36, window_bounds = array<i64: 2, 8, 64>}]} {
    %c0 = arith.constant 0 : index
    %c0_0 = arith.constant 0 : index
    %c0_1 = arith.constant 0 : index
    %0 = vector.load %arg1[%c0, %c0_0, %c0_1] : memref<2x8x32xf32, #tpu.memory_space<vmem>>, vector<2x8x32xf32>
    %1 = vector.shape_cast %0 : vector<2x8x32xf32> to vector<16x32xf32>
    %c0_2 = arith.constant 0 : index
    %c0_3 = arith.constant 0 : index
    %c0_4 = arith.constant 0 : index
    %2 = vector.load %arg2[%c0_2, %c0_3, %c0_4] : memref<2x8x32xf32, #tpu.memory_space<vmem>>, vector<2x8x32xf32>
    %3 = vector.shape_cast %2 : vector<2x8x32xf32> to vector<16x32xf32>
    %c0_5 = arith.constant 0 : index
    %c0_6 = arith.constant 0 : index
    %c0_7 = arith.constant 0 : index
    %4 = vector.load %arg3[%c0_5, %c0_6, %c0_7] : memref<2x32x96xf32, #tpu.memory_space<vmem>>, vector<1x32x96xf32>
    %5 = vector.shape_cast %4 : vector<1x32x96xf32> to vector<32x96xf32>
    %cst = arith.constant dense<0.000000e+00> : vector<16x96xf32>
    %6 = tpu.matmul %1, %5, %cst {dimension_numbers = #tpu.dot_dimension_numbers<[1], [0], [0], [1], [0, 0, 1, 1], [], []>} : vector<16x32xf32>, vector<32x96xf32>, vector<16x96xf32> -> vector<16x96xf32>
    %c0_8 = arith.constant 0 : index
    %c0_9 = arith.constant 0 : index
    %c0_10 = arith.constant 0 : index
    %7 = vector.load %arg4[%c0_8, %c0_9, %c0_10] : memref<2x1x96xf32, #tpu.memory_space<vmem>>, vector<1x1x96xf32>
    %8 = vector.shape_cast %7 : vector<1x1x96xf32> to vector<1x96xf32>
    %9 = vector.broadcast %8 : vector<1x96xf32> to vector<16x96xf32>
    %10 = arith.addf %6, %9 : vector<16x96xf32>
    %11 = vector.extract_strided_slice %10 {offsets = [0, 0], sizes = [16, 32], strides = [1, 1]} : vector<16x96xf32> to vector<16x32xf32>
    %12 = vector.extract_strided_slice %10 {offsets = [0, 32], sizes = [16, 64], strides = [1, 1]} : vector<16x96xf32> to vector<16x64xf32>
    %cst_11 = arith.constant 0.353553385 : f32
    %13 = vector.broadcast %cst_11 : f32 to vector<16x32xf32>
    %14 = arith.mulf %11, %13 : vector<16x32xf32>
    %15 = vector.shape_cast %14 : vector<16x32xf32> to vector<2x8x32xf32>
    %16 = vector.extract_strided_slice %12 {offsets = [0, 0], sizes = [16, 32], strides = [1, 1]} : vector<16x64xf32> to vector<16x32xf32>
    %17 = vector.shape_cast %16 : vector<16x32xf32> to vector<2x8x32xf32>
    %18 = vector.extract_strided_slice %12 {offsets = [0, 32], sizes = [16, 32], strides = [1, 1]} : vector<16x64xf32> to vector<16x32xf32>
    %19 = vector.shape_cast %18 : vector<16x32xf32> to vector<2x8x32xf32>
    %20 = vector.extract_strided_slice %15 {offsets = [0, 0, 0], sizes = [2, 8, 8], strides = [1, 1, 1]} : vector<2x8x32xf32> to vector<2x8x8xf32>
    %21 = vector.extract_strided_slice %17 {offsets = [0, 0, 0], sizes = [2, 8, 8], strides = [1, 1, 1]} : vector<2x8x32xf32> to vector<2x8x8xf32>
    "tpu.trace_start"() <{level = 10 : i32, message = "bqd,bkd->bqk"}> : () -> ()
    %cst_12 = arith.constant dense<0.000000e+00> : vector<2x8x8xf32>
    %22 = tpu.matmul %20, %21, %cst_12 {dimension_numbers = #tpu.dot_dimension_numbers<[2], [2], [1], [1], [0, 0, 0, 1, 1, 1], [0], [0]>} : vector<2x8x8xf32>, vector<2x8x8xf32>, vector<2x8x8xf32> -> vector<2x8x8xf32>
    "tpu.trace_stop"() : () -> ()
    %cst_13 = arith.constant dense<0xFF800000> : vector<2x8xf32>
    %23 = vector.multi_reduction <maximumf>, %22, %cst_13 [2] : vector<2x8x8xf32> to vector<2x8xf32>
    %24 = vector.shape_cast %23 : vector<2x8xf32> to vector<2x8x1xf32>
    %25 = vector.broadcast %24 : vector<2x8x1xf32> to vector<2x8x8xf32>
    %26 = arith.subf %22, %25 : vector<2x8x8xf32>
    %27 = math.exp %26 : vector<2x8x8xf32>
    %cst_14 = arith.constant dense<0.000000e+00> : vector<2x8xf32>
    %28 = vector.multi_reduction <add>, %27, %cst_14 [2] : vector<2x8x8xf32> to vector<2x8xf32>
    %29 = vector.shape_cast %28 : vector<2x8xf32> to vector<2x8x1xf32>
    %30 = tpu.reciprocal %29 {approx = true} : vector<2x8x1xf32> -> vector<2x8x1xf32>
    %31 = arith.mulf %29, %30 : vector<2x8x1xf32>
    %cst_15 = arith.constant 2.000000e+00 : f32
    %32 = vector.broadcast %cst_15 : f32 to vector<2x8x1xf32>
    %33 = arith.subf %32, %31 : vector<2x8x1xf32>
    %34 = arith.mulf %30, %33 : vector<2x8x1xf32>
    %35 = vector.broadcast %34 : vector<2x8x1xf32> to vector<2x8x8xf32>
    %36 = arith.mulf %27, %35 : vector<2x8x8xf32>
    %37 = vector.extract_strided_slice %19 {offsets = [0, 0, 0], sizes = [2, 8, 8], strides = [1, 1, 1]} : vector<2x8x32xf32> to vector<2x8x8xf32>
    "tpu.trace_start"() <{level = 10 : i32, message = "bqk,bkd->bqd"}> : () -> ()
    %cst_16 = arith.constant dense<0.000000e+00> : vector<2x8x8xf32>
    %38 = tpu.matmul %36, %37, %cst_16 {dimension_numbers = #tpu.dot_dimension_numbers<[2], [1], [1], [2], [0, 0, 0, 1, 1, 2], [0], [0]>} : vector<2x8x8xf32>, vector<2x8x8xf32>, vector<2x8x8xf32> -> vector<2x8x8xf32>
    "tpu.trace_stop"() : () -> ()
    %39 = vector.extract_strided_slice %15 {offsets = [0, 0, 8], sizes = [2, 8, 8], strides = [1, 1, 1]} : vector<2x8x32xf32> to vector<2x8x8xf32>
    %40 = vector.extract_strided_slice %17 {offsets = [0, 0, 8], sizes = [2, 8, 8], strides = [1, 1, 1]} : vector<2x8x32xf32> to vector<2x8x8xf32>
    "tpu.trace_start"() <{level = 10 : i32, message = "bqd,bkd->bqk"}> : () -> ()
    %cst_17 = arith.constant dense<0.000000e+00> : vector<2x8x8xf32>
    %41 = tpu.matmul %39, %40, %cst_17 {dimension_numbers = #tpu.dot_dimension_numbers<[2], [2], [1], [1], [0, 0, 0, 1, 1, 1], [0], [0]>} : vector<2x8x8xf32>, vector<2x8x8xf32>, vector<2x8x8xf32> -> vector<2x8x8xf32>
    "tpu.trace_stop"() : () -> ()
    %cst_18 = arith.constant dense<0xFF800000> : vector<2x8xf32>
    %42 = vector.multi_reduction <maximumf>, %41, %cst_18 [2] : vector<2x8x8xf32> to vector<2x8xf32>
    %43 = vector.shape_cast %42 : vector<2x8xf32> to vector<2x8x1xf32>
    %44 = vector.broadcast %43 : vector<2x8x1xf32> to vector<2x8x8xf32>
    %45 = arith.subf %41, %44 : vector<2x8x8xf32>
    %46 = math.exp %45 : vector<2x8x8xf32>
    %cst_19 = arith.constant dense<0.000000e+00> : vector<2x8xf32>
    %47 = vector.multi_reduction <add>, %46, %cst_19 [2] : vector<2x8x8xf32> to vector<2x8xf32>
    %48 = vector.shape_cast %47 : vector<2x8xf32> to vector<2x8x1xf32>
    %49 = tpu.reciprocal %48 {approx = true} : vector<2x8x1xf32> -> vector<2x8x1xf32>
    %50 = arith.mulf %48, %49 : vector<2x8x1xf32>
    %cst_20 = arith.constant 2.000000e+00 : f32
    %51 = vector.broadcast %cst_20 : f32 to vector<2x8x1xf32>
    %52 = arith.subf %51, %50 : vector<2x8x1xf32>
    %53 = arith.mulf %49, %52 : vector<2x8x1xf32>
    %54 = vector.broadcast %53 : vector<2x8x1xf32> to vector<2x8x8xf32>
    %55 = arith.mulf %46, %54 : vector<2x8x8xf32>
    %56 = vector.extract_strided_slice %19 {offsets = [0, 0, 8], sizes = [2, 8, 8], strides = [1, 1, 1]} : vector<2x8x32xf32> to vector<2x8x8xf32>
    "tpu.trace_start"() <{level = 10 : i32, message = "bqk,bkd->bqd"}> : () -> ()
    %cst_21 = arith.constant dense<0.000000e+00> : vector<2x8x8xf32>
    %57 = tpu.matmul %55, %56, %cst_21 {dimension_numbers = #tpu.dot_dimension_numbers<[2], [1], [1], [2], [0, 0, 0, 1, 1, 2], [0], [0]>} : vector<2x8x8xf32>, vector<2x8x8xf32>, vector<2x8x8xf32> -> vector<2x8x8xf32>
    "tpu.trace_stop"() : () -> ()
    %58 = vector.extract_strided_slice %15 {offsets = [0, 0, 16], sizes = [2, 8, 8], strides = [1, 1, 1]} : vector<2x8x32xf32> to vector<2x8x8xf32>
    %59 = vector.extract_strided_slice %17 {offsets = [0, 0, 16], sizes = [2, 8, 8], strides = [1, 1, 1]} : vector<2x8x32xf32> to vector<2x8x8xf32>
    "tpu.trace_start"() <{level = 10 : i32, message = "bqd,bkd->bqk"}> : () -> ()
    %cst_22 = arith.constant dense<0.000000e+00> : vector<2x8x8xf32>
    %60 = tpu.matmul %58, %59, %cst_22 {dimension_numbers = #tpu.dot_dimension_numbers<[2], [2], [1], [1], [0, 0, 0, 1, 1, 1], [0], [0]>} : vector<2x8x8xf32>, vector<2x8x8xf32>, vector<2x8x8xf32> -> vector<2x8x8xf32>
    "tpu.trace_stop"() : () -> ()
    %cst_23 = arith.constant dense<0xFF800000> : vector<2x8xf32>
    %61 = vector.multi_reduction <maximumf>, %60, %cst_23 [2] : vector<2x8x8xf32> to vector<2x8xf32>
    %62 = vector.shape_cast %61 : vector<2x8xf32> to vector<2x8x1xf32>
    %63 = vector.broadcast %62 : vector<2x8x1xf32> to vector<2x8x8xf32>
    %64 = arith.subf %60, %63 : vector<2x8x8xf32>
    %65 = math.exp %64 : vector<2x8x8xf32>
    %cst_24 = arith.constant dense<0.000000e+00> : vector<2x8xf32>
    %66 = vector.multi_reduction <add>, %65, %cst_24 [2] : vector<2x8x8xf32> to vector<2x8xf32>
    %67 = vector.shape_cast %66 : vector<2x8xf32> to vector<2x8x1xf32>
    %68 = tpu.reciprocal %67 {approx = true} : vector<2x8x1xf32> -> vector<2x8x1xf32>
    %69 = arith.mulf %67, %68 : vector<2x8x1xf32>
    %cst_25 = arith.constant 2.000000e+00 : f32
    %70 = vector.broadcast %cst_25 : f32 to vector<2x8x1xf32>
    %71 = arith.subf %70, %69 : vector<2x8x1xf32>
    %72 = arith.mulf %68, %71 : vector<2x8x1xf32>
    %73 = vector.broadcast %72 : vector<2x8x1xf32> to vector<2x8x8xf32>
    %74 = arith.mulf %65, %73 : vector<2x8x8xf32>
    %75 = vector.extract_strided_slice %19 {offsets = [0, 0, 16], sizes = [2, 8, 8], strides = [1, 1, 1]} : vector<2x8x32xf32> to vector<2x8x8xf32>
    "tpu.trace_start"() <{level = 10 : i32, message = "bqk,bkd->bqd"}> : () -> ()
    %cst_26 = arith.constant dense<0.000000e+00> : vector<2x8x8xf32>
    %76 = tpu.matmul %74, %75, %cst_26 {dimension_numbers = #tpu.dot_dimension_numbers<[2], [1], [1], [2], [0, 0, 0, 1, 1, 2], [0], [0]>} : vector<2x8x8xf32>, vector<2x8x8xf32>, vector<2x8x8xf32> -> vector<2x8x8xf32>
    "tpu.trace_stop"() : () -> ()
    %77 = vector.extract_strided_slice %15 {offsets = [0, 0, 24], sizes = [2, 8, 8], strides = [1, 1, 1]} : vector<2x8x32xf32> to vector<2x8x8xf32>
    %78 = vector.extract_strided_slice %17 {offsets = [0, 0, 24], sizes = [2, 8, 8], strides = [1, 1, 1]} : vector<2x8x32xf32> to vector<2x8x8xf32>
    "tpu.trace_start"() <{level = 10 : i32, message = "bqd,bkd->bqk"}> : () -> ()
    %cst_27 = arith.constant dense<0.000000e+00> : vector<2x8x8xf32>
    %79 = tpu.matmul %77, %78, %cst_27 {dimension_numbers = #tpu.dot_dimension_numbers<[2], [2], [1], [1], [0, 0, 0, 1, 1, 1], [0], [0]>} : vector<2x8x8xf32>, vector<2x8x8xf32>, vector<2x8x8xf32> -> vector<2x8x8xf32>
    "tpu.trace_stop"() : () -> ()
    %cst_28 = arith.constant dense<0xFF800000> : vector<2x8xf32>
    %80 = vector.multi_reduction <maximumf>, %79, %cst_28 [2] : vector<2x8x8xf32> to vector<2x8xf32>
    %81 = vector.shape_cast %80 : vector<2x8xf32> to vector<2x8x1xf32>
    %82 = vector.broadcast %81 : vector<2x8x1xf32> to vector<2x8x8xf32>
    %83 = arith.subf %79, %82 : vector<2x8x8xf32>
    %84 = math.exp %83 : vector<2x8x8xf32>
    %cst_29 = arith.constant dense<0.000000e+00> : vector<2x8xf32>
    %85 = vector.multi_reduction <add>, %84, %cst_29 [2] : vector<2x8x8xf32> to vector<2x8xf32>
    %86 = vector.shape_cast %85 : vector<2x8xf32> to vector<2x8x1xf32>
    %87 = tpu.reciprocal %86 {approx = true} : vector<2x8x1xf32> -> vector<2x8x1xf32>
    %88 = arith.mulf %86, %87 : vector<2x8x1xf32>
    %cst_30 = arith.constant 2.000000e+00 : f32
    %89 = vector.broadcast %cst_30 : f32 to vector<2x8x1xf32>
    %90 = arith.subf %89, %88 : vector<2x8x1xf32>
    %91 = arith.mulf %87, %90 : vector<2x8x1xf32>
    %92 = vector.broadcast %91 : vector<2x8x1xf32> to vector<2x8x8xf32>
    %93 = arith.mulf %84, %92 : vector<2x8x8xf32>
    %94 = vector.extract_strided_slice %19 {offsets = [0, 0, 24], sizes = [2, 8, 8], strides = [1, 1, 1]} : vector<2x8x32xf32> to vector<2x8x8xf32>
    "tpu.trace_start"() <{level = 10 : i32, message = "bqk,bkd->bqd"}> : () -> ()
    %cst_31 = arith.constant dense<0.000000e+00> : vector<2x8x8xf32>
    %95 = tpu.matmul %93, %94, %cst_31 {dimension_numbers = #tpu.dot_dimension_numbers<[2], [1], [1], [2], [0, 0, 0, 1, 1, 2], [0], [0]>} : vector<2x8x8xf32>, vector<2x8x8xf32>, vector<2x8x8xf32> -> vector<2x8x8xf32>
    "tpu.trace_stop"() : () -> ()
    %96 = tpu.concatenate %38, %57, %76, %95 in 2 : vector<2x8x8xf32>, vector<2x8x8xf32>, vector<2x8x8xf32>, vector<2x8x8xf32> -> vector<2x8x32xf32>
    %97 = vector.shape_cast %96 : vector<2x8x32xf32> to vector<16x32xf32>
    %c0_32 = arith.constant 0 : index
    %c0_33 = arith.constant 0 : index
    %c0_34 = arith.constant 0 : index
    %98 = vector.load %arg5[%c0_32, %c0_33, %c0_34] : memref<2x32x32xf32, #tpu.memory_space<vmem>>, vector<1x32x32xf32>
    %99 = vector.shape_cast %98 : vector<1x32x32xf32> to vector<32x32xf32>
    %cst_35 = arith.constant dense<0.000000e+00> : vector<16x32xf32>
    %100 = tpu.matmul %97, %99, %cst_35 {dimension_numbers = #tpu.dot_dimension_numbers<[1], [0], [0], [1], [0, 0, 1, 1], [], []>} : vector<16x32xf32>, vector<32x32xf32>, vector<16x32xf32> -> vector<16x32xf32>
    %c0_36 = arith.constant 0 : index
    %c0_37 = arith.constant 0 : index
    %c0_38 = arith.constant 0 : index
    %101 = vector.load %arg6[%c0_36, %c0_37, %c0_38] : memref<2x1x32xf32, #tpu.memory_space<vmem>>, vector<1x1x32xf32>
    %102 = vector.shape_cast %101 : vector<1x1x32xf32> to vector<1x32xf32>
    %103 = vector.broadcast %102 : vector<1x32xf32> to vector<16x32xf32>
    %104 = arith.addf %100, %103 : vector<16x32xf32>
    %c0_39 = arith.constant 0 : index
    %c0_40 = arith.constant 0 : index
    %c0_41 = arith.constant 0 : index
    %105 = vector.load %arg7[%c0_39, %c0_40, %c0_41] : memref<2x1x32xf32, #tpu.memory_space<vmem>>, vector<1x1x32xf32>
    %106 = vector.shape_cast %105 : vector<1x1x32xf32> to vector<1x32xf32>
    %c0_42 = arith.constant 0 : index
    %c0_43 = arith.constant 0 : index
    %c0_44 = arith.constant 0 : index
    %107 = vector.load %arg8[%c0_42, %c0_43, %c0_44] : memref<2x1x32xf32, #tpu.memory_space<vmem>>, vector<1x1x32xf32>
    %108 = vector.shape_cast %107 : vector<1x1x32xf32> to vector<1x32xf32>
    %109 = arith.addf %1, %104 : vector<16x32xf32>
    %cst_45 = arith.constant dense<0.000000e+00> : vector<16xf32>
    %110 = vector.multi_reduction <add>, %109, %cst_45 [1] : vector<16x32xf32> to vector<16xf32>
    %111 = vector.shape_cast %110 : vector<16xf32> to vector<16x1xf32>
    %cst_46 = arith.constant 3.200000e+01 : f32
    %112 = vector.broadcast %cst_46 : f32 to vector<16x1xf32>
    %113 = arith.divf %111, %112 : vector<16x1xf32>
    %114 = vector.broadcast %113 : vector<16x1xf32> to vector<16x32xf32>
    %115 = arith.subf %109, %114 : vector<16x32xf32>
    %116 = arith.mulf %115, %115 : vector<16x32xf32>
    %cst_47 = arith.constant dense<0.000000e+00> : vector<16xf32>
    %117 = vector.multi_reduction <add>, %116, %cst_47 [1] : vector<16x32xf32> to vector<16xf32>
    %118 = vector.shape_cast %117 : vector<16xf32> to vector<16x1xf32>
    %cst_48 = arith.constant 3.200000e+01 : f32
    %119 = vector.broadcast %cst_48 : f32 to vector<16x1xf32>
    %120 = arith.divf %118, %119 : vector<16x1xf32>
    %cst_49 = arith.constant 9.99999974E-6 : f32
    %121 = vector.broadcast %cst_49 : f32 to vector<16x1xf32>
    %122 = arith.addf %120, %121 : vector<16x1xf32>
    %123 = math.rsqrt %122 : vector<16x1xf32>
    %124 = vector.broadcast %123 : vector<16x1xf32> to vector<16x32xf32>
    %125 = arith.mulf %115, %124 : vector<16x32xf32>
    %126 = vector.broadcast %106 : vector<1x32xf32> to vector<16x32xf32>
    %127 = arith.mulf %125, %126 : vector<16x32xf32>
    %128 = vector.broadcast %108 : vector<1x32xf32> to vector<16x32xf32>
    %129 = arith.addf %127, %128 : vector<16x32xf32>
    %c0_50 = arith.constant 0 : index
    %c0_51 = arith.constant 0 : index
    %c0_52 = arith.constant 0 : index
    %130 = vector.load %arg9[%c0_50, %c0_51, %c0_52] : memref<2x32x64xf32, #tpu.memory_space<vmem>>, vector<1x32x64xf32>
    %131 = vector.shape_cast %130 : vector<1x32x64xf32> to vector<32x64xf32>
    %cst_53 = arith.constant dense<0.000000e+00> : vector<16x64xf32>
    %132 = tpu.matmul %129, %131, %cst_53 {dimension_numbers = #tpu.dot_dimension_numbers<[1], [0], [0], [1], [0, 0, 1, 1], [], []>} : vector<16x32xf32>, vector<32x64xf32>, vector<16x64xf32> -> vector<16x64xf32>
    %c0_54 = arith.constant 0 : index
    %c0_55 = arith.constant 0 : index
    %c0_56 = arith.constant 0 : index
    %133 = vector.load %arg10[%c0_54, %c0_55, %c0_56] : memref<2x1x64xf32, #tpu.memory_space<vmem>>, vector<1x1x64xf32>
    %134 = vector.shape_cast %133 : vector<1x1x64xf32> to vector<1x64xf32>
    %135 = vector.broadcast %134 : vector<1x64xf32> to vector<16x64xf32>
    %136 = arith.addf %132, %135 : vector<16x64xf32>
    %cst_57 = arith.constant 0.000000e+00 : f32
    %137 = vector.broadcast %cst_57 : f32 to vector<16x64xf32>
    %138 = arith.maximumf %136, %137 : vector<16x64xf32>
    %c0_58 = arith.constant 0 : index
    %c0_59 = arith.constant 0 : index
    %c0_60 = arith.constant 0 : index
    %139 = vector.load %arg11[%c0_58, %c0_59, %c0_60] : memref<2x64x32xf32, #tpu.memory_space<vmem>>, vector<1x64x32xf32>
    %140 = vector.shape_cast %139 : vector<1x64x32xf32> to vector<64x32xf32>
    %cst_61 = arith.constant dense<0.000000e+00> : vector<16x32xf32>
    %141 = tpu.matmul %138, %140, %cst_61 {dimension_numbers = #tpu.dot_dimension_numbers<[1], [0], [0], [1], [0, 0, 1, 1], [], []>} : vector<16x64xf32>, vector<64x32xf32>, vector<16x32xf32> -> vector<16x32xf32>
    %c0_62 = arith.constant 0 : index
    %c0_63 = arith.constant 0 : index
    %c0_64 = arith.constant 0 : index
    %142 = vector.load %arg12[%c0_62, %c0_63, %c0_64] : memref<2x1x32xf32, #tpu.memory_space<vmem>>, vector<1x1x32xf32>
    %143 = vector.shape_cast %142 : vector<1x1x32xf32> to vector<1x32xf32>
    %144 = vector.broadcast %143 : vector<1x32xf32> to vector<16x32xf32>
    %145 = arith.addf %141, %144 : vector<16x32xf32>
    %c0_65 = arith.constant 0 : index
    %c0_66 = arith.constant 0 : index
    %c0_67 = arith.constant 0 : index
    %146 = vector.load %arg13[%c0_65, %c0_66, %c0_67] : memref<2x1x32xf32, #tpu.memory_space<vmem>>, vector<1x1x32xf32>
    %147 = vector.shape_cast %146 : vector<1x1x32xf32> to vector<1x32xf32>
    %c0_68 = arith.constant 0 : index
    %c0_69 = arith.constant 0 : index
    %c0_70 = arith.constant 0 : index
    %148 = vector.load %arg14[%c0_68, %c0_69, %c0_70] : memref<2x1x32xf32, #tpu.memory_space<vmem>>, vector<1x1x32xf32>
    %149 = vector.shape_cast %148 : vector<1x1x32xf32> to vector<1x32xf32>
    %150 = arith.addf %129, %145 : vector<16x32xf32>
    %cst_71 = arith.constant dense<0.000000e+00> : vector<16xf32>
    %151 = vector.multi_reduction <add>, %150, %cst_71 [1] : vector<16x32xf32> to vector<16xf32>
    %152 = vector.shape_cast %151 : vector<16xf32> to vector<16x1xf32>
    %cst_72 = arith.constant 3.200000e+01 : f32
    %153 = vector.broadcast %cst_72 : f32 to vector<16x1xf32>
    %154 = arith.divf %152, %153 : vector<16x1xf32>
    %155 = vector.broadcast %154 : vector<16x1xf32> to vector<16x32xf32>
    %156 = arith.subf %150, %155 : vector<16x32xf32>
    %157 = arith.mulf %156, %156 : vector<16x32xf32>
    %cst_73 = arith.constant dense<0.000000e+00> : vector<16xf32>
    %158 = vector.multi_reduction <add>, %157, %cst_73 [1] : vector<16x32xf32> to vector<16xf32>
    %159 = vector.shape_cast %158 : vector<16xf32> to vector<16x1xf32>
    %cst_74 = arith.constant 3.200000e+01 : f32
    %160 = vector.broadcast %cst_74 : f32 to vector<16x1xf32>
    %161 = arith.divf %159, %160 : vector<16x1xf32>
    %cst_75 = arith.constant 9.99999974E-6 : f32
    %162 = vector.broadcast %cst_75 : f32 to vector<16x1xf32>
    %163 = arith.addf %161, %162 : vector<16x1xf32>
    %164 = math.rsqrt %163 : vector<16x1xf32>
    %165 = vector.broadcast %164 : vector<16x1xf32> to vector<16x32xf32>
    %166 = arith.mulf %156, %165 : vector<16x32xf32>
    %167 = vector.broadcast %147 : vector<1x32xf32> to vector<16x32xf32>
    %168 = arith.mulf %166, %167 : vector<16x32xf32>
    %169 = vector.broadcast %149 : vector<1x32xf32> to vector<16x32xf32>
    %170 = arith.addf %168, %169 : vector<16x32xf32>
    %c1 = arith.constant 1 : index
    %c0_76 = arith.constant 0 : index
    %c0_77 = arith.constant 0 : index
    %171 = vector.load %arg3[%c1, %c0_76, %c0_77] : memref<2x32x96xf32, #tpu.memory_space<vmem>>, vector<1x32x96xf32>
    %172 = vector.shape_cast %171 : vector<1x32x96xf32> to vector<32x96xf32>
    %cst_78 = arith.constant dense<0.000000e+00> : vector<16x96xf32>
    %173 = tpu.matmul %170, %172, %cst_78 {dimension_numbers = #tpu.dot_dimension_numbers<[1], [0], [0], [1], [0, 0, 1, 1], [], []>} : vector<16x32xf32>, vector<32x96xf32>, vector<16x96xf32> -> vector<16x96xf32>
    %c1_79 = arith.constant 1 : index
    %c0_80 = arith.constant 0 : index
    %c0_81 = arith.constant 0 : index
    %174 = vector.load %arg4[%c1_79, %c0_80, %c0_81] : memref<2x1x96xf32, #tpu.memory_space<vmem>>, vector<1x1x96xf32>
    %175 = vector.shape_cast %174 : vector<1x1x96xf32> to vector<1x96xf32>
    %176 = vector.broadcast %175 : vector<1x96xf32> to vector<16x96xf32>
    %177 = arith.addf %173, %176 : vector<16x96xf32>
    %178 = vector.extract_strided_slice %177 {offsets = [0, 0], sizes = [16, 32], strides = [1, 1]} : vector<16x96xf32> to vector<16x32xf32>
    %179 = vector.extract_strided_slice %177 {offsets = [0, 32], sizes = [16, 64], strides = [1, 1]} : vector<16x96xf32> to vector<16x64xf32>
    %cst_82 = arith.constant 0.353553385 : f32
    %180 = vector.broadcast %cst_82 : f32 to vector<16x32xf32>
    %181 = arith.mulf %178, %180 : vector<16x32xf32>
    %182 = vector.shape_cast %181 : vector<16x32xf32> to vector<2x8x32xf32>
    %183 = vector.extract_strided_slice %179 {offsets = [0, 0], sizes = [16, 32], strides = [1, 1]} : vector<16x64xf32> to vector<16x32xf32>
    %184 = vector.shape_cast %183 : vector<16x32xf32> to vector<2x8x32xf32>
    %185 = vector.extract_strided_slice %179 {offsets = [0, 32], sizes = [16, 32], strides = [1, 1]} : vector<16x64xf32> to vector<16x32xf32>
    %186 = vector.shape_cast %185 : vector<16x32xf32> to vector<2x8x32xf32>
    %187 = vector.extract_strided_slice %182 {offsets = [0, 0, 0], sizes = [2, 8, 8], strides = [1, 1, 1]} : vector<2x8x32xf32> to vector<2x8x8xf32>
    %188 = vector.extract_strided_slice %184 {offsets = [0, 0, 0], sizes = [2, 8, 8], strides = [1, 1, 1]} : vector<2x8x32xf32> to vector<2x8x8xf32>
    "tpu.trace_start"() <{level = 10 : i32, message = "bqd,bkd->bqk"}> : () -> ()
    %cst_83 = arith.constant dense<0.000000e+00> : vector<2x8x8xf32>
    %189 = tpu.matmul %187, %188, %cst_83 {dimension_numbers = #tpu.dot_dimension_numbers<[2], [2], [1], [1], [0, 0, 0, 1, 1, 1], [0], [0]>} : vector<2x8x8xf32>, vector<2x8x8xf32>, vector<2x8x8xf32> -> vector<2x8x8xf32>
    "tpu.trace_stop"() : () -> ()
    %cst_84 = arith.constant dense<0xFF800000> : vector<2x8xf32>
    %190 = vector.multi_reduction <maximumf>, %189, %cst_84 [2] : vector<2x8x8xf32> to vector<2x8xf32>
    %191 = vector.shape_cast %190 : vector<2x8xf32> to vector<2x8x1xf32>
    %192 = vector.broadcast %191 : vector<2x8x1xf32> to vector<2x8x8xf32>
    %193 = arith.subf %189, %192 : vector<2x8x8xf32>
    %194 = math.exp %193 : vector<2x8x8xf32>
    %cst_85 = arith.constant dense<0.000000e+00> : vector<2x8xf32>
    %195 = vector.multi_reduction <add>, %194, %cst_85 [2] : vector<2x8x8xf32> to vector<2x8xf32>
    %196 = vector.shape_cast %195 : vector<2x8xf32> to vector<2x8x1xf32>
    %197 = tpu.reciprocal %196 {approx = true} : vector<2x8x1xf32> -> vector<2x8x1xf32>
    %198 = arith.mulf %196, %197 : vector<2x8x1xf32>
    %cst_86 = arith.constant 2.000000e+00 : f32
    %199 = vector.broadcast %cst_86 : f32 to vector<2x8x1xf32>
    %200 = arith.subf %199, %198 : vector<2x8x1xf32>
    %201 = arith.mulf %197, %200 : vector<2x8x1xf32>
    %202 = vector.broadcast %201 : vector<2x8x1xf32> to vector<2x8x8xf32>
    %203 = arith.mulf %194, %202 : vector<2x8x8xf32>
    %204 = vector.extract_strided_slice %186 {offsets = [0, 0, 0], sizes = [2, 8, 8], strides = [1, 1, 1]} : vector<2x8x32xf32> to vector<2x8x8xf32>
    "tpu.trace_start"() <{level = 10 : i32, message = "bqk,bkd->bqd"}> : () -> ()
    %cst_87 = arith.constant dense<0.000000e+00> : vector<2x8x8xf32>
    %205 = tpu.matmul %203, %204, %cst_87 {dimension_numbers = #tpu.dot_dimension_numbers<[2], [1], [1], [2], [0, 0, 0, 1, 1, 2], [0], [0]>} : vector<2x8x8xf32>, vector<2x8x8xf32>, vector<2x8x8xf32> -> vector<2x8x8xf32>
    "tpu.trace_stop"() : () -> ()
    %206 = vector.extract_strided_slice %182 {offsets = [0, 0, 8], sizes = [2, 8, 8], strides = [1, 1, 1]} : vector<2x8x32xf32> to vector<2x8x8xf32>
    %207 = vector.extract_strided_slice %184 {offsets = [0, 0, 8], sizes = [2, 8, 8], strides = [1, 1, 1]} : vector<2x8x32xf32> to vector<2x8x8xf32>
    "tpu.trace_start"() <{level = 10 : i32, message = "bqd,bkd->bqk"}> : () -> ()
    %cst_88 = arith.constant dense<0.000000e+00> : vector<2x8x8xf32>
    %208 = tpu.matmul %206, %207, %cst_88 {dimension_numbers = #tpu.dot_dimension_numbers<[2], [2], [1], [1], [0, 0, 0, 1, 1, 1], [0], [0]>} : vector<2x8x8xf32>, vector<2x8x8xf32>, vector<2x8x8xf32> -> vector<2x8x8xf32>
    "tpu.trace_stop"() : () -> ()
    %cst_89 = arith.constant dense<0xFF800000> : vector<2x8xf32>
    %209 = vector.multi_reduction <maximumf>, %208, %cst_89 [2] : vector<2x8x8xf32> to vector<2x8xf32>
    %210 = vector.shape_cast %209 : vector<2x8xf32> to vector<2x8x1xf32>
    %211 = vector.broadcast %210 : vector<2x8x1xf32> to vector<2x8x8xf32>
    %212 = arith.subf %208, %211 : vector<2x8x8xf32>
    %213 = math.exp %212 : vector<2x8x8xf32>
    %cst_90 = arith.constant dense<0.000000e+00> : vector<2x8xf32>
    %214 = vector.multi_reduction <add>, %213, %cst_90 [2] : vector<2x8x8xf32> to vector<2x8xf32>
    %215 = vector.shape_cast %214 : vector<2x8xf32> to vector<2x8x1xf32>
    %216 = tpu.reciprocal %215 {approx = true} : vector<2x8x1xf32> -> vector<2x8x1xf32>
    %217 = arith.mulf %215, %216 : vector<2x8x1xf32>
    %cst_91 = arith.constant 2.000000e+00 : f32
    %218 = vector.broadcast %cst_91 : f32 to vector<2x8x1xf32>
    %219 = arith.subf %218, %217 : vector<2x8x1xf32>
    %220 = arith.mulf %216, %219 : vector<2x8x1xf32>
    %221 = vector.broadcast %220 : vector<2x8x1xf32> to vector<2x8x8xf32>
    %222 = arith.mulf %213, %221 : vector<2x8x8xf32>
    %223 = vector.extract_strided_slice %186 {offsets = [0, 0, 8], sizes = [2, 8, 8], strides = [1, 1, 1]} : vector<2x8x32xf32> to vector<2x8x8xf32>
    "tpu.trace_start"() <{level = 10 : i32, message = "bqk,bkd->bqd"}> : () -> ()
    %cst_92 = arith.constant dense<0.000000e+00> : vector<2x8x8xf32>
    %224 = tpu.matmul %222, %223, %cst_92 {dimension_numbers = #tpu.dot_dimension_numbers<[2], [1], [1], [2], [0, 0, 0, 1, 1, 2], [0], [0]>} : vector<2x8x8xf32>, vector<2x8x8xf32>, vector<2x8x8xf32> -> vector<2x8x8xf32>
    "tpu.trace_stop"() : () -> ()
    %225 = vector.extract_strided_slice %182 {offsets = [0, 0, 16], sizes = [2, 8, 8], strides = [1, 1, 1]} : vector<2x8x32xf32> to vector<2x8x8xf32>
    %226 = vector.extract_strided_slice %184 {offsets = [0, 0, 16], sizes = [2, 8, 8], strides = [1, 1, 1]} : vector<2x8x32xf32> to vector<2x8x8xf32>
    "tpu.trace_start"() <{level = 10 : i32, message = "bqd,bkd->bqk"}> : () -> ()
    %cst_93 = arith.constant dense<0.000000e+00> : vector<2x8x8xf32>
    %227 = tpu.matmul %225, %226, %cst_93 {dimension_numbers = #tpu.dot_dimension_numbers<[2], [2], [1], [1], [0, 0, 0, 1, 1, 1], [0], [0]>} : vector<2x8x8xf32>, vector<2x8x8xf32>, vector<2x8x8xf32> -> vector<2x8x8xf32>
    "tpu.trace_stop"() : () -> ()
    %cst_94 = arith.constant dense<0xFF800000> : vector<2x8xf32>
    %228 = vector.multi_reduction <maximumf>, %227, %cst_94 [2] : vector<2x8x8xf32> to vector<2x8xf32>
    %229 = vector.shape_cast %228 : vector<2x8xf32> to vector<2x8x1xf32>
    %230 = vector.broadcast %229 : vector<2x8x1xf32> to vector<2x8x8xf32>
    %231 = arith.subf %227, %230 : vector<2x8x8xf32>
    %232 = math.exp %231 : vector<2x8x8xf32>
    %cst_95 = arith.constant dense<0.000000e+00> : vector<2x8xf32>
    %233 = vector.multi_reduction <add>, %232, %cst_95 [2] : vector<2x8x8xf32> to vector<2x8xf32>
    %234 = vector.shape_cast %233 : vector<2x8xf32> to vector<2x8x1xf32>
    %235 = tpu.reciprocal %234 {approx = true} : vector<2x8x1xf32> -> vector<2x8x1xf32>
    %236 = arith.mulf %234, %235 : vector<2x8x1xf32>
    %cst_96 = arith.constant 2.000000e+00 : f32
    %237 = vector.broadcast %cst_96 : f32 to vector<2x8x1xf32>
    %238 = arith.subf %237, %236 : vector<2x8x1xf32>
    %239 = arith.mulf %235, %238 : vector<2x8x1xf32>
    %240 = vector.broadcast %239 : vector<2x8x1xf32> to vector<2x8x8xf32>
    %241 = arith.mulf %232, %240 : vector<2x8x8xf32>
    %242 = vector.extract_strided_slice %186 {offsets = [0, 0, 16], sizes = [2, 8, 8], strides = [1, 1, 1]} : vector<2x8x32xf32> to vector<2x8x8xf32>
    "tpu.trace_start"() <{level = 10 : i32, message = "bqk,bkd->bqd"}> : () -> ()
    %cst_97 = arith.constant dense<0.000000e+00> : vector<2x8x8xf32>
    %243 = tpu.matmul %241, %242, %cst_97 {dimension_numbers = #tpu.dot_dimension_numbers<[2], [1], [1], [2], [0, 0, 0, 1, 1, 2], [0], [0]>} : vector<2x8x8xf32>, vector<2x8x8xf32>, vector<2x8x8xf32> -> vector<2x8x8xf32>
    "tpu.trace_stop"() : () -> ()
    %244 = vector.extract_strided_slice %182 {offsets = [0, 0, 24], sizes = [2, 8, 8], strides = [1, 1, 1]} : vector<2x8x32xf32> to vector<2x8x8xf32>
    %245 = vector.extract_strided_slice %184 {offsets = [0, 0, 24], sizes = [2, 8, 8], strides = [1, 1, 1]} : vector<2x8x32xf32> to vector<2x8x8xf32>
    "tpu.trace_start"() <{level = 10 : i32, message = "bqd,bkd->bqk"}> : () -> ()
    %cst_98 = arith.constant dense<0.000000e+00> : vector<2x8x8xf32>
    %246 = tpu.matmul %244, %245, %cst_98 {dimension_numbers = #tpu.dot_dimension_numbers<[2], [2], [1], [1], [0, 0, 0, 1, 1, 1], [0], [0]>} : vector<2x8x8xf32>, vector<2x8x8xf32>, vector<2x8x8xf32> -> vector<2x8x8xf32>
    "tpu.trace_stop"() : () -> ()
    %cst_99 = arith.constant dense<0xFF800000> : vector<2x8xf32>
    %247 = vector.multi_reduction <maximumf>, %246, %cst_99 [2] : vector<2x8x8xf32> to vector<2x8xf32>
    %248 = vector.shape_cast %247 : vector<2x8xf32> to vector<2x8x1xf32>
    %249 = vector.broadcast %248 : vector<2x8x1xf32> to vector<2x8x8xf32>
    %250 = arith.subf %246, %249 : vector<2x8x8xf32>
    %251 = math.exp %250 : vector<2x8x8xf32>
    %cst_100 = arith.constant dense<0.000000e+00> : vector<2x8xf32>
    %252 = vector.multi_reduction <add>, %251, %cst_100 [2] : vector<2x8x8xf32> to vector<2x8xf32>
    %253 = vector.shape_cast %252 : vector<2x8xf32> to vector<2x8x1xf32>
    %254 = tpu.reciprocal %253 {approx = true} : vector<2x8x1xf32> -> vector<2x8x1xf32>
    %255 = arith.mulf %253, %254 : vector<2x8x1xf32>
    %cst_101 = arith.constant 2.000000e+00 : f32
    %256 = vector.broadcast %cst_101 : f32 to vector<2x8x1xf32>
    %257 = arith.subf %256, %255 : vector<2x8x1xf32>
    %258 = arith.mulf %254, %257 : vector<2x8x1xf32>
    %259 = vector.broadcast %258 : vector<2x8x1xf32> to vector<2x8x8xf32>
    %260 = arith.mulf %251, %259 : vector<2x8x8xf32>
    %261 = vector.extract_strided_slice %186 {offsets = [0, 0, 24], sizes = [2, 8, 8], strides = [1, 1, 1]} : vector<2x8x32xf32> to vector<2x8x8xf32>
    "tpu.trace_start"() <{level = 10 : i32, message = "bqk,bkd->bqd"}> : () -> ()
    %cst_102 = arith.constant dense<0.000000e+00> : vector<2x8x8xf32>
    %262 = tpu.matmul %260, %261, %cst_102 {dimension_numbers = #tpu.dot_dimension_numbers<[2], [1], [1], [2], [0, 0, 0, 1, 1, 2], [0], [0]>} : vector<2x8x8xf32>, vector<2x8x8xf32>, vector<2x8x8xf32> -> vector<2x8x8xf32>
    "tpu.trace_stop"() : () -> ()
    %263 = tpu.concatenate %205, %224, %243, %262 in 2 : vector<2x8x8xf32>, vector<2x8x8xf32>, vector<2x8x8xf32>, vector<2x8x8xf32> -> vector<2x8x32xf32>
    %264 = vector.shape_cast %263 : vector<2x8x32xf32> to vector<16x32xf32>
    %c1_103 = arith.constant 1 : index
    %c0_104 = arith.constant 0 : index
    %c0_105 = arith.constant 0 : index
    %265 = vector.load %arg5[%c1_103, %c0_104, %c0_105] : memref<2x32x32xf32, #tpu.memory_space<vmem>>, vector<1x32x32xf32>
    %266 = vector.shape_cast %265 : vector<1x32x32xf32> to vector<32x32xf32>
    %cst_106 = arith.constant dense<0.000000e+00> : vector<16x32xf32>
    %267 = tpu.matmul %264, %266, %cst_106 {dimension_numbers = #tpu.dot_dimension_numbers<[1], [0], [0], [1], [0, 0, 1, 1], [], []>} : vector<16x32xf32>, vector<32x32xf32>, vector<16x32xf32> -> vector<16x32xf32>
    %c1_107 = arith.constant 1 : index
    %c0_108 = arith.constant 0 : index
    %c0_109 = arith.constant 0 : index
    %268 = vector.load %arg6[%c1_107, %c0_108, %c0_109] : memref<2x1x32xf32, #tpu.memory_space<vmem>>, vector<1x1x32xf32>
    %269 = vector.shape_cast %268 : vector<1x1x32xf32> to vector<1x32xf32>
    %270 = vector.broadcast %269 : vector<1x32xf32> to vector<16x32xf32>
    %271 = arith.addf %267, %270 : vector<16x32xf32>
    %c1_110 = arith.constant 1 : index
    %c0_111 = arith.constant 0 : index
    %c0_112 = arith.constant 0 : index
    %272 = vector.load %arg7[%c1_110, %c0_111, %c0_112] : memref<2x1x32xf32, #tpu.memory_space<vmem>>, vector<1x1x32xf32>
    %273 = vector.shape_cast %272 : vector<1x1x32xf32> to vector<1x32xf32>
    %c1_113 = arith.constant 1 : index
    %c0_114 = arith.constant 0 : index
    %c0_115 = arith.constant 0 : index
    %274 = vector.load %arg8[%c1_113, %c0_114, %c0_115] : memref<2x1x32xf32, #tpu.memory_space<vmem>>, vector<1x1x32xf32>
    %275 = vector.shape_cast %274 : vector<1x1x32xf32> to vector<1x32xf32>
    %276 = arith.addf %170, %271 : vector<16x32xf32>
    %cst_116 = arith.constant dense<0.000000e+00> : vector<16xf32>
    %277 = vector.multi_reduction <add>, %276, %cst_116 [1] : vector<16x32xf32> to vector<16xf32>
    %278 = vector.shape_cast %277 : vector<16xf32> to vector<16x1xf32>
    %cst_117 = arith.constant 3.200000e+01 : f32
    %279 = vector.broadcast %cst_117 : f32 to vector<16x1xf32>
    %280 = arith.divf %278, %279 : vector<16x1xf32>
    %281 = vector.broadcast %280 : vector<16x1xf32> to vector<16x32xf32>
    %282 = arith.subf %276, %281 : vector<16x32xf32>
    %283 = arith.mulf %282, %282 : vector<16x32xf32>
    %cst_118 = arith.constant dense<0.000000e+00> : vector<16xf32>
    %284 = vector.multi_reduction <add>, %283, %cst_118 [1] : vector<16x32xf32> to vector<16xf32>
    %285 = vector.shape_cast %284 : vector<16xf32> to vector<16x1xf32>
    %cst_119 = arith.constant 3.200000e+01 : f32
    %286 = vector.broadcast %cst_119 : f32 to vector<16x1xf32>
    %287 = arith.divf %285, %286 : vector<16x1xf32>
    %cst_120 = arith.constant 9.99999974E-6 : f32
    %288 = vector.broadcast %cst_120 : f32 to vector<16x1xf32>
    %289 = arith.addf %287, %288 : vector<16x1xf32>
    %290 = math.rsqrt %289 : vector<16x1xf32>
    %291 = vector.broadcast %290 : vector<16x1xf32> to vector<16x32xf32>
    %292 = arith.mulf %282, %291 : vector<16x32xf32>
    %293 = vector.broadcast %273 : vector<1x32xf32> to vector<16x32xf32>
    %294 = arith.mulf %292, %293 : vector<16x32xf32>
    %295 = vector.broadcast %275 : vector<1x32xf32> to vector<16x32xf32>
    %296 = arith.addf %294, %295 : vector<16x32xf32>
    %c1_121 = arith.constant 1 : index
    %c0_122 = arith.constant 0 : index
    %c0_123 = arith.constant 0 : index
    %297 = vector.load %arg9[%c1_121, %c0_122, %c0_123] : memref<2x32x64xf32, #tpu.memory_space<vmem>>, vector<1x32x64xf32>
    %298 = vector.shape_cast %297 : vector<1x32x64xf32> to vector<32x64xf32>
    %cst_124 = arith.constant dense<0.000000e+00> : vector<16x64xf32>
    %299 = tpu.matmul %296, %298, %cst_124 {dimension_numbers = #tpu.dot_dimension_numbers<[1], [0], [0], [1], [0, 0, 1, 1], [], []>} : vector<16x32xf32>, vector<32x64xf32>, vector<16x64xf32> -> vector<16x64xf32>
    %c1_125 = arith.constant 1 : index
    %c0_126 = arith.constant 0 : index
    %c0_127 = arith.constant 0 : index
    %300 = vector.load %arg10[%c1_125, %c0_126, %c0_127] : memref<2x1x64xf32, #tpu.memory_space<vmem>>, vector<1x1x64xf32>
    %301 = vector.shape_cast %300 : vector<1x1x64xf32> to vector<1x64xf32>
    %302 = vector.broadcast %301 : vector<1x64xf32> to vector<16x64xf32>
    %303 = arith.addf %299, %302 : vector<16x64xf32>
    %cst_128 = arith.constant 0.000000e+00 : f32
    %304 = vector.broadcast %cst_128 : f32 to vector<16x64xf32>
    %305 = arith.maximumf %303, %304 : vector<16x64xf32>
    %c1_129 = arith.constant 1 : index
    %c0_130 = arith.constant 0 : index
    %c0_131 = arith.constant 0 : index
    %306 = vector.load %arg11[%c1_129, %c0_130, %c0_131] : memref<2x64x32xf32, #tpu.memory_space<vmem>>, vector<1x64x32xf32>
    %307 = vector.shape_cast %306 : vector<1x64x32xf32> to vector<64x32xf32>
    %cst_132 = arith.constant dense<0.000000e+00> : vector<16x32xf32>
    %308 = tpu.matmul %305, %307, %cst_132 {dimension_numbers = #tpu.dot_dimension_numbers<[1], [0], [0], [1], [0, 0, 1, 1], [], []>} : vector<16x64xf32>, vector<64x32xf32>, vector<16x32xf32> -> vector<16x32xf32>
    %c1_133 = arith.constant 1 : index
    %c0_134 = arith.constant 0 : index
    %c0_135 = arith.constant 0 : index
    %309 = vector.load %arg12[%c1_133, %c0_134, %c0_135] : memref<2x1x32xf32, #tpu.memory_space<vmem>>, vector<1x1x32xf32>
    %310 = vector.shape_cast %309 : vector<1x1x32xf32> to vector<1x32xf32>
    %311 = vector.broadcast %310 : vector<1x32xf32> to vector<16x32xf32>
    %312 = arith.addf %308, %311 : vector<16x32xf32>
    %c1_136 = arith.constant 1 : index
    %c0_137 = arith.constant 0 : index
    %c0_138 = arith.constant 0 : index
    %313 = vector.load %arg13[%c1_136, %c0_137, %c0_138] : memref<2x1x32xf32, #tpu.memory_space<vmem>>, vector<1x1x32xf32>
    %314 = vector.shape_cast %313 : vector<1x1x32xf32> to vector<1x32xf32>
    %c1_139 = arith.constant 1 : index
    %c0_140 = arith.constant 0 : index
    %c0_141 = arith.constant 0 : index
    %315 = vector.load %arg14[%c1_139, %c0_140, %c0_141] : memref<2x1x32xf32, #tpu.memory_space<vmem>>, vector<1x1x32xf32>
    %316 = vector.shape_cast %315 : vector<1x1x32xf32> to vector<1x32xf32>
    %317 = arith.addf %296, %312 : vector<16x32xf32>
    %cst_142 = arith.constant dense<0.000000e+00> : vector<16xf32>
    %318 = vector.multi_reduction <add>, %317, %cst_142 [1] : vector<16x32xf32> to vector<16xf32>
    %319 = vector.shape_cast %318 : vector<16xf32> to vector<16x1xf32>
    %cst_143 = arith.constant 3.200000e+01 : f32
    %320 = vector.broadcast %cst_143 : f32 to vector<16x1xf32>
    %321 = arith.divf %319, %320 : vector<16x1xf32>
    %322 = vector.broadcast %321 : vector<16x1xf32> to vector<16x32xf32>
    %323 = arith.subf %317, %322 : vector<16x32xf32>
    %324 = arith.mulf %323, %323 : vector<16x32xf32>
    %cst_144 = arith.constant dense<0.000000e+00> : vector<16xf32>
    %325 = vector.multi_reduction <add>, %324, %cst_144 [1] : vector<16x32xf32> to vector<16xf32>
    %326 = vector.shape_cast %325 : vector<16xf32> to vector<16x1xf32>
    %cst_145 = arith.constant 3.200000e+01 : f32
    %327 = vector.broadcast %cst_145 : f32 to vector<16x1xf32>
    %328 = arith.divf %326, %327 : vector<16x1xf32>
    %cst_146 = arith.constant 9.99999974E-6 : f32
    %329 = vector.broadcast %cst_146 : f32 to vector<16x1xf32>
    %330 = arith.addf %328, %329 : vector<16x1xf32>
    %331 = math.rsqrt %330 : vector<16x1xf32>
    %332 = vector.broadcast %331 : vector<16x1xf32> to vector<16x32xf32>
    %333 = arith.mulf %323, %332 : vector<16x32xf32>
    %334 = vector.broadcast %314 : vector<1x32xf32> to vector<16x32xf32>
    %335 = arith.mulf %333, %334 : vector<16x32xf32>
    %336 = vector.broadcast %316 : vector<1x32xf32> to vector<16x32xf32>
    %337 = arith.addf %335, %336 : vector<16x32xf32>
    %c0_147 = arith.constant 0 : index
    %c0_148 = arith.constant 0 : index
    %c0_149 = arith.constant 0 : index
    %338 = vector.load %arg15[%c0_147, %c0_148, %c0_149] : memref<2x32x96xf32, #tpu.memory_space<vmem>>, vector<1x32x96xf32>
    %339 = vector.shape_cast %338 : vector<1x32x96xf32> to vector<32x96xf32>
    %cst_150 = arith.constant dense<0.000000e+00> : vector<16x96xf32>
    %340 = tpu.matmul %3, %339, %cst_150 {dimension_numbers = #tpu.dot_dimension_numbers<[1], [0], [0], [1], [0, 0, 1, 1], [], []>} : vector<16x32xf32>, vector<32x96xf32>, vector<16x96xf32> -> vector<16x96xf32>
    %c0_151 = arith.constant 0 : index
    %c0_152 = arith.constant 0 : index
    %c0_153 = arith.constant 0 : index
    %341 = vector.load %arg16[%c0_151, %c0_152, %c0_153] : memref<2x1x96xf32, #tpu.memory_space<vmem>>, vector<1x1x96xf32>
    %342 = vector.shape_cast %341 : vector<1x1x96xf32> to vector<1x96xf32>
    %343 = vector.broadcast %342 : vector<1x96xf32> to vector<16x96xf32>
    %344 = arith.addf %340, %343 : vector<16x96xf32>
    %345 = vector.extract_strided_slice %344 {offsets = [0, 0], sizes = [16, 32], strides = [1, 1]} : vector<16x96xf32> to vector<16x32xf32>
    %346 = vector.extract_strided_slice %344 {offsets = [0, 32], sizes = [16, 64], strides = [1, 1]} : vector<16x96xf32> to vector<16x64xf32>
    %cst_154 = arith.constant 0.353553385 : f32
    %347 = vector.broadcast %cst_154 : f32 to vector<16x32xf32>
    %348 = arith.mulf %345, %347 : vector<16x32xf32>
    %349 = vector.shape_cast %348 : vector<16x32xf32> to vector<2x8x32xf32>
    %350 = vector.extract_strided_slice %346 {offsets = [0, 0], sizes = [16, 32], strides = [1, 1]} : vector<16x64xf32> to vector<16x32xf32>
    %351 = vector.shape_cast %350 : vector<16x32xf32> to vector<2x8x32xf32>
    %352 = vector.extract_strided_slice %346 {offsets = [0, 32], sizes = [16, 32], strides = [1, 1]} : vector<16x64xf32> to vector<16x32xf32>
    %353 = vector.shape_cast %352 : vector<16x32xf32> to vector<2x8x32xf32>
    %354 = vector.extract_strided_slice %349 {offsets = [0, 0, 0], sizes = [2, 8, 8], strides = [1, 1, 1]} : vector<2x8x32xf32> to vector<2x8x8xf32>
    %355 = vector.extract_strided_slice %351 {offsets = [0, 0, 0], sizes = [2, 8, 8], strides = [1, 1, 1]} : vector<2x8x32xf32> to vector<2x8x8xf32>
    "tpu.trace_start"() <{level = 10 : i32, message = "bqd,bkd->bqk"}> : () -> ()
    %cst_155 = arith.constant dense<0.000000e+00> : vector<2x8x8xf32>
    %356 = tpu.matmul %354, %355, %cst_155 {dimension_numbers = #tpu.dot_dimension_numbers<[2], [2], [1], [1], [0, 0, 0, 1, 1, 1], [0], [0]>} : vector<2x8x8xf32>, vector<2x8x8xf32>, vector<2x8x8xf32> -> vector<2x8x8xf32>
    "tpu.trace_stop"() : () -> ()
    %cst_156 = arith.constant dense<0xFF800000> : vector<2x8xf32>
    %357 = vector.multi_reduction <maximumf>, %356, %cst_156 [2] : vector<2x8x8xf32> to vector<2x8xf32>
    %358 = vector.shape_cast %357 : vector<2x8xf32> to vector<2x8x1xf32>
    %359 = vector.broadcast %358 : vector<2x8x1xf32> to vector<2x8x8xf32>
    %360 = arith.subf %356, %359 : vector<2x8x8xf32>
    %361 = math.exp %360 : vector<2x8x8xf32>
    %cst_157 = arith.constant dense<0.000000e+00> : vector<2x8xf32>
    %362 = vector.multi_reduction <add>, %361, %cst_157 [2] : vector<2x8x8xf32> to vector<2x8xf32>
    %363 = vector.shape_cast %362 : vector<2x8xf32> to vector<2x8x1xf32>
    %364 = tpu.reciprocal %363 {approx = true} : vector<2x8x1xf32> -> vector<2x8x1xf32>
    %365 = arith.mulf %363, %364 : vector<2x8x1xf32>
    %cst_158 = arith.constant 2.000000e+00 : f32
    %366 = vector.broadcast %cst_158 : f32 to vector<2x8x1xf32>
    %367 = arith.subf %366, %365 : vector<2x8x1xf32>
    %368 = arith.mulf %364, %367 : vector<2x8x1xf32>
    %369 = vector.broadcast %368 : vector<2x8x1xf32> to vector<2x8x8xf32>
    %370 = arith.mulf %361, %369 : vector<2x8x8xf32>
    %371 = vector.extract_strided_slice %353 {offsets = [0, 0, 0], sizes = [2, 8, 8], strides = [1, 1, 1]} : vector<2x8x32xf32> to vector<2x8x8xf32>
    "tpu.trace_start"() <{level = 10 : i32, message = "bqk,bkd->bqd"}> : () -> ()
    %cst_159 = arith.constant dense<0.000000e+00> : vector<2x8x8xf32>
    %372 = tpu.matmul %370, %371, %cst_159 {dimension_numbers = #tpu.dot_dimension_numbers<[2], [1], [1], [2], [0, 0, 0, 1, 1, 2], [0], [0]>} : vector<2x8x8xf32>, vector<2x8x8xf32>, vector<2x8x8xf32> -> vector<2x8x8xf32>
    "tpu.trace_stop"() : () -> ()
    %373 = vector.extract_strided_slice %349 {offsets = [0, 0, 8], sizes = [2, 8, 8], strides = [1, 1, 1]} : vector<2x8x32xf32> to vector<2x8x8xf32>
    %374 = vector.extract_strided_slice %351 {offsets = [0, 0, 8], sizes = [2, 8, 8], strides = [1, 1, 1]} : vector<2x8x32xf32> to vector<2x8x8xf32>
    "tpu.trace_start"() <{level = 10 : i32, message = "bqd,bkd->bqk"}> : () -> ()
    %cst_160 = arith.constant dense<0.000000e+00> : vector<2x8x8xf32>
    %375 = tpu.matmul %373, %374, %cst_160 {dimension_numbers = #tpu.dot_dimension_numbers<[2], [2], [1], [1], [0, 0, 0, 1, 1, 1], [0], [0]>} : vector<2x8x8xf32>, vector<2x8x8xf32>, vector<2x8x8xf32> -> vector<2x8x8xf32>
    "tpu.trace_stop"() : () -> ()
    %cst_161 = arith.constant dense<0xFF800000> : vector<2x8xf32>
    %376 = vector.multi_reduction <maximumf>, %375, %cst_161 [2] : vector<2x8x8xf32> to vector<2x8xf32>
    %377 = vector.shape_cast %376 : vector<2x8xf32> to vector<2x8x1xf32>
    %378 = vector.broadcast %377 : vector<2x8x1xf32> to vector<2x8x8xf32>
    %379 = arith.subf %375, %378 : vector<2x8x8xf32>
    %380 = math.exp %379 : vector<2x8x8xf32>
    %cst_162 = arith.constant dense<0.000000e+00> : vector<2x8xf32>
    %381 = vector.multi_reduction <add>, %380, %cst_162 [2] : vector<2x8x8xf32> to vector<2x8xf32>
    %382 = vector.shape_cast %381 : vector<2x8xf32> to vector<2x8x1xf32>
    %383 = tpu.reciprocal %382 {approx = true} : vector<2x8x1xf32> -> vector<2x8x1xf32>
    %384 = arith.mulf %382, %383 : vector<2x8x1xf32>
    %cst_163 = arith.constant 2.000000e+00 : f32
    %385 = vector.broadcast %cst_163 : f32 to vector<2x8x1xf32>
    %386 = arith.subf %385, %384 : vector<2x8x1xf32>
    %387 = arith.mulf %383, %386 : vector<2x8x1xf32>
    %388 = vector.broadcast %387 : vector<2x8x1xf32> to vector<2x8x8xf32>
    %389 = arith.mulf %380, %388 : vector<2x8x8xf32>
    %390 = vector.extract_strided_slice %353 {offsets = [0, 0, 8], sizes = [2, 8, 8], strides = [1, 1, 1]} : vector<2x8x32xf32> to vector<2x8x8xf32>
    "tpu.trace_start"() <{level = 10 : i32, message = "bqk,bkd->bqd"}> : () -> ()
    %cst_164 = arith.constant dense<0.000000e+00> : vector<2x8x8xf32>
    %391 = tpu.matmul %389, %390, %cst_164 {dimension_numbers = #tpu.dot_dimension_numbers<[2], [1], [1], [2], [0, 0, 0, 1, 1, 2], [0], [0]>} : vector<2x8x8xf32>, vector<2x8x8xf32>, vector<2x8x8xf32> -> vector<2x8x8xf32>
    "tpu.trace_stop"() : () -> ()
    %392 = vector.extract_strided_slice %349 {offsets = [0, 0, 16], sizes = [2, 8, 8], strides = [1, 1, 1]} : vector<2x8x32xf32> to vector<2x8x8xf32>
    %393 = vector.extract_strided_slice %351 {offsets = [0, 0, 16], sizes = [2, 8, 8], strides = [1, 1, 1]} : vector<2x8x32xf32> to vector<2x8x8xf32>
    "tpu.trace_start"() <{level = 10 : i32, message = "bqd,bkd->bqk"}> : () -> ()
    %cst_165 = arith.constant dense<0.000000e+00> : vector<2x8x8xf32>
    %394 = tpu.matmul %392, %393, %cst_165 {dimension_numbers = #tpu.dot_dimension_numbers<[2], [2], [1], [1], [0, 0, 0, 1, 1, 1], [0], [0]>} : vector<2x8x8xf32>, vector<2x8x8xf32>, vector<2x8x8xf32> -> vector<2x8x8xf32>
    "tpu.trace_stop"() : () -> ()
    %cst_166 = arith.constant dense<0xFF800000> : vector<2x8xf32>
    %395 = vector.multi_reduction <maximumf>, %394, %cst_166 [2] : vector<2x8x8xf32> to vector<2x8xf32>
    %396 = vector.shape_cast %395 : vector<2x8xf32> to vector<2x8x1xf32>
    %397 = vector.broadcast %396 : vector<2x8x1xf32> to vector<2x8x8xf32>
    %398 = arith.subf %394, %397 : vector<2x8x8xf32>
    %399 = math.exp %398 : vector<2x8x8xf32>
    %cst_167 = arith.constant dense<0.000000e+00> : vector<2x8xf32>
    %400 = vector.multi_reduction <add>, %399, %cst_167 [2] : vector<2x8x8xf32> to vector<2x8xf32>
    %401 = vector.shape_cast %400 : vector<2x8xf32> to vector<2x8x1xf32>
    %402 = tpu.reciprocal %401 {approx = true} : vector<2x8x1xf32> -> vector<2x8x1xf32>
    %403 = arith.mulf %401, %402 : vector<2x8x1xf32>
    %cst_168 = arith.constant 2.000000e+00 : f32
    %404 = vector.broadcast %cst_168 : f32 to vector<2x8x1xf32>
    %405 = arith.subf %404, %403 : vector<2x8x1xf32>
    %406 = arith.mulf %402, %405 : vector<2x8x1xf32>
    %407 = vector.broadcast %406 : vector<2x8x1xf32> to vector<2x8x8xf32>
    %408 = arith.mulf %399, %407 : vector<2x8x8xf32>
    %409 = vector.extract_strided_slice %353 {offsets = [0, 0, 16], sizes = [2, 8, 8], strides = [1, 1, 1]} : vector<2x8x32xf32> to vector<2x8x8xf32>
    "tpu.trace_start"() <{level = 10 : i32, message = "bqk,bkd->bqd"}> : () -> ()
    %cst_169 = arith.constant dense<0.000000e+00> : vector<2x8x8xf32>
    %410 = tpu.matmul %408, %409, %cst_169 {dimension_numbers = #tpu.dot_dimension_numbers<[2], [1], [1], [2], [0, 0, 0, 1, 1, 2], [0], [0]>} : vector<2x8x8xf32>, vector<2x8x8xf32>, vector<2x8x8xf32> -> vector<2x8x8xf32>
    "tpu.trace_stop"() : () -> ()
    %411 = vector.extract_strided_slice %349 {offsets = [0, 0, 24], sizes = [2, 8, 8], strides = [1, 1, 1]} : vector<2x8x32xf32> to vector<2x8x8xf32>
    %412 = vector.extract_strided_slice %351 {offsets = [0, 0, 24], sizes = [2, 8, 8], strides = [1, 1, 1]} : vector<2x8x32xf32> to vector<2x8x8xf32>
    "tpu.trace_start"() <{level = 10 : i32, message = "bqd,bkd->bqk"}> : () -> ()
    %cst_170 = arith.constant dense<0.000000e+00> : vector<2x8x8xf32>
    %413 = tpu.matmul %411, %412, %cst_170 {dimension_numbers = #tpu.dot_dimension_numbers<[2], [2], [1], [1], [0, 0, 0, 1, 1, 1], [0], [0]>} : vector<2x8x8xf32>, vector<2x8x8xf32>, vector<2x8x8xf32> -> vector<2x8x8xf32>
    "tpu.trace_stop"() : () -> ()
    %cst_171 = arith.constant dense<0xFF800000> : vector<2x8xf32>
    %414 = vector.multi_reduction <maximumf>, %413, %cst_171 [2] : vector<2x8x8xf32> to vector<2x8xf32>
    %415 = vector.shape_cast %414 : vector<2x8xf32> to vector<2x8x1xf32>
    %416 = vector.broadcast %415 : vector<2x8x1xf32> to vector<2x8x8xf32>
    %417 = arith.subf %413, %416 : vector<2x8x8xf32>
    %418 = math.exp %417 : vector<2x8x8xf32>
    %cst_172 = arith.constant dense<0.000000e+00> : vector<2x8xf32>
    %419 = vector.multi_reduction <add>, %418, %cst_172 [2] : vector<2x8x8xf32> to vector<2x8xf32>
    %420 = vector.shape_cast %419 : vector<2x8xf32> to vector<2x8x1xf32>
    %421 = tpu.reciprocal %420 {approx = true} : vector<2x8x1xf32> -> vector<2x8x1xf32>
    %422 = arith.mulf %420, %421 : vector<2x8x1xf32>
    %cst_173 = arith.constant 2.000000e+00 : f32
    %423 = vector.broadcast %cst_173 : f32 to vector<2x8x1xf32>
    %424 = arith.subf %423, %422 : vector<2x8x1xf32>
    %425 = arith.mulf %421, %424 : vector<2x8x1xf32>
    %426 = vector.broadcast %425 : vector<2x8x1xf32> to vector<2x8x8xf32>
    %427 = arith.mulf %418, %426 : vector<2x8x8xf32>
    %428 = vector.extract_strided_slice %353 {offsets = [0, 0, 24], sizes = [2, 8, 8], strides = [1, 1, 1]} : vector<2x8x32xf32> to vector<2x8x8xf32>
    "tpu.trace_start"() <{level = 10 : i32, message = "bqk,bkd->bqd"}> : () -> ()
    %cst_174 = arith.constant dense<0.000000e+00> : vector<2x8x8xf32>
    %429 = tpu.matmul %427, %428, %cst_174 {dimension_numbers = #tpu.dot_dimension_numbers<[2], [1], [1], [2], [0, 0, 0, 1, 1, 2], [0], [0]>} : vector<2x8x8xf32>, vector<2x8x8xf32>, vector<2x8x8xf32> -> vector<2x8x8xf32>
    "tpu.trace_stop"() : () -> ()
    %430 = tpu.concatenate %372, %391, %410, %429 in 2 : vector<2x8x8xf32>, vector<2x8x8xf32>, vector<2x8x8xf32>, vector<2x8x8xf32> -> vector<2x8x32xf32>
    %431 = vector.shape_cast %430 : vector<2x8x32xf32> to vector<16x32xf32>
    %c0_175 = arith.constant 0 : index
    %c0_176 = arith.constant 0 : index
    %c0_177 = arith.constant 0 : index
    %432 = vector.load %arg17[%c0_175, %c0_176, %c0_177] : memref<2x32x32xf32, #tpu.memory_space<vmem>>, vector<1x32x32xf32>
    %433 = vector.shape_cast %432 : vector<1x32x32xf32> to vector<32x32xf32>
    %cst_178 = arith.constant dense<0.000000e+00> : vector<16x32xf32>
    %434 = tpu.matmul %431, %433, %cst_178 {dimension_numbers = #tpu.dot_dimension_numbers<[1], [0], [0], [1], [0, 0, 1, 1], [], []>} : vector<16x32xf32>, vector<32x32xf32>, vector<16x32xf32> -> vector<16x32xf32>
    %c0_179 = arith.constant 0 : index
    %c0_180 = arith.constant 0 : index
    %c0_181 = arith.constant 0 : index
    %435 = vector.load %arg18[%c0_179, %c0_180, %c0_181] : memref<2x1x32xf32, #tpu.memory_space<vmem>>, vector<1x1x32xf32>
    %436 = vector.shape_cast %435 : vector<1x1x32xf32> to vector<1x32xf32>
    %437 = vector.broadcast %436 : vector<1x32xf32> to vector<16x32xf32>
    %438 = arith.addf %434, %437 : vector<16x32xf32>
    %c0_182 = arith.constant 0 : index
    %c0_183 = arith.constant 0 : index
    %c0_184 = arith.constant 0 : index
    %439 = vector.load %arg19[%c0_182, %c0_183, %c0_184] : memref<2x1x32xf32, #tpu.memory_space<vmem>>, vector<1x1x32xf32>
    %440 = vector.shape_cast %439 : vector<1x1x32xf32> to vector<1x32xf32>
    %c0_185 = arith.constant 0 : index
    %c0_186 = arith.constant 0 : index
    %c0_187 = arith.constant 0 : index
    %441 = vector.load %arg20[%c0_185, %c0_186, %c0_187] : memref<2x1x32xf32, #tpu.memory_space<vmem>>, vector<1x1x32xf32>
    %442 = vector.shape_cast %441 : vector<1x1x32xf32> to vector<1x32xf32>
    %443 = arith.addf %3, %438 : vector<16x32xf32>
    %cst_188 = arith.constant dense<0.000000e+00> : vector<16xf32>
    %444 = vector.multi_reduction <add>, %443, %cst_188 [1] : vector<16x32xf32> to vector<16xf32>
    %445 = vector.shape_cast %444 : vector<16xf32> to vector<16x1xf32>
    %cst_189 = arith.constant 3.200000e+01 : f32
    %446 = vector.broadcast %cst_189 : f32 to vector<16x1xf32>
    %447 = arith.divf %445, %446 : vector<16x1xf32>
    %448 = vector.broadcast %447 : vector<16x1xf32> to vector<16x32xf32>
    %449 = arith.subf %443, %448 : vector<16x32xf32>
    %450 = arith.mulf %449, %449 : vector<16x32xf32>
    %cst_190 = arith.constant dense<0.000000e+00> : vector<16xf32>
    %451 = vector.multi_reduction <add>, %450, %cst_190 [1] : vector<16x32xf32> to vector<16xf32>
    %452 = vector.shape_cast %451 : vector<16xf32> to vector<16x1xf32>
    %cst_191 = arith.constant 3.200000e+01 : f32
    %453 = vector.broadcast %cst_191 : f32 to vector<16x1xf32>
    %454 = arith.divf %452, %453 : vector<16x1xf32>
    %cst_192 = arith.constant 9.99999974E-6 : f32
    %455 = vector.broadcast %cst_192 : f32 to vector<16x1xf32>
    %456 = arith.addf %454, %455 : vector<16x1xf32>
    %457 = math.rsqrt %456 : vector<16x1xf32>
    %458 = vector.broadcast %457 : vector<16x1xf32> to vector<16x32xf32>
    %459 = arith.mulf %449, %458 : vector<16x32xf32>
    %460 = vector.broadcast %440 : vector<1x32xf32> to vector<16x32xf32>
    %461 = arith.mulf %459, %460 : vector<16x32xf32>
    %462 = vector.broadcast %442 : vector<1x32xf32> to vector<16x32xf32>
    %463 = arith.addf %461, %462 : vector<16x32xf32>
    %c0_193 = arith.constant 0 : index
    %c0_194 = arith.constant 0 : index
    %c0_195 = arith.constant 0 : index
    %464 = vector.load %arg21[%c0_193, %c0_194, %c0_195] : memref<2x32x32xf32, #tpu.memory_space<vmem>>, vector<1x32x32xf32>
    %465 = vector.shape_cast %464 : vector<1x32x32xf32> to vector<32x32xf32>
    %cst_196 = arith.constant dense<0.000000e+00> : vector<16x32xf32>
    %466 = tpu.matmul %463, %465, %cst_196 {dimension_numbers = #tpu.dot_dimension_numbers<[1], [0], [0], [1], [0, 0, 1, 1], [], []>} : vector<16x32xf32>, vector<32x32xf32>, vector<16x32xf32> -> vector<16x32xf32>
    %c0_197 = arith.constant 0 : index
    %c0_198 = arith.constant 0 : index
    %c0_199 = arith.constant 0 : index
    %467 = vector.load %arg22[%c0_197, %c0_198, %c0_199] : memref<2x1x32xf32, #tpu.memory_space<vmem>>, vector<1x1x32xf32>
    %468 = vector.shape_cast %467 : vector<1x1x32xf32> to vector<1x32xf32>
    %469 = vector.broadcast %468 : vector<1x32xf32> to vector<16x32xf32>
    %470 = arith.addf %466, %469 : vector<16x32xf32>
    %c0_200 = arith.constant 0 : index
    %c0_201 = arith.constant 0 : index
    %c0_202 = arith.constant 0 : index
    %471 = vector.load %arg23[%c0_200, %c0_201, %c0_202] : memref<2x32x64xf32, #tpu.memory_space<vmem>>, vector<1x32x64xf32>
    %472 = vector.shape_cast %471 : vector<1x32x64xf32> to vector<32x64xf32>
    %cst_203 = arith.constant dense<0.000000e+00> : vector<16x64xf32>
    %473 = tpu.matmul %337, %472, %cst_203 {dimension_numbers = #tpu.dot_dimension_numbers<[1], [0], [0], [1], [0, 0, 1, 1], [], []>} : vector<16x32xf32>, vector<32x64xf32>, vector<16x64xf32> -> vector<16x64xf32>
    %c0_204 = arith.constant 0 : index
    %c0_205 = arith.constant 0 : index
    %c0_206 = arith.constant 0 : index
    %474 = vector.load %arg24[%c0_204, %c0_205, %c0_206] : memref<2x1x64xf32, #tpu.memory_space<vmem>>, vector<1x1x64xf32>
    %475 = vector.shape_cast %474 : vector<1x1x64xf32> to vector<1x64xf32>
    %476 = vector.broadcast %475 : vector<1x64xf32> to vector<16x64xf32>
    %477 = arith.addf %473, %476 : vector<16x64xf32>
    %cst_207 = arith.constant 0.353553385 : f32
    %478 = vector.broadcast %cst_207 : f32 to vector<16x32xf32>
    %479 = arith.mulf %470, %478 : vector<16x32xf32>
    %480 = vector.shape_cast %479 : vector<16x32xf32> to vector<2x8x32xf32>
    %481 = vector.extract_strided_slice %477 {offsets = [0, 0], sizes = [16, 32], strides = [1, 1]} : vector<16x64xf32> to vector<16x32xf32>
    %482 = vector.shape_cast %481 : vector<16x32xf32> to vector<2x8x32xf32>
    %483 = vector.extract_strided_slice %477 {offsets = [0, 32], sizes = [16, 32], strides = [1, 1]} : vector<16x64xf32> to vector<16x32xf32>
    %484 = vector.shape_cast %483 : vector<16x32xf32> to vector<2x8x32xf32>
    %485 = vector.extract_strided_slice %480 {offsets = [0, 0, 0], sizes = [2, 8, 8], strides = [1, 1, 1]} : vector<2x8x32xf32> to vector<2x8x8xf32>
    %486 = vector.extract_strided_slice %482 {offsets = [0, 0, 0], sizes = [2, 8, 8], strides = [1, 1, 1]} : vector<2x8x32xf32> to vector<2x8x8xf32>
    "tpu.trace_start"() <{level = 10 : i32, message = "bqd,bkd->bqk"}> : () -> ()
    %cst_208 = arith.constant dense<0.000000e+00> : vector<2x8x8xf32>
    %487 = tpu.matmul %485, %486, %cst_208 {dimension_numbers = #tpu.dot_dimension_numbers<[2], [2], [1], [1], [0, 0, 0, 1, 1, 1], [0], [0]>} : vector<2x8x8xf32>, vector<2x8x8xf32>, vector<2x8x8xf32> -> vector<2x8x8xf32>
    "tpu.trace_stop"() : () -> ()
    %cst_209 = arith.constant dense<0xFF800000> : vector<2x8xf32>
    %488 = vector.multi_reduction <maximumf>, %487, %cst_209 [2] : vector<2x8x8xf32> to vector<2x8xf32>
    %489 = vector.shape_cast %488 : vector<2x8xf32> to vector<2x8x1xf32>
    %490 = vector.broadcast %489 : vector<2x8x1xf32> to vector<2x8x8xf32>
    %491 = arith.subf %487, %490 : vector<2x8x8xf32>
    %492 = math.exp %491 : vector<2x8x8xf32>
    %cst_210 = arith.constant dense<0.000000e+00> : vector<2x8xf32>
    %493 = vector.multi_reduction <add>, %492, %cst_210 [2] : vector<2x8x8xf32> to vector<2x8xf32>
    %494 = vector.shape_cast %493 : vector<2x8xf32> to vector<2x8x1xf32>
    %495 = tpu.reciprocal %494 {approx = true} : vector<2x8x1xf32> -> vector<2x8x1xf32>
    %496 = arith.mulf %494, %495 : vector<2x8x1xf32>
    %cst_211 = arith.constant 2.000000e+00 : f32
    %497 = vector.broadcast %cst_211 : f32 to vector<2x8x1xf32>
    %498 = arith.subf %497, %496 : vector<2x8x1xf32>
    %499 = arith.mulf %495, %498 : vector<2x8x1xf32>
    %500 = vector.broadcast %499 : vector<2x8x1xf32> to vector<2x8x8xf32>
    %501 = arith.mulf %492, %500 : vector<2x8x8xf32>
    %502 = vector.extract_strided_slice %484 {offsets = [0, 0, 0], sizes = [2, 8, 8], strides = [1, 1, 1]} : vector<2x8x32xf32> to vector<2x8x8xf32>
    "tpu.trace_start"() <{level = 10 : i32, message = "bqk,bkd->bqd"}> : () -> ()
    %cst_212 = arith.constant dense<0.000000e+00> : vector<2x8x8xf32>
    %503 = tpu.matmul %501, %502, %cst_212 {dimension_numbers = #tpu.dot_dimension_numbers<[2], [1], [1], [2], [0, 0, 0, 1, 1, 2], [0], [0]>} : vector<2x8x8xf32>, vector<2x8x8xf32>, vector<2x8x8xf32> -> vector<2x8x8xf32>
    "tpu.trace_stop"() : () -> ()
    %504 = vector.extract_strided_slice %480 {offsets = [0, 0, 8], sizes = [2, 8, 8], strides = [1, 1, 1]} : vector<2x8x32xf32> to vector<2x8x8xf32>
    %505 = vector.extract_strided_slice %482 {offsets = [0, 0, 8], sizes = [2, 8, 8], strides = [1, 1, 1]} : vector<2x8x32xf32> to vector<2x8x8xf32>
    "tpu.trace_start"() <{level = 10 : i32, message = "bqd,bkd->bqk"}> : () -> ()
    %cst_213 = arith.constant dense<0.000000e+00> : vector<2x8x8xf32>
    %506 = tpu.matmul %504, %505, %cst_213 {dimension_numbers = #tpu.dot_dimension_numbers<[2], [2], [1], [1], [0, 0, 0, 1, 1, 1], [0], [0]>} : vector<2x8x8xf32>, vector<2x8x8xf32>, vector<2x8x8xf32> -> vector<2x8x8xf32>
    "tpu.trace_stop"() : () -> ()
    %cst_214 = arith.constant dense<0xFF800000> : vector<2x8xf32>
    %507 = vector.multi_reduction <maximumf>, %506, %cst_214 [2] : vector<2x8x8xf32> to vector<2x8xf32>
    %508 = vector.shape_cast %507 : vector<2x8xf32> to vector<2x8x1xf32>
    %509 = vector.broadcast %508 : vector<2x8x1xf32> to vector<2x8x8xf32>
    %510 = arith.subf %506, %509 : vector<2x8x8xf32>
    %511 = math.exp %510 : vector<2x8x8xf32>
    %cst_215 = arith.constant dense<0.000000e+00> : vector<2x8xf32>
    %512 = vector.multi_reduction <add>, %511, %cst_215 [2] : vector<2x8x8xf32> to vector<2x8xf32>
    %513 = vector.shape_cast %512 : vector<2x8xf32> to vector<2x8x1xf32>
    %514 = tpu.reciprocal %513 {approx = true} : vector<2x8x1xf32> -> vector<2x8x1xf32>
    %515 = arith.mulf %513, %514 : vector<2x8x1xf32>
    %cst_216 = arith.constant 2.000000e+00 : f32
    %516 = vector.broadcast %cst_216 : f32 to vector<2x8x1xf32>
    %517 = arith.subf %516, %515 : vector<2x8x1xf32>
    %518 = arith.mulf %514, %517 : vector<2x8x1xf32>
    %519 = vector.broadcast %518 : vector<2x8x1xf32> to vector<2x8x8xf32>
    %520 = arith.mulf %511, %519 : vector<2x8x8xf32>
    %521 = vector.extract_strided_slice %484 {offsets = [0, 0, 8], sizes = [2, 8, 8], strides = [1, 1, 1]} : vector<2x8x32xf32> to vector<2x8x8xf32>
    "tpu.trace_start"() <{level = 10 : i32, message = "bqk,bkd->bqd"}> : () -> ()
    %cst_217 = arith.constant dense<0.000000e+00> : vector<2x8x8xf32>
    %522 = tpu.matmul %520, %521, %cst_217 {dimension_numbers = #tpu.dot_dimension_numbers<[2], [1], [1], [2], [0, 0, 0, 1, 1, 2], [0], [0]>} : vector<2x8x8xf32>, vector<2x8x8xf32>, vector<2x8x8xf32> -> vector<2x8x8xf32>
    "tpu.trace_stop"() : () -> ()
    %523 = vector.extract_strided_slice %480 {offsets = [0, 0, 16], sizes = [2, 8, 8], strides = [1, 1, 1]} : vector<2x8x32xf32> to vector<2x8x8xf32>
    %524 = vector.extract_strided_slice %482 {offsets = [0, 0, 16], sizes = [2, 8, 8], strides = [1, 1, 1]} : vector<2x8x32xf32> to vector<2x8x8xf32>
    "tpu.trace_start"() <{level = 10 : i32, message = "bqd,bkd->bqk"}> : () -> ()
    %cst_218 = arith.constant dense<0.000000e+00> : vector<2x8x8xf32>
    %525 = tpu.matmul %523, %524, %cst_218 {dimension_numbers = #tpu.dot_dimension_numbers<[2], [2], [1], [1], [0, 0, 0, 1, 1, 1], [0], [0]>} : vector<2x8x8xf32>, vector<2x8x8xf32>, vector<2x8x8xf32> -> vector<2x8x8xf32>
    "tpu.trace_stop"() : () -> ()
    %cst_219 = arith.constant dense<0xFF800000> : vector<2x8xf32>
    %526 = vector.multi_reduction <maximumf>, %525, %cst_219 [2] : vector<2x8x8xf32> to vector<2x8xf32>
    %527 = vector.shape_cast %526 : vector<2x8xf32> to vector<2x8x1xf32>
    %528 = vector.broadcast %527 : vector<2x8x1xf32> to vector<2x8x8xf32>
    %529 = arith.subf %525, %528 : vector<2x8x8xf32>
    %530 = math.exp %529 : vector<2x8x8xf32>
    %cst_220 = arith.constant dense<0.000000e+00> : vector<2x8xf32>
    %531 = vector.multi_reduction <add>, %530, %cst_220 [2] : vector<2x8x8xf32> to vector<2x8xf32>
    %532 = vector.shape_cast %531 : vector<2x8xf32> to vector<2x8x1xf32>
    %533 = tpu.reciprocal %532 {approx = true} : vector<2x8x1xf32> -> vector<2x8x1xf32>
    %534 = arith.mulf %532, %533 : vector<2x8x1xf32>
    %cst_221 = arith.constant 2.000000e+00 : f32
    %535 = vector.broadcast %cst_221 : f32 to vector<2x8x1xf32>
    %536 = arith.subf %535, %534 : vector<2x8x1xf32>
    %537 = arith.mulf %533, %536 : vector<2x8x1xf32>
    %538 = vector.broadcast %537 : vector<2x8x1xf32> to vector<2x8x8xf32>
    %539 = arith.mulf %530, %538 : vector<2x8x8xf32>
    %540 = vector.extract_strided_slice %484 {offsets = [0, 0, 16], sizes = [2, 8, 8], strides = [1, 1, 1]} : vector<2x8x32xf32> to vector<2x8x8xf32>
    "tpu.trace_start"() <{level = 10 : i32, message = "bqk,bkd->bqd"}> : () -> ()
    %cst_222 = arith.constant dense<0.000000e+00> : vector<2x8x8xf32>
    %541 = tpu.matmul %539, %540, %cst_222 {dimension_numbers = #tpu.dot_dimension_numbers<[2], [1], [1], [2], [0, 0, 0, 1, 1, 2], [0], [0]>} : vector<2x8x8xf32>, vector<2x8x8xf32>, vector<2x8x8xf32> -> vector<2x8x8xf32>
    "tpu.trace_stop"() : () -> ()
    %542 = vector.extract_strided_slice %480 {offsets = [0, 0, 24], sizes = [2, 8, 8], strides = [1, 1, 1]} : vector<2x8x32xf32> to vector<2x8x8xf32>
    %543 = vector.extract_strided_slice %482 {offsets = [0, 0, 24], sizes = [2, 8, 8], strides = [1, 1, 1]} : vector<2x8x32xf32> to vector<2x8x8xf32>
    "tpu.trace_start"() <{level = 10 : i32, message = "bqd,bkd->bqk"}> : () -> ()
    %cst_223 = arith.constant dense<0.000000e+00> : vector<2x8x8xf32>
    %544 = tpu.matmul %542, %543, %cst_223 {dimension_numbers = #tpu.dot_dimension_numbers<[2], [2], [1], [1], [0, 0, 0, 1, 1, 1], [0], [0]>} : vector<2x8x8xf32>, vector<2x8x8xf32>, vector<2x8x8xf32> -> vector<2x8x8xf32>
    "tpu.trace_stop"() : () -> ()
    %cst_224 = arith.constant dense<0xFF800000> : vector<2x8xf32>
    %545 = vector.multi_reduction <maximumf>, %544, %cst_224 [2] : vector<2x8x8xf32> to vector<2x8xf32>
    %546 = vector.shape_cast %545 : vector<2x8xf32> to vector<2x8x1xf32>
    %547 = vector.broadcast %546 : vector<2x8x1xf32> to vector<2x8x8xf32>
    %548 = arith.subf %544, %547 : vector<2x8x8xf32>
    %549 = math.exp %548 : vector<2x8x8xf32>
    %cst_225 = arith.constant dense<0.000000e+00> : vector<2x8xf32>
    %550 = vector.multi_reduction <add>, %549, %cst_225 [2] : vector<2x8x8xf32> to vector<2x8xf32>
    %551 = vector.shape_cast %550 : vector<2x8xf32> to vector<2x8x1xf32>
    %552 = tpu.reciprocal %551 {approx = true} : vector<2x8x1xf32> -> vector<2x8x1xf32>
    %553 = arith.mulf %551, %552 : vector<2x8x1xf32>
    %cst_226 = arith.constant 2.000000e+00 : f32
    %554 = vector.broadcast %cst_226 : f32 to vector<2x8x1xf32>
    %555 = arith.subf %554, %553 : vector<2x8x1xf32>
    %556 = arith.mulf %552, %555 : vector<2x8x1xf32>
    %557 = vector.broadcast %556 : vector<2x8x1xf32> to vector<2x8x8xf32>
    %558 = arith.mulf %549, %557 : vector<2x8x8xf32>
    %559 = vector.extract_strided_slice %484 {offsets = [0, 0, 24], sizes = [2, 8, 8], strides = [1, 1, 1]} : vector<2x8x32xf32> to vector<2x8x8xf32>
    "tpu.trace_start"() <{level = 10 : i32, message = "bqk,bkd->bqd"}> : () -> ()
    %cst_227 = arith.constant dense<0.000000e+00> : vector<2x8x8xf32>
    %560 = tpu.matmul %558, %559, %cst_227 {dimension_numbers = #tpu.dot_dimension_numbers<[2], [1], [1], [2], [0, 0, 0, 1, 1, 2], [0], [0]>} : vector<2x8x8xf32>, vector<2x8x8xf32>, vector<2x8x8xf32> -> vector<2x8x8xf32>
    "tpu.trace_stop"() : () -> ()
    %561 = tpu.concatenate %503, %522, %541, %560 in 2 : vector<2x8x8xf32>, vector<2x8x8xf32>, vector<2x8x8xf32>, vector<2x8x8xf32> -> vector<2x8x32xf32>
    %562 = vector.shape_cast %561 : vector<2x8x32xf32> to vector<16x32xf32>
    %c0_228 = arith.constant 0 : index
    %c0_229 = arith.constant 0 : index
    %c0_230 = arith.constant 0 : index
    %563 = vector.load %arg25[%c0_228, %c0_229, %c0_230] : memref<2x32x32xf32, #tpu.memory_space<vmem>>, vector<1x32x32xf32>
    %564 = vector.shape_cast %563 : vector<1x32x32xf32> to vector<32x32xf32>
    %cst_231 = arith.constant dense<0.000000e+00> : vector<16x32xf32>
    %565 = tpu.matmul %562, %564, %cst_231 {dimension_numbers = #tpu.dot_dimension_numbers<[1], [0], [0], [1], [0, 0, 1, 1], [], []>} : vector<16x32xf32>, vector<32x32xf32>, vector<16x32xf32> -> vector<16x32xf32>
    %c0_232 = arith.constant 0 : index
    %c0_233 = arith.constant 0 : index
    %c0_234 = arith.constant 0 : index
    %566 = vector.load %arg26[%c0_232, %c0_233, %c0_234] : memref<2x1x32xf32, #tpu.memory_space<vmem>>, vector<1x1x32xf32>
    %567 = vector.shape_cast %566 : vector<1x1x32xf32> to vector<1x32xf32>
    %568 = vector.broadcast %567 : vector<1x32xf32> to vector<16x32xf32>
    %569 = arith.addf %565, %568 : vector<16x32xf32>
    %c0_235 = arith.constant 0 : index
    %c0_236 = arith.constant 0 : index
    %c0_237 = arith.constant 0 : index
    %570 = vector.load %arg27[%c0_235, %c0_236, %c0_237] : memref<2x1x32xf32, #tpu.memory_space<vmem>>, vector<1x1x32xf32>
    %571 = vector.shape_cast %570 : vector<1x1x32xf32> to vector<1x32xf32>
    %c0_238 = arith.constant 0 : index
    %c0_239 = arith.constant 0 : index
    %c0_240 = arith.constant 0 : index
    %572 = vector.load %arg28[%c0_238, %c0_239, %c0_240] : memref<2x1x32xf32, #tpu.memory_space<vmem>>, vector<1x1x32xf32>
    %573 = vector.shape_cast %572 : vector<1x1x32xf32> to vector<1x32xf32>
    %574 = arith.addf %463, %569 : vector<16x32xf32>
    %cst_241 = arith.constant dense<0.000000e+00> : vector<16xf32>
    %575 = vector.multi_reduction <add>, %574, %cst_241 [1] : vector<16x32xf32> to vector<16xf32>
    %576 = vector.shape_cast %575 : vector<16xf32> to vector<16x1xf32>
    %cst_242 = arith.constant 3.200000e+01 : f32
    %577 = vector.broadcast %cst_242 : f32 to vector<16x1xf32>
    %578 = arith.divf %576, %577 : vector<16x1xf32>
    %579 = vector.broadcast %578 : vector<16x1xf32> to vector<16x32xf32>
    %580 = arith.subf %574, %579 : vector<16x32xf32>
    %581 = arith.mulf %580, %580 : vector<16x32xf32>
    %cst_243 = arith.constant dense<0.000000e+00> : vector<16xf32>
    %582 = vector.multi_reduction <add>, %581, %cst_243 [1] : vector<16x32xf32> to vector<16xf32>
    %583 = vector.shape_cast %582 : vector<16xf32> to vector<16x1xf32>
    %cst_244 = arith.constant 3.200000e+01 : f32
    %584 = vector.broadcast %cst_244 : f32 to vector<16x1xf32>
    %585 = arith.divf %583, %584 : vector<16x1xf32>
    %cst_245 = arith.constant 9.99999974E-6 : f32
    %586 = vector.broadcast %cst_245 : f32 to vector<16x1xf32>
    %587 = arith.addf %585, %586 : vector<16x1xf32>
    %588 = math.rsqrt %587 : vector<16x1xf32>
    %589 = vector.broadcast %588 : vector<16x1xf32> to vector<16x32xf32>
    %590 = arith.mulf %580, %589 : vector<16x32xf32>
    %591 = vector.broadcast %571 : vector<1x32xf32> to vector<16x32xf32>
    %592 = arith.mulf %590, %591 : vector<16x32xf32>
    %593 = vector.broadcast %573 : vector<1x32xf32> to vector<16x32xf32>
    %594 = arith.addf %592, %593 : vector<16x32xf32>
    %c0_246 = arith.constant 0 : index
    %c0_247 = arith.constant 0 : index
    %c0_248 = arith.constant 0 : index
    %595 = vector.load %arg29[%c0_246, %c0_247, %c0_248] : memref<2x32x64xf32, #tpu.memory_space<vmem>>, vector<1x32x64xf32>
    %596 = vector.shape_cast %595 : vector<1x32x64xf32> to vector<32x64xf32>
    %cst_249 = arith.constant dense<0.000000e+00> : vector<16x64xf32>
    %597 = tpu.matmul %594, %596, %cst_249 {dimension_numbers = #tpu.dot_dimension_numbers<[1], [0], [0], [1], [0, 0, 1, 1], [], []>} : vector<16x32xf32>, vector<32x64xf32>, vector<16x64xf32> -> vector<16x64xf32>
    %c0_250 = arith.constant 0 : index
    %c0_251 = arith.constant 0 : index
    %c0_252 = arith.constant 0 : index
    %598 = vector.load %arg30[%c0_250, %c0_251, %c0_252] : memref<2x1x64xf32, #tpu.memory_space<vmem>>, vector<1x1x64xf32>
    %599 = vector.shape_cast %598 : vector<1x1x64xf32> to vector<1x64xf32>
    %600 = vector.broadcast %599 : vector<1x64xf32> to vector<16x64xf32>
    %601 = arith.addf %597, %600 : vector<16x64xf32>
    %cst_253 = arith.constant 0.000000e+00 : f32
    %602 = vector.broadcast %cst_253 : f32 to vector<16x64xf32>
    %603 = arith.maximumf %601, %602 : vector<16x64xf32>
    %c0_254 = arith.constant 0 : index
    %c0_255 = arith.constant 0 : index
    %c0_256 = arith.constant 0 : index
    %604 = vector.load %arg31[%c0_254, %c0_255, %c0_256] : memref<2x64x32xf32, #tpu.memory_space<vmem>>, vector<1x64x32xf32>
    %605 = vector.shape_cast %604 : vector<1x64x32xf32> to vector<64x32xf32>
    %cst_257 = arith.constant dense<0.000000e+00> : vector<16x32xf32>
    %606 = tpu.matmul %603, %605, %cst_257 {dimension_numbers = #tpu.dot_dimension_numbers<[1], [0], [0], [1], [0, 0, 1, 1], [], []>} : vector<16x64xf32>, vector<64x32xf32>, vector<16x32xf32> -> vector<16x32xf32>
    %c0_258 = arith.constant 0 : index
    %c0_259 = arith.constant 0 : index
    %c0_260 = arith.constant 0 : index
    %607 = vector.load %arg32[%c0_258, %c0_259, %c0_260] : memref<2x1x32xf32, #tpu.memory_space<vmem>>, vector<1x1x32xf32>
    %608 = vector.shape_cast %607 : vector<1x1x32xf32> to vector<1x32xf32>
    %609 = vector.broadcast %608 : vector<1x32xf32> to vector<16x32xf32>
    %610 = arith.addf %606, %609 : vector<16x32xf32>
    %c0_261 = arith.constant 0 : index
    %c0_262 = arith.constant 0 : index
    %c0_263 = arith.constant 0 : index
    %611 = vector.load %arg33[%c0_261, %c0_262, %c0_263] : memref<2x1x32xf32, #tpu.memory_space<vmem>>, vector<1x1x32xf32>
    %612 = vector.shape_cast %611 : vector<1x1x32xf32> to vector<1x32xf32>
    %c0_264 = arith.constant 0 : index
    %c0_265 = arith.constant 0 : index
    %c0_266 = arith.constant 0 : index
    %613 = vector.load %arg34[%c0_264, %c0_265, %c0_266] : memref<2x1x32xf32, #tpu.memory_space<vmem>>, vector<1x1x32xf32>
    %614 = vector.shape_cast %613 : vector<1x1x32xf32> to vector<1x32xf32>
    %615 = arith.addf %594, %610 : vector<16x32xf32>
    %cst_267 = arith.constant dense<0.000000e+00> : vector<16xf32>
    %616 = vector.multi_reduction <add>, %615, %cst_267 [1] : vector<16x32xf32> to vector<16xf32>
    %617 = vector.shape_cast %616 : vector<16xf32> to vector<16x1xf32>
    %cst_268 = arith.constant 3.200000e+01 : f32
    %618 = vector.broadcast %cst_268 : f32 to vector<16x1xf32>
    %619 = arith.divf %617, %618 : vector<16x1xf32>
    %620 = vector.broadcast %619 : vector<16x1xf32> to vector<16x32xf32>
    %621 = arith.subf %615, %620 : vector<16x32xf32>
    %622 = arith.mulf %621, %621 : vector<16x32xf32>
    %cst_269 = arith.constant dense<0.000000e+00> : vector<16xf32>
    %623 = vector.multi_reduction <add>, %622, %cst_269 [1] : vector<16x32xf32> to vector<16xf32>
    %624 = vector.shape_cast %623 : vector<16xf32> to vector<16x1xf32>
    %cst_270 = arith.constant 3.200000e+01 : f32
    %625 = vector.broadcast %cst_270 : f32 to vector<16x1xf32>
    %626 = arith.divf %624, %625 : vector<16x1xf32>
    %cst_271 = arith.constant 9.99999974E-6 : f32
    %627 = vector.broadcast %cst_271 : f32 to vector<16x1xf32>
    %628 = arith.addf %626, %627 : vector<16x1xf32>
    %629 = math.rsqrt %628 : vector<16x1xf32>
    %630 = vector.broadcast %629 : vector<16x1xf32> to vector<16x32xf32>
    %631 = arith.mulf %621, %630 : vector<16x32xf32>
    %632 = vector.broadcast %612 : vector<1x32xf32> to vector<16x32xf32>
    %633 = arith.mulf %631, %632 : vector<16x32xf32>
    %634 = vector.broadcast %614 : vector<1x32xf32> to vector<16x32xf32>
    %635 = arith.addf %633, %634 : vector<16x32xf32>
    %c1_272 = arith.constant 1 : index
    %c0_273 = arith.constant 0 : index
    %c0_274 = arith.constant 0 : index
    %636 = vector.load %arg15[%c1_272, %c0_273, %c0_274] : memref<2x32x96xf32, #tpu.memory_space<vmem>>, vector<1x32x96xf32>
    %637 = vector.shape_cast %636 : vector<1x32x96xf32> to vector<32x96xf32>
    %cst_275 = arith.constant dense<0.000000e+00> : vector<16x96xf32>
    %638 = tpu.matmul %635, %637, %cst_275 {dimension_numbers = #tpu.dot_dimension_numbers<[1], [0], [0], [1], [0, 0, 1, 1], [], []>} : vector<16x32xf32>, vector<32x96xf32>, vector<16x96xf32> -> vector<16x96xf32>
    %c1_276 = arith.constant 1 : index
    %c0_277 = arith.constant 0 : index
    %c0_278 = arith.constant 0 : index
    %639 = vector.load %arg16[%c1_276, %c0_277, %c0_278] : memref<2x1x96xf32, #tpu.memory_space<vmem>>, vector<1x1x96xf32>
    %640 = vector.shape_cast %639 : vector<1x1x96xf32> to vector<1x96xf32>
    %641 = vector.broadcast %640 : vector<1x96xf32> to vector<16x96xf32>
    %642 = arith.addf %638, %641 : vector<16x96xf32>
    %643 = vector.extract_strided_slice %642 {offsets = [0, 0], sizes = [16, 32], strides = [1, 1]} : vector<16x96xf32> to vector<16x32xf32>
    %644 = vector.extract_strided_slice %642 {offsets = [0, 32], sizes = [16, 64], strides = [1, 1]} : vector<16x96xf32> to vector<16x64xf32>
    %cst_279 = arith.constant 0.353553385 : f32
    %645 = vector.broadcast %cst_279 : f32 to vector<16x32xf32>
    %646 = arith.mulf %643, %645 : vector<16x32xf32>
    %647 = vector.shape_cast %646 : vector<16x32xf32> to vector<2x8x32xf32>
    %648 = vector.extract_strided_slice %644 {offsets = [0, 0], sizes = [16, 32], strides = [1, 1]} : vector<16x64xf32> to vector<16x32xf32>
    %649 = vector.shape_cast %648 : vector<16x32xf32> to vector<2x8x32xf32>
    %650 = vector.extract_strided_slice %644 {offsets = [0, 32], sizes = [16, 32], strides = [1, 1]} : vector<16x64xf32> to vector<16x32xf32>
    %651 = vector.shape_cast %650 : vector<16x32xf32> to vector<2x8x32xf32>
    %652 = vector.extract_strided_slice %647 {offsets = [0, 0, 0], sizes = [2, 8, 8], strides = [1, 1, 1]} : vector<2x8x32xf32> to vector<2x8x8xf32>
    %653 = vector.extract_strided_slice %649 {offsets = [0, 0, 0], sizes = [2, 8, 8], strides = [1, 1, 1]} : vector<2x8x32xf32> to vector<2x8x8xf32>
    "tpu.trace_start"() <{level = 10 : i32, message = "bqd,bkd->bqk"}> : () -> ()
    %cst_280 = arith.constant dense<0.000000e+00> : vector<2x8x8xf32>
    %654 = tpu.matmul %652, %653, %cst_280 {dimension_numbers = #tpu.dot_dimension_numbers<[2], [2], [1], [1], [0, 0, 0, 1, 1, 1], [0], [0]>} : vector<2x8x8xf32>, vector<2x8x8xf32>, vector<2x8x8xf32> -> vector<2x8x8xf32>
    "tpu.trace_stop"() : () -> ()
    %cst_281 = arith.constant dense<0xFF800000> : vector<2x8xf32>
    %655 = vector.multi_reduction <maximumf>, %654, %cst_281 [2] : vector<2x8x8xf32> to vector<2x8xf32>
    %656 = vector.shape_cast %655 : vector<2x8xf32> to vector<2x8x1xf32>
    %657 = vector.broadcast %656 : vector<2x8x1xf32> to vector<2x8x8xf32>
    %658 = arith.subf %654, %657 : vector<2x8x8xf32>
    %659 = math.exp %658 : vector<2x8x8xf32>
    %cst_282 = arith.constant dense<0.000000e+00> : vector<2x8xf32>
    %660 = vector.multi_reduction <add>, %659, %cst_282 [2] : vector<2x8x8xf32> to vector<2x8xf32>
    %661 = vector.shape_cast %660 : vector<2x8xf32> to vector<2x8x1xf32>
    %662 = tpu.reciprocal %661 {approx = true} : vector<2x8x1xf32> -> vector<2x8x1xf32>
    %663 = arith.mulf %661, %662 : vector<2x8x1xf32>
    %cst_283 = arith.constant 2.000000e+00 : f32
    %664 = vector.broadcast %cst_283 : f32 to vector<2x8x1xf32>
    %665 = arith.subf %664, %663 : vector<2x8x1xf32>
    %666 = arith.mulf %662, %665 : vector<2x8x1xf32>
    %667 = vector.broadcast %666 : vector<2x8x1xf32> to vector<2x8x8xf32>
    %668 = arith.mulf %659, %667 : vector<2x8x8xf32>
    %669 = vector.extract_strided_slice %651 {offsets = [0, 0, 0], sizes = [2, 8, 8], strides = [1, 1, 1]} : vector<2x8x32xf32> to vector<2x8x8xf32>
    "tpu.trace_start"() <{level = 10 : i32, message = "bqk,bkd->bqd"}> : () -> ()
    %cst_284 = arith.constant dense<0.000000e+00> : vector<2x8x8xf32>
    %670 = tpu.matmul %668, %669, %cst_284 {dimension_numbers = #tpu.dot_dimension_numbers<[2], [1], [1], [2], [0, 0, 0, 1, 1, 2], [0], [0]>} : vector<2x8x8xf32>, vector<2x8x8xf32>, vector<2x8x8xf32> -> vector<2x8x8xf32>
    "tpu.trace_stop"() : () -> ()
    %671 = vector.extract_strided_slice %647 {offsets = [0, 0, 8], sizes = [2, 8, 8], strides = [1, 1, 1]} : vector<2x8x32xf32> to vector<2x8x8xf32>
    %672 = vector.extract_strided_slice %649 {offsets = [0, 0, 8], sizes = [2, 8, 8], strides = [1, 1, 1]} : vector<2x8x32xf32> to vector<2x8x8xf32>
    "tpu.trace_start"() <{level = 10 : i32, message = "bqd,bkd->bqk"}> : () -> ()
    %cst_285 = arith.constant dense<0.000000e+00> : vector<2x8x8xf32>
    %673 = tpu.matmul %671, %672, %cst_285 {dimension_numbers = #tpu.dot_dimension_numbers<[2], [2], [1], [1], [0, 0, 0, 1, 1, 1], [0], [0]>} : vector<2x8x8xf32>, vector<2x8x8xf32>, vector<2x8x8xf32> -> vector<2x8x8xf32>
    "tpu.trace_stop"() : () -> ()
    %cst_286 = arith.constant dense<0xFF800000> : vector<2x8xf32>
    %674 = vector.multi_reduction <maximumf>, %673, %cst_286 [2] : vector<2x8x8xf32> to vector<2x8xf32>
    %675 = vector.shape_cast %674 : vector<2x8xf32> to vector<2x8x1xf32>
    %676 = vector.broadcast %675 : vector<2x8x1xf32> to vector<2x8x8xf32>
    %677 = arith.subf %673, %676 : vector<2x8x8xf32>
    %678 = math.exp %677 : vector<2x8x8xf32>
    %cst_287 = arith.constant dense<0.000000e+00> : vector<2x8xf32>
    %679 = vector.multi_reduction <add>, %678, %cst_287 [2] : vector<2x8x8xf32> to vector<2x8xf32>
    %680 = vector.shape_cast %679 : vector<2x8xf32> to vector<2x8x1xf32>
    %681 = tpu.reciprocal %680 {approx = true} : vector<2x8x1xf32> -> vector<2x8x1xf32>
    %682 = arith.mulf %680, %681 : vector<2x8x1xf32>
    %cst_288 = arith.constant 2.000000e+00 : f32
    %683 = vector.broadcast %cst_288 : f32 to vector<2x8x1xf32>
    %684 = arith.subf %683, %682 : vector<2x8x1xf32>
    %685 = arith.mulf %681, %684 : vector<2x8x1xf32>
    %686 = vector.broadcast %685 : vector<2x8x1xf32> to vector<2x8x8xf32>
    %687 = arith.mulf %678, %686 : vector<2x8x8xf32>
    %688 = vector.extract_strided_slice %651 {offsets = [0, 0, 8], sizes = [2, 8, 8], strides = [1, 1, 1]} : vector<2x8x32xf32> to vector<2x8x8xf32>
    "tpu.trace_start"() <{level = 10 : i32, message = "bqk,bkd->bqd"}> : () -> ()
    %cst_289 = arith.constant dense<0.000000e+00> : vector<2x8x8xf32>
    %689 = tpu.matmul %687, %688, %cst_289 {dimension_numbers = #tpu.dot_dimension_numbers<[2], [1], [1], [2], [0, 0, 0, 1, 1, 2], [0], [0]>} : vector<2x8x8xf32>, vector<2x8x8xf32>, vector<2x8x8xf32> -> vector<2x8x8xf32>
    "tpu.trace_stop"() : () -> ()
    %690 = vector.extract_strided_slice %647 {offsets = [0, 0, 16], sizes = [2, 8, 8], strides = [1, 1, 1]} : vector<2x8x32xf32> to vector<2x8x8xf32>
    %691 = vector.extract_strided_slice %649 {offsets = [0, 0, 16], sizes = [2, 8, 8], strides = [1, 1, 1]} : vector<2x8x32xf32> to vector<2x8x8xf32>
    "tpu.trace_start"() <{level = 10 : i32, message = "bqd,bkd->bqk"}> : () -> ()
    %cst_290 = arith.constant dense<0.000000e+00> : vector<2x8x8xf32>
    %692 = tpu.matmul %690, %691, %cst_290 {dimension_numbers = #tpu.dot_dimension_numbers<[2], [2], [1], [1], [0, 0, 0, 1, 1, 1], [0], [0]>} : vector<2x8x8xf32>, vector<2x8x8xf32>, vector<2x8x8xf32> -> vector<2x8x8xf32>
    "tpu.trace_stop"() : () -> ()
    %cst_291 = arith.constant dense<0xFF800000> : vector<2x8xf32>
    %693 = vector.multi_reduction <maximumf>, %692, %cst_291 [2] : vector<2x8x8xf32> to vector<2x8xf32>
    %694 = vector.shape_cast %693 : vector<2x8xf32> to vector<2x8x1xf32>
    %695 = vector.broadcast %694 : vector<2x8x1xf32> to vector<2x8x8xf32>
    %696 = arith.subf %692, %695 : vector<2x8x8xf32>
    %697 = math.exp %696 : vector<2x8x8xf32>
    %cst_292 = arith.constant dense<0.000000e+00> : vector<2x8xf32>
    %698 = vector.multi_reduction <add>, %697, %cst_292 [2] : vector<2x8x8xf32> to vector<2x8xf32>
    %699 = vector.shape_cast %698 : vector<2x8xf32> to vector<2x8x1xf32>
    %700 = tpu.reciprocal %699 {approx = true} : vector<2x8x1xf32> -> vector<2x8x1xf32>
    %701 = arith.mulf %699, %700 : vector<2x8x1xf32>
    %cst_293 = arith.constant 2.000000e+00 : f32
    %702 = vector.broadcast %cst_293 : f32 to vector<2x8x1xf32>
    %703 = arith.subf %702, %701 : vector<2x8x1xf32>
    %704 = arith.mulf %700, %703 : vector<2x8x1xf32>
    %705 = vector.broadcast %704 : vector<2x8x1xf32> to vector<2x8x8xf32>
    %706 = arith.mulf %697, %705 : vector<2x8x8xf32>
    %707 = vector.extract_strided_slice %651 {offsets = [0, 0, 16], sizes = [2, 8, 8], strides = [1, 1, 1]} : vector<2x8x32xf32> to vector<2x8x8xf32>
    "tpu.trace_start"() <{level = 10 : i32, message = "bqk,bkd->bqd"}> : () -> ()
    %cst_294 = arith.constant dense<0.000000e+00> : vector<2x8x8xf32>
    %708 = tpu.matmul %706, %707, %cst_294 {dimension_numbers = #tpu.dot_dimension_numbers<[2], [1], [1], [2], [0, 0, 0, 1, 1, 2], [0], [0]>} : vector<2x8x8xf32>, vector<2x8x8xf32>, vector<2x8x8xf32> -> vector<2x8x8xf32>
    "tpu.trace_stop"() : () -> ()
    %709 = vector.extract_strided_slice %647 {offsets = [0, 0, 24], sizes = [2, 8, 8], strides = [1, 1, 1]} : vector<2x8x32xf32> to vector<2x8x8xf32>
    %710 = vector.extract_strided_slice %649 {offsets = [0, 0, 24], sizes = [2, 8, 8], strides = [1, 1, 1]} : vector<2x8x32xf32> to vector<2x8x8xf32>
    "tpu.trace_start"() <{level = 10 : i32, message = "bqd,bkd->bqk"}> : () -> ()
    %cst_295 = arith.constant dense<0.000000e+00> : vector<2x8x8xf32>
    %711 = tpu.matmul %709, %710, %cst_295 {dimension_numbers = #tpu.dot_dimension_numbers<[2], [2], [1], [1], [0, 0, 0, 1, 1, 1], [0], [0]>} : vector<2x8x8xf32>, vector<2x8x8xf32>, vector<2x8x8xf32> -> vector<2x8x8xf32>
    "tpu.trace_stop"() : () -> ()
    %cst_296 = arith.constant dense<0xFF800000> : vector<2x8xf32>
    %712 = vector.multi_reduction <maximumf>, %711, %cst_296 [2] : vector<2x8x8xf32> to vector<2x8xf32>
    %713 = vector.shape_cast %712 : vector<2x8xf32> to vector<2x8x1xf32>
    %714 = vector.broadcast %713 : vector<2x8x1xf32> to vector<2x8x8xf32>
    %715 = arith.subf %711, %714 : vector<2x8x8xf32>
    %716 = math.exp %715 : vector<2x8x8xf32>
    %cst_297 = arith.constant dense<0.000000e+00> : vector<2x8xf32>
    %717 = vector.multi_reduction <add>, %716, %cst_297 [2] : vector<2x8x8xf32> to vector<2x8xf32>
    %718 = vector.shape_cast %717 : vector<2x8xf32> to vector<2x8x1xf32>
    %719 = tpu.reciprocal %718 {approx = true} : vector<2x8x1xf32> -> vector<2x8x1xf32>
    %720 = arith.mulf %718, %719 : vector<2x8x1xf32>
    %cst_298 = arith.constant 2.000000e+00 : f32
    %721 = vector.broadcast %cst_298 : f32 to vector<2x8x1xf32>
    %722 = arith.subf %721, %720 : vector<2x8x1xf32>
    %723 = arith.mulf %719, %722 : vector<2x8x1xf32>
    %724 = vector.broadcast %723 : vector<2x8x1xf32> to vector<2x8x8xf32>
    %725 = arith.mulf %716, %724 : vector<2x8x8xf32>
    %726 = vector.extract_strided_slice %651 {offsets = [0, 0, 24], sizes = [2, 8, 8], strides = [1, 1, 1]} : vector<2x8x32xf32> to vector<2x8x8xf32>
    "tpu.trace_start"() <{level = 10 : i32, message = "bqk,bkd->bqd"}> : () -> ()
    %cst_299 = arith.constant dense<0.000000e+00> : vector<2x8x8xf32>
    %727 = tpu.matmul %725, %726, %cst_299 {dimension_numbers = #tpu.dot_dimension_numbers<[2], [1], [1], [2], [0, 0, 0, 1, 1, 2], [0], [0]>} : vector<2x8x8xf32>, vector<2x8x8xf32>, vector<2x8x8xf32> -> vector<2x8x8xf32>
    "tpu.trace_stop"() : () -> ()
    %728 = tpu.concatenate %670, %689, %708, %727 in 2 : vector<2x8x8xf32>, vector<2x8x8xf32>, vector<2x8x8xf32>, vector<2x8x8xf32> -> vector<2x8x32xf32>
    %729 = vector.shape_cast %728 : vector<2x8x32xf32> to vector<16x32xf32>
    %c1_300 = arith.constant 1 : index
    %c0_301 = arith.constant 0 : index
    %c0_302 = arith.constant 0 : index
    %730 = vector.load %arg17[%c1_300, %c0_301, %c0_302] : memref<2x32x32xf32, #tpu.memory_space<vmem>>, vector<1x32x32xf32>
    %731 = vector.shape_cast %730 : vector<1x32x32xf32> to vector<32x32xf32>
    %cst_303 = arith.constant dense<0.000000e+00> : vector<16x32xf32>
    %732 = tpu.matmul %729, %731, %cst_303 {dimension_numbers = #tpu.dot_dimension_numbers<[1], [0], [0], [1], [0, 0, 1, 1], [], []>} : vector<16x32xf32>, vector<32x32xf32>, vector<16x32xf32> -> vector<16x32xf32>
    %c1_304 = arith.constant 1 : index
    %c0_305 = arith.constant 0 : index
    %c0_306 = arith.constant 0 : index
    %733 = vector.load %arg18[%c1_304, %c0_305, %c0_306] : memref<2x1x32xf32, #tpu.memory_space<vmem>>, vector<1x1x32xf32>
    %734 = vector.shape_cast %733 : vector<1x1x32xf32> to vector<1x32xf32>
    %735 = vector.broadcast %734 : vector<1x32xf32> to vector<16x32xf32>
    %736 = arith.addf %732, %735 : vector<16x32xf32>
    %c1_307 = arith.constant 1 : index
    %c0_308 = arith.constant 0 : index
    %c0_309 = arith.constant 0 : index
    %737 = vector.load %arg19[%c1_307, %c0_308, %c0_309] : memref<2x1x32xf32, #tpu.memory_space<vmem>>, vector<1x1x32xf32>
    %738 = vector.shape_cast %737 : vector<1x1x32xf32> to vector<1x32xf32>
    %c1_310 = arith.constant 1 : index
    %c0_311 = arith.constant 0 : index
    %c0_312 = arith.constant 0 : index
    %739 = vector.load %arg20[%c1_310, %c0_311, %c0_312] : memref<2x1x32xf32, #tpu.memory_space<vmem>>, vector<1x1x32xf32>
    %740 = vector.shape_cast %739 : vector<1x1x32xf32> to vector<1x32xf32>
    %741 = arith.addf %635, %736 : vector<16x32xf32>
    %cst_313 = arith.constant dense<0.000000e+00> : vector<16xf32>
    %742 = vector.multi_reduction <add>, %741, %cst_313 [1] : vector<16x32xf32> to vector<16xf32>
    %743 = vector.shape_cast %742 : vector<16xf32> to vector<16x1xf32>
    %cst_314 = arith.constant 3.200000e+01 : f32
    %744 = vector.broadcast %cst_314 : f32 to vector<16x1xf32>
    %745 = arith.divf %743, %744 : vector<16x1xf32>
    %746 = vector.broadcast %745 : vector<16x1xf32> to vector<16x32xf32>
    %747 = arith.subf %741, %746 : vector<16x32xf32>
    %748 = arith.mulf %747, %747 : vector<16x32xf32>
    %cst_315 = arith.constant dense<0.000000e+00> : vector<16xf32>
    %749 = vector.multi_reduction <add>, %748, %cst_315 [1] : vector<16x32xf32> to vector<16xf32>
    %750 = vector.shape_cast %749 : vector<16xf32> to vector<16x1xf32>
    %cst_316 = arith.constant 3.200000e+01 : f32
    %751 = vector.broadcast %cst_316 : f32 to vector<16x1xf32>
    %752 = arith.divf %750, %751 : vector<16x1xf32>
    %cst_317 = arith.constant 9.99999974E-6 : f32
    %753 = vector.broadcast %cst_317 : f32 to vector<16x1xf32>
    %754 = arith.addf %752, %753 : vector<16x1xf32>
    %755 = math.rsqrt %754 : vector<16x1xf32>
    %756 = vector.broadcast %755 : vector<16x1xf32> to vector<16x32xf32>
    %757 = arith.mulf %747, %756 : vector<16x32xf32>
    %758 = vector.broadcast %738 : vector<1x32xf32> to vector<16x32xf32>
    %759 = arith.mulf %757, %758 : vector<16x32xf32>
    %760 = vector.broadcast %740 : vector<1x32xf32> to vector<16x32xf32>
    %761 = arith.addf %759, %760 : vector<16x32xf32>
    %c1_318 = arith.constant 1 : index
    %c0_319 = arith.constant 0 : index
    %c0_320 = arith.constant 0 : index
    %762 = vector.load %arg21[%c1_318, %c0_319, %c0_320] : memref<2x32x32xf32, #tpu.memory_space<vmem>>, vector<1x32x32xf32>
    %763 = vector.shape_cast %762 : vector<1x32x32xf32> to vector<32x32xf32>
    %cst_321 = arith.constant dense<0.000000e+00> : vector<16x32xf32>
    %764 = tpu.matmul %761, %763, %cst_321 {dimension_numbers = #tpu.dot_dimension_numbers<[1], [0], [0], [1], [0, 0, 1, 1], [], []>} : vector<16x32xf32>, vector<32x32xf32>, vector<16x32xf32> -> vector<16x32xf32>
    %c1_322 = arith.constant 1 : index
    %c0_323 = arith.constant 0 : index
    %c0_324 = arith.constant 0 : index
    %765 = vector.load %arg22[%c1_322, %c0_323, %c0_324] : memref<2x1x32xf32, #tpu.memory_space<vmem>>, vector<1x1x32xf32>
    %766 = vector.shape_cast %765 : vector<1x1x32xf32> to vector<1x32xf32>
    %767 = vector.broadcast %766 : vector<1x32xf32> to vector<16x32xf32>
    %768 = arith.addf %764, %767 : vector<16x32xf32>
    %c1_325 = arith.constant 1 : index
    %c0_326 = arith.constant 0 : index
    %c0_327 = arith.constant 0 : index
    %769 = vector.load %arg23[%c1_325, %c0_326, %c0_327] : memref<2x32x64xf32, #tpu.memory_space<vmem>>, vector<1x32x64xf32>
    %770 = vector.shape_cast %769 : vector<1x32x64xf32> to vector<32x64xf32>
    %cst_328 = arith.constant dense<0.000000e+00> : vector<16x64xf32>
    %771 = tpu.matmul %337, %770, %cst_328 {dimension_numbers = #tpu.dot_dimension_numbers<[1], [0], [0], [1], [0, 0, 1, 1], [], []>} : vector<16x32xf32>, vector<32x64xf32>, vector<16x64xf32> -> vector<16x64xf32>
    %c1_329 = arith.constant 1 : index
    %c0_330 = arith.constant 0 : index
    %c0_331 = arith.constant 0 : index
    %772 = vector.load %arg24[%c1_329, %c0_330, %c0_331] : memref<2x1x64xf32, #tpu.memory_space<vmem>>, vector<1x1x64xf32>
    %773 = vector.shape_cast %772 : vector<1x1x64xf32> to vector<1x64xf32>
    %774 = vector.broadcast %773 : vector<1x64xf32> to vector<16x64xf32>
    %775 = arith.addf %771, %774 : vector<16x64xf32>
    %cst_332 = arith.constant 0.353553385 : f32
    %776 = vector.broadcast %cst_332 : f32 to vector<16x32xf32>
    %777 = arith.mulf %768, %776 : vector<16x32xf32>
    %778 = vector.shape_cast %777 : vector<16x32xf32> to vector<2x8x32xf32>
    %779 = vector.extract_strided_slice %775 {offsets = [0, 0], sizes = [16, 32], strides = [1, 1]} : vector<16x64xf32> to vector<16x32xf32>
    %780 = vector.shape_cast %779 : vector<16x32xf32> to vector<2x8x32xf32>
    %781 = vector.extract_strided_slice %775 {offsets = [0, 32], sizes = [16, 32], strides = [1, 1]} : vector<16x64xf32> to vector<16x32xf32>
    %782 = vector.shape_cast %781 : vector<16x32xf32> to vector<2x8x32xf32>
    %783 = vector.extract_strided_slice %778 {offsets = [0, 0, 0], sizes = [2, 8, 8], strides = [1, 1, 1]} : vector<2x8x32xf32> to vector<2x8x8xf32>
    %784 = vector.extract_strided_slice %780 {offsets = [0, 0, 0], sizes = [2, 8, 8], strides = [1, 1, 1]} : vector<2x8x32xf32> to vector<2x8x8xf32>
    "tpu.trace_start"() <{level = 10 : i32, message = "bqd,bkd->bqk"}> : () -> ()
    %cst_333 = arith.constant dense<0.000000e+00> : vector<2x8x8xf32>
    %785 = tpu.matmul %783, %784, %cst_333 {dimension_numbers = #tpu.dot_dimension_numbers<[2], [2], [1], [1], [0, 0, 0, 1, 1, 1], [0], [0]>} : vector<2x8x8xf32>, vector<2x8x8xf32>, vector<2x8x8xf32> -> vector<2x8x8xf32>
    "tpu.trace_stop"() : () -> ()
    %cst_334 = arith.constant dense<0xFF800000> : vector<2x8xf32>
    %786 = vector.multi_reduction <maximumf>, %785, %cst_334 [2] : vector<2x8x8xf32> to vector<2x8xf32>
    %787 = vector.shape_cast %786 : vector<2x8xf32> to vector<2x8x1xf32>
    %788 = vector.broadcast %787 : vector<2x8x1xf32> to vector<2x8x8xf32>
    %789 = arith.subf %785, %788 : vector<2x8x8xf32>
    %790 = math.exp %789 : vector<2x8x8xf32>
    %cst_335 = arith.constant dense<0.000000e+00> : vector<2x8xf32>
    %791 = vector.multi_reduction <add>, %790, %cst_335 [2] : vector<2x8x8xf32> to vector<2x8xf32>
    %792 = vector.shape_cast %791 : vector<2x8xf32> to vector<2x8x1xf32>
    %793 = tpu.reciprocal %792 {approx = true} : vector<2x8x1xf32> -> vector<2x8x1xf32>
    %794 = arith.mulf %792, %793 : vector<2x8x1xf32>
    %cst_336 = arith.constant 2.000000e+00 : f32
    %795 = vector.broadcast %cst_336 : f32 to vector<2x8x1xf32>
    %796 = arith.subf %795, %794 : vector<2x8x1xf32>
    %797 = arith.mulf %793, %796 : vector<2x8x1xf32>
    %798 = vector.broadcast %797 : vector<2x8x1xf32> to vector<2x8x8xf32>
    %799 = arith.mulf %790, %798 : vector<2x8x8xf32>
    %800 = vector.extract_strided_slice %782 {offsets = [0, 0, 0], sizes = [2, 8, 8], strides = [1, 1, 1]} : vector<2x8x32xf32> to vector<2x8x8xf32>
    "tpu.trace_start"() <{level = 10 : i32, message = "bqk,bkd->bqd"}> : () -> ()
    %cst_337 = arith.constant dense<0.000000e+00> : vector<2x8x8xf32>
    %801 = tpu.matmul %799, %800, %cst_337 {dimension_numbers = #tpu.dot_dimension_numbers<[2], [1], [1], [2], [0, 0, 0, 1, 1, 2], [0], [0]>} : vector<2x8x8xf32>, vector<2x8x8xf32>, vector<2x8x8xf32> -> vector<2x8x8xf32>
    "tpu.trace_stop"() : () -> ()
    %802 = vector.extract_strided_slice %778 {offsets = [0, 0, 8], sizes = [2, 8, 8], strides = [1, 1, 1]} : vector<2x8x32xf32> to vector<2x8x8xf32>
    %803 = vector.extract_strided_slice %780 {offsets = [0, 0, 8], sizes = [2, 8, 8], strides = [1, 1, 1]} : vector<2x8x32xf32> to vector<2x8x8xf32>
    "tpu.trace_start"() <{level = 10 : i32, message = "bqd,bkd->bqk"}> : () -> ()
    %cst_338 = arith.constant dense<0.000000e+00> : vector<2x8x8xf32>
    %804 = tpu.matmul %802, %803, %cst_338 {dimension_numbers = #tpu.dot_dimension_numbers<[2], [2], [1], [1], [0, 0, 0, 1, 1, 1], [0], [0]>} : vector<2x8x8xf32>, vector<2x8x8xf32>, vector<2x8x8xf32> -> vector<2x8x8xf32>
    "tpu.trace_stop"() : () -> ()
    %cst_339 = arith.constant dense<0xFF800000> : vector<2x8xf32>
    %805 = vector.multi_reduction <maximumf>, %804, %cst_339 [2] : vector<2x8x8xf32> to vector<2x8xf32>
    %806 = vector.shape_cast %805 : vector<2x8xf32> to vector<2x8x1xf32>
    %807 = vector.broadcast %806 : vector<2x8x1xf32> to vector<2x8x8xf32>
    %808 = arith.subf %804, %807 : vector<2x8x8xf32>
    %809 = math.exp %808 : vector<2x8x8xf32>
    %cst_340 = arith.constant dense<0.000000e+00> : vector<2x8xf32>
    %810 = vector.multi_reduction <add>, %809, %cst_340 [2] : vector<2x8x8xf32> to vector<2x8xf32>
    %811 = vector.shape_cast %810 : vector<2x8xf32> to vector<2x8x1xf32>
    %812 = tpu.reciprocal %811 {approx = true} : vector<2x8x1xf32> -> vector<2x8x1xf32>
    %813 = arith.mulf %811, %812 : vector<2x8x1xf32>
    %cst_341 = arith.constant 2.000000e+00 : f32
    %814 = vector.broadcast %cst_341 : f32 to vector<2x8x1xf32>
    %815 = arith.subf %814, %813 : vector<2x8x1xf32>
    %816 = arith.mulf %812, %815 : vector<2x8x1xf32>
    %817 = vector.broadcast %816 : vector<2x8x1xf32> to vector<2x8x8xf32>
    %818 = arith.mulf %809, %817 : vector<2x8x8xf32>
    %819 = vector.extract_strided_slice %782 {offsets = [0, 0, 8], sizes = [2, 8, 8], strides = [1, 1, 1]} : vector<2x8x32xf32> to vector<2x8x8xf32>
    "tpu.trace_start"() <{level = 10 : i32, message = "bqk,bkd->bqd"}> : () -> ()
    %cst_342 = arith.constant dense<0.000000e+00> : vector<2x8x8xf32>
    %820 = tpu.matmul %818, %819, %cst_342 {dimension_numbers = #tpu.dot_dimension_numbers<[2], [1], [1], [2], [0, 0, 0, 1, 1, 2], [0], [0]>} : vector<2x8x8xf32>, vector<2x8x8xf32>, vector<2x8x8xf32> -> vector<2x8x8xf32>
    "tpu.trace_stop"() : () -> ()
    %821 = vector.extract_strided_slice %778 {offsets = [0, 0, 16], sizes = [2, 8, 8], strides = [1, 1, 1]} : vector<2x8x32xf32> to vector<2x8x8xf32>
    %822 = vector.extract_strided_slice %780 {offsets = [0, 0, 16], sizes = [2, 8, 8], strides = [1, 1, 1]} : vector<2x8x32xf32> to vector<2x8x8xf32>
    "tpu.trace_start"() <{level = 10 : i32, message = "bqd,bkd->bqk"}> : () -> ()
    %cst_343 = arith.constant dense<0.000000e+00> : vector<2x8x8xf32>
    %823 = tpu.matmul %821, %822, %cst_343 {dimension_numbers = #tpu.dot_dimension_numbers<[2], [2], [1], [1], [0, 0, 0, 1, 1, 1], [0], [0]>} : vector<2x8x8xf32>, vector<2x8x8xf32>, vector<2x8x8xf32> -> vector<2x8x8xf32>
    "tpu.trace_stop"() : () -> ()
    %cst_344 = arith.constant dense<0xFF800000> : vector<2x8xf32>
    %824 = vector.multi_reduction <maximumf>, %823, %cst_344 [2] : vector<2x8x8xf32> to vector<2x8xf32>
    %825 = vector.shape_cast %824 : vector<2x8xf32> to vector<2x8x1xf32>
    %826 = vector.broadcast %825 : vector<2x8x1xf32> to vector<2x8x8xf32>
    %827 = arith.subf %823, %826 : vector<2x8x8xf32>
    %828 = math.exp %827 : vector<2x8x8xf32>
    %cst_345 = arith.constant dense<0.000000e+00> : vector<2x8xf32>
    %829 = vector.multi_reduction <add>, %828, %cst_345 [2] : vector<2x8x8xf32> to vector<2x8xf32>
    %830 = vector.shape_cast %829 : vector<2x8xf32> to vector<2x8x1xf32>
    %831 = tpu.reciprocal %830 {approx = true} : vector<2x8x1xf32> -> vector<2x8x1xf32>
    %832 = arith.mulf %830, %831 : vector<2x8x1xf32>
    %cst_346 = arith.constant 2.000000e+00 : f32
    %833 = vector.broadcast %cst_346 : f32 to vector<2x8x1xf32>
    %834 = arith.subf %833, %832 : vector<2x8x1xf32>
    %835 = arith.mulf %831, %834 : vector<2x8x1xf32>
    %836 = vector.broadcast %835 : vector<2x8x1xf32> to vector<2x8x8xf32>
    %837 = arith.mulf %828, %836 : vector<2x8x8xf32>
    %838 = vector.extract_strided_slice %782 {offsets = [0, 0, 16], sizes = [2, 8, 8], strides = [1, 1, 1]} : vector<2x8x32xf32> to vector<2x8x8xf32>
    "tpu.trace_start"() <{level = 10 : i32, message = "bqk,bkd->bqd"}> : () -> ()
    %cst_347 = arith.constant dense<0.000000e+00> : vector<2x8x8xf32>
    %839 = tpu.matmul %837, %838, %cst_347 {dimension_numbers = #tpu.dot_dimension_numbers<[2], [1], [1], [2], [0, 0, 0, 1, 1, 2], [0], [0]>} : vector<2x8x8xf32>, vector<2x8x8xf32>, vector<2x8x8xf32> -> vector<2x8x8xf32>
    "tpu.trace_stop"() : () -> ()
    %840 = vector.extract_strided_slice %778 {offsets = [0, 0, 24], sizes = [2, 8, 8], strides = [1, 1, 1]} : vector<2x8x32xf32> to vector<2x8x8xf32>
    %841 = vector.extract_strided_slice %780 {offsets = [0, 0, 24], sizes = [2, 8, 8], strides = [1, 1, 1]} : vector<2x8x32xf32> to vector<2x8x8xf32>
    "tpu.trace_start"() <{level = 10 : i32, message = "bqd,bkd->bqk"}> : () -> ()
    %cst_348 = arith.constant dense<0.000000e+00> : vector<2x8x8xf32>
    %842 = tpu.matmul %840, %841, %cst_348 {dimension_numbers = #tpu.dot_dimension_numbers<[2], [2], [1], [1], [0, 0, 0, 1, 1, 1], [0], [0]>} : vector<2x8x8xf32>, vector<2x8x8xf32>, vector<2x8x8xf32> -> vector<2x8x8xf32>
    "tpu.trace_stop"() : () -> ()
    %cst_349 = arith.constant dense<0xFF800000> : vector<2x8xf32>
    %843 = vector.multi_reduction <maximumf>, %842, %cst_349 [2] : vector<2x8x8xf32> to vector<2x8xf32>
    %844 = vector.shape_cast %843 : vector<2x8xf32> to vector<2x8x1xf32>
    %845 = vector.broadcast %844 : vector<2x8x1xf32> to vector<2x8x8xf32>
    %846 = arith.subf %842, %845 : vector<2x8x8xf32>
    %847 = math.exp %846 : vector<2x8x8xf32>
    %cst_350 = arith.constant dense<0.000000e+00> : vector<2x8xf32>
    %848 = vector.multi_reduction <add>, %847, %cst_350 [2] : vector<2x8x8xf32> to vector<2x8xf32>
    %849 = vector.shape_cast %848 : vector<2x8xf32> to vector<2x8x1xf32>
    %850 = tpu.reciprocal %849 {approx = true} : vector<2x8x1xf32> -> vector<2x8x1xf32>
    %851 = arith.mulf %849, %850 : vector<2x8x1xf32>
    %cst_351 = arith.constant 2.000000e+00 : f32
    %852 = vector.broadcast %cst_351 : f32 to vector<2x8x1xf32>
    %853 = arith.subf %852, %851 : vector<2x8x1xf32>
    %854 = arith.mulf %850, %853 : vector<2x8x1xf32>
    %855 = vector.broadcast %854 : vector<2x8x1xf32> to vector<2x8x8xf32>
    %856 = arith.mulf %847, %855 : vector<2x8x8xf32>
    %857 = vector.extract_strided_slice %782 {offsets = [0, 0, 24], sizes = [2, 8, 8], strides = [1, 1, 1]} : vector<2x8x32xf32> to vector<2x8x8xf32>
    "tpu.trace_start"() <{level = 10 : i32, message = "bqk,bkd->bqd"}> : () -> ()
    %cst_352 = arith.constant dense<0.000000e+00> : vector<2x8x8xf32>
    %858 = tpu.matmul %856, %857, %cst_352 {dimension_numbers = #tpu.dot_dimension_numbers<[2], [1], [1], [2], [0, 0, 0, 1, 1, 2], [0], [0]>} : vector<2x8x8xf32>, vector<2x8x8xf32>, vector<2x8x8xf32> -> vector<2x8x8xf32>
    "tpu.trace_stop"() : () -> ()
    %859 = tpu.concatenate %801, %820, %839, %858 in 2 : vector<2x8x8xf32>, vector<2x8x8xf32>, vector<2x8x8xf32>, vector<2x8x8xf32> -> vector<2x8x32xf32>
    %860 = vector.shape_cast %859 : vector<2x8x32xf32> to vector<16x32xf32>
    %c1_353 = arith.constant 1 : index
    %c0_354 = arith.constant 0 : index
    %c0_355 = arith.constant 0 : index
    %861 = vector.load %arg25[%c1_353, %c0_354, %c0_355] : memref<2x32x32xf32, #tpu.memory_space<vmem>>, vector<1x32x32xf32>
    %862 = vector.shape_cast %861 : vector<1x32x32xf32> to vector<32x32xf32>
    %cst_356 = arith.constant dense<0.000000e+00> : vector<16x32xf32>
    %863 = tpu.matmul %860, %862, %cst_356 {dimension_numbers = #tpu.dot_dimension_numbers<[1], [0], [0], [1], [0, 0, 1, 1], [], []>} : vector<16x32xf32>, vector<32x32xf32>, vector<16x32xf32> -> vector<16x32xf32>
    %c1_357 = arith.constant 1 : index
    %c0_358 = arith.constant 0 : index
    %c0_359 = arith.constant 0 : index
    %864 = vector.load %arg26[%c1_357, %c0_358, %c0_359] : memref<2x1x32xf32, #tpu.memory_space<vmem>>, vector<1x1x32xf32>
    %865 = vector.shape_cast %864 : vector<1x1x32xf32> to vector<1x32xf32>
    %866 = vector.broadcast %865 : vector<1x32xf32> to vector<16x32xf32>
    %867 = arith.addf %863, %866 : vector<16x32xf32>
    %c1_360 = arith.constant 1 : index
    %c0_361 = arith.constant 0 : index
    %c0_362 = arith.constant 0 : index
    %868 = vector.load %arg27[%c1_360, %c0_361, %c0_362] : memref<2x1x32xf32, #tpu.memory_space<vmem>>, vector<1x1x32xf32>
    %869 = vector.shape_cast %868 : vector<1x1x32xf32> to vector<1x32xf32>
    %c1_363 = arith.constant 1 : index
    %c0_364 = arith.constant 0 : index
    %c0_365 = arith.constant 0 : index
    %870 = vector.load %arg28[%c1_363, %c0_364, %c0_365] : memref<2x1x32xf32, #tpu.memory_space<vmem>>, vector<1x1x32xf32>
    %871 = vector.shape_cast %870 : vector<1x1x32xf32> to vector<1x32xf32>
    %872 = arith.addf %761, %867 : vector<16x32xf32>
    %cst_366 = arith.constant dense<0.000000e+00> : vector<16xf32>
    %873 = vector.multi_reduction <add>, %872, %cst_366 [1] : vector<16x32xf32> to vector<16xf32>
    %874 = vector.shape_cast %873 : vector<16xf32> to vector<16x1xf32>
    %cst_367 = arith.constant 3.200000e+01 : f32
    %875 = vector.broadcast %cst_367 : f32 to vector<16x1xf32>
    %876 = arith.divf %874, %875 : vector<16x1xf32>
    %877 = vector.broadcast %876 : vector<16x1xf32> to vector<16x32xf32>
    %878 = arith.subf %872, %877 : vector<16x32xf32>
    %879 = arith.mulf %878, %878 : vector<16x32xf32>
    %cst_368 = arith.constant dense<0.000000e+00> : vector<16xf32>
    %880 = vector.multi_reduction <add>, %879, %cst_368 [1] : vector<16x32xf32> to vector<16xf32>
    %881 = vector.shape_cast %880 : vector<16xf32> to vector<16x1xf32>
    %cst_369 = arith.constant 3.200000e+01 : f32
    %882 = vector.broadcast %cst_369 : f32 to vector<16x1xf32>
    %883 = arith.divf %881, %882 : vector<16x1xf32>
    %cst_370 = arith.constant 9.99999974E-6 : f32
    %884 = vector.broadcast %cst_370 : f32 to vector<16x1xf32>
    %885 = arith.addf %883, %884 : vector<16x1xf32>
    %886 = math.rsqrt %885 : vector<16x1xf32>
    %887 = vector.broadcast %886 : vector<16x1xf32> to vector<16x32xf32>
    %888 = arith.mulf %878, %887 : vector<16x32xf32>
    %889 = vector.broadcast %869 : vector<1x32xf32> to vector<16x32xf32>
    %890 = arith.mulf %888, %889 : vector<16x32xf32>
    %891 = vector.broadcast %871 : vector<1x32xf32> to vector<16x32xf32>
    %892 = arith.addf %890, %891 : vector<16x32xf32>
    %c1_371 = arith.constant 1 : index
    %c0_372 = arith.constant 0 : index
    %c0_373 = arith.constant 0 : index
    %893 = vector.load %arg29[%c1_371, %c0_372, %c0_373] : memref<2x32x64xf32, #tpu.memory_space<vmem>>, vector<1x32x64xf32>
    %894 = vector.shape_cast %893 : vector<1x32x64xf32> to vector<32x64xf32>
    %cst_374 = arith.constant dense<0.000000e+00> : vector<16x64xf32>
    %895 = tpu.matmul %892, %894, %cst_374 {dimension_numbers = #tpu.dot_dimension_numbers<[1], [0], [0], [1], [0, 0, 1, 1], [], []>} : vector<16x32xf32>, vector<32x64xf32>, vector<16x64xf32> -> vector<16x64xf32>
    %c1_375 = arith.constant 1 : index
    %c0_376 = arith.constant 0 : index
    %c0_377 = arith.constant 0 : index
    %896 = vector.load %arg30[%c1_375, %c0_376, %c0_377] : memref<2x1x64xf32, #tpu.memory_space<vmem>>, vector<1x1x64xf32>
    %897 = vector.shape_cast %896 : vector<1x1x64xf32> to vector<1x64xf32>
    %898 = vector.broadcast %897 : vector<1x64xf32> to vector<16x64xf32>
    %899 = arith.addf %895, %898 : vector<16x64xf32>
    %cst_378 = arith.constant 0.000000e+00 : f32
    %900 = vector.broadcast %cst_378 : f32 to vector<16x64xf32>
    %901 = arith.maximumf %899, %900 : vector<16x64xf32>
    %c1_379 = arith.constant 1 : index
    %c0_380 = arith.constant 0 : index
    %c0_381 = arith.constant 0 : index
    %902 = vector.load %arg31[%c1_379, %c0_380, %c0_381] : memref<2x64x32xf32, #tpu.memory_space<vmem>>, vector<1x64x32xf32>
    %903 = vector.shape_cast %902 : vector<1x64x32xf32> to vector<64x32xf32>
    %cst_382 = arith.constant dense<0.000000e+00> : vector<16x32xf32>
    %904 = tpu.matmul %901, %903, %cst_382 {dimension_numbers = #tpu.dot_dimension_numbers<[1], [0], [0], [1], [0, 0, 1, 1], [], []>} : vector<16x64xf32>, vector<64x32xf32>, vector<16x32xf32> -> vector<16x32xf32>
    %c1_383 = arith.constant 1 : index
    %c0_384 = arith.constant 0 : index
    %c0_385 = arith.constant 0 : index
    %905 = vector.load %arg32[%c1_383, %c0_384, %c0_385] : memref<2x1x32xf32, #tpu.memory_space<vmem>>, vector<1x1x32xf32>
    %906 = vector.shape_cast %905 : vector<1x1x32xf32> to vector<1x32xf32>
    %907 = vector.broadcast %906 : vector<1x32xf32> to vector<16x32xf32>
    %908 = arith.addf %904, %907 : vector<16x32xf32>
    %c1_386 = arith.constant 1 : index
    %c0_387 = arith.constant 0 : index
    %c0_388 = arith.constant 0 : index
    %909 = vector.load %arg33[%c1_386, %c0_387, %c0_388] : memref<2x1x32xf32, #tpu.memory_space<vmem>>, vector<1x1x32xf32>
    %910 = vector.shape_cast %909 : vector<1x1x32xf32> to vector<1x32xf32>
    %c1_389 = arith.constant 1 : index
    %c0_390 = arith.constant 0 : index
    %c0_391 = arith.constant 0 : index
    %911 = vector.load %arg34[%c1_389, %c0_390, %c0_391] : memref<2x1x32xf32, #tpu.memory_space<vmem>>, vector<1x1x32xf32>
    %912 = vector.shape_cast %911 : vector<1x1x32xf32> to vector<1x32xf32>
    %913 = arith.addf %892, %908 : vector<16x32xf32>
    %cst_392 = arith.constant dense<0.000000e+00> : vector<16xf32>
    %914 = vector.multi_reduction <add>, %913, %cst_392 [1] : vector<16x32xf32> to vector<16xf32>
    %915 = vector.shape_cast %914 : vector<16xf32> to vector<16x1xf32>
    %cst_393 = arith.constant 3.200000e+01 : f32
    %916 = vector.broadcast %cst_393 : f32 to vector<16x1xf32>
    %917 = arith.divf %915, %916 : vector<16x1xf32>
    %918 = vector.broadcast %917 : vector<16x1xf32> to vector<16x32xf32>
    %919 = arith.subf %913, %918 : vector<16x32xf32>
    %920 = arith.mulf %919, %919 : vector<16x32xf32>
    %cst_394 = arith.constant dense<0.000000e+00> : vector<16xf32>
    %921 = vector.multi_reduction <add>, %920, %cst_394 [1] : vector<16x32xf32> to vector<16xf32>
    %922 = vector.shape_cast %921 : vector<16xf32> to vector<16x1xf32>
    %cst_395 = arith.constant 3.200000e+01 : f32
    %923 = vector.broadcast %cst_395 : f32 to vector<16x1xf32>
    %924 = arith.divf %922, %923 : vector<16x1xf32>
    %cst_396 = arith.constant 9.99999974E-6 : f32
    %925 = vector.broadcast %cst_396 : f32 to vector<16x1xf32>
    %926 = arith.addf %924, %925 : vector<16x1xf32>
    %927 = math.rsqrt %926 : vector<16x1xf32>
    %928 = vector.broadcast %927 : vector<16x1xf32> to vector<16x32xf32>
    %929 = arith.mulf %919, %928 : vector<16x32xf32>
    %930 = vector.broadcast %910 : vector<1x32xf32> to vector<16x32xf32>
    %931 = arith.mulf %929, %930 : vector<16x32xf32>
    %932 = vector.broadcast %912 : vector<1x32xf32> to vector<16x32xf32>
    %933 = arith.addf %931, %932 : vector<16x32xf32>
    %c0_397 = arith.constant 0 : index
    %c0_398 = arith.constant 0 : index
    %934 = vector.load %arg35[%c0_397, %c0_398] : memref<32x64xf32, #tpu.memory_space<vmem>>, vector<32x64xf32>
    %cst_399 = arith.constant dense<0.000000e+00> : vector<16x64xf32>
    %935 = tpu.matmul %933, %934, %cst_399 {dimension_numbers = #tpu.dot_dimension_numbers<[1], [0], [0], [1], [0, 0, 1, 1], [], []>} : vector<16x32xf32>, vector<32x64xf32>, vector<16x64xf32> -> vector<16x64xf32>
    %c0_400 = arith.constant 0 : index
    %c0_401 = arith.constant 0 : index
    %936 = vector.load %arg36[%c0_400, %c0_401] : memref<1x64xf32, #tpu.memory_space<vmem>>, vector<1x64xf32>
    %937 = vector.broadcast %936 : vector<1x64xf32> to vector<16x64xf32>
    %938 = arith.addf %935, %937 : vector<16x64xf32>
    %939 = vector.shape_cast %938 : vector<16x64xf32> to vector<2x8x64xf32>
    %c0_402 = arith.constant 0 : index
    %c0_403 = arith.constant 0 : index
    %c0_404 = arith.constant 0 : index
    %940 = vector.load %arg37[%c0_402, %c0_403, %c0_404] : memref<2x8x64xf32, #tpu.memory_space<vmem>>, vector<2x8x64xf32>
    tpu.vector_store %arg37[%c0_402, %c0_403, %c0_404], %939 {strides = array<i32>} : memref<2x8x64xf32, #tpu.memory_space<vmem>>, vector<2x8x64xf32>,
    return
  }
  func.func @transform_0(%arg0: i32) -> (i32, i32, i32) {
    %c0_i32 = arith.constant 0 : i32
    %c0_i32_0 = arith.constant 0 : i32
    %c0_i32_1 = arith.constant 0 : i32
    return %arg0, %c0_i32, %c0_i32_0 : i32, i32, i32
  }
  func.func @transform_1(%arg0: i32) -> (i32, i32, i32) {
    %c0_i32 = arith.constant 0 : i32
    %c0_i32_0 = arith.constant 0 : i32
    %c0_i32_1 = arith.constant 0 : i32
    return %arg0, %c0_i32, %c0_i32_0 : i32, i32, i32
  }
  func.func @transform_2(%arg0: i32) -> (i32, i32, i32) {
    %c0_i32 = arith.constant 0 : i32
    %c0_i32_0 = arith.constant 0 : i32
    %c0_i32_1 = arith.constant 0 : i32
    %c0_i32_2 = arith.constant 0 : i32
    return %c0_i32, %c0_i32_0, %c0_i32_1 : i32, i32, i32
  }
  func.func @transform_3(%arg0: i32) -> (i32, i32, i32) {
    %c0_i32 = arith.constant 0 : i32
    %c0_i32_0 = arith.constant 0 : i32
    %c0_i32_1 = arith.constant 0 : i32
    %c0_i32_2 = arith.constant 0 : i32
    return %c0_i32, %c0_i32_0, %c0_i32_1 : i32, i32, i32
  }
  func.func @transform_4(%arg0: i32) -> (i32, i32, i32) {
    %c0_i32 = arith.constant 0 : i32
    %c0_i32_0 = arith.constant 0 : i32
    %c0_i32_1 = arith.constant 0 : i32
    %c0_i32_2 = arith.constant 0 : i32
    return %c0_i32, %c0_i32_0, %c0_i32_1 : i32, i32, i32
  }
  func.func @transform_5(%arg0: i32) -> (i32, i32, i32) {
    %c0_i32 = arith.constant 0 : i32
    %c0_i32_0 = arith.constant 0 : i32
    %c0_i32_1 = arith.constant 0 : i32
    %c0_i32_2 = arith.constant 0 : i32
    return %c0_i32, %c0_i32_0, %c0_i32_1 : i32, i32, i32
  }
  func.func @transform_6(%arg0: i32) -> (i32, i32, i32) {
    %c0_i32 = arith.constant 0 : i32
    %c0_i32_0 = arith.constant 0 : i32
    %c0_i32_1 = arith.constant 0 : i32
    %c0_i32_2 = arith.constant 0 : i32
    return %c0_i32, %c0_i32_0, %c0_i32_1 : i32, i32, i32
  }
  func.func @transform_7(%arg0: i32) -> (i32, i32, i32) {
    %c0_i32 = arith.constant 0 : i32
    %c0_i32_0 = arith.constant 0 : i32
    %c0_i32_1 = arith.constant 0 : i32
    %c0_i32_2 = arith.constant 0 : i32
    return %c0_i32, %c0_i32_0, %c0_i32_1 : i32, i32, i32
  }
  func.func @transform_8(%arg0: i32) -> (i32, i32, i32) {
    %c0_i32 = arith.constant 0 : i32
    %c0_i32_0 = arith.constant 0 : i32
    %c0_i32_1 = arith.constant 0 : i32
    %c0_i32_2 = arith.constant 0 : i32
    return %c0_i32, %c0_i32_0, %c0_i32_1 : i32, i32, i32
  }
  func.func @transform_9(%arg0: i32) -> (i32, i32, i32) {
    %c0_i32 = arith.constant 0 : i32
    %c0_i32_0 = arith.constant 0 : i32
    %c0_i32_1 = arith.constant 0 : i32
    %c0_i32_2 = arith.constant 0 : i32
    return %c0_i32, %c0_i32_0, %c0_i32_1 : i32, i32, i32
  }
  func.func @transform_10(%arg0: i32) -> (i32, i32, i32) {
    %c0_i32 = arith.constant 0 : i32
    %c0_i32_0 = arith.constant 0 : i32
    %c0_i32_1 = arith.constant 0 : i32
    %c0_i32_2 = arith.constant 0 : i32
    return %c0_i32, %c0_i32_0, %c0_i32_1 : i32, i32, i32
  }
  func.func @transform_11(%arg0: i32) -> (i32, i32, i32) {
    %c0_i32 = arith.constant 0 : i32
    %c0_i32_0 = arith.constant 0 : i32
    %c0_i32_1 = arith.constant 0 : i32
    %c0_i32_2 = arith.constant 0 : i32
    return %c0_i32, %c0_i32_0, %c0_i32_1 : i32, i32, i32
  }
  func.func @transform_12(%arg0: i32) -> (i32, i32, i32) {
    %c0_i32 = arith.constant 0 : i32
    %c0_i32_0 = arith.constant 0 : i32
    %c0_i32_1 = arith.constant 0 : i32
    %c0_i32_2 = arith.constant 0 : i32
    return %c0_i32, %c0_i32_0, %c0_i32_1 : i32, i32, i32
  }
  func.func @transform_13(%arg0: i32) -> (i32, i32, i32) {
    %c0_i32 = arith.constant 0 : i32
    %c0_i32_0 = arith.constant 0 : i32
    %c0_i32_1 = arith.constant 0 : i32
    %c0_i32_2 = arith.constant 0 : i32
    return %c0_i32, %c0_i32_0, %c0_i32_1 : i32, i32, i32
  }
  func.func @transform_14(%arg0: i32) -> (i32, i32, i32) {
    %c0_i32 = arith.constant 0 : i32
    %c0_i32_0 = arith.constant 0 : i32
    %c0_i32_1 = arith.constant 0 : i32
    %c0_i32_2 = arith.constant 0 : i32
    return %c0_i32, %c0_i32_0, %c0_i32_1 : i32, i32, i32
  }
  func.func @transform_15(%arg0: i32) -> (i32, i32, i32) {
    %c0_i32 = arith.constant 0 : i32
    %c0_i32_0 = arith.constant 0 : i32
    %c0_i32_1 = arith.constant 0 : i32
    %c0_i32_2 = arith.constant 0 : i32
    return %c0_i32, %c0_i32_0, %c0_i32_1 : i32, i32, i32
  }
  func.func @transform_16(%arg0: i32) -> (i32, i32, i32) {
    %c0_i32 = arith.constant 0 : i32
    %c0_i32_0 = arith.constant 0 : i32
    %c0_i32_1 = arith.constant 0 : i32
    %c0_i32_2 = arith.constant 0 : i32
    return %c0_i32, %c0_i32_0, %c0_i32_1 : i32, i32, i32
  }
  func.func @transform_17(%arg0: i32) -> (i32, i32, i32) {
    %c0_i32 = arith.constant 0 : i32
    %c0_i32_0 = arith.constant 0 : i32
    %c0_i32_1 = arith.constant 0 : i32
    %c0_i32_2 = arith.constant 0 : i32
    return %c0_i32, %c0_i32_0, %c0_i32_1 : i32, i32, i32
  }
  func.func @transform_18(%arg0: i32) -> (i32, i32, i32) {
    %c0_i32 = arith.constant 0 : i32
    %c0_i32_0 = arith.constant 0 : i32
    %c0_i32_1 = arith.constant 0 : i32
    %c0_i32_2 = arith.constant 0 : i32
    return %c0_i32, %c0_i32_0, %c0_i32_1 : i32, i32, i32
  }
  func.func @transform_19(%arg0: i32) -> (i32, i32, i32) {
    %c0_i32 = arith.constant 0 : i32
    %c0_i32_0 = arith.constant 0 : i32
    %c0_i32_1 = arith.constant 0 : i32
    %c0_i32_2 = arith.constant 0 : i32
    return %c0_i32, %c0_i32_0, %c0_i32_1 : i32, i32, i32
  }
  func.func @transform_20(%arg0: i32) -> (i32, i32, i32) {
    %c0_i32 = arith.constant 0 : i32
    %c0_i32_0 = arith.constant 0 : i32
    %c0_i32_1 = arith.constant 0 : i32
    %c0_i32_2 = arith.constant 0 : i32
    return %c0_i32, %c0_i32_0, %c0_i32_1 : i32, i32, i32
  }
  func.func @transform_21(%arg0: i32) -> (i32, i32, i32) {
    %c0_i32 = arith.constant 0 : i32
    %c0_i32_0 = arith.constant 0 : i32
    %c0_i32_1 = arith.constant 0 : i32
    %c0_i32_2 = arith.constant 0 : i32
    return %c0_i32, %c0_i32_0, %c0_i32_1 : i32, i32, i32
  }
  func.func @transform_22(%arg0: i32) -> (i32, i32, i32) {
    %c0_i32 = arith.constant 0 : i32
    %c0_i32_0 = arith.constant 0 : i32
    %c0_i32_1 = arith.constant 0 : i32
    %c0_i32_2 = arith.constant 0 : i32
    return %c0_i32, %c0_i32_0, %c0_i32_1 : i32, i32, i32
  }
  func.func @transform_23(%arg0: i32) -> (i32, i32, i32) {
    %c0_i32 = arith.constant 0 : i32
    %c0_i32_0 = arith.constant 0 : i32
    %c0_i32_1 = arith.constant 0 : i32
    %c0_i32_2 = arith.constant 0 : i32
    return %c0_i32, %c0_i32_0, %c0_i32_1 : i32, i32, i32
  }
  func.func @transform_24(%arg0: i32) -> (i32, i32, i32) {
    %c0_i32 = arith.constant 0 : i32
    %c0_i32_0 = arith.constant 0 : i32
    %c0_i32_1 = arith.constant 0 : i32
    %c0_i32_2 = arith.constant 0 : i32
    return %c0_i32, %c0_i32_0, %c0_i32_1 : i32, i32, i32
  }
  func.func @transform_25(%arg0: i32) -> (i32, i32, i32) {
    %c0_i32 = arith.constant 0 : i32
    %c0_i32_0 = arith.constant 0 : i32
    %c0_i32_1 = arith.constant 0 : i32
    %c0_i32_2 = arith.constant 0 : i32
    return %c0_i32, %c0_i32_0, %c0_i32_1 : i32, i32, i32
  }
  func.func @transform_26(%arg0: i32) -> (i32, i32, i32) {
    %c0_i32 = arith.constant 0 : i32
    %c0_i32_0 = arith.constant 0 : i32
    %c0_i32_1 = arith.constant 0 : i32
    %c0_i32_2 = arith.constant 0 : i32
    return %c0_i32, %c0_i32_0, %c0_i32_1 : i32, i32, i32
  }
  func.func @transform_27(%arg0: i32) -> (i32, i32, i32) {
    %c0_i32 = arith.constant 0 : i32
    %c0_i32_0 = arith.constant 0 : i32
    %c0_i32_1 = arith.constant 0 : i32
    %c0_i32_2 = arith.constant 0 : i32
    return %c0_i32, %c0_i32_0, %c0_i32_1 : i32, i32, i32
  }
  func.func @transform_28(%arg0: i32) -> (i32, i32, i32) {
    %c0_i32 = arith.constant 0 : i32
    %c0_i32_0 = arith.constant 0 : i32
    %c0_i32_1 = arith.constant 0 : i32
    %c0_i32_2 = arith.constant 0 : i32
    return %c0_i32, %c0_i32_0, %c0_i32_1 : i32, i32, i32
  }
  func.func @transform_29(%arg0: i32) -> (i32, i32, i32) {
    %c0_i32 = arith.constant 0 : i32
    %c0_i32_0 = arith.constant 0 : i32
    %c0_i32_1 = arith.constant 0 : i32
    %c0_i32_2 = arith.constant 0 : i32
    return %c0_i32, %c0_i32_0, %c0_i32_1 : i32, i32, i32
  }
  func.func @transform_30(%arg0: i32) -> (i32, i32, i32) {
    %c0_i32 = arith.constant 0 : i32
    %c0_i32_0 = arith.constant 0 : i32
    %c0_i32_1 = arith.constant 0 : i32
    %c0_i32_2 = arith.constant 0 : i32
    return %c0_i32, %c0_i32_0, %c0_i32_1 : i32, i32, i32
  }
  func.func @transform_31(%arg0: i32) -> (i32, i32, i32) {
    %c0_i32 = arith.constant 0 : i32
    %c0_i32_0 = arith.constant 0 : i32
    %c0_i32_1 = arith.constant 0 : i32
    %c0_i32_2 = arith.constant 0 : i32
    return %c0_i32, %c0_i32_0, %c0_i32_1 : i32, i32, i32
  }
  func.func @transform_32(%arg0: i32) -> (i32, i32, i32) {
    %c0_i32 = arith.constant 0 : i32
    %c0_i32_0 = arith.constant 0 : i32
    %c0_i32_1 = arith.constant 0 : i32
    %c0_i32_2 = arith.constant 0 : i32
    return %c0_i32, %c0_i32_0, %c0_i32_1 : i32, i32, i32
  }
  func.func @transform_33(%arg0: i32) -> (i32, i32, i32) {
    %c0_i32 = arith.constant 0 : i32
    %c0_i32_0 = arith.constant 0 : i32
    %c0_i32_1 = arith.constant 0 : i32
    %c0_i32_2 = arith.constant 0 : i32
    return %c0_i32, %c0_i32_0, %c0_i32_1 : i32, i32, i32
  }
  func.func @transform_34(%arg0: i32) -> (i32, i32) {
    %c0_i32 = arith.constant 0 : i32
    %c0_i32_0 = arith.constant 0 : i32
    %c0_i32_1 = arith.constant 0 : i32
    return %c0_i32, %c0_i32_0 : i32, i32
  }
  func.func @transform_35(%arg0: i32) -> (i32, i32) {
    %c0_i32 = arith.constant 0 : i32
    %c0_i32_0 = arith.constant 0 : i32
    %c0_i32_1 = arith.constant 0 : i32
    return %c0_i32, %c0_i32_0 : i32, i32
  }
  func.func @transform_36(%arg0: i32) -> (i32, i32, i32) {
    %c0_i32 = arith.constant 0 : i32
    %c0_i32_0 = arith.constant 0 : i32
    %c0_i32_1 = arith.constant 0 : i32
    return %arg0, %c0_i32, %c0_i32_0 : i32, i32, i32
  }
}

</mosaic_0001>

<bundles_post_ra>
// kernel: transformer_forward.1
= control target key start
LH: loop header
LB: loop body
LE: loop exit
PB: predicated region body
PF: predicated region fallthrough
CT: control target
= control target key end

     0   :  { %s13032_s6 = smov 1   ;;  %s13033_s10 = smov 2   ;;  %s14594_s0 = inlined_call_operand.smem [shape: u32[37], index: -1, kind: input, shape index: {}] }
   0x1   :  { %s13094_s5 = sld [smem:[%s14594_s0]]   ;;  %s13034_s14 = smov 3  }
   0x2   :  { %s13099_s9 = sld [smem:[%s14594_s0 + %s13032_s6]]   ;;  %s13035_s18 = smov 4  }
   0x3   :  { %s13104_s13 = sld [smem:[%s14594_s0 + %s13033_s10]]   ;;  %s13036_s22 = smov 5  }
   0x4   :  { %s13109_s17 = sld [smem:[%s14594_s0 + %s13034_s14]]   ;;  %s13037_s26 = smov 6  }
   0x5   :  { %s13114_s21 = sld [smem:[%s14594_s0 + %s13035_s18]]   ;;  %s13038_s30 = smov 7  }
   0x6   :  { %s13119_s25 = sld [smem:[%s14594_s0 + %s13036_s22]]   ;;  %s13039_s4 = smov 8  }
   0x7   :  { %s13124_s29 = sld [smem:[%s14594_s0 + %s13037_s26]]   ;;  %s13040_s10 = smov 9  }
   0x8   :  { %14626 = sst [smem:[#allocation5_spill]] %s13099_s9  ;;  %s13041_s15 = smov 10  }
   0x9   :  { %s13129_s3 = sld [smem:[%s14594_s0 + %s13038_s30]]   ;;  %s13042_s20 = smov 11  }
   0xa   :  { %s13134_s8 = sld [smem:[%s14594_s0 + %s13039_s4]]   ;;  %s13043_s26 = smov 12  }
   0xb   :  { %s13139_s14 = sld [smem:[%s14594_s0 + %s13040_s10]]   ;;  %s13044_s1 = smov 13  }
   0xc   :  { %s13144_s19 = sld [smem:[%s14594_s0 + %s13041_s15]]   ;;  %s13045_s7 = smov 14  }
   0xd   :  { %s13149_s24 = sld [smem:[%s14594_s0 + %s13042_s20]]   ;;  %s13046_s15 = smov 15  }
   0xe   :  { %s13154_s30 = sld [smem:[%s14594_s0 + %s13043_s26]]   ;;  %s13047_s22 = smov 16  }
   0xf   :  { %s13159_s6 = sld [smem:[%s14594_s0 + %s13044_s1]]   ;;  %s13048_s28 = smov 17  }
  0x10   :  { %s13164_s12 = sld [smem:[%s14594_s0 + %s13045_s7]]   ;;  %s13049_s7 = smov 18  }
  0x11   :  { %s13169_s20 = sld [smem:[%s14594_s0 + %s13046_s15]]   ;;  %s13050_s15 = smov 19  }
  0x12   :  { %s13174_s27 = sld [smem:[%s14594_s0 + %s13047_s22]]   ;;  %s13051_s22 = smov 20  }
  0x13   :  { %s13179_s4 = sld [smem:[%s14594_s0 + %s13048_s28]]   ;;  %s13052_s28 = smov 21  }
  0x14   :  { %s13184_s9 = sld [smem:[%s14594_s0 + %s13049_s7]]   ;;  %s13053_s7 = smov 22  }
  0x17   :  { %14627 = sst [smem:[#allocation6_spill]] %s13169_s20 }
  0x18   :  { %14628 = sst [smem:[#allocation7_spill]] %s13174_s27 }
  0x19   :  { %14629 = sst [smem:[#allocation8_spill]] %s13179_s4 }
  0x1a   :  { %14630 = sst [smem:[#allocation9_spill]] %s13184_s9 }
  0x1b   :  { %s13189_s20 = sld [smem:[%s14594_s0 + %s13050_s15]]   ;;  %s13054_s15 = smov 23  }
  0x1c   :  { %s13194_s27 = sld [smem:[%s14594_s0 + %s13051_s22]]   ;;  %s13055_s22 = smov 24  }
  0x1d   :  { %s13199_s4 = sld [smem:[%s14594_s0 + %s13052_s28]]   ;;  %s13056_s28 = smov 25  }
  0x1e   :  { %s13204_s9 = sld [smem:[%s14594_s0 + %s13053_s7]]   ;;  %s13057_s7 = smov 26  }
  0x21   :  { %14631 = sst [smem:[#allocation10_spill]] %s13189_s20 }
  0x22   :  { %14632 = sst [smem:[#allocation11_spill]] %s13194_s27 }
  0x23   :  { %14633 = sst [smem:[#allocation12_spill]] %s13199_s4 }
  0x24   :  { %14634 = sst [smem:[#allocation13_spill]] %s13204_s9 }
  0x25   :  { %s13209_s20 = sld [smem:[%s14594_s0 + %s13054_s15]]   ;;  %s13058_s15 = smov 27  }
  0x26   :  { %s13214_s27 = sld [smem:[%s14594_s0 + %s13055_s22]]   ;;  %s13059_s22 = smov 28  }
  0x27   :  { %s13219_s4 = sld [smem:[%s14594_s0 + %s13056_s28]]   ;;  %s13060_s28 = smov 29  }
  0x28   :  { %s13224_s9 = sld [smem:[%s14594_s0 + %s13057_s7]]   ;;  %s13061_s7 = smov 30  }
  0x2b   :  { %14635 = sst [smem:[#allocation14_spill]] %s13209_s20 }
  0x2c   :  { %14636 = sst [smem:[#allocation15_spill]] %s13214_s27 }
  0x2d   :  { %14637 = sst [smem:[#allocation16_spill]] %s13219_s4 }
  0x2e   :  { %14638 = sst [smem:[#allocation17_spill]] %s13224_s9 }
  0x2f   :  { %s13229_s20 = sld [smem:[%s14594_s0 + %s13058_s15]]   ;;  %s13062_s15 = smov 31  }
  0x30   :  { %s13234_s27 = sld [smem:[%s14594_s0 + %s13059_s22]]   ;;  %s13063_s22 = smov 32  }
  0x31   :  { %s13239_s4 = sld [smem:[%s14594_s0 + %s13060_s28]]   ;;  %s13064_s28 = smov 33  }
  0x32   :  { %s13244_s9 = sld [smem:[%s14594_s0 + %s13061_s7]]   ;;  %s13065_s7 = smov 34  }
  0x35   :  { %14639 = sst [smem:[#allocation18_spill]] %s13229_s20 }
  0x36   :  { %14640 = sst [smem:[#allocation19_spill]] %s13234_s27 }
  0x37   :  { %14641 = sst [smem:[#allocation20_spill]] %s13239_s4 }
  0x38   :  { %14642 = sst [smem:[#allocation21_spill]] %s13244_s9 }
  0x39   :  { %s13249_s20 = sld [smem:[%s14594_s0 + %s13062_s15]]   ;;  %s13066_s15 = smov 35  }
  0x3a   :  { %s13254_s27 = sld [smem:[%s14594_s0 + %s13063_s22]]   ;;  %s13067_s22 = smov 36  }
  0x3b   :  { %s13259_s4 = sld [smem:[%s14594_s0 + %s13064_s28]]  }
  0x3c   :  { %s13264_s9 = sld [smem:[%s14594_s0 + %s13065_s7]]  }
  0x3f   :  { %14643 = sst [smem:[#allocation22_spill]] %s13249_s20 }
  0x40   :  { %14644 = sst [smem:[#allocation23_spill]] %s13254_s27 }
  0x41   :  { %s13269_s20 = sld [smem:[%s14594_s0 + %s13066_s15]]  }
  0x42   :  { %s13274_s27 = sld [smem:[%s14594_s0 + %s13067_s22]]  }
  0x43   :  { %v155_v0 = vld [vmem:[%s13104_s13] sm:$0xff]  ;;  %v156_v1 = vld [vmem:[%s13104_s13 + $0x8] sm:$0xff]  ;;  %v157_v2 = vld [vmem:[%s13104_s13 + $0x10] sm:$0xff]  ;;  %vm166_vm0 = vcmask 261120  }
  0x44   :  { %v12506_v3 = vpack.c.bf16 %v156_v1, %v155_v0  ;;  %v158_v4 = vld [vmem:[%s13104_s13 + $0x18] sm:$0xff]  ;;  %v13281_v5 = vld [vmem:[%s13094_s5] sm:$0xff] }
  0x45   :  { %v12510_v6 = vpack.c.bf16 %v158_v4, %v157_v2  ;;  %11749 = vmatprep.mubr.msk.f32.mxu0 %vm166_vm0, %v13281_v5 }
  0x46   :  { %78 = vsyncpa [#allocation3], 0  ;;  %12507 = vmatprep.subr.bf16.mxu0 %v12506_v3  ;;  %v13286_v7 = vld [vmem:[%s13094_s5 + $0x8] sm:$0xff]  ;;  %v13068_v8 = vmov 0.0   ;;  %vm13069_vm1 = vmmov 0   ;;  %s13070_s0 = smov 96  }
  0x47   :  { %12509 = vmatpush3.bf16.msra.mxu0 %v12506_v3  ;;  %11752 = vmatprep.subr.mxu1 %v13068_v8  ;;  %v11089_v9 = vld [vmem:[%s13109_s17] ss:$0 sm:$0xff]  ;;  %vm253_vm2 = vcmask 64512   ;;  %s13071_s5 = smov 64   ;;  %s13072_s28 = smov 88   ;;  %vm1624_vm3 = vcmask 195584  }
  0x48   :  { %12511 = vmatprep.subr.bf16.mxu0 %v12510_v6  ;;  %11754 = vmatprep.mubr.msk.f32.mxu1 %vm13069_vm1, %v13068_v8  ;;  %s13073_s1 = smov 120   ;;  %s13074_s2 = smov 56   ;;  %vm1621_vm4 = vcmask 130048   ;;  %vm1875_vm5 = vcmask 523264  }
  0x49   :  { %s13075_s7 = smov 112   ;;  %s13076_s10 = smov 80  }
  0x4a   :  { %s13077_s11 = smov 48   ;;  %s14624_s15 = smov 72  }
  0x4b   :  { %12513 = vmatpush3.bf16.msra.mxu0 %v12510_v6  ;;  %s14622_s16 = smov 104   ;;  %s14620_s18 = smov 40  }
  0x4c   :  { %11772 = vmatprep.subr.mxu0 %v13068_v8  ;;  %s14618_s22 = smov 8   ;;  %s14616_s23 = smov 16  }
  0x4d   :  { %s14614_s26 = smov 24  }
  0x4e   :  { %11750 = vmatmul.mubr.msk.f32.vlgmr.msra.gmra.mrb[0].mxu0 %vm166_vm0, %v13286_v7 }
  0x4f   :  { %11774 = vmatprep.mubr.msk.f32.mxu0 %vm13069_vm1, %v13068_v8 }
 0x121   :  { %v11751_v10 = vpop.f32.mrb[0].mxu0 }
 0x122   :  { %v239_v11 = vpop.f32.mrb[1].mxu0  ;;  %v13301_v13 = vadd.f32 %v11751_v10, %v11089_v9 }
 0x123   :  { %v13297_v12 = vadd.f32 %v11089_v9, %v239_v11 }
 0x124   :  { %v13316_v17 = vmul.f32 0.35355338, %v13301_v13 }
 0x125   :  { %251 = vrot.lane.b32.xlu0 %v13297_v12, %s13070_s0  ;;  %v13308_v15 = vmul.f32 0.35355338, %v13297_v12 }
 0x129   :  { %330 = vrot.lane.b32.xlu0 %v13301_v13, %s13070_s0 }
 0x197   :  { %v252_v14 = vpop.permute.xlu0 %251 }
 0x198   :  { %11753 = vmatpush3.xpose.msk.msra.mxu1 %vm253_vm2, %v252_v14 }
 0x199   :  { %11757 = vmatprep.subr.mxu1 %v13068_v8 }
 0x19b   :  { %v331_v16 = vpop.permute.xlu0 %330  ;;  %11755 = vmatmul.mubr.msk.f32.vlgmr.msra.gmra.mrb[0].mxu1 %vm253_vm2, %v13308_v15 }
 0x19c   :  { %11758 = vmatpush3.xpose.msk.msra.mxu1 %vm253_vm2, %v331_v16  ;;  %11759 = vmatprep.mubr.msk.f32.mxu1 %vm13069_vm1, %v13068_v8 }
 0x19d   :  { %11762 = vmatprep.subr.mxu1 %v13068_v8 }
 0x19f   :  { %11760 = vmatmul.mubr.msk.f32.vlgmr.msra.gmra.mrb[2].mxu1 %vm253_vm2, %v13316_v17 }
 0x1a0   :  { %11764 = vmatprep.mubr.msk.f32.mxu1 %vm13069_vm1, %v13068_v8 }
 0x26e   :  { %v325_v18 = vpop.f32.mrb[0].mxu1 }
 0x26f   :  { %v11756_v19 = vpop.f32.mrb[1].mxu1  ;;  %v407_v20 = vsel %vm253_vm2, %v325_v18, -inf }
 0x270   :  { %408 = vmax.xlane.f32.xlu1 %v407_v20 }
 0x272   :  { %v403_v21 = vpop.f32.mrb[2].mxu1 }
 0x273   :  { %v11761_v22 = vpop.f32.mrb[3].mxu1  ;;  %v410_v23 = vsel %vm253_vm2, %v403_v21, -inf }
 0x274   :  { %411 = vmax.xlane.f32.xlu1 %v410_v23 }
 0x285   :  { %435 = vrot.lane.b32.xlu1 %v13297_v12, %s13071_s5 }
 0x289   :  { %511 = vrot.lane.b32.xlu1 %v13301_v13, %s13071_s5 }
 0x28d   :  { %589 = vrot.lane.b32.xlu1 %v13297_v12, %s13072_s28 }
 0x2fd   :  { %v409_v24 = vpop.xlane.xlu1 %408 }
 0x2fe   :  { %v413_v25 = vsub.f32 %v325_v18, %v409_v24 }
 0x300   :  { %v415_v26 = vmul.f32 1.442695, %v413_v25 }
 0x301   :  { %v412_v27 = vpop.xlane.xlu1 %411 }
 0x302   :  { %12776 = vpow2.f32 %v415_v26  ;;  %v414_v28 = vsub.f32 %v403_v21, %v412_v27 }
 0x304   :  { %v417_v29 = vmul.f32 1.442695, %v414_v28 }
 0x305   :  { %v436_v30 = vpop.permute.xlu1 %435 }
 0x306   :  { %12778 = vpow2.f32 %v417_v29  ;;  %11763 = vmatpush3.msra.mxu1 %v436_v30 }
 0x307   :  { %11767 = vmatprep.subr.mxu1 %v13068_v8 }
 0x309   :  { %v512_v31 = vpop.permute.xlu1 %511 }
 0x30c   :  { %v12777_v32 = vpop.eup %12776 }
 0x30d   :  { %v590_v33 = vpop.permute.xlu1 %589  ;;  %v419_v34 = vsel %vm253_vm2, %v12777_v32, 0.0 }
 0x30e   :  { %420 = vadd.xlane.f32.xlu0 %v419_v34  ;;  %11773 = vmatpush3.xpose.msk.msra.mxu0 %vm253_vm2, %v590_v33 }
 0x30f   :  { %11782 = vmatprep.subr.mxu0 %v13068_v8 }
 0x310   :  { %v12779_v35 = vpop.eup %12778 }
 0x311   :  { %v422_v36 = vsel %vm253_vm2, %v12779_v35, 0.0 }
 0x312   :  { %423 = vadd.xlane.f32.xlu1 %v422_v36 }
 0x323   :  { %667 = vrot.lane.b32.xlu1 %v13301_v13, %s13072_s28 }
 0x324   :  { %587 = vrot.lane.b32.xlu0 %v13308_v15, %s13073_s1 }
 0x327   :  { %665 = vrot.lane.b32.xlu1 %v13316_v17, %s13073_s1 }
 0x39b   :  { %v421_v37 = vpop.xlane.xlu0 %420 }
 0x39c   :  { %12780 = vrcp.f32 %v421_v37 }
 0x39f   :  { %v588_v38 = vpop.permute.xlu0 %587  ;;  %v424_v39 = vpop.xlane.xlu1 %423 }
 0x3a0   :  { %12782 = vrcp.f32 %v424_v39  ;;  %11775 = vmatmul.mubr.msk.f32.vlgmr.msra.gmra.mrb[2].mxu0 %vm253_vm2, %v588_v38 }
 0x3a1   :  { %11784 = vmatprep.mubr.msk.f32.mxu0 %vm13069_vm1, %v13068_v8 }
 0x3a3   :  { %v668_v50 = vpop.permute.xlu1 %667 }
 0x3a6   :  { %v12781_v40 = vpop.eup %12780 }
 0x3a7   :  { %v427_v41 = vmul.f32 %v12781_v40, %v421_v37  ;;  %v666_v51 = vpop.permute.xlu1 %665 }
 0x3a9   :  { %v429_v42 = vsub.f32 2.0, %v427_v41 }
 0x3aa   :  { %v12783_v43 = vpop.eup %12782 }
 0x3ab   :  { %v431_v44 = vmul.f32 %v12781_v40, %v429_v42  ;;  %v428_v45 = vmul.f32 %v12783_v43, %v424_v39 }
 0x3ad   :  { %v433_v46 = vmul.f32 %v12777_v32, %v431_v44  ;;  %v430_v47 = vsub.f32 2.0, %v428_v45 }
 0x3af   :  { %v432_v48 = vmul.f32 %v12783_v43, %v430_v47  ;;  %11765 = vmatmul.mubr.msk.f32.vlgmr.msra.gmra.mrb[4].mxu1 %vm253_vm2, %v433_v46 }
 0x3b0   :  { %11768 = vmatpush3.msra.mxu1 %v512_v31  ;;  %11769 = vmatprep.mubr.msk.f32.mxu1 %vm13069_vm1, %v13068_v8 }
 0x3b1   :  { %v434_v49 = vmul.f32 %v12779_v35, %v432_v48  ;;  %11777 = vmatprep.subr.mxu1 %v13068_v8 }
 0x3b3   :  { %11770 = vmatmul.mubr.msk.f32.vlgmr.msra.gmra.mrb[6].mxu1 %vm253_vm2, %v434_v49 }
 0x3b4   :  { %11779 = vmatprep.mubr.msk.f32.mxu1 %vm13069_vm1, %v13068_v8 }
 0x3b7   :  { %11778 = vmatpush3.xpose.msk.msra.mxu1 %vm253_vm2, %v668_v50 }
 0x3b8   :  { %11787 = vmatprep.subr.mxu1 %v13068_v8 }
 0x3ba   :  { %11780 = vmatmul.mubr.msk.f32.vlgmr.msra.gmra.mrb[8].mxu1 %vm253_vm2, %v666_v51 }
 0x3bb   :  { %11789 = vmatprep.mubr.msk.f32.mxu1 %vm13069_vm1, %v13068_v8 }
 0x473   :  { %v661_v52 = vpop.f32.mrb[2].mxu0 }
 0x474   :  { %v11776_v53 = vpop.f32.mrb[3].mxu0  ;;  %v743_v54 = vsel %vm253_vm2, %v661_v52, -inf }
 0x475   :  { %744 = vmax.xlane.f32.xlu1 %v743_v54 }
 0x482   :  { %v13358_v55 = vpop.f32.mrb[4].mxu1 }
 0x483   :  { %v11766_v56 = vpop.f32.mrb[5].mxu1 }
 0x486   :  { %v13360_v57 = vpop.f32.mrb[6].mxu1 }
 0x487   :  { %v11771_v58 = vpop.f32.mrb[7].mxu1 }
 0x48d   :  { %v739_v59 = vpop.f32.mrb[8].mxu1 }
 0x48e   :  { %v11781_v60 = vpop.f32.mrb[9].mxu1  ;;  %v746_v61 = vsel %vm253_vm2, %v739_v59, -inf }
 0x48f   :  { %747 = vmax.xlane.f32.xlu0 %v746_v61 }
 0x4a5   :  { %847 = vrot.lane.b32.xlu0 %v13301_v13, %s13074_s2 }
 0x4a9   :  { %923 = vrot.lane.b32.xlu0 %v13308_v15, %s13075_s7 }
 0x502   :  { %v745_v62 = vpop.xlane.xlu1 %744 }
 0x503   :  { %v749_v63 = vsub.f32 %v661_v52, %v745_v62 }
 0x505   :  { %v751_v0 = vmul.f32 1.442695, %v749_v63 }
 0x507   :  { %12784 = vpow2.f32 %v751_v0 }
 0x511   :  { %v12785_v1 = vpop.eup %12784 }
 0x512   :  { %v755_v2 = vsel %vm253_vm2, %v12785_v1, 0.0 }
 0x513   :  { %756 = vadd.xlane.f32.xlu1 %v755_v2 }
 0x51c   :  { %v748_v3 = vpop.xlane.xlu0 %747 }
 0x51d   :  { %v750_v6 = vsub.f32 %v739_v59, %v748_v3 }
 0x51f   :  { %v753_v9 = vmul.f32 1.442695, %v750_v6 }
 0x520   :  { %v848_v4 = vpop.permute.xlu0 %847 }
 0x521   :  { %11788 = vmatpush3.msra.mxu1 %v848_v4  ;;  %12786 = vpow2.f32 %v753_v9 }
 0x522   :  { %11797 = vmatprep.subr.mxu1 %v13068_v8 }
 0x524   :  { %771 = vrot.lane.b32.xlu1 %v13297_v12, %s13074_s2  ;;  %v924_v24 = vpop.permute.xlu0 %923 }
 0x528   :  { %925 = vrot.lane.b32.xlu1 %v13297_v12, %s13076_s10 }
 0x52b   :  { %v12787_v10 = vpop.eup %12786 }
 0x52c   :  { %v758_v11 = vsel %vm253_vm2, %v12787_v10, 0.0 }
 0x54c   :  { %759 = vadd.xlane.f32.xlu1 %v758_v11 }
 0x55d   :  { %1003 = vrot.lane.b32.xlu1 %v13301_v13, %s13076_s10 }
 0x561   :  { %1001 = vrot.lane.b32.xlu1 %v13316_v17, %s13075_s7 }
 0x5a0   :  { %v757_v14 = vpop.xlane.xlu1 %756 }
 0x5a1   :  { %12788 = vrcp.f32 %v757_v14 }
 0x5a4   :  { %v772_v16 = vpop.permute.xlu1 %771 }
 0x5a5   :  { %11783 = vmatpush3.msra.mxu0 %v772_v16 }
 0x5a6   :  { %11792 = vmatprep.subr.mxu0 %v13068_v8 }
 0x5a8   :  { %v926_v23 = vpop.permute.xlu1 %925 }
 0x5ab   :  { %v12789_v18 = vpop.eup %12788 }
 0x5ac   :  { %v763_v19 = vmul.f32 %v12789_v18, %v757_v14 }
 0x5ae   :  { %v765_v20 = vsub.f32 2.0, %v763_v19 }
 0x5b0   :  { %v767_v21 = vmul.f32 %v12789_v18, %v765_v20 }
 0x5b2   :  { %v769_v22 = vmul.f32 %v12785_v1, %v767_v21 }
 0x5b4   :  { %11785 = vmatmul.mubr.msk.f32.vlgmr.msra.gmra.mrb[4].mxu0 %vm253_vm2, %v769_v22 }
 0x5b5   :  { %11793 = vmatpush3.xpose.msk.msra.mxu0 %vm253_vm2, %v926_v23  ;;  %11794 = vmatprep.mubr.msk.f32.mxu0 %vm13069_vm1, %v13068_v8 }
 0x5b6   :  { %11802 = vmatprep.subr.mxu0 %v13068_v8 }
 0x5b8   :  { %11795 = vmatmul.mubr.msk.f32.vlgmr.msra.gmra.mrb[6].mxu0 %vm253_vm2, %v924_v24 }
 0x5b9   :  { %11804 = vmatprep.mubr.msk.f32.mxu0 %vm13069_vm1, %v13068_v8 }
 0x5d9   :  { %v760_v25 = vpop.xlane.xlu1 %759 }
 0x5da   :  { %12790 = vrcp.f32 %v760_v25 }
 0x5dd   :  { %v1004_v30 = vpop.permute.xlu1 %1003 }
 0x5e1   :  { %v1002_v32 = vpop.permute.xlu1 %1001 }
 0x5e4   :  { %v12791_v26 = vpop.eup %12790 }
 0x5e5   :  { %v764_v27 = vmul.f32 %v12791_v26, %v760_v25 }
 0x5e7   :  { %v766_v28 = vsub.f32 2.0, %v764_v27 }
 0x5e9   :  { %v768_v29 = vmul.f32 %v12791_v26, %v766_v28 }
 0x5eb   :  { %v770_v31 = vmul.f32 %v12787_v10, %v768_v29 }
 0x5ed   :  { %11790 = vmatmul.mubr.msk.f32.vlgmr.msra.gmra.mrb[10].mxu1 %vm253_vm2, %v770_v31 }
 0x5ee   :  { %11798 = vmatpush3.xpose.msk.msra.mxu1 %vm253_vm2, %v1004_v30  ;;  %11799 = vmatprep.mubr.msk.f32.mxu1 %vm13069_vm1, %v13068_v8 }
 0x5ef   :  { %11807 = vmatprep.subr.mxu1 %v13068_v8 }
 0x5f1   :  { %11800 = vmatmul.mubr.msk.f32.vlgmr.msra.gmra.mrb[12].mxu1 %vm253_vm2, %v1002_v32 }
 0x5f2   :  { %11809 = vmatprep.mubr.msk.f32.mxu1 %vm13069_vm1, %v13068_v8 }
 0x687   :  { %v13395_v33 = vpop.f32.mrb[4].mxu0 }
 0x688   :  { %v11786_v34 = vpop.f32.mrb[5].mxu0 }
 0x68b   :  { %v997_v35 = vpop.f32.mrb[6].mxu0 }
 0x68c   :  { %v11796_v36 = vpop.f32.mrb[7].mxu0  ;;  %v1079_v37 = vsel %vm253_vm2, %v997_v35, -inf }
 0x68d   :  { %1080 = vmax.xlane.f32.xlu0 %v1079_v37 }
 0x6c0   :  { %v13398_v38 = vpop.f32.mrb[10].mxu1 }
 0x6c1   :  { %v11791_v39 = vpop.f32.mrb[11].mxu1 }
 0x6c4   :  { %v1075_v40 = vpop.f32.mrb[12].mxu1 }
 0x6c5   :  { %v11801_v41 = vpop.f32.mrb[13].mxu1  ;;  %v1082_v42 = vsel %vm253_vm2, %v1075_v40, -inf }
 0x6c6   :  { %1083 = vmax.xlane.f32.xlu1 %v1082_v42 }
 0x6d7   :  { %1107 = vrot.lane.b32.xlu1 %v13297_v12, %s13077_s11 }
 0x6db   :  { %1261 = vrot.lane.b32.xlu1 %v13297_v12, %s14624_s15 }
 0x6df   :  { %1339 = vrot.lane.b32.xlu1 %v13301_v13, %s14624_s15 }
 0x6e3   :  { %1337 = vrot.lane.b32.xlu1 %v13316_v17, %s14622_s16 }
 0x71a   :  { %v1081_v43 = vpop.xlane.xlu0 %1080 }
 0x71b   :  { %v1085_v44 = vsub.f32 %v997_v35, %v1081_v43 }
 0x71d   :  { %v1087_v45 = vmul.f32 1.442695, %v1085_v44 }
 0x71f   :  { %12792 = vpow2.f32 %v1087_v45 }
 0x729   :  { %v12793_v46 = vpop.eup %12792 }
 0x72a   :  { %v1091_v47 = vsel %vm253_vm2, %v12793_v46, 0.0 }
 0x72b   :  { %1092 = vadd.xlane.f32.xlu0 %v1091_v47  ;;  %v1628_v47 = vld [vmem:[%s13114_s21 + $0x8] sm:$0xff] }
 0x753   :  { %v1084_v48 = vpop.xlane.xlu1 %1083 }
 0x754   :  { %v1086_v49 = vsub.f32 %v1075_v40, %v1084_v48  ;;  %v1629_v48 = vld [vmem:[%s13114_s21 + $0x10] sm:$0xff] }
 0x756   :  { %v1089_v50 = vmul.f32 1.442695, %v1086_v49 }
 0x757   :  { %v1108_v51 = vpop.permute.xlu1 %1107 }
 0x758   :  { %12794 = vpow2.f32 %v1089_v50  ;;  %11803 = vmatpush3.msra.mxu0 %v1108_v51  ;;  %v1630_v50 = vld [vmem:[%s13114_s21 + $0x18] sm:$0xff] }
 0x759   :  { %11812 = vmatprep.subr.mxu0 %v13068_v8  ;;  %v12518_v51 = vpack.c.bf16 %v1630_v50, %v1629_v48  ;;  %v11120_v48 = vld [vmem:[%s13129_s3] ss:$0 sm:$0xff] }
 0x75b   :  { %v1262_v61 = vpop.permute.xlu1 %1261 }
 0x75f   :  { %v1340_v4 = vpop.permute.xlu1 %1339 }
 0x762   :  { %v12795_v52 = vpop.eup %12794 }
 0x763   :  { %v1094_v53 = vsel %vm253_vm2, %v12795_v52, 0.0  ;;  %v1338_v9 = vpop.permute.xlu1 %1337 }
 0x764   :  { %1095 = vadd.xlane.f32.xlu0 %v1094_v53 }
 0x77a   :  { %1183 = vrot.lane.b32.xlu0 %v13301_v13, %s13077_s11 }
 0x77e   :  { %1259 = vrot.lane.b32.xlu0 %v13308_v15, %s14622_s16 }
 0x7b8   :  { %v1093_v17 = vpop.xlane.xlu0 %1092 }
 0x7b9   :  { %12796 = vrcp.f32 %v1093_v17 }
 0x7c3   :  { %v12797_v54 = vpop.eup %12796 }
 0x7c4   :  { %v1099_v56 = vmul.f32 %v12797_v54, %v1093_v17 }
 0x7c6   :  { %v1101_v58 = vsub.f32 2.0, %v1099_v56 }
 0x7c8   :  { %v1103_v59 = vmul.f32 %v12797_v54, %v1101_v58 }
 0x7ca   :  { %v1105_v60 = vmul.f32 %v12793_v46, %v1103_v59  ;;  %v1627_v46 = vld [vmem:[%s13114_s21] sm:$0xff] }
 0x7cb   :  { %v12514_v49 = vpack.c.bf16 %v1628_v47, %v1627_v46  ;;  %v11119_v46 = vld [vmem:[%s13124_s29] ss:$0 sm:$0xff] }
 0x7cc   :  { %11805 = vmatmul.mubr.msk.f32.vlgmr.msra.gmra.mrb[8].mxu0 %vm253_vm2, %v1105_v60 }
 0x7cd   :  { %11813 = vmatpush3.xpose.msk.msra.mxu0 %vm253_vm2, %v1262_v61  ;;  %11814 = vmatprep.mubr.msk.f32.mxu0 %vm13069_vm1, %v13068_v8 }
 0x7ce   :  { %11822 = vmatprep.subr.mxu0 %v13068_v8 }
 0x7f1   :  { %v1096_v62 = vpop.xlane.xlu0 %1095 }
 0x7f2   :  { %12798 = vrcp.f32 %v1096_v62 }
 0x7f5   :  { %v1184_v15 = vpop.permute.xlu0 %1183 }
 0x7f6   :  { %11808 = vmatpush3.msra.mxu1 %v1184_v15 }
 0x7f7   :  { %11817 = vmatprep.subr.mxu1 %v13068_v8 }
 0x7f9   :  { %v1260_v63 = vpop.permute.xlu0 %1259 }
 0x7fa   :  { %11815 = vmatmul.mubr.msk.f32.vlgmr.msra.gmra.mrb[10].mxu0 %vm253_vm2, %v1260_v63 }
 0x7fb   :  { %11824 = vmatprep.mubr.msk.f32.mxu0 %vm13069_vm1, %v13068_v8 }
 0x7fc   :  { %v12799_v0 = vpop.eup %12798 }
 0x7fd   :  { %v1100_v1 = vmul.f32 %v12799_v0, %v1096_v62 }
 0x7ff   :  { %v1102_v2 = vsub.f32 2.0, %v1100_v1 }
 0x801   :  { %v1104_v3 = vmul.f32 %v12799_v0, %v1102_v2 }
 0x803   :  { %v1106_v6 = vmul.f32 %v12795_v52, %v1104_v3 }
 0x805   :  { %11810 = vmatmul.mubr.msk.f32.vlgmr.msra.gmra.mrb[14].mxu1 %vm253_vm2, %v1106_v6 }
 0x806   :  { %11818 = vmatpush3.xpose.msk.msra.mxu1 %vm253_vm2, %v1340_v4  ;;  %11819 = vmatprep.mubr.msk.f32.mxu1 %vm13069_vm1, %v13068_v8 }
 0x807   :  { %11827 = vmatprep.subr.mxu1 %v13068_v8 }
 0x809   :  { %11820 = vmatmul.mubr.msk.f32.vlgmr.msra.gmra.mrb[16].mxu1 %vm253_vm2, %v1338_v9 }
 0x80a   :  { %11829 = vmatprep.mubr.msk.f32.mxu1 %vm13069_vm1, %v13068_v8 }
 0x89f   :  { %v1179_v10 = vpop.f32.mrb[8].mxu0 }
 0x8a0   :  { %v11806_v11 = vpop.f32.mrb[9].mxu0 }
 0x8cd   :  { %v1333_v14 = vpop.f32.mrb[10].mxu0 }
 0x8ce   :  { %v11816_v16 = vpop.f32.mrb[11].mxu0  ;;  %v1415_v18 = vsel %vm253_vm2, %v1333_v14, -inf }
 0x8cf   :  { %1416 = vmax.xlane.f32.xlu0 %v1415_v18 }
 0x8d8   :  { %v1255_v19 = vpop.f32.mrb[14].mxu1 }
 0x8d9   :  { %v11811_v20 = vpop.f32.mrb[15].mxu1 }
 0x8dc   :  { %v1411_v21 = vpop.f32.mrb[16].mxu1 }
 0x8dd   :  { %v11821_v22 = vpop.f32.mrb[17].mxu1  ;;  %v1418_v23 = vsel %vm253_vm2, %v1411_v21, -inf }
 0x8de   :  { %1419 = vmax.xlane.f32.xlu1 %v1418_v23 }
 0x8ef   :  { %1443 = vrot.lane.b32.xlu1 %v13297_v12, %s14620_s18 }
 0x8f3   :  { %1597 = vrot.lane.b32.xlu1 %v13395_v33, %s14618_s22 }
 0x8f7   :  { %1599 = vrot.lane.b32.xlu1 %v13398_v38, %s14618_s22 }
 0x8fb   :  { %1607 = vrot.lane.b32.xlu1 %v1255_v19, %s14616_s23 }
 0x95c   :  { %v1417_v24 = vpop.xlane.xlu0 %1416 }
 0x95d   :  { %v1421_v25 = vsub.f32 %v1333_v14, %v1417_v24 }
 0x95f   :  { %v1423_v26 = vmul.f32 1.442695, %v1421_v25 }
 0x961   :  { %12800 = vpow2.f32 %v1423_v26  ;;  %v1766_v26 = vld [vmem:[%s13134_s8] sm:$0xff] }
 0x96b   :  { %v12801_v27 = vpop.eup %12800  ;;  %v1420_v28 = vpop.xlane.xlu1 %1419 }
 0x96c   :  { %v1422_v29 = vsub.f32 %v1411_v21, %v1420_v28  ;;  %v1427_v30 = vsel %vm253_vm2, %v12801_v27, 0.0  ;;  %v1768_v28 = vld [vmem:[%s13134_s8 + $0x10] sm:$0xff] }
 0x96d   :  { %1428 = vadd.xlane.f32.xlu0 %v1427_v30  ;;  %v1769_v30 = vld [vmem:[%s13134_s8 + $0x18] sm:$0xff] }
 0x96e   :  { %v1425_v12 = vmul.f32 1.442695, %v1422_v29 }
 0x96f   :  { %v1444_v31 = vpop.permute.xlu1 %1443 }
 0x970   :  { %12802 = vpow2.f32 %v1425_v12  ;;  %11823 = vmatpush3.msra.mxu0 %v1444_v31  ;;  %v12526_v12 = vpack.c.bf16 %v1769_v30, %v1768_v28  ;;  %v1860_v31 = vld [vmem:[%s13144_s19] sm:$0xff] }
 0x971   :  { %12515 = vmatprep.subr.bf16.mxu0 %v12514_v49 }
 0x973   :  { %v1598_v56 = vpop.permute.xlu1 %1597 }
 0x974   :  { %v1619_v59 = vsel %vm253_vm2, %v13358_v55, %v1598_v56  ;;  %v11116_v55 = vld [vmem:[%s13119_s25] ss:$0 sm:$0xff]  ;;  %v1867_v56 = vld [vmem:[%s13144_s19 + $0x38] sm:$0xff] }
 0x977   :  { %v1600_v15 = vpop.permute.xlu1 %1599 }
 0x978   :  { %v1620_v0 = vsel %vm253_vm2, %v13360_v57, %v1600_v15 }
 0x97a   :  { %v12803_v32 = vpop.eup %12802 }
 0x97b   :  { %v1430_v33 = vsel %vm253_vm2, %v12803_v32, 0.0  ;;  %v1608_v63 = vpop.permute.xlu1 %1607 }
 0x97c   :  { %1431 = vadd.xlane.f32.xlu0 %v1430_v33  ;;  %v1623_v1 = vsel %vm1621_vm4, %v1620_v0, %v1608_v63  ;;  %v1862_v33 = vld [vmem:[%s13144_s19 + $0x10] sm:$0xff] }
 0x992   :  { %1519 = vrot.lane.b32.xlu0 %v13301_v13, %s14620_s18 }
 0x996   :  { %1605 = vrot.lane.b32.xlu0 %v1179_v10, %s14616_s23 }
 0x9fa   :  { %v1429_v34 = vpop.xlane.xlu0 %1428 }
 0x9fb   :  { %12804 = vrcp.f32 %v1429_v34 }
 0xa05   :  { %v12805_v35 = vpop.eup %12804 }
 0xa06   :  { %v1435_v36 = vmul.f32 %v12805_v35, %v1429_v34 }
 0xa08   :  { %v1437_v37 = vsub.f32 2.0, %v1435_v36 }
 0xa09   :  { %v1432_v38 = vpop.xlane.xlu0 %1431 }
 0xa0a   :  { %v1439_v39 = vmul.f32 %v12805_v35, %v1437_v37  ;;  %12806 = vrcp.f32 %v1432_v38  ;;  %v1863_v35 = vld [vmem:[%s13144_s19 + $0x18] sm:$0xff]  ;;  %v1864_v37 = vld [vmem:[%s13144_s19 + $0x20] sm:$0xff] }
 0xa0b   :  { %v12534_v36 = vpack.c.bf16 %v1863_v35, %v1862_v33  ;;  %v11127_v35 = vld [vmem:[%s13154_s30] ss:$0 sm:$0xff] }
 0xa0c   :  { %v1441_v40 = vmul.f32 %v12801_v27, %v1439_v39  ;;  %v1767_v27 = vld [vmem:[%s13134_s8 + $0x8] sm:$0xff] }
 0xa0d   :  { %v1520_v41 = vpop.permute.xlu0 %1519  ;;  %v12522_v29 = vpack.c.bf16 %v1767_v27, %v1766_v26  ;;  %v11132_v27 = vld [vmem:[%s13104_s13 + $0x38] sm:$0xff] }
 0xa0e   :  { %11825 = vmatmul.mubr.msk.f32.vlgmr.msra.gmra.mrb[12].mxu0 %vm253_vm2, %v1441_v40  ;;  %11828 = vmatpush3.msra.mxu1 %v1520_v41 }
 0xa0f   :  { %12517 = vmatpush3.bf16.msra.mxu0 %v12514_v49  ;;  %12523 = vmatprep.subr.bf16.mxu1 %v12522_v29 }
 0xa10   :  { %12519 = vmatprep.subr.bf16.mxu0 %v12518_v51 }
 0xa11   :  { %v1606_v58 = vpop.permute.xlu0 %1605 }
 0xa12   :  { %v1622_v60 = vsel %vm1621_vm4, %v1619_v59, %v1606_v58  ;;  %v11121_v59 = vld [vmem:[%s13139_s14] ss:$0 sm:$0xff] }
 0xa13   :  { %12521 = vmatpush3.bf16.msra.mxu0 %v12518_v51 }
 0xa14   :  { %v12807_v13 = vpop.eup %12806 }
 0xa15   :  { %v1436_v42 = vmul.f32 %v12807_v13, %v1432_v38  ;;  %v1865_v38 = vld [vmem:[%s13144_s19 + $0x28] sm:$0xff] }
 0xa16   :  { %v12538_v39 = vpack.c.bf16 %v1865_v38, %v1864_v37 }
 0xa17   :  { %v1438_v43 = vsub.f32 2.0, %v1436_v42 }
 0xa19   :  { %v1440_v44 = vmul.f32 %v12807_v13, %v1438_v43 }
 0xa1b   :  { %v1442_v45 = vmul.f32 %v12803_v32, %v1440_v44  ;;  %v1861_v32 = vld [vmem:[%s13144_s19 + $0x8] sm:$0xff] }
 0xa1c   :  { %v12530_v34 = vpack.c.bf16 %v1861_v32, %v1860_v31 }
 0xa1d   :  { %11830 = vmatmul.mubr.msk.f32.vlgmr.msra.gmra.mrb[18].mxu1 %vm253_vm2, %v1442_v45 }
 0xa1e   :  { %12525 = vmatpush3.bf16.msra.mxu1 %v12522_v29  ;;  %12531 = vmatprep.subr.bf16.mxu0 %v12530_v34 }
 0xa1f   :  { %12527 = vmatprep.subr.bf16.mxu1 %v12526_v12 }
 0xa22   :  { %12529 = vmatpush3.bf16.msra.mxu1 %v12526_v12 }
 0xae1   :  { %v1515_v52 = vpop.f32.mrb[12].mxu0 }
 0xae2   :  { %1613 = vrot.lane.b32.xlu0 %v1515_v52, %s14614_s26  ;;  %v11826_v53 = vpop.f32.mrb[13].mxu0 }
 0xaf0   :  { %v1591_v17 = vpop.f32.mrb[18].mxu1 }
 0xaf1   :  { %1615 = vrot.lane.b32.xlu1 %v1591_v17, %s14614_s26  ;;  %v11831_v54 = vpop.f32.mrb[19].mxu1 }
 0xaf2   :  { %v1866_v54 = vld [vmem:[%s13144_s19 + $0x30] sm:$0xff] }
 0xaf3   :  { %v12542_v58 = vpack.c.bf16 %v1867_v56, %v1866_v54 }
 0xb54   :  { %v1614_v61 = vpop.permute.xlu0 %1613 }
 0xb55   :  { %v1625_v62 = vsel %vm1624_vm3, %v1622_v60, %v1614_v61 }
 0xb56   :  { %11840 = vmatprep.mubr.msk.f32.mxu0 %vm166_vm0, %v1625_v62 }
 0xb63   :  { %v1616_v2 = vpop.permute.xlu1 %1615 }
 0xb64   :  { %v1626_v3 = vsel %vm1624_vm3, %v1623_v1, %v1616_v2  ;;  %v11124_v1 = vld [vmem:[%s13149_s24] ss:$0 sm:$0xff] }
 0xb65   :  { %11841 = vmatmul.mubr.msk.f32.vlgmr.msra.gmra.mrb[14].mxu0 %vm166_vm0, %v1626_v3 }
 0xb66   :  { %12533 = vmatpush3.bf16.msra.mxu0 %v12530_v34 }
 0xb67   :  { %12535 = vmatprep.subr.bf16.mxu0 %v12534_v36 }
 0xb6a   :  { %12537 = vmatpush3.bf16.msra.mxu0 %v12534_v36 }
 0xb6b   :  { %12539 = vmatprep.subr.bf16.mxu0 %v12538_v39 }
 0xb6e   :  { %12541 = vmatpush3.bf16.msra.mxu0 %v12538_v39  ;;  %v11128_v39 = vld [vmem:[%s13159_s6] ss:$0 sm:$0xff] }
 0xb6f   :  { %12543 = vmatprep.subr.bf16.mxu0 %v12542_v58 }
 0xb72   :  { %12545 = vmatpush3.bf16.msra.mxu0 %v12542_v58 }
 0xb73   :  { %11894 = vmatprep.subr.mxu0 %v13068_v8 }
 0xc38   :  { %v11842_v4 = vpop.f32.mrb[14].mxu0 }
 0xc39   :  { %v1716_v6 = vadd.f32 %v11842_v4, %v11116_v55  ;;  %v1710_v9 = vpop.f32.mrb[15].mxu0 }
 0xc3a   :  { %v1711_v10 = vadd.f32 %v11116_v55, %v1710_v9 }
 0xc3b   :  { %v1722_v11 = vadd.f32 %v1716_v6, %v13286_v7 }
 0xc3c   :  { %v1721_v14 = vadd.f32 %v1711_v10, %v13281_v5 }
 0xc3d   :  { %v1726_v16 = vsel %vm166_vm0, %v1722_v11, 0.0 }
 0xc3e   :  { %1727 = vadd.xlane.f32.xlu1 %v1726_v16  ;;  %v1723_v57 = vsel %vm166_vm0, %v1721_v14, 0.0 }
 0xc3f   :  { %1724 = vadd.xlane.f32.xlu0 %v1723_v57 }
 0xccb   :  { %v1728_v18 = vpop.xlane.xlu1 %1727 }
 0xccc   :  { %v1731_v19 = vmul.f32 0.03125, %v1728_v18  ;;  %v1725_v20 = vpop.xlane.xlu0 %1724 }
 0xccd   :  { %v1730_v21 = vmul.f32 0.03125, %v1725_v20 }
 0xcce   :  { %v1733_v22 = vsub.f32 %v1722_v11, %v1731_v19 }
 0xccf   :  { %v1732_v23 = vsub.f32 %v1721_v14, %v1730_v21 }
 0xcd0   :  { %v1735_v7 = vmul.f32 %v1733_v22, %v1733_v22 }
 0xcd1   :  { %v1734_v24 = vmul.f32 %v1732_v23, %v1732_v23 }
 0xcd2   :  { %v1739_v25 = vsel %vm166_vm0, %v1735_v7, 0.0  ;;  %v11130_v7 = vld [vmem:[%s13104_s13 + $0x28] sm:$0xff] }
 0xcd3   :  { %v1736_v5 = vsel %vm166_vm0, %v1734_v24, 0.0 }
 0xcd4   :  { %1737 = vadd.xlane.f32.xlu0 %v1736_v5  ;;  %v11129_v5 = vld [vmem:[%s13104_s13 + $0x20] sm:$0xff] }
 0xcd5   :  { %v12546_v26 = vpack.c.bf16 %v11130_v7, %v11129_v5 }
 0xcd7   :  { %12547 = vmatprep.subr.bf16.mxu1 %v12546_v26 }
 0xcd8   :  { %1740 = vadd.xlane.f32.xlu0 %v1739_v25  ;;  %v11131_v25 = vld [vmem:[%s13104_s13 + $0x30] sm:$0xff]  ;;  %s14645_s13 = sld [smem:[#allocation5_spill]] }
 0xcd9   :  { %v12550_v28 = vpack.c.bf16 %v11132_v27, %v11131_v25 }
 0xd61   :  { %v1738_v40 = vpop.xlane.xlu0 %1737 }
 0xd62   :  { %v1742_v41 = vmul.f32 0.03125, %v1738_v40 }
 0xd64   :  { %v1744_v13 = vadd.f32 1e-05, %v1742_v41 }
 0xd65   :  { %v1741_v42 = vpop.xlane.xlu0 %1740 }
 0xd66   :  { %12808 = vrsqrt.f32 %v1744_v13  ;;  %v1743_v43 = vmul.f32 0.03125, %v1741_v42 }
 0xd68   :  { %v1745_v44 = vadd.f32 1e-05, %v1743_v43  ;;  %v11134_v43 = vld [vmem:[%s13109_s17 + $0x1] ss:$0 sm:$0xff]  ;;  %s14646_s17 = sld [smem:[#allocation6_spill]] }
 0xd6a   :  { %12810 = vrsqrt.f32 %v1745_v44 }
 0xd70   :  { %v12809_v45 = vpop.eup %12808 }
 0xd71   :  { %v1748_v47 = vmul.f32 %v12809_v45, %v1732_v23 }
 0xd73   :  { %v1756_v49 = vmul.f32 %v11119_v46, %v1748_v47 }
 0xd74   :  { %v12811_v50 = vpop.eup %12810 }
 0xd75   :  { %v1749_v51 = vmul.f32 %v12811_v50, %v1733_v22  ;;  %v1764_v52 = vadd.f32 %v11120_v48, %v1756_v49 }
 0xd77   :  { %v1757_v53 = vmul.f32 %v11119_v46, %v1749_v51  ;;  %11851 = vmatprep.mubr.msk.f32.mxu1 %vm166_vm0, %v1764_v52 }
 0xd79   :  { %v1765_v17 = vadd.f32 %v11120_v48, %v1757_v53 }
 0xd7b   :  { %11852 = vmatmul.mubr.msk.f32.vlgmr.msra.gmra.mrb[20].mxu1 %vm166_vm0, %v1765_v17 }
 0xd7c   :  { %12549 = vmatpush3.bf16.msra.mxu1 %v12546_v26 }
 0xd7d   :  { %12551 = vmatprep.subr.bf16.mxu1 %v12550_v28 }
 0xd80   :  { %12553 = vmatpush3.bf16.msra.mxu1 %v12550_v28 }
 0xd81   :  { %11884 = vmatprep.subr.mxu1 %v13068_v8 }
 0xe4e   :  { %v11853_v60 = vpop.f32.mrb[20].mxu1 }
 0xe4f   :  { %v1855_v61 = vadd.f32 %v11853_v60, %v11121_v59  ;;  %v1849_v62 = vpop.f32.mrb[21].mxu1 }
 0xe50   :  { %v1850_v15 = vadd.f32 %v11121_v59, %v1849_v62 }
 0xe51   :  { %v1859_v0 = vmax.f32 %v1855_v61, 0.0 }
 0xe52   :  { %v1858_v63 = vmax.f32 %v1850_v15, 0.0 }
 0xe54   :  { %11870 = vmatprep.mubr.msk.f32.mxu0 %vm1875_vm5, %v1858_v63 }
 0xe55   :  { %11871 = vmatmul.mubr.msk.f32.vlgmr.msra.gmra.mrb[16].mxu0 %vm1875_vm5, %v1859_v0 }
 0xe56   :  { %11896 = vmatprep.mubr.msk.f32.mxu0 %vm13069_vm1, %v13068_v8 }
 0xf28   :  { %v11872_v2 = vpop.f32.mrb[16].mxu0 }
 0xf29   :  { %v1954_v3 = vadd.f32 %v11872_v2, %v11124_v1  ;;  %v1948_v55 = vpop.f32.mrb[17].mxu0 }
 0xf2a   :  { %v1949_v4 = vadd.f32 %v11124_v1, %v1948_v55 }
 0xf2b   :  { %v1960_v6 = vadd.f32 %v1954_v3, %v1765_v17 }
 0xf2c   :  { %v1959_v9 = vadd.f32 %v1949_v4, %v1764_v52 }
 0xf2d   :  { %v1964_v10 = vsel %vm166_vm0, %v1960_v6, 0.0 }
 0xf2e   :  { %1965 = vadd.xlane.f32.xlu0 %v1964_v10  ;;  %v1961_v11 = vsel %vm166_vm0, %v1959_v9, 0.0 }
 0xf2f   :  { %1962 = vadd.xlane.f32.xlu1 %v1961_v11 }
 0xfbb   :  { %v1966_v14 = vpop.xlane.xlu0 %1965 }
 0xfbc   :  { %v1968_v16 = vmul.f32 0.03125, %v1966_v14  ;;  %v1963_v57 = vpop.xlane.xlu1 %1962 }
 0xfbd   :  { %v1967_v18 = vmul.f32 0.03125, %v1963_v57 }
 0xfbe   :  { %v1970_v19 = vsub.f32 %v1960_v6, %v1968_v16 }
 0xfbf   :  { %v1969_v20 = vsub.f32 %v1959_v9, %v1967_v18 }
 0xfc0   :  { %v1972_v21 = vmul.f32 %v1970_v19, %v1970_v19 }
 0xfc1   :  { %v1971_v22 = vmul.f32 %v1969_v20, %v1969_v20 }
 0xfc2   :  { %v1976_v23 = vsel %vm166_vm0, %v1972_v21, 0.0 }
 0xfc3   :  { %1977 = vadd.xlane.f32.xlu0 %v1976_v23  ;;  %v1973_v24 = vsel %vm166_vm0, %v1971_v22, 0.0 }
 0xfc4   :  { %1974 = vadd.xlane.f32.xlu1 %v1973_v24 }
0x1050   :  { %v1978_v29 = vpop.xlane.xlu0 %1977 }
0x1051   :  { %v1980_v30 = vmul.f32 0.03125, %v1978_v29  ;;  %v1975_v12 = vpop.xlane.xlu1 %1974 }
0x1052   :  { %v1979_v31 = vmul.f32 0.03125, %v1975_v12 }
0x1053   :  { %v1982_v32 = vadd.f32 1e-05, %v1980_v30 }
0x1054   :  { %v1981_v33 = vadd.f32 1e-05, %v1979_v31 }
0x1055   :  { %12812 = vrsqrt.f32 %v1982_v32 }
0x1056   :  { %12814 = vrsqrt.f32 %v1981_v33 }
0x105f   :  { %v12813_v34 = vpop.eup %12812 }
0x1060   :  { %v12815_v36 = vpop.eup %12814  ;;  %v1986_v37 = vmul.f32 %v12813_v34, %v1970_v19 }
0x1061   :  { %v1985_v38 = vmul.f32 %v12815_v36, %v1969_v20 }
0x1062   :  { %v1994_v40 = vmul.f32 %v11127_v35, %v1986_v37 }
0x1063   :  { %v1993_v41 = vmul.f32 %v11127_v35, %v1985_v38 }
0x1064   :  { %v13508_v42 = vadd.f32 %v11128_v39, %v1994_v40 }
0x1065   :  { %v13506_v13 = vadd.f32 %v11128_v39, %v1993_v41 }
0x1067   :  { %11881 = vmatprep.mubr.msk.f32.mxu1 %vm166_vm0, %v13506_v13 }
0x1068   :  { %11882 = vmatmul.mubr.msk.f32.vlgmr.msra.gmra.mrb[22].mxu1 %vm166_vm0, %v13508_v42 }
0x1069   :  { %11886 = vmatprep.mubr.msk.f32.mxu1 %vm13069_vm1, %v13068_v8 }
0x113b   :  { %v11883_v44 = vpop.f32.mrb[22].mxu1 }
0x113c   :  { %v13517_v45 = vadd.f32 %v11883_v44, %v11134_v43  ;;  %v2088_v46 = vpop.f32.mrb[23].mxu1 }
0x113d   :  { %v13519_v47 = vadd.f32 %v11134_v43, %v2088_v46 }
0x113e   :  { %2178 = vrot.lane.b32.xlu0 %v13517_v45, %s13070_s0  ;;  %v13536_v51 = vmul.f32 0.35355338, %v13517_v45 }
0x113f   :  { %2100 = vrot.lane.b32.xlu1 %v13519_v47, %s13070_s0  ;;  %v13527_v49 = vmul.f32 0.35355338, %v13519_v47 }
0x11b0   :  { %v2179_v50 = vpop.permute.xlu0 %2178 }
0x11b1   :  { %v2101_v48 = vpop.permute.xlu1 %2100 }
0x11b2   :  { %11885 = vmatpush3.xpose.msk.msra.mxu1 %vm253_vm2, %v2101_v48 }
0x11b3   :  { %11889 = vmatprep.subr.mxu1 %v13068_v8 }
0x11b5   :  { %11887 = vmatmul.mubr.msk.f32.vlgmr.msra.gmra.mrb[24].mxu1 %vm253_vm2, %v13527_v49 }
0x11b6   :  { %11890 = vmatpush3.xpose.msk.msra.mxu1 %vm253_vm2, %v2179_v50  ;;  %11891 = vmatprep.mubr.msk.f32.mxu1 %vm13069_vm1, %v13068_v8 }
0x11b7   :  { %11899 = vmatprep.subr.mxu1 %v13068_v8 }
0x11b9   :  { %11892 = vmatmul.mubr.msk.f32.vlgmr.msra.gmra.mrb[26].mxu1 %vm253_vm2, %v13536_v51 }
0x11ba   :  { %11901 = vmatprep.mubr.msk.f32.mxu1 %vm13069_vm1, %v13068_v8 }
0x1288   :  { %v2173_v52 = vpop.f32.mrb[24].mxu1 }
0x1289   :  { %v11888_v53 = vpop.f32.mrb[25].mxu1  ;;  %v2255_v17 = vsel %vm253_vm2, %v2173_v52, -inf }
0x128a   :  { %2256 = vmax.xlane.f32.xlu1 %v2255_v17 }
0x128c   :  { %v2251_v54 = vpop.f32.mrb[26].mxu1 }
0x128d   :  { %v11893_v56 = vpop.f32.mrb[27].mxu1  ;;  %v2258_v58 = vsel %vm253_vm2, %v2251_v54, -inf }
0x128e   :  { %2259 = vmax.xlane.f32.xlu0 %v2258_v58 }
0x129b   :  { %2283 = vrot.lane.b32.xlu1 %v13519_v47, %s13071_s5 }
0x1317   :  { %v2257_v59 = vpop.xlane.xlu1 %2256 }
0x1318   :  { %v2261_v60 = vsub.f32 %v2173_v52, %v2257_v59 }
0x131a   :  { %v2263_v61 = vmul.f32 1.442695, %v2261_v60 }
0x131b   :  { %v2284_v62 = vpop.permute.xlu1 %2283  ;;  %v2260_v15 = vpop.xlane.xlu0 %2259 }
0x131c   :  { %12816 = vpow2.f32 %v2263_v61  ;;  %v2262_v63 = vsub.f32 %v2251_v54, %v2260_v15  ;;  %11895 = vmatpush3.msra.mxu0 %v2284_v62 }
0x131d   :  { %11904 = vmatprep.subr.mxu0 %v13068_v8 }
0x131e   :  { %v2265_v0 = vmul.f32 1.442695, %v2262_v63 }
0x1320   :  { %12818 = vpow2.f32 %v2265_v0 }
0x1326   :  { %v12817_v1 = vpop.eup %12816 }
0x1327   :  { %v2267_v2 = vsel %vm253_vm2, %v12817_v1, 0.0 }
0x1328   :  { %2268 = vadd.xlane.f32.xlu1 %v2267_v2 }
0x132a   :  { %v12819_v3 = vpop.eup %12818 }
0x132b   :  { %v2270_v55 = vsel %vm253_vm2, %v12819_v3, 0.0 }
0x132c   :  { %2271 = vadd.xlane.f32.xlu0 %v2270_v55 }
0x1339   :  { %2437 = vrot.lane.b32.xlu1 %v13519_v47, %s13072_s28 }
0x133d   :  { %2515 = vrot.lane.b32.xlu1 %v13517_v45, %s13072_s28 }
0x1341   :  { %2513 = vrot.lane.b32.xlu1 %v13536_v51, %s13073_s1 }
0x1342   :  { %2359 = vrot.lane.b32.xlu0 %v13517_v45, %s13071_s5 }
0x1346   :  { %2435 = vrot.lane.b32.xlu0 %v13527_v49, %s13073_s1 }
0x13b5   :  { %v2269_v4 = vpop.xlane.xlu1 %2268 }
0x13b6   :  { %12820 = vrcp.f32 %v2269_v4 }
0x13b9   :  { %v2272_v6 = vpop.xlane.xlu0 %2271  ;;  %v2438_v57 = vpop.permute.xlu1 %2437 }
0x13ba   :  { %12822 = vrcp.f32 %v2272_v6 }
0x13bd   :  { %v2360_v9 = vpop.permute.xlu0 %2359  ;;  %v2516_v23 = vpop.permute.xlu1 %2515 }
0x13be   :  { %11900 = vmatpush3.msra.mxu1 %v2360_v9 }
0x13bf   :  { %11909 = vmatprep.subr.mxu1 %v13068_v8 }
0x13c0   :  { %v12821_v10 = vpop.eup %12820 }
0x13c1   :  { %v2275_v11 = vmul.f32 %v12821_v10, %v2269_v4  ;;  %v2436_v5 = vpop.permute.xlu0 %2435  ;;  %v2514_v7 = vpop.permute.xlu1 %2513 }
0x13c3   :  { %v2277_v14 = vsub.f32 2.0, %v2275_v11 }
0x13c4   :  { %v12823_v16 = vpop.eup %12822 }
0x13c5   :  { %v2279_v18 = vmul.f32 %v12821_v10, %v2277_v14  ;;  %v2276_v19 = vmul.f32 %v12823_v16, %v2272_v6 }
0x13c7   :  { %v2281_v20 = vmul.f32 %v12817_v1, %v2279_v18  ;;  %v2278_v21 = vsub.f32 2.0, %v2276_v19 }
0x13c9   :  { %v2280_v22 = vmul.f32 %v12823_v16, %v2278_v21  ;;  %11897 = vmatmul.mubr.msk.f32.vlgmr.msra.gmra.mrb[18].mxu0 %vm253_vm2, %v2281_v20 }
0x13ca   :  { %11905 = vmatpush3.xpose.msk.msra.mxu0 %vm253_vm2, %v2438_v57  ;;  %11906 = vmatprep.mubr.msk.f32.mxu0 %vm13069_vm1, %v13068_v8 }
0x13cb   :  { %v2282_v24 = vmul.f32 %v12819_v3, %v2280_v22  ;;  %11914 = vmatprep.subr.mxu0 %v13068_v8 }
0x13cd   :  { %11902 = vmatmul.mubr.msk.f32.vlgmr.msra.gmra.mrb[28].mxu1 %vm253_vm2, %v2282_v24  ;;  %11907 = vmatmul.mubr.msk.f32.vlgmr.msra.gmra.mrb[20].mxu0 %vm253_vm2, %v2436_v5 }
0x13ce   :  { %11910 = vmatpush3.xpose.msk.msra.mxu1 %vm253_vm2, %v2516_v23  ;;  %11911 = vmatprep.mubr.msk.f32.mxu1 %vm13069_vm1, %v13068_v8 }
0x13cf   :  { %11919 = vmatprep.subr.mxu1 %v13068_v8  ;;  %11916 = vmatprep.mubr.msk.f32.mxu0 %vm13069_vm1, %v13068_v8 }
0x13d1   :  { %11912 = vmatmul.mubr.msk.f32.vlgmr.msra.gmra.mrb[30].mxu1 %vm253_vm2, %v2514_v7 }
0x13d2   :  { %11921 = vmatprep.mubr.msk.f32.mxu1 %vm13069_vm1, %v13068_v8 }
0x149c   :  { %v13577_v25 = vpop.f32.mrb[18].mxu0 }
0x149d   :  { %v11898_v26 = vpop.f32.mrb[19].mxu0 }
0x14a0   :  { %v13579_v27 = vpop.f32.mrb[28].mxu1  ;;  %v2509_v28 = vpop.f32.mrb[20].mxu0 }
0x14a1   :  { %v11903_v29 = vpop.f32.mrb[29].mxu1  ;;  %v11908_v30 = vpop.f32.mrb[21].mxu0  ;;  %v2591_v12 = vsel %vm253_vm2, %v2509_v28, -inf }
0x14a2   :  { %2592 = vmax.xlane.f32.xlu0 %v2591_v12 }
0x14a4   :  { %v2587_v31 = vpop.f32.mrb[30].mxu1 }
0x14a5   :  { %v11913_v32 = vpop.f32.mrb[31].mxu1  ;;  %v2594_v33 = vsel %vm253_vm2, %v2587_v31, -inf }
0x14a6   :  { %2595 = vmax.xlane.f32.xlu1 %v2594_v33 }
0x14b7   :  { %2619 = vrot.lane.b32.xlu1 %v13519_v47, %s13074_s2 }
0x14bb   :  { %2773 = vrot.lane.b32.xlu1 %v13519_v47, %s13076_s10 }
0x14bf   :  { %2851 = vrot.lane.b32.xlu1 %v13517_v45, %s13076_s10 }
0x14c3   :  { %2849 = vrot.lane.b32.xlu1 %v13536_v51, %s13075_s7 }
0x152f   :  { %v2593_v34 = vpop.xlane.xlu0 %2592 }
0x1530   :  { %v2597_v35 = vsub.f32 %v2509_v28, %v2593_v34 }
0x1532   :  { %v2599_v36 = vmul.f32 1.442695, %v2597_v35 }
0x1533   :  { %v2596_v37 = vpop.xlane.xlu1 %2595 }
0x1534   :  { %12824 = vpow2.f32 %v2599_v36  ;;  %v2598_v38 = vsub.f32 %v2587_v31, %v2596_v37 }
0x1536   :  { %v2601_v39 = vmul.f32 1.442695, %v2598_v38 }
0x1537   :  { %v2620_v40 = vpop.permute.xlu1 %2619 }
0x1538   :  { %12826 = vpow2.f32 %v2601_v39  ;;  %11915 = vmatpush3.msra.mxu0 %v2620_v40 }
0x1539   :  { %11924 = vmatprep.subr.mxu0 %v13068_v8 }
0x153b   :  { %v2774_v58 = vpop.permute.xlu1 %2773 }
0x153e   :  { %v12825_v41 = vpop.eup %12824 }
0x153f   :  { %v2603_v43 = vsel %vm253_vm2, %v12825_v41, 0.0  ;;  %v2852_v63 = vpop.permute.xlu1 %2851 }
0x1540   :  { %2604 = vadd.xlane.f32.xlu0 %v2603_v43 }
0x1542   :  { %v12827_v44 = vpop.eup %12826 }
0x1543   :  { %v2606_v46 = vsel %vm253_vm2, %v12827_v44, 0.0  ;;  %v2850_v2 = vpop.permute.xlu1 %2849 }
0x1544   :  { %2607 = vadd.xlane.f32.xlu0 %v2606_v46 }
0x155a   :  { %2695 = vrot.lane.b32.xlu0 %v13517_v45, %s13074_s2 }
0x155e   :  { %2771 = vrot.lane.b32.xlu0 %v13527_v49, %s13075_s7 }
0x15cd   :  { %v2605_v48 = vpop.xlane.xlu0 %2604 }
0x15ce   :  { %12828 = vrcp.f32 %v2605_v48 }
0x15d1   :  { %v2608_v50 = vpop.xlane.xlu0 %2607 }
0x15d2   :  { %12830 = vrcp.f32 %v2608_v50 }
0x15d5   :  { %v2696_v52 = vpop.permute.xlu0 %2695 }
0x15d6   :  { %11920 = vmatpush3.msra.mxu1 %v2696_v52 }
0x15d7   :  { %11929 = vmatprep.subr.mxu1 %v13068_v8 }
0x15d8   :  { %v12829_v53 = vpop.eup %12828 }
0x15d9   :  { %v2611_v17 = vmul.f32 %v12829_v53, %v2605_v48  ;;  %v2772_v1 = vpop.permute.xlu0 %2771 }
0x15db   :  { %v2613_v54 = vsub.f32 2.0, %v2611_v17 }
0x15dc   :  { %v12831_v56 = vpop.eup %12830 }
0x15dd   :  { %v2615_v59 = vmul.f32 %v12829_v53, %v2613_v54  ;;  %v2612_v60 = vmul.f32 %v12831_v56, %v2608_v50 }
0x15df   :  { %v2617_v61 = vmul.f32 %v12825_v41, %v2615_v59  ;;  %v2614_v62 = vsub.f32 2.0, %v2612_v60 }
0x15e1   :  { %v2616_v15 = vmul.f32 %v12831_v56, %v2614_v62  ;;  %11917 = vmatmul.mubr.msk.f32.vlgmr.msra.gmra.mrb[22].mxu0 %vm253_vm2, %v2617_v61 }
0x15e2   :  { %11925 = vmatpush3.xpose.msk.msra.mxu0 %vm253_vm2, %v2774_v58  ;;  %11926 = vmatprep.mubr.msk.f32.mxu0 %vm13069_vm1, %v13068_v8 }
0x15e3   :  { %v2618_v0 = vmul.f32 %v12827_v44, %v2616_v15  ;;  %11934 = vmatprep.subr.mxu0 %v13068_v8 }
0x15e5   :  { %11922 = vmatmul.mubr.msk.f32.vlgmr.msra.gmra.mrb[32].mxu1 %vm253_vm2, %v2618_v0  ;;  %11927 = vmatmul.mubr.msk.f32.vlgmr.msra.gmra.mrb[24].mxu0 %vm253_vm2, %v2772_v1 }
0x15e6   :  { %11930 = vmatpush3.xpose.msk.msra.mxu1 %vm253_vm2, %v2852_v63  ;;  %11931 = vmatprep.mubr.msk.f32.mxu1 %vm13069_vm1, %v13068_v8 }
0x15e7   :  { %11939 = vmatprep.subr.mxu1 %v13068_v8  ;;  %11936 = vmatprep.mubr.msk.f32.mxu0 %vm13069_vm1, %v13068_v8 }
0x15e9   :  { %11932 = vmatmul.mubr.msk.f32.vlgmr.msra.gmra.mrb[34].mxu1 %vm253_vm2, %v2850_v2 }
0x15ea   :  { %11941 = vmatprep.mubr.msk.f32.mxu1 %vm13069_vm1, %v13068_v8 }
0x16b4   :  { %v13615_v3 = vpop.f32.mrb[22].mxu0 }
0x16b5   :  { %v11918_v55 = vpop.f32.mrb[23].mxu0 }
0x16b8   :  { %v13617_v4 = vpop.f32.mrb[32].mxu1  ;;  %v2845_v6 = vpop.f32.mrb[24].mxu0 }
0x16b9   :  { %v11923_v9 = vpop.f32.mrb[33].mxu1  ;;  %v11928_v10 = vpop.f32.mrb[25].mxu0  ;;  %v2927_v11 = vsel %vm253_vm2, %v2845_v6, -inf }
0x16ba   :  { %2928 = vmax.xlane.f32.xlu0 %v2927_v11 }
0x16bc   :  { %v2923_v14 = vpop.f32.mrb[34].mxu1 }
0x16bd   :  { %v11933_v16 = vpop.f32.mrb[35].mxu1  ;;  %v2930_v57 = vsel %vm253_vm2, %v2923_v14, -inf }
0x16be   :  { %2931 = vmax.xlane.f32.xlu1 %v2930_v57 }
0x16cf   :  { %2955 = vrot.lane.b32.xlu1 %v13519_v47, %s13077_s11 }
0x16d3   :  { %3109 = vrot.lane.b32.xlu1 %v13519_v47, %s14624_s15 }
0x16d7   :  { %3187 = vrot.lane.b32.xlu1 %v13517_v45, %s14624_s15 }
0x16db   :  { %3185 = vrot.lane.b32.xlu1 %v13536_v51, %s14622_s16 }
0x1747   :  { %v2929_v18 = vpop.xlane.xlu0 %2928 }
0x1748   :  { %v2933_v19 = vsub.f32 %v2845_v6, %v2929_v18 }
0x174a   :  { %v2935_v20 = vmul.f32 1.442695, %v2933_v19 }
0x174b   :  { %v2932_v21 = vpop.xlane.xlu1 %2931 }
0x174c   :  { %12832 = vpow2.f32 %v2935_v20  ;;  %v2934_v22 = vsub.f32 %v2923_v14, %v2932_v21  ;;  %v11161_v21 = vld [vmem:[%s13114_s21 + $0x20] sm:$0xff] }
0x174e   :  { %v2937_v23 = vmul.f32 1.442695, %v2934_v22  ;;  %v11162_v22 = vld [vmem:[%s13114_s21 + $0x28] sm:$0xff] }
0x174f   :  { %v2956_v24 = vpop.permute.xlu1 %2955 }
0x1750   :  { %12834 = vpow2.f32 %v2937_v23  ;;  %11935 = vmatpush3.msra.mxu0 %v2956_v24  ;;  %v12554_v23 = vpack.c.bf16 %v11162_v22, %v11161_v21  ;;  %v11163_v24 = vld [vmem:[%s13114_s21 + $0x30] sm:$0xff] }
0x1751   :  { %11944 = vmatprep.subr.mxu0 %v13068_v8 }
0x1753   :  { %v3110_v34 = vpop.permute.xlu1 %3109 }
0x1756   :  { %v12833_v5 = vpop.eup %12832 }
0x1757   :  { %v2939_v7 = vsel %vm253_vm2, %v12833_v5, 0.0 }
0x1758   :  { %2940 = vadd.xlane.f32.xlu0 %v2939_v7 }
0x175a   :  { %v12835_v26 = vpop.eup %12834 }
0x175b   :  { %v2942_v28 = vsel %vm253_vm2, %v12835_v26, 0.0 }
0x175c   :  { %2943 = vadd.xlane.f32.xlu0 %v2942_v28 }
0x1772   :  { %3031 = vrot.lane.b32.xlu0 %v13517_v45, %s13077_s11 }
0x1776   :  { %3107 = vrot.lane.b32.xlu0 %v13527_v49, %s14622_s16  ;;  %v3188_v49 = vpop.permute.xlu1 %3187 }
0x177a   :  { %v3186_v43 = vpop.permute.xlu1 %3185 }
0x17e5   :  { %v2941_v51 = vpop.xlane.xlu0 %2940 }
0x17e6   :  { %12836 = vrcp.f32 %v2941_v51 }
0x17e9   :  { %v2944_v29 = vpop.xlane.xlu0 %2943 }
0x17ea   :  { %12838 = vrcp.f32 %v2944_v29 }
0x17ed   :  { %v3032_v30 = vpop.permute.xlu0 %3031 }
0x17ee   :  { %11940 = vmatpush3.msra.mxu1 %v3032_v30 }
0x17ef   :  { %11949 = vmatprep.subr.mxu1 %v13068_v8 }
0x17f0   :  { %v12837_v12 = vpop.eup %12836 }
0x17f1   :  { %v2947_v31 = vmul.f32 %v12837_v12, %v2941_v51  ;;  %v3108_v41 = vpop.permute.xlu0 %3107 }
0x17f3   :  { %v2949_v32 = vsub.f32 2.0, %v2947_v31 }
0x17f4   :  { %v12839_v33 = vpop.eup %12838 }
0x17f5   :  { %v2951_v35 = vmul.f32 %v12837_v12, %v2949_v32  ;;  %v2948_v36 = vmul.f32 %v12839_v33, %v2944_v29 }
0x17f7   :  { %v2953_v37 = vmul.f32 %v12833_v5, %v2951_v35  ;;  %v2950_v38 = vsub.f32 2.0, %v2948_v36  ;;  %v11164_v5 = vld [vmem:[%s13114_s21 + $0x38] sm:$0xff]  ;;  %s14647_s21 = sld [smem:[#allocation7_spill]] }
0x17f8   :  { %v12558_v7 = vpack.c.bf16 %v11164_v5, %v11163_v24  ;;  %v11171_v24 = vld [vmem:[%s13124_s29 + $0x1] ss:$0 sm:$0xff]  ;;  %s14649_s29 = sld [smem:[#allocation13_spill]] }
0x17f9   :  { %v2952_v39 = vmul.f32 %v12839_v33, %v2950_v38  ;;  %11937 = vmatmul.mubr.msk.f32.vlgmr.msra.gmra.mrb[26].mxu0 %vm253_vm2, %v2953_v37 }
0x17fa   :  { %11945 = vmatpush3.xpose.msk.msra.mxu0 %vm253_vm2, %v3110_v34  ;;  %11946 = vmatprep.mubr.msk.f32.mxu0 %vm13069_vm1, %v13068_v8 }
0x17fb   :  { %v2954_v40 = vmul.f32 %v12835_v26, %v2952_v39  ;;  %11954 = vmatprep.subr.mxu0 %v13068_v8 }
0x17fd   :  { %11942 = vmatmul.mubr.msk.f32.vlgmr.msra.gmra.mrb[36].mxu1 %vm253_vm2, %v2954_v40  ;;  %11947 = vmatmul.mubr.msk.f32.vlgmr.msra.gmra.mrb[28].mxu0 %vm253_vm2, %v3108_v41  ;;  %v11166_v40 = vld [vmem:[%s13119_s25 + $0x1] ss:$0 sm:$0xff]  ;;  %s14648_s25 = sld [smem:[#allocation8_spill]] }
0x17fe   :  { %11950 = vmatpush3.xpose.msk.msra.mxu1 %vm253_vm2, %v3188_v49  ;;  %11951 = vmatprep.mubr.msk.f32.mxu1 %vm13069_vm1, %v13068_v8 }
0x17ff   :  { %11959 = vmatprep.subr.mxu1 %v13068_v8  ;;  %11956 = vmatprep.mubr.msk.f32.mxu0 %vm13069_vm1, %v13068_v8 }
0x1801   :  { %11952 = vmatmul.mubr.msk.f32.vlgmr.msra.gmra.mrb[38].mxu1 %vm253_vm2, %v3186_v43 }
0x1802   :  { %11961 = vmatprep.mubr.msk.f32.mxu1 %vm13069_vm1, %v13068_v8 }
0x18cc   :  { %v3027_v44 = vpop.f32.mrb[26].mxu0 }
0x18cd   :  { %v11938_v46 = vpop.f32.mrb[27].mxu0 }
0x18d0   :  { %v3103_v48 = vpop.f32.mrb[36].mxu1  ;;  %v3181_v50 = vpop.f32.mrb[28].mxu0 }
0x18d1   :  { %v11943_v52 = vpop.f32.mrb[37].mxu1  ;;  %v11948_v53 = vpop.f32.mrb[29].mxu0  ;;  %v3263_v17 = vsel %vm253_vm2, %v3181_v50, -inf }
0x18d2   :  { %3264 = vmax.xlane.f32.xlu0 %v3263_v17 }
0x18d4   :  { %v3259_v54 = vpop.f32.mrb[38].mxu1 }
0x18d5   :  { %v11953_v56 = vpop.f32.mrb[39].mxu1  ;;  %v3266_v58 = vsel %vm253_vm2, %v3259_v54, -inf }
0x18d6   :  { %3267 = vmax.xlane.f32.xlu1 %v3266_v58 }
0x18e7   :  { %3291 = vrot.lane.b32.xlu1 %v13519_v47, %s14620_s18 }
0x18eb   :  { %3445 = vrot.lane.b32.xlu1 %v13615_v3, %s14618_s22 }
0x18ef   :  { %3447 = vrot.lane.b32.xlu1 %v13617_v4, %s14618_s22 }
0x18f3   :  { %3455 = vrot.lane.b32.xlu1 %v3103_v48, %s14616_s23 }
0x195f   :  { %v3265_v59 = vpop.xlane.xlu0 %3264 }
0x1960   :  { %v3269_v60 = vsub.f32 %v3181_v50, %v3265_v59 }
0x1962   :  { %v3271_v61 = vmul.f32 1.442695, %v3269_v60 }
0x1963   :  { %v3268_v62 = vpop.xlane.xlu1 %3267 }
0x1964   :  { %12840 = vpow2.f32 %v3271_v61  ;;  %v3270_v15 = vsub.f32 %v3259_v54, %v3268_v62  ;;  %v11173_v61 = vld [vmem:[%s13134_s8 + $0x20] sm:$0xff]  ;;  %v11174_v62 = vld [vmem:[%s13134_s8 + $0x28] sm:$0xff] }
0x1966   :  { %v3273_v63 = vmul.f32 1.442695, %v3270_v15  ;;  %v11175_v15 = vld [vmem:[%s13134_s8 + $0x30] sm:$0xff] }
0x1967   :  { %v3292_v0 = vpop.permute.xlu1 %3291 }
0x1968   :  { %12842 = vpow2.f32 %v3273_v63  ;;  %11955 = vmatpush3.msra.mxu0 %v3292_v0  ;;  %v12562_v63 = vpack.c.bf16 %v11174_v62, %v11173_v61  ;;  %v11176_v0 = vld [vmem:[%s13134_s8 + $0x38] sm:$0xff]  ;;  %s14651_s8 = sld [smem:[#allocation9_spill]] }
0x1969   :  { %12555 = vmatprep.subr.bf16.mxu0 %v12554_v23 }
0x196b   :  { %v3446_v30 = vpop.permute.xlu1 %3445 }
0x196c   :  { %v3467_v32 = vsel %vm253_vm2, %v13577_v25, %v3446_v30  ;;  %v3859_v30 = vld [vmem:[%s13164_s12 + $0x10] sm:$0xff] }
0x196e   :  { %v12841_v1 = vpop.eup %12840 }
0x196f   :  { %v3275_v47 = vsel %vm253_vm2, %v12841_v1, 0.0  ;;  %v3448_v12 = vpop.permute.xlu1 %3447 }
0x1970   :  { %3276 = vadd.xlane.f32.xlu0 %v3275_v47  ;;  %v3468_v37 = vsel %vm253_vm2, %v13579_v27, %v3448_v12  ;;  %v3857_v47 = vld [vmem:[%s13164_s12] sm:$0xff]  ;;  %v3860_v12 = vld [vmem:[%s13164_s12 + $0x18] sm:$0xff] }
0x1972   :  { %v12843_v2 = vpop.eup %12842 }
0x1973   :  { %v3278_v3 = vsel %vm253_vm2, %v12843_v2, 0.0  ;;  %v3456_v33 = vpop.permute.xlu1 %3455 }
0x1974   :  { %3279 = vadd.xlane.f32.xlu0 %v3278_v3  ;;  %v3470_v38 = vsel %vm1621_vm4, %v3468_v37, %v3456_v33  ;;  %v12590_v33 = vpack.c.bf16 %v3860_v12, %v3859_v30  ;;  %v11188_v37 = vld [vmem:[%s13144_s19 + $0x78] sm:$0xff] }
0x198a   :  { %3367 = vrot.lane.b32.xlu0 %v13517_v45, %s14620_s18 }
0x198e   :  { %3453 = vrot.lane.b32.xlu0 %v3027_v44, %s14616_s23 }
0x19fd   :  { %v3277_v55 = vpop.xlane.xlu0 %3276 }
0x19fe   :  { %12844 = vrcp.f32 %v3277_v55 }
0x1a01   :  { %v3280_v4 = vpop.xlane.xlu0 %3279 }
0x1a02   :  { %12846 = vrcp.f32 %v3280_v4 }
0x1a05   :  { %v3368_v6 = vpop.permute.xlu0 %3367 }
0x1a06   :  { %11960 = vmatpush3.msra.mxu1 %v3368_v6  ;;  %v11183_v6 = vld [vmem:[%s13144_s19 + $0x50] sm:$0xff] }
0x1a07   :  { %12563 = vmatprep.subr.bf16.mxu1 %v12562_v63 }
0x1a08   :  { %v12845_v9 = vpop.eup %12844 }
0x1a09   :  { %v3283_v10 = vmul.f32 %v12845_v9, %v3277_v55  ;;  %v3454_v31 = vpop.permute.xlu0 %3453  ;;  %v11181_v55 = vld [vmem:[%s13144_s19 + $0x40] sm:$0xff] }
0x1a0a   :  { %v3469_v34 = vsel %vm1621_vm4, %v3467_v32, %v3454_v31 }
0x1a0b   :  { %v3285_v11 = vsub.f32 2.0, %v3283_v10  ;;  %v11184_v10 = vld [vmem:[%s13144_s19 + $0x58] sm:$0xff] }
0x1a0c   :  { %v12847_v14 = vpop.eup %12846 }
0x1a0d   :  { %v3287_v16 = vmul.f32 %v12845_v9, %v3285_v11  ;;  %v3284_v57 = vmul.f32 %v12847_v14, %v3280_v4  ;;  %v11182_v4 = vld [vmem:[%s13144_s19 + $0x48] sm:$0xff]  ;;  %v12574_v11 = vpack.c.bf16 %v11184_v10, %v11183_v6 }
0x1a0e   :  { %v12570_v9 = vpack.c.bf16 %v11182_v4, %v11181_v55 }
0x1a0f   :  { %v3289_v18 = vmul.f32 %v12841_v1, %v3287_v16  ;;  %v3286_v45 = vsub.f32 2.0, %v3284_v57  ;;  %v12566_v1 = vpack.c.bf16 %v11176_v0, %v11175_v15  ;;  %v11186_v16 = vld [vmem:[%s13144_s19 + $0x68] sm:$0xff] }
0x1a11   :  { %v3288_v19 = vmul.f32 %v12847_v14, %v3286_v45  ;;  %11957 = vmatmul.mubr.msk.f32.vlgmr.msra.gmra.mrb[30].mxu0 %vm253_vm2, %v3289_v18  ;;  %v11185_v14 = vld [vmem:[%s13144_s19 + $0x60] sm:$0xff] }
0x1a12   :  { %12557 = vmatpush3.bf16.msra.mxu0 %v12554_v23  ;;  %v12578_v57 = vpack.c.bf16 %v11186_v16, %v11185_v14 }
0x1a13   :  { %v3290_v20 = vmul.f32 %v12843_v2, %v3288_v19  ;;  %12559 = vmatprep.subr.bf16.mxu0 %v12558_v7  ;;  %v3858_v2 = vld [vmem:[%s13164_s12 + $0x8] sm:$0xff] }
0x1a14   :  { %v12586_v3 = vpack.c.bf16 %v3858_v2, %v3857_v47 }
0x1a15   :  { %11962 = vmatmul.mubr.msk.f32.vlgmr.msra.gmra.mrb[40].mxu1 %vm253_vm2, %v3290_v20 }
0x1a16   :  { %12561 = vmatpush3.bf16.msra.mxu0 %v12558_v7  ;;  %12565 = vmatpush3.bf16.msra.mxu1 %v12562_v63  ;;  %v11172_v7 = vld [vmem:[%s13129_s3 + $0x1] ss:$0 sm:$0xff]  ;;  %s14650_s3 = sld [smem:[#allocation11_spill]] }
0x1a17   :  { %12567 = vmatprep.subr.bf16.mxu1 %v12566_v1  ;;  %12571 = vmatprep.subr.bf16.mxu0 %v12570_v9 }
0x1a1a   :  { %12569 = vmatpush3.bf16.msra.mxu1 %v12566_v1 }
0x1a1b   :  { %12587 = vmatprep.subr.bf16.mxu1 %v12586_v3 }
0x1ae4   :  { %v3363_v26 = vpop.f32.mrb[30].mxu0 }
0x1ae5   :  { %3461 = vrot.lane.b32.xlu0 %v3363_v26, %s14614_s26  ;;  %v11958_v28 = vpop.f32.mrb[31].mxu0 }
0x1ae8   :  { %v3439_v51 = vpop.f32.mrb[40].mxu1 }
0x1ae9   :  { %3463 = vrot.lane.b32.xlu1 %v3439_v51, %s14614_s26  ;;  %v11963_v29 = vpop.f32.mrb[41].mxu1 }
0x1b57   :  { %v3462_v35 = vpop.permute.xlu0 %3461 }
0x1b58   :  { %v3471_v36 = vsel %vm1624_vm3, %v3469_v34, %v3462_v35  ;;  %v13715_v34 = vld [vmem:[%s14645_s13] sm:$0xff]  ;;  %v13722_v35 = vld [vmem:[%s14645_s13 + $0x8] sm:$0xff]  ;;  %s14657_s13 = sld [smem:[#allocation19_spill]] }
0x1b59   :  { %11972 = vmatprep.mubr.msk.f32.mxu0 %vm166_vm0, %v3471_v36  ;;  %v11187_v36 = vld [vmem:[%s13144_s19 + $0x70] sm:$0xff]  ;;  %s14653_s19 = sld [smem:[#allocation14_spill]] }
0x1b5b   :  { %v3464_v39 = vpop.permute.xlu1 %3463 }
0x1b5c   :  { %v3472_v49 = vsel %vm1624_vm3, %v3470_v38, %v3464_v39  ;;  %v12582_v38 = vpack.c.bf16 %v11188_v37, %v11187_v36  ;;  %v11178_v39 = vld [vmem:[%s13139_s14 + $0x1] ss:$0 sm:$0xff]  ;;  %s14652_s14 = sld [smem:[#allocation10_spill]] }
0x1b5d   :  { %11973 = vmatmul.mubr.msk.f32.vlgmr.msra.gmra.mrb[32].mxu0 %vm166_vm0, %v3472_v49 }
0x1b5e   :  { %12573 = vmatpush3.bf16.msra.mxu0 %v12570_v9 }
0x1b5f   :  { %12575 = vmatprep.subr.bf16.mxu0 %v12574_v11 }
0x1b62   :  { %12577 = vmatpush3.bf16.msra.mxu0 %v12574_v11 }
0x1b63   :  { %12579 = vmatprep.subr.bf16.mxu0 %v12578_v57 }
0x1b66   :  { %12581 = vmatpush3.bf16.msra.mxu0 %v12578_v57 }
0x1b67   :  { %12583 = vmatprep.subr.bf16.mxu0 %v12582_v38 }
0x1b6a   :  { %12585 = vmatpush3.bf16.msra.mxu0 %v12582_v38 }
0x1b6b   :  { %12026 = vmatprep.subr.mxu0 %v13068_v8 }
0x1c30   :  { %v11974_v25 = vpop.f32.mrb[32].mxu0 }
0x1c31   :  { %v3564_v41 = vadd.f32 %v11974_v25, %v11166_v40  ;;  %v3558_v43 = vpop.f32.mrb[33].mxu0 }
0x1c32   :  { %v3559_v44 = vadd.f32 %v11166_v40, %v3558_v43 }
0x1c33   :  { %v3572_v46 = vadd.f32 %v3564_v41, %v13508_v42 }
0x1c34   :  { %v3571_v48 = vadd.f32 %v3559_v44, %v13506_v13 }
0x1c35   :  { %v3576_v50 = vsel %vm166_vm0, %v3572_v46, 0.0 }
0x1c36   :  { %3577 = vadd.xlane.f32.xlu1 %v3576_v50  ;;  %v3573_v27 = vsel %vm166_vm0, %v3571_v48, 0.0 }
0x1c37   :  { %3574 = vadd.xlane.f32.xlu0 %v3573_v27 }
0x1cc3   :  { %v3578_v52 = vpop.xlane.xlu1 %3577 }
0x1cc4   :  { %v3580_v53 = vmul.f32 0.03125, %v3578_v52  ;;  %v3575_v17 = vpop.xlane.xlu0 %3574 }
0x1cc5   :  { %v3579_v54 = vmul.f32 0.03125, %v3575_v17 }
0x1cc6   :  { %v3582_v56 = vsub.f32 %v3572_v46, %v3580_v53  ;;  %v11197_v46 = vld [vmem:[%s14646_s17] ss:$0 sm:$0xff] }
0x1cc7   :  { %v3581_v58 = vsub.f32 %v3571_v48, %v3579_v54 }
0x1cc8   :  { %v3584_v42 = vmul.f32 %v3582_v56, %v3582_v56 }
0x1cc9   :  { %v3583_v59 = vmul.f32 %v3581_v58, %v3581_v58 }
0x1cca   :  { %v3588_v60 = vsel %vm166_vm0, %v3584_v42, 0.0 }
0x1ccb   :  { %v3585_v13 = vsel %vm166_vm0, %v3583_v59, 0.0 }
0x1ccc   :  { %3586 = vadd.xlane.f32.xlu0 %v3585_v13 }
0x1cd0   :  { %3589 = vadd.xlane.f32.xlu0 %v3588_v60 }
0x1d59   :  { %v3587_v18 = vpop.xlane.xlu0 %3586 }
0x1d5a   :  { %v3591_v45 = vmul.f32 0.03125, %v3587_v18 }
0x1d5c   :  { %v3593_v19 = vadd.f32 1e-05, %v3591_v45 }
0x1d5d   :  { %v3590_v20 = vpop.xlane.xlu0 %3589 }
0x1d5e   :  { %12848 = vrsqrt.f32 %v3593_v19  ;;  %v3592_v21 = vmul.f32 0.03125, %v3590_v20 }
0x1d60   :  { %v3594_v22 = vadd.f32 1e-05, %v3592_v21 }
0x1d62   :  { %12850 = vrsqrt.f32 %v3594_v22 }
0x1d68   :  { %v12849_v23 = vpop.eup %12848 }
0x1d69   :  { %v3597_v5 = vmul.f32 %v12849_v23, %v3581_v58 }
0x1d6b   :  { %v3605_v26 = vmul.f32 %v11171_v24, %v3597_v5 }
0x1d6c   :  { %v12851_v28 = vpop.eup %12850 }
0x1d6d   :  { %v3598_v51 = vmul.f32 %v12851_v28, %v3582_v56  ;;  %v13706_v29 = vadd.f32 %v11172_v7, %v3605_v26 }
0x1d6f   :  { %v3606_v31 = vmul.f32 %v11171_v24, %v3598_v51  ;;  %11983 = vmatprep.mubr.msk.f32.mxu1 %vm166_vm0, %v13706_v29 }
0x1d71   :  { %v13712_v32 = vadd.f32 %v11172_v7, %v3606_v31 }
0x1d73   :  { %11984 = vmatmul.mubr.msk.f32.vlgmr.msra.gmra.mrb[42].mxu1 %vm166_vm0, %v13712_v32 }
0x1d74   :  { %12589 = vmatpush3.bf16.msra.mxu1 %v12586_v3  ;;  %12013 = vmatprep.mubr.msk.f32.mxu1 %vm166_vm0, %v13715_v34 }
0x1d75   :  { %12591 = vmatprep.subr.bf16.mxu1 %v12590_v33 }
0x1d78   :  { %12593 = vmatpush3.bf16.msra.mxu1 %v12590_v33 }
0x1d79   :  { %12016 = vmatprep.subr.mxu1 %v13068_v8 }
0x1d7b   :  { %12014 = vmatmul.mubr.msk.f32.vlgmr.msra.gmra.mrb[44].mxu1 %vm166_vm0, %v13722_v35 }
0x1d7c   :  { %12018 = vmatprep.mubr.msk.f32.mxu1 %vm13069_vm1, %v13068_v8 }
0x1e46   :  { %v11985_v49 = vpop.f32.mrb[42].mxu1 }
0x1e47   :  { %v3706_v40 = vadd.f32 %v11985_v49, %v11178_v39  ;;  %v3700_v25 = vpop.f32.mrb[43].mxu1 }
0x1e48   :  { %v3701_v41 = vadd.f32 %v11178_v39, %v3700_v25 }
0x1e49   :  { %v3710_v44 = vmax.f32 %v3706_v40, 0.0 }
0x1e4a   :  { %v3709_v43 = vmax.f32 %v3701_v41, 0.0 }
0x1e4c   :  { %12002 = vmatprep.mubr.msk.f32.mxu0 %vm1875_vm5, %v3709_v43 }
0x1e4d   :  { %12003 = vmatmul.mubr.msk.f32.vlgmr.msra.gmra.mrb[34].mxu0 %vm1875_vm5, %v3710_v44 }
0x1e4e   :  { %v12015_v48 = vpop.f32.mrb[44].mxu1  ;;  %12028 = vmatprep.mubr.msk.f32.mxu0 %vm13069_vm1, %v13068_v8 }
0x1e4f   :  { %v13738_v50 = vadd.f32 %v12015_v48, %v11197_v46  ;;  %v3940_v27 = vpop.f32.mrb[45].mxu1 }
0x1e50   :  { %v13740_v52 = vadd.f32 %v11197_v46, %v3940_v27 }
0x1e51   :  { %4030 = vrot.lane.b32.xlu0 %v13738_v50, %s13070_s0  ;;  %v13757_v56 = vmul.f32 0.35355338, %v13738_v50 }
0x1e52   :  { %3952 = vrot.lane.b32.xlu1 %v13740_v52, %s13070_s0  ;;  %v13748_v17 = vmul.f32 0.35355338, %v13740_v52 }
0x1ec3   :  { %v4031_v54 = vpop.permute.xlu0 %4030 }
0x1ec4   :  { %v3953_v53 = vpop.permute.xlu1 %3952 }
0x1ec5   :  { %12017 = vmatpush3.xpose.msk.msra.mxu1 %vm253_vm2, %v3953_v53 }
0x1ec6   :  { %12021 = vmatprep.subr.mxu1 %v13068_v8 }
0x1ec8   :  { %12019 = vmatmul.mubr.msk.f32.vlgmr.msra.gmra.mrb[46].mxu1 %vm253_vm2, %v13748_v17 }
0x1ec9   :  { %12022 = vmatpush3.xpose.msk.msra.mxu1 %vm253_vm2, %v4031_v54  ;;  %12023 = vmatprep.mubr.msk.f32.mxu1 %vm13069_vm1, %v13068_v8 }
0x1eca   :  { %12031 = vmatprep.subr.mxu1 %v13068_v8 }
0x1ecc   :  { %12024 = vmatmul.mubr.msk.f32.vlgmr.msra.gmra.mrb[48].mxu1 %vm253_vm2, %v13757_v56 }
0x1ecd   :  { %12033 = vmatprep.mubr.msk.f32.mxu1 %vm13069_vm1, %v13068_v8 }
0x1f20   :  { %v13764_v58 = vpop.f32.mrb[34].mxu0 }
0x1f21   :  { %v13766_v59 = vpop.f32.mrb[35].mxu0 }
0x1f9b   :  { %v4025_v13 = vpop.f32.mrb[46].mxu1 }
0x1f9c   :  { %v12020_v42 = vpop.f32.mrb[47].mxu1  ;;  %v4107_v60 = vsel %vm253_vm2, %v4025_v13, -inf }
0x1f9d   :  { %4108 = vmax.xlane.f32.xlu1 %v4107_v60 }
0x1f9f   :  { %v4103_v61 = vpop.f32.mrb[48].mxu1 }
0x1fa0   :  { %v12025_v62 = vpop.f32.mrb[49].mxu1  ;;  %v4110_v15 = vsel %vm253_vm2, %v4103_v61, -inf }
0x1fa1   :  { %4111 = vmax.xlane.f32.xlu0 %v4110_v15 }
0x1fae   :  { %4135 = vrot.lane.b32.xlu1 %v13740_v52, %s13071_s5 }
0x202a   :  { %v4109_v63 = vpop.xlane.xlu1 %4108 }
0x202b   :  { %v4113_v0 = vsub.f32 %v4025_v13, %v4109_v63 }
0x202d   :  { %v4115_v1 = vmul.f32 1.442695, %v4113_v0 }
0x202e   :  { %v4136_v47 = vpop.permute.xlu1 %4135  ;;  %v4112_v2 = vpop.xlane.xlu0 %4111 }
0x202f   :  { %12852 = vpow2.f32 %v4115_v1  ;;  %v4114_v3 = vsub.f32 %v4103_v61, %v4112_v2  ;;  %12027 = vmatpush3.msra.mxu0 %v4136_v47 }
0x2030   :  { %12036 = vmatprep.subr.mxu0 %v13068_v8 }
0x2031   :  { %v4117_v55 = vmul.f32 1.442695, %v4114_v3 }
0x2033   :  { %12854 = vpow2.f32 %v4117_v55 }
0x2039   :  { %v12853_v4 = vpop.eup %12852 }
0x203a   :  { %v4119_v6 = vsel %vm253_vm2, %v12853_v4, 0.0 }
0x203b   :  { %4120 = vadd.xlane.f32.xlu1 %v4119_v6 }
0x203d   :  { %v12855_v9 = vpop.eup %12854 }
0x203e   :  { %v4122_v10 = vsel %vm253_vm2, %v12855_v9, 0.0 }
0x203f   :  { %4123 = vadd.xlane.f32.xlu0 %v4122_v10 }
0x204c   :  { %4289 = vrot.lane.b32.xlu1 %v13740_v52, %s13072_s28 }
0x2050   :  { %4367 = vrot.lane.b32.xlu1 %v13738_v50, %s13072_s28 }
0x2054   :  { %4365 = vrot.lane.b32.xlu1 %v13757_v56, %s13073_s1 }
0x2055   :  { %4211 = vrot.lane.b32.xlu0 %v13738_v50, %s13071_s5 }
0x2059   :  { %4287 = vrot.lane.b32.xlu0 %v13748_v17, %s13073_s1 }
0x20c8   :  { %v4121_v11 = vpop.xlane.xlu1 %4120 }
0x20c9   :  { %12856 = vrcp.f32 %v4121_v11 }
0x20cc   :  { %v4124_v14 = vpop.xlane.xlu0 %4123  ;;  %v4290_v20 = vpop.permute.xlu1 %4289 }
0x20cd   :  { %12858 = vrcp.f32 %v4124_v14 }
0x20d0   :  { %v4212_v16 = vpop.permute.xlu0 %4211  ;;  %v4368_v7 = vpop.permute.xlu1 %4367 }
0x20d1   :  { %12032 = vmatpush3.msra.mxu1 %v4212_v16 }
0x20d2   :  { %12041 = vmatprep.subr.mxu1 %v13068_v8 }
0x20d3   :  { %v12857_v57 = vpop.eup %12856 }
0x20d4   :  { %v4127_v18 = vmul.f32 %v12857_v57, %v4121_v11  ;;  %v4288_v28 = vpop.permute.xlu0 %4287  ;;  %v4366_v51 = vpop.permute.xlu1 %4365 }
0x20d6   :  { %v4129_v45 = vsub.f32 2.0, %v4127_v18 }
0x20d7   :  { %v12859_v19 = vpop.eup %12858 }
0x20d8   :  { %v4131_v21 = vmul.f32 %v12857_v57, %v4129_v45  ;;  %v4128_v22 = vmul.f32 %v12859_v19, %v4124_v14 }
0x20da   :  { %v4133_v23 = vmul.f32 %v12853_v4, %v4131_v21  ;;  %v4130_v24 = vsub.f32 2.0, %v4128_v22 }
0x20dc   :  { %v4132_v5 = vmul.f32 %v12859_v19, %v4130_v24  ;;  %12029 = vmatmul.mubr.msk.f32.vlgmr.msra.gmra.mrb[36].mxu0 %vm253_vm2, %v4133_v23 }
0x20dd   :  { %12037 = vmatpush3.xpose.msk.msra.mxu0 %vm253_vm2, %v4290_v20  ;;  %12038 = vmatprep.mubr.msk.f32.mxu0 %vm13069_vm1, %v13068_v8 }
0x20de   :  { %v4134_v26 = vmul.f32 %v12855_v9, %v4132_v5  ;;  %12046 = vmatprep.subr.mxu0 %v13068_v8 }
0x20e0   :  { %12034 = vmatmul.mubr.msk.f32.vlgmr.msra.gmra.mrb[50].mxu1 %vm253_vm2, %v4134_v26  ;;  %12039 = vmatmul.mubr.msk.f32.vlgmr.msra.gmra.mrb[38].mxu0 %vm253_vm2, %v4288_v28 }
0x20e1   :  { %12042 = vmatpush3.xpose.msk.msra.mxu1 %vm253_vm2, %v4368_v7  ;;  %12043 = vmatprep.mubr.msk.f32.mxu1 %vm13069_vm1, %v13068_v8 }
0x20e2   :  { %12051 = vmatprep.subr.mxu1 %v13068_v8  ;;  %12048 = vmatprep.mubr.msk.f32.mxu0 %vm13069_vm1, %v13068_v8 }
0x20e4   :  { %12044 = vmatmul.mubr.msk.f32.vlgmr.msra.gmra.mrb[52].mxu1 %vm253_vm2, %v4366_v51 }
0x20e5   :  { %12053 = vmatprep.mubr.msk.f32.mxu1 %vm13069_vm1, %v13068_v8 }
0x21af   :  { %v13802_v30 = vpop.f32.mrb[36].mxu0 }
0x21b0   :  { %v12030_v12 = vpop.f32.mrb[37].mxu0 }
0x21b3   :  { %v13804_v31 = vpop.f32.mrb[50].mxu1  ;;  %v4361_v33 = vpop.f32.mrb[38].mxu0 }
0x21b4   :  { %v12035_v36 = vpop.f32.mrb[51].mxu1  ;;  %v12040_v37 = vpop.f32.mrb[39].mxu0  ;;  %v4443_v38 = vsel %vm253_vm2, %v4361_v33, -inf }
0x21b5   :  { %4444 = vmax.xlane.f32.xlu0 %v4443_v38 }
0x21b7   :  { %v4439_v39 = vpop.f32.mrb[52].mxu1 }
0x21b8   :  { %v12045_v49 = vpop.f32.mrb[53].mxu1  ;;  %v4446_v40 = vsel %vm253_vm2, %v4439_v39, -inf }
0x21b9   :  { %4447 = vmax.xlane.f32.xlu1 %v4446_v40 }
0x21ca   :  { %4471 = vrot.lane.b32.xlu1 %v13740_v52, %s13074_s2 }
0x21ce   :  { %4625 = vrot.lane.b32.xlu1 %v13740_v52, %s13076_s10 }
0x21d2   :  { %4703 = vrot.lane.b32.xlu1 %v13738_v50, %s13076_s10 }
0x21d6   :  { %4701 = vrot.lane.b32.xlu1 %v13757_v56, %s13075_s7 }
0x2242   :  { %v4445_v25 = vpop.xlane.xlu0 %4444 }
0x2243   :  { %v4449_v41 = vsub.f32 %v4361_v33, %v4445_v25 }
0x2245   :  { %v4451_v43 = vmul.f32 1.442695, %v4449_v41 }
0x2246   :  { %v4448_v44 = vpop.xlane.xlu1 %4447 }
0x2247   :  { %12860 = vpow2.f32 %v4451_v43  ;;  %v4450_v46 = vsub.f32 %v4439_v39, %v4448_v44 }
0x2249   :  { %v4453_v48 = vmul.f32 1.442695, %v4450_v46 }
0x224a   :  { %v4472_v27 = vpop.permute.xlu1 %4471 }
0x224b   :  { %12862 = vpow2.f32 %v4453_v48  ;;  %12047 = vmatpush3.msra.mxu0 %v4472_v27 }
0x224c   :  { %12056 = vmatprep.subr.mxu0 %v13068_v8 }
0x224e   :  { %v4626_v47 = vpop.permute.xlu1 %4625 }
0x2251   :  { %v12861_v53 = vpop.eup %12860 }
0x2252   :  { %v4455_v54 = vsel %vm253_vm2, %v12861_v53, 0.0  ;;  %v4704_v9 = vpop.permute.xlu1 %4703 }
0x2253   :  { %4456 = vadd.xlane.f32.xlu0 %v4455_v54 }
0x2255   :  { %v12863_v13 = vpop.eup %12862 }
0x2256   :  { %v4458_v42 = vsel %vm253_vm2, %v12863_v13, 0.0  ;;  %v4702_v14 = vpop.permute.xlu1 %4701 }
0x2257   :  { %4459 = vadd.xlane.f32.xlu0 %v4458_v42 }
0x226d   :  { %4547 = vrot.lane.b32.xlu0 %v13738_v50, %s13074_s2 }
0x2271   :  { %4623 = vrot.lane.b32.xlu0 %v13748_v17, %s13075_s7 }
0x22e0   :  { %v4457_v60 = vpop.xlane.xlu0 %4456 }
0x22e1   :  { %12864 = vrcp.f32 %v4457_v60 }
0x22e4   :  { %v4460_v61 = vpop.xlane.xlu0 %4459 }
0x22e5   :  { %12866 = vrcp.f32 %v4460_v61 }
0x22e8   :  { %v4548_v62 = vpop.permute.xlu0 %4547 }
0x22e9   :  { %12052 = vmatpush3.msra.mxu1 %v4548_v62 }
0x22ea   :  { %12061 = vmatprep.subr.mxu1 %v13068_v8 }
0x22eb   :  { %v12865_v15 = vpop.eup %12864 }
0x22ec   :  { %v4463_v63 = vmul.f32 %v12865_v15, %v4457_v60  ;;  %v4624_v11 = vpop.permute.xlu0 %4623 }
0x22ee   :  { %v4465_v0 = vsub.f32 2.0, %v4463_v63 }
0x22ef   :  { %v12867_v1 = vpop.eup %12866 }
0x22f0   :  { %v4467_v2 = vmul.f32 %v12865_v15, %v4465_v0  ;;  %v4464_v3 = vmul.f32 %v12867_v1, %v4460_v61 }
0x22f2   :  { %v4469_v55 = vmul.f32 %v12861_v53, %v4467_v2  ;;  %v4466_v4 = vsub.f32 2.0, %v4464_v3 }
0x22f4   :  { %v4468_v6 = vmul.f32 %v12867_v1, %v4466_v4  ;;  %12049 = vmatmul.mubr.msk.f32.vlgmr.msra.gmra.mrb[40].mxu0 %vm253_vm2, %v4469_v55 }
0x22f5   :  { %12057 = vmatpush3.xpose.msk.msra.mxu0 %vm253_vm2, %v4626_v47  ;;  %12058 = vmatprep.mubr.msk.f32.mxu0 %vm13069_vm1, %v13068_v8 }
0x22f6   :  { %v4470_v10 = vmul.f32 %v12863_v13, %v4468_v6  ;;  %12066 = vmatprep.subr.mxu0 %v13068_v8 }
0x22f8   :  { %12054 = vmatmul.mubr.msk.f32.vlgmr.msra.gmra.mrb[54].mxu1 %vm253_vm2, %v4470_v10  ;;  %12059 = vmatmul.mubr.msk.f32.vlgmr.msra.gmra.mrb[42].mxu0 %vm253_vm2, %v4624_v11 }
0x22f9   :  { %12062 = vmatpush3.xpose.msk.msra.mxu1 %vm253_vm2, %v4704_v9  ;;  %12063 = vmatprep.mubr.msk.f32.mxu1 %vm13069_vm1, %v13068_v8 }
0x22fa   :  { %12071 = vmatprep.subr.mxu1 %v13068_v8  ;;  %12068 = vmatprep.mubr.msk.f32.mxu0 %vm13069_vm1, %v13068_v8 }
0x22fc   :  { %12064 = vmatmul.mubr.msk.f32.vlgmr.msra.gmra.mrb[56].mxu1 %vm253_vm2, %v4702_v14 }
0x22fd   :  { %12073 = vmatprep.mubr.msk.f32.mxu1 %vm13069_vm1, %v13068_v8 }
0x23c7   :  { %v13840_v16 = vpop.f32.mrb[40].mxu0 }
0x23c8   :  { %v12050_v57 = vpop.f32.mrb[41].mxu0 }
0x23cb   :  { %v13842_v18 = vpop.f32.mrb[54].mxu1  ;;  %v4697_v45 = vpop.f32.mrb[42].mxu0 }
0x23cc   :  { %v12055_v19 = vpop.f32.mrb[55].mxu1  ;;  %v12060_v20 = vpop.f32.mrb[43].mxu0  ;;  %v4779_v21 = vsel %vm253_vm2, %v4697_v45, -inf }
0x23cd   :  { %4780 = vmax.xlane.f32.xlu0 %v4779_v21 }
0x23cf   :  { %v4775_v22 = vpop.f32.mrb[56].mxu1 }
0x23d0   :  { %v12065_v23 = vpop.f32.mrb[57].mxu1  ;;  %v4782_v24 = vsel %vm253_vm2, %v4775_v22, -inf }
0x23d1   :  { %4783 = vmax.xlane.f32.xlu1 %v4782_v24 }
0x23e2   :  { %4807 = vrot.lane.b32.xlu1 %v13740_v52, %s13077_s11 }
0x23e6   :  { %4961 = vrot.lane.b32.xlu1 %v13740_v52, %s14624_s15 }
0x23ea   :  { %5039 = vrot.lane.b32.xlu1 %v13738_v50, %s14624_s15 }
0x23ee   :  { %5037 = vrot.lane.b32.xlu1 %v13757_v56, %s14622_s16 }
0x245a   :  { %v4781_v5 = vpop.xlane.xlu0 %4780 }
0x245b   :  { %v4785_v7 = vsub.f32 %v4697_v45, %v4781_v5 }
0x245d   :  { %v4787_v26 = vmul.f32 1.442695, %v4785_v7 }
0x245e   :  { %v4784_v28 = vpop.xlane.xlu1 %4783 }
0x245f   :  { %12868 = vpow2.f32 %v4787_v26  ;;  %v4786_v51 = vsub.f32 %v4775_v22, %v4784_v28 }
0x2461   :  { %v4789_v12 = vmul.f32 1.442695, %v4786_v51 }
0x2462   :  { %v4808_v33 = vpop.permute.xlu1 %4807 }
0x2463   :  { %12870 = vpow2.f32 %v4789_v12  ;;  %12067 = vmatpush3.msra.mxu0 %v4808_v33 }
0x2464   :  { %12076 = vmatprep.subr.mxu0 %v13068_v8 }
0x2466   :  { %v4962_v46 = vpop.permute.xlu1 %4961 }
0x2469   :  { %v12869_v36 = vpop.eup %12868 }
0x246a   :  { %v4791_v37 = vsel %vm253_vm2, %v12869_v36, 0.0 }
0x246b   :  { %4792 = vadd.xlane.f32.xlu0 %v4791_v37  ;;  %v5326_v37 = vld [vmem:[%s14647_s21 + $0x8] sm:$0xff] }
0x246d   :  { %v12871_v38 = vpop.eup %12870 }
0x246e   :  { %v4794_v39 = vsel %vm253_vm2, %v12871_v38, 0.0 }
0x246f   :  { %4795 = vadd.xlane.f32.xlu0 %v4794_v39  ;;  %v5327_v39 = vld [vmem:[%s14647_s21 + $0x10] sm:$0xff] }
0x2485   :  { %4883 = vrot.lane.b32.xlu0 %v13738_v50, %s13077_s11 }
0x2489   :  { %4959 = vrot.lane.b32.xlu0 %v13748_v17, %s14622_s16  ;;  %v5040_v17 = vpop.permute.xlu1 %5039 }
0x248d   :  { %v5038_v61 = vpop.permute.xlu1 %5037 }
0x24f8   :  { %v4793_v56 = vpop.xlane.xlu0 %4792 }
0x24f9   :  { %12872 = vrcp.f32 %v4793_v56 }
0x24fc   :  { %v4796_v49 = vpop.xlane.xlu0 %4795 }
0x24fd   :  { %12874 = vrcp.f32 %v4796_v49 }
0x2500   :  { %v4884_v40 = vpop.permute.xlu0 %4883 }
0x2501   :  { %12072 = vmatpush3.msra.mxu1 %v4884_v40 }
0x2502   :  { %12081 = vmatprep.subr.mxu1 %v13068_v8 }
0x2503   :  { %v12873_v25 = vpop.eup %12872 }
0x2504   :  { %v4799_v41 = vmul.f32 %v12873_v25, %v4793_v56  ;;  %v4960_v60 = vpop.permute.xlu0 %4959  ;;  %v5328_v56 = vld [vmem:[%s14647_s21 + $0x18] sm:$0xff] }
0x2506   :  { %v4801_v43 = vsub.f32 2.0, %v4799_v41 }
0x2507   :  { %v12875_v44 = vpop.eup %12874 }
0x2508   :  { %v4803_v48 = vmul.f32 %v12873_v25, %v4801_v43  ;;  %v4800_v27 = vmul.f32 %v12875_v44, %v4796_v49  ;;  %v12598_v49 = vpack.c.bf16 %v5328_v56, %v5327_v39 }
0x250a   :  { %v4805_v53 = vmul.f32 %v12869_v36, %v4803_v48  ;;  %v4802_v54 = vsub.f32 2.0, %v4800_v27  ;;  %v5325_v36 = vld [vmem:[%s14647_s21] sm:$0xff] }
0x250c   :  { %v4804_v13 = vmul.f32 %v12875_v44, %v4802_v54  ;;  %12069 = vmatmul.mubr.msk.f32.vlgmr.msra.gmra.mrb[44].mxu0 %vm253_vm2, %v4805_v53  ;;  %v11190_v44 = vld [vmem:[%s13149_s24 + $0x1] ss:$0 sm:$0xff]  ;;  %s14654_s24 = sld [smem:[#allocation12_spill]] }
0x250d   :  { %12077 = vmatpush3.xpose.msk.msra.mxu0 %vm253_vm2, %v4962_v46  ;;  %12078 = vmatprep.mubr.msk.f32.mxu0 %vm13069_vm1, %v13068_v8  ;;  %v3801_v46 = vadd.f32 %v11190_v44, %v13766_v59  ;;  %v3806_v53 = vadd.f32 %v13764_v58, %v11190_v44 }
0x250e   :  { %v4806_v42 = vmul.f32 %v12871_v38, %v4804_v13  ;;  %12086 = vmatprep.subr.mxu0 %v13068_v8  ;;  %v12594_v38 = vpack.c.bf16 %v5326_v37, %v5325_v36 }
0x250f   :  { %v3813_v48 = vadd.f32 %v3801_v46, %v13706_v29  ;;  %v3814_v54 = vadd.f32 %v3806_v53, %v13712_v32 }
0x2510   :  { %12074 = vmatmul.mubr.msk.f32.vlgmr.msra.gmra.mrb[58].mxu1 %vm253_vm2, %v4806_v42  ;;  %12079 = vmatmul.mubr.msk.f32.vlgmr.msra.gmra.mrb[46].mxu0 %vm253_vm2, %v4960_v60 }
0x2511   :  { %12082 = vmatpush3.xpose.msk.msra.mxu1 %vm253_vm2, %v5040_v17  ;;  %12083 = vmatprep.mubr.msk.f32.mxu1 %vm13069_vm1, %v13068_v8  ;;  %v3815_v27 = vsel %vm166_vm0, %v3813_v48, 0.0  ;;  %v3818_v13 = vsel %vm166_vm0, %v3814_v54, 0.0 }
0x2512   :  { %12091 = vmatprep.subr.mxu1 %v13068_v8  ;;  %12088 = vmatprep.mubr.msk.f32.mxu0 %vm13069_vm1, %v13068_v8 }
0x2514   :  { %12084 = vmatmul.mubr.msk.f32.vlgmr.msra.gmra.mrb[60].mxu1 %vm253_vm2, %v5038_v61 }
0x2515   :  { %12093 = vmatprep.mubr.msk.f32.mxu1 %vm13069_vm1, %v13068_v8 }
0x25df   :  { %v4879_v62 = vpop.f32.mrb[44].mxu0 }
0x25e0   :  { %v12070_v15 = vpop.f32.mrb[45].mxu0 }
0x25e3   :  { %v4955_v63 = vpop.f32.mrb[58].mxu1  ;;  %v5033_v0 = vpop.f32.mrb[46].mxu0 }
0x25e4   :  { %v12075_v1 = vpop.f32.mrb[59].mxu1  ;;  %v12080_v47 = vpop.f32.mrb[47].mxu0  ;;  %v5115_v2 = vsel %vm253_vm2, %v5033_v0, -inf }
0x25e5   :  { %5116 = vmax.xlane.f32.xlu0 %v5115_v2 }
0x25e7   :  { %v5111_v3 = vpop.f32.mrb[60].mxu1 }
0x25e8   :  { %v12085_v55 = vpop.f32.mrb[61].mxu1  ;;  %v5118_v4 = vsel %vm253_vm2, %v5111_v3, -inf }
0x25e9   :  { %5119 = vmax.xlane.f32.xlu1 %v5118_v4 }
0x25fa   :  { %5143 = vrot.lane.b32.xlu1 %v13740_v52, %s14620_s18 }
0x25fe   :  { %5297 = vrot.lane.b32.xlu1 %v13840_v16, %s14618_s22 }
0x2602   :  { %5299 = vrot.lane.b32.xlu1 %v13842_v18, %s14618_s22 }
0x2606   :  { %5307 = vrot.lane.b32.xlu1 %v4955_v63, %s14616_s23 }
0x2672   :  { %v5117_v6 = vpop.xlane.xlu0 %5116 }
0x2673   :  { %v5121_v9 = vsub.f32 %v5033_v0, %v5117_v6 }
0x2675   :  { %v5123_v10 = vmul.f32 1.442695, %v5121_v9  ;;  %v11224_v9 = vld [vmem:[%s14648_s25] ss:$0 sm:$0xff] }
0x2676   :  { %v5120_v11 = vpop.xlane.xlu1 %5119 }
0x2677   :  { %12876 = vpow2.f32 %v5123_v10  ;;  %v5122_v14 = vsub.f32 %v5111_v3, %v5120_v11 }
0x2679   :  { %v5125_v57 = vmul.f32 1.442695, %v5122_v14 }
0x267a   :  { %v5144_v45 = vpop.permute.xlu1 %5143 }
0x267b   :  { %12878 = vpow2.f32 %v5125_v57  ;;  %12087 = vmatpush3.msra.mxu0 %v5144_v45 }
0x267c   :  { %12595 = vmatprep.subr.bf16.mxu0 %v12594_v38 }
0x267e   :  { %v5298_v17 = vpop.permute.xlu1 %5297 }
0x267f   :  { %v5319_v61 = vsel %vm253_vm2, %v13802_v30, %v5298_v17  ;;  %v5463_v17 = vld [vmem:[%s14650_s3] sm:$0xff] }
0x2681   :  { %v12877_v19 = vpop.eup %12876 }
0x2682   :  { %v5127_v52 = vsel %vm253_vm2, %v12877_v19, 0.0  ;;  %v5300_v42 = vpop.permute.xlu1 %5299 }
0x2683   :  { %5128 = vadd.xlane.f32.xlu0 %v5127_v52  ;;  %v5320_v32 = vsel %vm253_vm2, %v13804_v31, %v5300_v42  ;;  %v5464_v42 = vld [vmem:[%s14650_s3 + $0x8] sm:$0xff] }
0x2685   :  { %v12879_v16 = vpop.eup %12878 }
0x2686   :  { %v5130_v20 = vsel %vm253_vm2, %v12879_v16, 0.0 }
0x2687   :  { %5131 = vadd.xlane.f32.xlu0 %v5130_v20 }
0x269d   :  { %5219 = vrot.lane.b32.xlu0 %v13738_v50, %s14620_s18  ;;  %s14661_s18 = sld [smem:[#allocation20_spill]] }
0x26a1   :  { %5305 = vrot.lane.b32.xlu0 %v4879_v62, %s14616_s23  ;;  %v5308_v62 = vpop.permute.xlu1 %5307 }
0x26a2   :  { %v5322_v58 = vsel %vm1621_vm4, %v5320_v32, %v5308_v62  ;;  %v5466_v62 = vld [vmem:[%s14650_s3 + $0x18] sm:$0xff] }
0x2710   :  { %v5129_v18 = vpop.xlane.xlu0 %5128 }
0x2711   :  { %12880 = vrcp.f32 %v5129_v18 }
0x2714   :  { %v5132_v21 = vpop.xlane.xlu0 %5131 }
0x2715   :  { %12882 = vrcp.f32 %v5132_v21 }
0x2718   :  { %v5220_v22 = vpop.permute.xlu0 %5219 }
0x2719   :  { %12092 = vmatpush3.msra.mxu1 %v5220_v22 }
0x271b   :  { %v12881_v23 = vpop.eup %12880 }
0x271c   :  { %v5135_v24 = vmul.f32 %v12881_v23, %v5129_v18  ;;  %v5306_v60 = vpop.permute.xlu0 %5305 }
0x271d   :  { %v5321_v59 = vsel %vm1621_vm4, %v5319_v61, %v5306_v60  ;;  %v5465_v60 = vld [vmem:[%s14650_s3 + $0x10] sm:$0xff]  ;;  %v12602_v61 = vpack.c.bf16 %v5464_v42, %v5463_v17 }
0x271e   :  { %v5137_v5 = vsub.f32 2.0, %v5135_v24 }
0x271f   :  { %v12883_v7 = vpop.eup %12882  ;;  %12603 = vmatprep.subr.bf16.mxu1 %v12602_v61 }
0x2720   :  { %v5139_v26 = vmul.f32 %v12881_v23, %v5137_v5  ;;  %v5136_v28 = vmul.f32 %v12883_v7, %v5132_v21  ;;  %v11196_v23 = vld [vmem:[%s13159_s6 + $0x1] ss:$0 sm:$0xff]  ;;  %s14656_s6 = sld [smem:[#allocation16_spill]] }
0x2722   :  { %v5141_v51 = vmul.f32 %v12877_v19, %v5139_v26  ;;  %v5138_v50 = vsub.f32 2.0, %v5136_v28  ;;  %v5556_v28 = vld [vmem:[%s14649_s29 + $0x8] sm:$0xff] }
0x2724   :  { %v5140_v12 = vmul.f32 %v12883_v7, %v5138_v50  ;;  %12089 = vmatmul.mubr.msk.f32.vlgmr.msra.gmra.mrb[48].mxu0 %vm253_vm2, %v5141_v51  ;;  %v5557_v50 = vld [vmem:[%s14649_s29 + $0x10] sm:$0xff] }
0x2725   :  { %12597 = vmatpush3.bf16.msra.mxu0 %v12594_v38 }
0x2726   :  { %v5142_v33 = vmul.f32 %v12879_v16, %v5140_v12  ;;  %12599 = vmatprep.subr.bf16.mxu0 %v12598_v49  ;;  %v11195_v16 = vld [vmem:[%s13154_s30 + $0x1] ss:$0 sm:$0xff]  ;;  %v5558_v12 = vld [vmem:[%s14649_s29 + $0x18] sm:$0xff]  ;;  %s14655_s30 = sld [smem:[#allocation15_spill]] }
0x2728   :  { %12094 = vmatmul.mubr.msk.f32.vlgmr.msra.gmra.mrb[62].mxu1 %vm253_vm2, %v5142_v33  ;;  %v12614_v33 = vpack.c.bf16 %v5558_v12, %v5557_v50 }
0x2729   :  { %12601 = vmatpush3.bf16.msra.mxu0 %v12598_v49  ;;  %12605 = vmatpush3.bf16.msra.mxu1 %v12602_v61 }
0x27f7   :  { %v5215_v40 = vpop.f32.mrb[48].mxu0 }
0x27f8   :  { %5313 = vrot.lane.b32.xlu0 %v5215_v40, %s14614_s26  ;;  %v12090_v25 = vpop.f32.mrb[49].mxu0 }
0x27fb   :  { %v5291_v41 = vpop.f32.mrb[62].mxu1 }
0x27fc   :  { %5315 = vrot.lane.b32.xlu1 %v5291_v41, %s14614_s26  ;;  %v12095_v43 = vpop.f32.mrb[63].mxu1 }
0x2817   :  { %3816 = vadd.xlane.f32.xlu0 %v3815_v27 }
0x2820   :  { %3819 = vadd.xlane.f32.xlu1 %v3818_v13 }
0x286a   :  { %v5314_v29 = vpop.permute.xlu0 %5313 }
0x286b   :  { %v5323_v15 = vsel %vm1624_vm3, %v5321_v59, %v5314_v29  ;;  %v12606_v59 = vpack.c.bf16 %v5466_v62, %v5465_v60 }
0x286c   :  { %12104 = vmatprep.mubr.msk.f32.mxu0 %vm166_vm0, %v5323_v15 }
0x286d   :  { %12607 = vmatprep.subr.bf16.mxu1 %v12606_v59 }
0x286e   :  { %v5316_v63 = vpop.permute.xlu1 %5315  ;;  %12609 = vmatpush3.bf16.msra.mxu1 %v12606_v59 }
0x286f   :  { %v5324_v0 = vsel %vm1624_vm3, %v5322_v58, %v5316_v63  ;;  %12129 = vmatprep.subr.mxu1 %v13068_v8 }
0x2870   :  { %12105 = vmatmul.mubr.msk.f32.vlgmr.msra.gmra.mrb[50].mxu0 %vm166_vm0, %v5324_v0 }
0x28a4   :  { %v3817_v30 = vpop.xlane.xlu0 %3816 }
0x28a5   :  { %v3821_v1 = vmul.f32 0.03125, %v3817_v30 }
0x28a7   :  { %v3823_v47 = vsub.f32 %v3813_v48, %v3821_v1  ;;  %v11227_v1 = vld [vmem:[%s14651_s8] ss:$0 sm:$0xff] }
0x28a9   :  { %v3825_v2 = vmul.f32 %v3823_v47, %v3823_v47 }
0x28ab   :  { %v3827_v3 = vsel %vm166_vm0, %v3825_v2, 0.0  ;;  %v11228_v2 = vld [vmem:[%s14652_s14] ss:$0 sm:$0xff] }
0x28ac   :  { %3828 = vadd.xlane.f32.xlu1 %v3827_v3 }
0x28ad   :  { %v3820_v55 = vpop.xlane.xlu1 %3819 }
0x28ae   :  { %v3822_v14 = vmul.f32 0.03125, %v3820_v55 }
0x28b0   :  { %v3824_v20 = vsub.f32 %v3814_v54, %v3822_v14 }
0x2939   :  { %v3829_v4 = vpop.xlane.xlu1 %3828 }
0x293a   :  { %v3833_v6 = vmul.f32 0.03125, %v3829_v4 }
0x293c   :  { %v3835_v31 = vadd.f32 1e-05, %v3833_v6 }
0x293e   :  { %12884 = vrsqrt.f32 %v3835_v31 }
0x2943   :  { %v12106_v10 = vpop.f32.mrb[50].mxu0 }
0x2944   :  { %v5408_v11 = vpop.f32.mrb[51].mxu0  ;;  %v5414_v57 = vadd.f32 %v12106_v10, %v11224_v9  ;;  %v11232_v10 = vld [vmem:[%s14653_s19] ss:$0 sm:$0xff] }
0x2945   :  { %v5409_v45 = vadd.f32 %v11224_v9, %v5408_v11 }
0x2946   :  { %v5420_v18 = vadd.f32 %v5414_v57, %v13722_v35  ;;  %v5555_v35 = vld [vmem:[%s14649_s29] sm:$0xff] }
0x2947   :  { %v5419_v19 = vadd.f32 %v5409_v45, %v13715_v34  ;;  %v3826_v34 = vmul.f32 %v3824_v20, %v3824_v20  ;;  %v12610_v51 = vpack.c.bf16 %v5556_v28, %v5555_v35 }
0x2948   :  { %v12885_v52 = vpop.eup %12884  ;;  %v5424_v5 = vsel %vm166_vm0, %v5420_v18, 0.0 }
0x2949   :  { %v5421_v21 = vsel %vm166_vm0, %v5419_v19, 0.0  ;;  %v3839_v22 = vmul.f32 %v12885_v52, %v3823_v47  ;;  %v3830_v26 = vsel %vm166_vm0, %v3826_v34, 0.0  ;;  %12611 = vmatprep.subr.bf16.mxu0 %v12610_v51 }
0x294a   :  { %5422 = vadd.xlane.f32.xlu0 %v5421_v21  ;;  %12613 = vmatpush3.bf16.msra.mxu0 %v12610_v51 }
0x294b   :  { %v3847_v24 = vmul.f32 %v11195_v16, %v3839_v22  ;;  %12615 = vmatprep.subr.bf16.mxu0 %v12614_v33 }
0x294d   :  { %v13925_v7 = vadd.f32 %v11196_v23, %v3847_v24 }
0x294e   :  { %5425 = vadd.xlane.f32.xlu0 %v5424_v5  ;;  %12617 = vmatpush3.bf16.msra.mxu0 %v12614_v33 }
0x294f   :  { %12126 = vmatprep.mubr.msk.f32.mxu0 %vm166_vm0, %v13925_v7  ;;  %12139 = vmatprep.subr.mxu0 %v13068_v8 }
0x2952   :  { %3831 = vadd.xlane.f32.xlu0 %v3830_v26 }
0x29d7   :  { %v5423_v36 = vpop.xlane.xlu0 %5422 }
0x29d8   :  { %v5427_v37 = vmul.f32 0.03125, %v5423_v36 }
0x29da   :  { %v5429_v38 = vsub.f32 %v5419_v19, %v5427_v37  ;;  %v11229_v19 = vld [vmem:[%s14654_s24] ss:$0 sm:$0xff] }
0x29db   :  { %v5426_v39 = vpop.xlane.xlu0 %5425 }
0x29dc   :  { %v5428_v56 = vmul.f32 0.03125, %v5426_v39  ;;  %v5431_v49 = vmul.f32 %v5429_v38, %v5429_v38 }
0x29de   :  { %v5430_v40 = vsub.f32 %v5420_v18, %v5428_v56  ;;  %v5433_v25 = vsel %vm166_vm0, %v5431_v49, 0.0 }
0x29df   :  { %5434 = vadd.xlane.f32.xlu1 %v5433_v25  ;;  %v3832_v41 = vpop.xlane.xlu0 %3831 }
0x29e0   :  { %v3834_v43 = vmul.f32 0.03125, %v3832_v41  ;;  %v5432_v44 = vmul.f32 %v5430_v40, %v5430_v40 }
0x29e2   :  { %v3836_v46 = vadd.f32 1e-05, %v3834_v43  ;;  %v5436_v48 = vsel %vm166_vm0, %v5432_v44, 0.0 }
0x29e3   :  { %5437 = vadd.xlane.f32.xlu0 %v5436_v48 }
0x29e4   :  { %12886 = vrsqrt.f32 %v3836_v46 }
0x29ee   :  { %v12887_v27 = vpop.eup %12886 }
0x29ef   :  { %v3840_v53 = vmul.f32 %v12887_v27, %v3824_v20 }
0x29f1   :  { %v3848_v54 = vmul.f32 %v11195_v16, %v3840_v53 }
0x29f3   :  { %v13937_v13 = vadd.f32 %v11196_v23, %v3848_v54 }
0x29f5   :  { %12127 = vmatmul.mubr.msk.f32.vlgmr.msra.gmra.mrb[52].mxu0 %vm166_vm0, %v13937_v13 }
0x29f6   :  { %12141 = vmatprep.mubr.msk.f32.mxu0 %vm13069_vm1, %v13068_v8 }
0x2a6c   :  { %v5435_v29 = vpop.xlane.xlu1 %5434 }
0x2a6d   :  { %v5439_v15 = vmul.f32 0.03125, %v5435_v29 }
0x2a6f   :  { %v5441_v32 = vadd.f32 1e-05, %v5439_v15 }
0x2a70   :  { %v5438_v58 = vpop.xlane.xlu0 %5437 }
0x2a71   :  { %12888 = vrsqrt.f32 %v5441_v32  ;;  %v5440_v63 = vmul.f32 0.03125, %v5438_v58 }
0x2a73   :  { %v5442_v0 = vadd.f32 1e-05, %v5440_v63 }
0x2a75   :  { %12890 = vrsqrt.f32 %v5442_v0 }
0x2a7b   :  { %v12889_v30 = vpop.eup %12888 }
0x2a7c   :  { %v5445_v47 = vmul.f32 %v12889_v30, %v5429_v38 }
0x2a7e   :  { %v5453_v3 = vmul.f32 %v11227_v1, %v5445_v47 }
0x2a7f   :  { %v12891_v55 = vpop.eup %12890 }
0x2a80   :  { %v5446_v4 = vmul.f32 %v12891_v55, %v5430_v40  ;;  %v13950_v6 = vadd.f32 %v11228_v2, %v5453_v3 }
0x2a82   :  { %v5454_v31 = vmul.f32 %v11227_v1, %v5446_v4  ;;  %12115 = vmatprep.mubr.msk.f32.mxu1 %vm166_vm0, %v13950_v6 }
0x2a84   :  { %v13954_v9 = vadd.f32 %v11228_v2, %v5454_v31 }
0x2a86   :  { %12116 = vmatmul.mubr.msk.f32.vlgmr.msra.gmra.mrb[64].mxu1 %vm166_vm0, %v13954_v9 }
0x2a87   :  { %12131 = vmatprep.mubr.msk.f32.mxu1 %vm13069_vm1, %v13068_v8 }
0x2ac8   :  { %v12128_v11 = vpop.f32.mrb[52].mxu0 }
0x2ac9   :  { %v13961_v14 = vadd.f32 %v12128_v11, %v11232_v10  ;;  %v5638_v57 = vpop.f32.mrb[53].mxu0 }
0x2aca   :  { %v13963_v45 = vadd.f32 %v11232_v10, %v5638_v57 }
0x2acc   :  { %12130 = vmatpush3.xpose.msk.msra.mxu1 %vm253_vm2, %v13963_v45 }
0x2acd   :  { %12134 = vmatprep.subr.mxu1 %v13068_v8 }
0x2b59   :  { %v12117_v52 = vpop.f32.mrb[64].mxu1 }
0x2b5a   :  { %v5546_v16 = vpop.f32.mrb[65].mxu1  ;;  %v5552_v18 = vadd.f32 %v12117_v52, %v11229_v19 }
0x2b5b   :  { %v5547_v20 = vadd.f32 %v11229_v19, %v5546_v16 }
0x2b5c   :  { %v13977_v22 = vmul.f32 0.35355338, %v5552_v18 }
0x2b5d   :  { %v13969_v21 = vmul.f32 0.35355338, %v5547_v20 }
0x2b5f   :  { %12132 = vmatmul.mubr.msk.f32.vlgmr.msra.gmra.mrb[66].mxu1 %vm253_vm2, %v13969_v21 }
0x2b60   :  { %12135 = vmatpush3.xpose.msk.msra.mxu1 %vm253_vm2, %v13961_v14  ;;  %12136 = vmatprep.mubr.msk.f32.mxu1 %vm13069_vm1, %v13068_v8 }
0x2b61   :  { %12144 = vmatprep.subr.mxu1 %v13068_v8 }
0x2b63   :  { %12137 = vmatmul.mubr.msk.f32.vlgmr.msra.gmra.mrb[68].mxu1 %vm253_vm2, %v13977_v22 }
0x2b64   :  { %12146 = vmatprep.mubr.msk.f32.mxu1 %vm13069_vm1, %v13068_v8 }
0x2c32   :  { %v5721_v23 = vpop.f32.mrb[66].mxu1 }
0x2c33   :  { %v12133_v24 = vpop.f32.mrb[67].mxu1  ;;  %v5801_v5 = vsel %vm253_vm2, %v5721_v23, -inf }
0x2c34   :  { %5802 = vmax.xlane.f32.xlu1 %v5801_v5 }
0x2c36   :  { %v5797_v34 = vpop.f32.mrb[68].mxu1 }
0x2c37   :  { %v12138_v26 = vpop.f32.mrb[69].mxu1  ;;  %v5804_v35 = vsel %vm253_vm2, %v5797_v34, -inf }
0x2c38   :  { %5805 = vmax.xlane.f32.xlu0 %v5804_v35 }
0x2c45   :  { %5829 = vrot.lane.b32.xlu1 %v13963_v45, %s13070_s0 }
0x2cc1   :  { %v5803_v28 = vpop.xlane.xlu1 %5802 }
0x2cc2   :  { %v5807_v51 = vsub.f32 %v5721_v23, %v5803_v28 }
0x2cc4   :  { %v5809_v50 = vmul.f32 1.442695, %v5807_v51 }
0x2cc5   :  { %v5830_v12 = vpop.permute.xlu1 %5829  ;;  %v5806_v33 = vpop.xlane.xlu0 %5805 }
0x2cc6   :  { %12892 = vpow2.f32 %v5809_v50  ;;  %v5808_v36 = vsub.f32 %v5797_v34, %v5806_v33  ;;  %12140 = vmatpush3.msra.mxu0 %v5830_v12 }
0x2cc7   :  { %12149 = vmatprep.subr.mxu0 %v13068_v8 }
0x2cc8   :  { %v5811_v37 = vmul.f32 1.442695, %v5808_v36 }
0x2cca   :  { %12894 = vpow2.f32 %v5811_v37 }
0x2cd0   :  { %v12893_v38 = vpop.eup %12892 }
0x2cd1   :  { %v5813_v39 = vsel %vm253_vm2, %v12893_v38, 0.0 }
0x2cd2   :  { %5814 = vadd.xlane.f32.xlu1 %v5813_v39 }
0x2cd4   :  { %v12895_v56 = vpop.eup %12894 }
0x2cd5   :  { %v5816_v49 = vsel %vm253_vm2, %v12895_v56, 0.0 }
0x2cd6   :  { %5817 = vadd.xlane.f32.xlu0 %v5816_v49 }
0x2ce3   :  { %5983 = vrot.lane.b32.xlu1 %v13963_v45, %s13073_s1 }
0x2ce7   :  { %6061 = vrot.lane.b32.xlu1 %v13961_v14, %s13073_s1 }
0x2ceb   :  { %6059 = vrot.lane.b32.xlu1 %v13977_v22, %s13073_s1 }
0x2cec   :  { %5905 = vrot.lane.b32.xlu0 %v13961_v14, %s13070_s0 }
0x2cf0   :  { %5981 = vrot.lane.b32.xlu0 %v13969_v21, %s13073_s1 }
0x2d5f   :  { %v5815_v40 = vpop.xlane.xlu1 %5814 }
0x2d60   :  { %12896 = vrcp.f32 %v5815_v40 }
0x2d63   :  { %v5818_v25 = vpop.xlane.xlu0 %5817  ;;  %v5984_v27 = vpop.permute.xlu1 %5983 }
0x2d64   :  { %12898 = vrcp.f32 %v5818_v25 }
0x2d67   :  { %v5906_v41 = vpop.permute.xlu0 %5905  ;;  %v6062_v61 = vpop.permute.xlu1 %6061 }
0x2d68   :  { %12145 = vmatpush3.msra.mxu1 %v5906_v41 }
0x2d69   :  { %12154 = vmatprep.subr.mxu1 %v13068_v8 }
0x2d6a   :  { %v12897_v43 = vpop.eup %12896 }
0x2d6b   :  { %v5821_v44 = vmul.f32 %v12897_v43, %v5815_v40  ;;  %v5982_v59 = vpop.permute.xlu0 %5981  ;;  %v6060_v29 = vpop.permute.xlu1 %6059 }
0x2d6d   :  { %v5823_v46 = vsub.f32 2.0, %v5821_v44 }
0x2d6e   :  { %v12899_v48 = vpop.eup %12898 }
0x2d6f   :  { %v5825_v53 = vmul.f32 %v12897_v43, %v5823_v46  ;;  %v5822_v54 = vmul.f32 %v12899_v48, %v5818_v25 }
0x2d71   :  { %v5827_v17 = vmul.f32 %v12893_v38, %v5825_v53  ;;  %v5824_v42 = vsub.f32 2.0, %v5822_v54 }
0x2d73   :  { %v5826_v60 = vmul.f32 %v12899_v48, %v5824_v42  ;;  %12142 = vmatmul.mubr.msk.f32.vlgmr.msra.gmra.mrb[54].mxu0 %vm253_vm2, %v5827_v17 }
0x2d74   :  { %12150 = vmatpush3.xpose.msk.msra.mxu0 %vm253_vm2, %v5984_v27  ;;  %12151 = vmatprep.mubr.msk.f32.mxu0 %vm13069_vm1, %v13068_v8 }
0x2d75   :  { %v5828_v62 = vmul.f32 %v12895_v56, %v5826_v60  ;;  %12159 = vmatprep.subr.mxu0 %v13068_v8 }
0x2d77   :  { %12147 = vmatmul.mubr.msk.f32.vlgmr.msra.gmra.mrb[70].mxu1 %vm253_vm2, %v5828_v62  ;;  %12152 = vmatmul.mubr.msk.f32.vlgmr.msra.gmra.mrb[56].mxu0 %vm253_vm2, %v5982_v59 }
0x2d78   :  { %12155 = vmatpush3.xpose.msk.msra.mxu1 %vm253_vm2, %v6062_v61  ;;  %12156 = vmatprep.mubr.msk.f32.mxu1 %vm13069_vm1, %v13068_v8 }
0x2d79   :  { %12164 = vmatprep.subr.mxu1 %v13068_v8  ;;  %12161 = vmatprep.mubr.msk.f32.mxu0 %vm13069_vm1, %v13068_v8 }
0x2d7b   :  { %12157 = vmatmul.mubr.msk.f32.vlgmr.msra.gmra.mrb[72].mxu1 %vm253_vm2, %v6060_v29 }
0x2d7c   :  { %12166 = vmatprep.mubr.msk.f32.mxu1 %vm13069_vm1, %v13068_v8 }
0x2e46   :  { %v14018_v15 = vpop.f32.mrb[54].mxu0 }
0x2e47   :  { %v12143_v32 = vpop.f32.mrb[55].mxu0 }
0x2e4a   :  { %v14020_v58 = vpop.f32.mrb[70].mxu1  ;;  %v6055_v63 = vpop.f32.mrb[56].mxu0 }
0x2e4b   :  { %v12148_v0 = vpop.f32.mrb[71].mxu1  ;;  %v12153_v30 = vpop.f32.mrb[57].mxu0  ;;  %v6137_v1 = vsel %vm253_vm2, %v6055_v63, -inf }
0x2e4c   :  { %6138 = vmax.xlane.f32.xlu0 %v6137_v1 }
0x2e4e   :  { %v6133_v47 = vpop.f32.mrb[72].mxu1 }
0x2e4f   :  { %v12158_v2 = vpop.f32.mrb[73].mxu1  ;;  %v6140_v3 = vsel %vm253_vm2, %v6133_v47, -inf }
0x2e50   :  { %6141 = vmax.xlane.f32.xlu1 %v6140_v3 }
0x2e61   :  { %6165 = vrot.lane.b32.xlu1 %v13963_v45, %s13072_s28 }
0x2e65   :  { %6319 = vrot.lane.b32.xlu1 %v13963_v45, %s13075_s7 }
0x2e69   :  { %6397 = vrot.lane.b32.xlu1 %v13961_v14, %s13075_s7 }
0x2e6d   :  { %6395 = vrot.lane.b32.xlu1 %v13977_v22, %s13075_s7 }
0x2ed9   :  { %v6139_v55 = vpop.xlane.xlu0 %6138 }
0x2eda   :  { %v6143_v4 = vsub.f32 %v6055_v63, %v6139_v55 }
0x2edc   :  { %v6145_v31 = vmul.f32 1.442695, %v6143_v4 }
0x2edd   :  { %v6142_v10 = vpop.xlane.xlu1 %6141 }
0x2ede   :  { %12900 = vpow2.f32 %v6145_v31  ;;  %v6144_v11 = vsub.f32 %v6133_v47, %v6142_v10 }
0x2ee0   :  { %v6147_v57 = vmul.f32 1.442695, %v6144_v11 }
0x2ee1   :  { %v6166_v19 = vpop.permute.xlu1 %6165 }
0x2ee2   :  { %12902 = vpow2.f32 %v6147_v57  ;;  %12160 = vmatpush3.msra.mxu0 %v6166_v19 }
0x2ee3   :  { %12169 = vmatprep.subr.mxu0 %v13068_v8 }
0x2ee5   :  { %v6320_v51 = vpop.permute.xlu1 %6319 }
0x2ee8   :  { %v12901_v52 = vpop.eup %12900 }
0x2ee9   :  { %v6149_v16 = vsel %vm253_vm2, %v12901_v52, 0.0  ;;  %v6398_v38 = vpop.permute.xlu1 %6397 }
0x2eea   :  { %6150 = vadd.xlane.f32.xlu0 %v6149_v16 }
0x2eec   :  { %v12903_v20 = vpop.eup %12902 }
0x2eed   :  { %v6152_v18 = vsel %vm253_vm2, %v12903_v20, 0.0  ;;  %v6396_v49 = vpop.permute.xlu1 %6395 }
0x2eee   :  { %6153 = vadd.xlane.f32.xlu0 %v6152_v18 }
0x2f04   :  { %6241 = vrot.lane.b32.xlu0 %v13961_v14, %s13072_s28 }
0x2f08   :  { %6317 = vrot.lane.b32.xlu0 %v13969_v21, %s13075_s7 }
0x2f77   :  { %v6151_v23 = vpop.xlane.xlu0 %6150 }
0x2f78   :  { %12904 = vrcp.f32 %v6151_v23 }
0x2f7b   :  { %v6154_v24 = vpop.xlane.xlu0 %6153 }
0x2f7c   :  { %12906 = vrcp.f32 %v6154_v24 }
0x2f7f   :  { %v6242_v5 = vpop.permute.xlu0 %6241 }
0x2f80   :  { %12165 = vmatpush3.msra.mxu1 %v6242_v5 }
0x2f81   :  { %12174 = vmatprep.subr.mxu1 %v13068_v8 }
0x2f82   :  { %v12905_v34 = vpop.eup %12904 }
0x2f83   :  { %v6157_v26 = vmul.f32 %v12905_v34, %v6151_v23  ;;  %v6318_v56 = vpop.permute.xlu0 %6317 }
0x2f85   :  { %v6159_v35 = vsub.f32 2.0, %v6157_v26 }
0x2f86   :  { %v12907_v28 = vpop.eup %12906 }
0x2f87   :  { %v6161_v50 = vmul.f32 %v12905_v34, %v6159_v35  ;;  %v6158_v12 = vmul.f32 %v12907_v28, %v6154_v24 }
0x2f89   :  { %v6163_v33 = vmul.f32 %v12901_v52, %v6161_v50  ;;  %v6160_v36 = vsub.f32 2.0, %v6158_v12 }
0x2f8b   :  { %v6162_v37 = vmul.f32 %v12907_v28, %v6160_v36  ;;  %12162 = vmatmul.mubr.msk.f32.vlgmr.msra.gmra.mrb[58].mxu0 %vm253_vm2, %v6163_v33 }
0x2f8c   :  { %12170 = vmatpush3.xpose.msk.msra.mxu0 %vm253_vm2, %v6320_v51  ;;  %12171 = vmatprep.mubr.msk.f32.mxu0 %vm13069_vm1, %v13068_v8 }
0x2f8d   :  { %v6164_v39 = vmul.f32 %v12903_v20, %v6162_v37  ;;  %12179 = vmatprep.subr.mxu0 %v13068_v8 }
0x2f8f   :  { %12167 = vmatmul.mubr.msk.f32.vlgmr.msra.gmra.mrb[74].mxu1 %vm253_vm2, %v6164_v39  ;;  %12172 = vmatmul.mubr.msk.f32.vlgmr.msra.gmra.mrb[60].mxu0 %vm253_vm2, %v6318_v56 }
0x2f90   :  { %12175 = vmatpush3.xpose.msk.msra.mxu1 %vm253_vm2, %v6398_v38  ;;  %12176 = vmatprep.mubr.msk.f32.mxu1 %vm13069_vm1, %v13068_v8 }
0x2f91   :  { %12184 = vmatprep.subr.mxu1 %v13068_v8  ;;  %12181 = vmatprep.mubr.msk.f32.mxu0 %vm13069_vm1, %v13068_v8 }
0x2f93   :  { %12177 = vmatmul.mubr.msk.f32.vlgmr.msra.gmra.mrb[76].mxu1 %vm253_vm2, %v6396_v49 }
0x2f94   :  { %12186 = vmatprep.mubr.msk.f32.mxu1 %vm13069_vm1, %v13068_v8 }
0x305e   :  { %v14056_v40 = vpop.f32.mrb[58].mxu0 }
0x305f   :  { %v12163_v25 = vpop.f32.mrb[59].mxu0 }
0x3062   :  { %v14058_v41 = vpop.f32.mrb[74].mxu1  ;;  %v6391_v43 = vpop.f32.mrb[60].mxu0 }
0x3063   :  { %v12168_v44 = vpop.f32.mrb[75].mxu1  ;;  %v12173_v46 = vpop.f32.mrb[61].mxu0  ;;  %v6473_v48 = vsel %vm253_vm2, %v6391_v43, -inf }
0x3064   :  { %6474 = vmax.xlane.f32.xlu0 %v6473_v48 }
0x3066   :  { %v6469_v27 = vpop.f32.mrb[76].mxu1 }
0x3067   :  { %v12178_v53 = vpop.f32.mrb[77].mxu1  ;;  %v6476_v54 = vsel %vm253_vm2, %v6469_v27, -inf }
0x3068   :  { %6477 = vmax.xlane.f32.xlu1 %v6476_v54 }
0x3079   :  { %6501 = vrot.lane.b32.xlu1 %v13963_v45, %s13076_s10 }
0x307d   :  { %6655 = vrot.lane.b32.xlu1 %v13963_v45, %s14622_s16 }
0x3081   :  { %6733 = vrot.lane.b32.xlu1 %v13961_v14, %s14622_s16 }
0x3085   :  { %6731 = vrot.lane.b32.xlu1 %v13977_v22, %s14622_s16 }
0x30f1   :  { %v6475_v17 = vpop.xlane.xlu0 %6474 }
0x30f2   :  { %v6479_v42 = vsub.f32 %v6391_v43, %v6475_v17 }
0x30f4   :  { %v6481_v60 = vmul.f32 1.442695, %v6479_v42 }
0x30f5   :  { %v6478_v61 = vpop.xlane.xlu1 %6477 }
0x30f6   :  { %12908 = vpow2.f32 %v6481_v60  ;;  %v6480_v62 = vsub.f32 %v6469_v27, %v6478_v61 }
0x30f8   :  { %v6483_v59 = vmul.f32 1.442695, %v6480_v62 }
0x30f9   :  { %v6502_v29 = vpop.permute.xlu1 %6501 }
0x30fa   :  { %12910 = vpow2.f32 %v6483_v59  ;;  %12180 = vmatpush3.msra.mxu0 %v6502_v29  ;;  %v7019_v59 = vld [vmem:[%s14655_s30] sm:$0xff]  ;;  %v7020_v29 = vld [vmem:[%s14655_s30 + $0x8] sm:$0xff] }
0x30fb   :  { %12189 = vmatprep.subr.mxu0 %v13068_v8 }
0x30fd   :  { %v6656_v31 = vpop.permute.xlu1 %6655 }
0x3100   :  { %v12909_v32 = vpop.eup %12908 }
0x3101   :  { %v6485_v63 = vsel %vm253_vm2, %v12909_v32, 0.0 }
0x3102   :  { %6486 = vadd.xlane.f32.xlu0 %v6485_v63  ;;  %v7021_v63 = vld [vmem:[%s14655_s30 + $0x10] sm:$0xff] }
0x3104   :  { %v12911_v0 = vpop.eup %12910 }
0x3105   :  { %v6488_v30 = vsel %vm253_vm2, %v12911_v0, 0.0 }
0x3106   :  { %6489 = vadd.xlane.f32.xlu0 %v6488_v30 }
0x311c   :  { %6577 = vrot.lane.b32.xlu0 %v13961_v14, %s13076_s10 }
0x3120   :  { %6653 = vrot.lane.b32.xlu0 %v13969_v21, %s14622_s16  ;;  %v6734_v21 = vpop.permute.xlu1 %6733  ;;  %s14662_s16 = sld [smem:[#allocation22_spill]] }
0x3124   :  { %v6732_v18 = vpop.permute.xlu1 %6731 }
0x318f   :  { %v6487_v22 = vpop.xlane.xlu0 %6486 }
0x3190   :  { %12912 = vrcp.f32 %v6487_v22 }
0x3193   :  { %v6490_v1 = vpop.xlane.xlu0 %6489 }
0x3194   :  { %12914 = vrcp.f32 %v6490_v1 }
0x3197   :  { %v6578_v47 = vpop.permute.xlu0 %6577 }
0x3198   :  { %12185 = vmatpush3.msra.mxu1 %v6578_v47 }
0x3199   :  { %12194 = vmatprep.subr.mxu1 %v13068_v8 }
0x319a   :  { %v12913_v2 = vpop.eup %12912 }
0x319b   :  { %v6493_v3 = vmul.f32 %v12913_v2, %v6487_v22  ;;  %v6654_v20 = vpop.permute.xlu0 %6653 }
0x319d   :  { %v6495_v55 = vsub.f32 2.0, %v6493_v3 }
0x319e   :  { %v12915_v4 = vpop.eup %12914 }
0x319f   :  { %v6497_v10 = vmul.f32 %v12913_v2, %v6495_v55  ;;  %v6494_v11 = vmul.f32 %v12915_v4, %v6490_v1 }
0x31a1   :  { %v6499_v57 = vmul.f32 %v12909_v32, %v6497_v10  ;;  %v6496_v19 = vsub.f32 2.0, %v6494_v11  ;;  %v12618_v32 = vpack.c.bf16 %v7020_v29, %v7019_v59 }
0x31a3   :  { %v6498_v52 = vmul.f32 %v12915_v4, %v6496_v19  ;;  %12182 = vmatmul.mubr.msk.f32.vlgmr.msra.gmra.mrb[62].mxu0 %vm253_vm2, %v6499_v57 }
0x31a4   :  { %12190 = vmatpush3.xpose.msk.msra.mxu0 %vm253_vm2, %v6656_v31  ;;  %12191 = vmatprep.mubr.msk.f32.mxu0 %vm13069_vm1, %v13068_v8 }
0x31a5   :  { %v6500_v16 = vmul.f32 %v12911_v0, %v6498_v52  ;;  %12199 = vmatprep.subr.mxu0 %v13068_v8  ;;  %v7022_v0 = vld [vmem:[%s14655_s30 + $0x18] sm:$0xff] }
0x31a6   :  { %v12622_v30 = vpack.c.bf16 %v7022_v0, %v7021_v63 }
0x31a7   :  { %12187 = vmatmul.mubr.msk.f32.vlgmr.msra.gmra.mrb[78].mxu1 %vm253_vm2, %v6500_v16  ;;  %12192 = vmatmul.mubr.msk.f32.vlgmr.msra.gmra.mrb[64].mxu0 %vm253_vm2, %v6654_v20 }
0x31a8   :  { %12195 = vmatpush3.xpose.msk.msra.mxu1 %vm253_vm2, %v6734_v21  ;;  %12196 = vmatprep.mubr.msk.f32.mxu1 %vm13069_vm1, %v13068_v8 }
0x31a9   :  { %12204 = vmatprep.subr.mxu1 %v13068_v8  ;;  %12201 = vmatprep.mubr.msk.f32.mxu0 %vm13069_vm1, %v13068_v8 }
0x31ab   :  { %12197 = vmatmul.mubr.msk.f32.vlgmr.msra.gmra.mrb[80].mxu1 %vm253_vm2, %v6732_v18  ;;  %v11259_v18 = vld [vmem:[%s14656_s6] ss:$0 sm:$0xff] }
0x31ac   :  { %12206 = vmatprep.mubr.msk.f32.mxu1 %vm13069_vm1, %v13068_v8 }
0x3276   :  { %v6573_v23 = vpop.f32.mrb[62].mxu0 }
0x3277   :  { %v12183_v24 = vpop.f32.mrb[63].mxu0 }
0x327a   :  { %v6649_v5 = vpop.f32.mrb[78].mxu1  ;;  %v6727_v34 = vpop.f32.mrb[64].mxu0 }
0x327b   :  { %v12188_v26 = vpop.f32.mrb[79].mxu1  ;;  %v12193_v35 = vpop.f32.mrb[65].mxu0  ;;  %v6809_v28 = vsel %vm253_vm2, %v6727_v34, -inf }
0x327c   :  { %6810 = vmax.xlane.f32.xlu0 %v6809_v28 }
0x327e   :  { %v6805_v51 = vpop.f32.mrb[80].mxu1 }
0x327f   :  { %v12198_v50 = vpop.f32.mrb[81].mxu1  ;;  %v6812_v12 = vsel %vm253_vm2, %v6805_v51, -inf }
0x3280   :  { %6813 = vmax.xlane.f32.xlu1 %v6812_v12 }
0x3291   :  { %6837 = vrot.lane.b32.xlu1 %v13963_v45, %s14624_s15 }
0x3295   :  { %6991 = vrot.lane.b32.xlu1 %v14056_v40, %s14618_s22 }
0x3299   :  { %6993 = vrot.lane.b32.xlu1 %v14058_v41, %s14618_s22  ;;  %s14660_s22 = sld [smem:[#allocation18_spill]] }
0x329d   :  { %7001 = vrot.lane.b32.xlu1 %v6649_v5, %s14616_s23 }
0x329f   :  { %v11263_v0 = vld [vmem:[%s14660_s22] ss:$0 sm:$0xff] }
0x3309   :  { %v6811_v33 = vpop.xlane.xlu0 %6810 }
0x330a   :  { %v6815_v36 = vsub.f32 %v6727_v34, %v6811_v33 }
0x330c   :  { %v6817_v37 = vmul.f32 1.442695, %v6815_v36 }
0x330d   :  { %v6814_v38 = vpop.xlane.xlu1 %6813 }
0x330e   :  { %12916 = vpow2.f32 %v6817_v37  ;;  %v6816_v39 = vsub.f32 %v6805_v51, %v6814_v38 }
0x3310   :  { %v6819_v56 = vmul.f32 1.442695, %v6816_v39  ;;  %v7157_v39 = vld [vmem:[%s14657_s13] sm:$0xff] }
0x3311   :  { %v6838_v49 = vpop.permute.xlu1 %6837 }
0x3312   :  { %12918 = vpow2.f32 %v6819_v56  ;;  %12200 = vmatpush3.msra.mxu0 %v6838_v49  ;;  %v7158_v56 = vld [vmem:[%s14657_s13 + $0x8] sm:$0xff]  ;;  %v7159_v49 = vld [vmem:[%s14657_s13 + $0x10] sm:$0xff] }
0x3313   :  { %12619 = vmatprep.subr.bf16.mxu0 %v12618_v32 }
0x3315   :  { %v6992_v3 = vpop.permute.xlu1 %6991 }
0x3316   :  { %v7013_v31 = vsel %vm253_vm2, %v14018_v15, %v6992_v3 }
0x3318   :  { %v12917_v25 = vpop.eup %12916 }
0x3319   :  { %v6821_v45 = vsel %vm253_vm2, %v12917_v25, 0.0  ;;  %v6994_v55 = vpop.permute.xlu1 %6993 }
0x331a   :  { %6822 = vadd.xlane.f32.xlu0 %v6821_v45  ;;  %v7014_v52 = vsel %vm253_vm2, %v14020_v58, %v6994_v55  ;;  %v7160_v45 = vld [vmem:[%s14657_s13 + $0x18] sm:$0xff] }
0x331c   :  { %v12919_v40 = vpop.eup %12918 }
0x331d   :  { %v6824_v43 = vsel %vm253_vm2, %v12919_v40, 0.0  ;;  %v7002_v10 = vpop.permute.xlu1 %7001 }
0x331e   :  { %6825 = vadd.xlane.f32.xlu0 %v6824_v43  ;;  %v7016_v21 = vsel %vm1621_vm4, %v7014_v52, %v7002_v10  ;;  %v11264_v10 = vld [vmem:[%s14661_s18] ss:$0 sm:$0xff] }
0x3334   :  { %6913 = vrot.lane.b32.xlu0 %v13961_v14, %s14624_s15  ;;  %s14663_s15 = sld [smem:[#allocation23_spill]] }
0x3338   :  { %6999 = vrot.lane.b32.xlu0 %v6573_v23, %s14616_s23  ;;  %s14659_s23 = sld [smem:[#allocation17_spill]] }
0x33a7   :  { %v6823_v41 = vpop.xlane.xlu0 %6822 }
0x33a8   :  { %12920 = vrcp.f32 %v6823_v41 }
0x33ab   :  { %v6826_v44 = vpop.xlane.xlu0 %6825 }
0x33ac   :  { %12922 = vrcp.f32 %v6826_v44 }
0x33af   :  { %v6914_v46 = vpop.permute.xlu0 %6913 }
0x33b0   :  { %12205 = vmatpush3.msra.mxu1 %v6914_v46 }
0x33b2   :  { %v12921_v48 = vpop.eup %12920 }
0x33b3   :  { %v6829_v27 = vmul.f32 %v12921_v48, %v6823_v41  ;;  %v7000_v4 = vpop.permute.xlu0 %6999 }
0x33b4   :  { %v7015_v11 = vsel %vm1621_vm4, %v7013_v31, %v7000_v4 }
0x33b5   :  { %v6831_v53 = vsub.f32 2.0, %v6829_v27 }
0x33b6   :  { %v12923_v54 = vpop.eup %12922 }
0x33b7   :  { %v6833_v17 = vmul.f32 %v12921_v48, %v6831_v53  ;;  %v6830_v42 = vmul.f32 %v12923_v54, %v6826_v44 }
0x33b9   :  { %v6835_v60 = vmul.f32 %v12917_v25, %v6833_v17  ;;  %v6832_v14 = vsub.f32 2.0, %v6830_v42  ;;  %v12626_v25 = vpack.c.bf16 %v7158_v56, %v7157_v39  ;;  %v11273_v39 = vld [vmem:[%s13164_s12 + $0x28] sm:$0xff]  ;;  %v11274_v56 = vld [vmem:[%s13164_s12 + $0x30] sm:$0xff] }
0x33bb   :  { %v6834_v61 = vmul.f32 %v12923_v54, %v6832_v14  ;;  %12202 = vmatmul.mubr.msk.f32.vlgmr.msra.gmra.mrb[66].mxu0 %vm253_vm2, %v6835_v60  ;;  %12627 = vmatprep.subr.bf16.mxu1 %v12626_v25 }
0x33bc   :  { %12621 = vmatpush3.bf16.msra.mxu0 %v12618_v32  ;;  %v11262_v32 = vld [vmem:[%s14659_s23] ss:$0 sm:$0xff] }
0x33bd   :  { %v6836_v62 = vmul.f32 %v12919_v40, %v6834_v61  ;;  %12623 = vmatprep.subr.bf16.mxu0 %v12622_v30  ;;  %v12630_v40 = vpack.c.bf16 %v7160_v45, %v7159_v49 }
0x33bf   :  { %12207 = vmatmul.mubr.msk.f32.vlgmr.msra.gmra.mrb[82].mxu1 %vm253_vm2, %v6836_v62 }
0x33c0   :  { %12625 = vmatpush3.bf16.msra.mxu0 %v12622_v30  ;;  %12629 = vmatpush3.bf16.msra.mxu1 %v12626_v25  ;;  %v11275_v25 = vld [vmem:[%s13164_s12 + $0x38] sm:$0xff] }
0x33c1   :  { %12631 = vmatprep.subr.bf16.mxu1 %v12630_v40  ;;  %v12654_v45 = vpack.c.bf16 %v11275_v25, %v11274_v56 }
0x33c4   :  { %12633 = vmatpush3.bf16.msra.mxu1 %v12630_v40 }
0x348e   :  { %v6909_v22 = vpop.f32.mrb[66].mxu0 }
0x348f   :  { %7007 = vrot.lane.b32.xlu0 %v6909_v22, %s14614_s26  ;;  %v12203_v1 = vpop.f32.mrb[67].mxu0 }
0x3492   :  { %v6985_v47 = vpop.f32.mrb[82].mxu1 }
0x3493   :  { %7009 = vrot.lane.b32.xlu1 %v6985_v47, %s14614_s26  ;;  %v12208_v2 = vpop.f32.mrb[83].mxu1  ;;  %s14658_s26 = sld [smem:[#allocation21_spill]] }
0x3499   :  { %v7251_v43 = vld [vmem:[%s14658_s26] sm:$0xff]  ;;  %v7252_v41 = vld [vmem:[%s14658_s26 + $0x8] sm:$0xff]  ;;  %v7253_v44 = vld [vmem:[%s14658_s26 + $0x10] sm:$0xff] }
0x349a   :  { %v12634_v46 = vpack.c.bf16 %v7252_v41, %v7251_v43  ;;  %v7254_v48 = vld [vmem:[%s14658_s26 + $0x18] sm:$0xff]  ;;  %v7255_v53 = vld [vmem:[%s14658_s26 + $0x20] sm:$0xff]  ;;  %v7256_v54 = vld [vmem:[%s14658_s26 + $0x28] sm:$0xff] }
0x349b   :  { %v12638_v27 = vpack.c.bf16 %v7254_v48, %v7253_v44  ;;  %v12642_v17 = vpack.c.bf16 %v7256_v54, %v7255_v53  ;;  %v7257_v55 = vld [vmem:[%s14658_s26 + $0x30] sm:$0xff]  ;;  %v7258_v4 = vld [vmem:[%s14658_s26 + $0x38] sm:$0xff]  ;;  %v11270_v53 = vld [vmem:[%s14663_s15] ss:$0 sm:$0xff] }
0x349c   :  { %12635 = vmatprep.subr.bf16.mxu0 %v12634_v46  ;;  %v12646_v31 = vpack.c.bf16 %v7258_v4, %v7257_v55 }
0x3501   :  { %v7008_v57 = vpop.permute.xlu0 %7007 }
0x3502   :  { %v7017_v19 = vsel %vm1624_vm3, %v7015_v11, %v7008_v57 }
0x3503   :  { %12217 = vmatprep.mubr.msk.f32.mxu0 %vm166_vm0, %v7017_v19 }
0x3505   :  { %v7010_v16 = vpop.permute.xlu1 %7009 }
0x3506   :  { %v7018_v20 = vsel %vm1624_vm3, %v7016_v21, %v7010_v16 }
0x3507   :  { %12218 = vmatmul.mubr.msk.f32.vlgmr.msra.gmra.mrb[68].mxu0 %vm166_vm0, %v7018_v20  ;;  %v11267_v20 = vld [vmem:[%s14662_s16] ss:$0 sm:$0xff] }
0x3508   :  { %12637 = vmatpush3.bf16.msra.mxu0 %v12634_v46 }
0x3509   :  { %12639 = vmatprep.subr.bf16.mxu0 %v12638_v27 }
0x350c   :  { %12641 = vmatpush3.bf16.msra.mxu0 %v12638_v27 }
0x350d   :  { %12643 = vmatprep.subr.bf16.mxu0 %v12642_v17 }
0x3510   :  { %12645 = vmatpush3.bf16.msra.mxu0 %v12642_v17 }
0x3511   :  { %12647 = vmatprep.subr.bf16.mxu0 %v12646_v31 }
0x3514   :  { %12649 = vmatpush3.bf16.msra.mxu0 %v12646_v31 }
0x3515   :  { %12271 = vmatprep.subr.mxu0 %v13068_v8 }
0x35da   :  { %v12219_v15 = vpop.f32.mrb[68].mxu0 }
0x35db   :  { %v7108_v23 = vadd.f32 %v12219_v15, %v11259_v18  ;;  %v7102_v24 = vpop.f32.mrb[69].mxu0 }
0x35dc   :  { %v7103_v5 = vadd.f32 %v11259_v18, %v7102_v24 }
0x35dd   :  { %v7114_v34 = vadd.f32 %v7108_v23, %v13954_v9 }
0x35de   :  { %v7113_v26 = vadd.f32 %v7103_v5, %v13950_v6 }
0x35df   :  { %v7118_v35 = vsel %vm166_vm0, %v7114_v34, 0.0 }
0x35e0   :  { %7119 = vadd.xlane.f32.xlu1 %v7118_v35  ;;  %v7115_v58 = vsel %vm166_vm0, %v7113_v26, 0.0 }
0x35e1   :  { %7116 = vadd.xlane.f32.xlu0 %v7115_v58 }
0x366d   :  { %v7120_v28 = vpop.xlane.xlu1 %7119 }
0x366e   :  { %v7122_v51 = vmul.f32 0.03125, %v7120_v28  ;;  %v7117_v50 = vpop.xlane.xlu0 %7116 }
0x366f   :  { %v7121_v12 = vmul.f32 0.03125, %v7117_v50 }
0x3670   :  { %v7124_v33 = vsub.f32 %v7114_v34, %v7122_v51 }
0x3671   :  { %v7123_v36 = vsub.f32 %v7113_v26, %v7121_v12 }
0x3672   :  { %v7126_v9 = vmul.f32 %v7124_v33, %v7124_v33 }
0x3673   :  { %v7125_v37 = vmul.f32 %v7123_v36, %v7123_v36 }
0x3674   :  { %v7130_v38 = vsel %vm166_vm0, %v7126_v9, 0.0 }
0x3675   :  { %v7127_v6 = vsel %vm166_vm0, %v7125_v37, 0.0 }
0x3676   :  { %7128 = vadd.xlane.f32.xlu0 %v7127_v6 }
0x367a   :  { %7131 = vadd.xlane.f32.xlu0 %v7130_v38  ;;  %v11272_v38 = vld [vmem:[%s13164_s12 + $0x20] sm:$0xff]  ;;  %s14664_s12 = smov 72  }
0x367b   :  { %v12650_v49 = vpack.c.bf16 %v11273_v39, %v11272_v38 }
0x367d   :  { %12651 = vmatprep.subr.bf16.mxu1 %v12650_v49 }
0x3703   :  { %v7129_v42 = vpop.xlane.xlu0 %7128 }
0x3704   :  { %v7133_v60 = vmul.f32 0.03125, %v7129_v42 }
0x3706   :  { %v7135_v14 = vadd.f32 1e-05, %v7133_v60  ;;  %v11271_v60 = vld [vmem:[%s13259_s4] ss:$0 sm:$0xff] }
0x3707   :  { %v7132_v61 = vpop.xlane.xlu0 %7131 }
0x3708   :  { %12924 = vrsqrt.f32 %v7135_v14  ;;  %v7134_v62 = vmul.f32 0.03125, %v7132_v61 }
0x370a   :  { %v7136_v59 = vadd.f32 1e-05, %v7134_v62 }
0x370c   :  { %12926 = vrsqrt.f32 %v7136_v59 }
0x3712   :  { %v12925_v29 = vpop.eup %12924 }
0x3713   :  { %v7139_v63 = vmul.f32 %v12925_v29, %v7123_v36  ;;  %v11277_v29 = vld [vmem:[%s14646_s17 + $0x1] ss:$0 sm:$0xff]  ;;  %s14668_s17 = smov 16  }
0x3715   :  { %v7147_v30 = vmul.f32 %v11262_v32, %v7139_v63 }
0x3716   :  { %v12927_v22 = vpop.eup %12926 }
0x3717   :  { %v7140_v1 = vmul.f32 %v12927_v22, %v7124_v33  ;;  %v7155_v47 = vadd.f32 %v11263_v0, %v7147_v30 }
0x3719   :  { %v7148_v2 = vmul.f32 %v11262_v32, %v7140_v1  ;;  %12228 = vmatprep.mubr.msk.f32.mxu1 %vm166_vm0, %v7155_v47 }
0x371b   :  { %v7156_v3 = vadd.f32 %v11263_v0, %v7148_v2 }
0x371d   :  { %12229 = vmatmul.mubr.msk.f32.vlgmr.msra.gmra.mrb[84].mxu1 %vm166_vm0, %v7156_v3 }
0x371e   :  { %12653 = vmatpush3.bf16.msra.mxu1 %v12650_v49 }
0x371f   :  { %12655 = vmatprep.subr.bf16.mxu1 %v12654_v45 }
0x3722   :  { %12657 = vmatpush3.bf16.msra.mxu1 %v12654_v45 }
0x3723   :  { %12261 = vmatprep.subr.mxu1 %v13068_v8 }
0x37f0   :  { %v12230_v11 = vpop.f32.mrb[84].mxu1 }
0x37f1   :  { %v7246_v57 = vadd.f32 %v12230_v11, %v11264_v10  ;;  %v7240_v19 = vpop.f32.mrb[85].mxu1 }
0x37f2   :  { %v7241_v52 = vadd.f32 %v11264_v10, %v7240_v19 }
0x37f3   :  { %v7250_v16 = vmax.f32 %v7246_v57, 0.0 }
0x37f4   :  { %v7249_v21 = vmax.f32 %v7241_v52, 0.0 }
0x37f6   :  { %12247 = vmatprep.mubr.msk.f32.mxu0 %vm1875_vm5, %v7249_v21 }
0x37f7   :  { %12248 = vmatmul.mubr.msk.f32.vlgmr.msra.gmra.mrb[70].mxu0 %vm1875_vm5, %v7250_v16 }
0x37f8   :  { %12273 = vmatprep.mubr.msk.f32.mxu0 %vm13069_vm1, %v13068_v8 }
0x38ca   :  { %v12249_v18 = vpop.f32.mrb[70].mxu0 }
0x38cb   :  { %v7344_v15 = vadd.f32 %v12249_v18, %v11267_v20  ;;  %v7338_v23 = vpop.f32.mrb[71].mxu0 }
0x38cc   :  { %v7339_v24 = vadd.f32 %v11267_v20, %v7338_v23 }
0x38cd   :  { %v7350_v5 = vadd.f32 %v7344_v15, %v7156_v3 }
0x38ce   :  { %v7349_v34 = vadd.f32 %v7339_v24, %v7155_v47 }
0x38cf   :  { %v7354_v26 = vsel %vm166_vm0, %v7350_v5, 0.0 }
0x38d0   :  { %7355 = vadd.xlane.f32.xlu0 %v7354_v26  ;;  %v7351_v35 = vsel %vm166_vm0, %v7349_v34, 0.0 }
0x38d1   :  { %7352 = vadd.xlane.f32.xlu1 %v7351_v35 }
0x395d   :  { %v7356_v58 = vpop.xlane.xlu0 %7355 }
0x395e   :  { %v7358_v28 = vmul.f32 0.03125, %v7356_v58  ;;  %v7353_v51 = vpop.xlane.xlu1 %7352 }
0x395f   :  { %v7357_v50 = vmul.f32 0.03125, %v7353_v51 }
0x3960   :  { %v7360_v12 = vsub.f32 %v7350_v5, %v7358_v28 }
0x3961   :  { %v7359_v33 = vsub.f32 %v7349_v34, %v7357_v50 }
0x3962   :  { %v7362_v36 = vmul.f32 %v7360_v12, %v7360_v12 }
0x3963   :  { %v7361_v37 = vmul.f32 %v7359_v33, %v7359_v33 }
0x3964   :  { %v7366_v6 = vsel %vm166_vm0, %v7362_v36, 0.0 }
0x3965   :  { %7367 = vadd.xlane.f32.xlu0 %v7366_v6  ;;  %v7363_v9 = vsel %vm166_vm0, %v7361_v37, 0.0 }
0x3966   :  { %7364 = vadd.xlane.f32.xlu1 %v7363_v9 }
0x39f2   :  { %v7368_v40 = vpop.xlane.xlu0 %7367 }
0x39f3   :  { %v7370_v43 = vmul.f32 0.03125, %v7368_v40  ;;  %v7365_v41 = vpop.xlane.xlu1 %7364 }
0x39f4   :  { %v7369_v44 = vmul.f32 0.03125, %v7365_v41 }
0x39f5   :  { %v7372_v46 = vadd.f32 1e-05, %v7370_v43 }
0x39f6   :  { %v7371_v48 = vadd.f32 1e-05, %v7369_v44 }
0x39f7   :  { %12928 = vrsqrt.f32 %v7372_v46 }
0x39f8   :  { %12930 = vrsqrt.f32 %v7371_v48 }
0x3a01   :  { %v12929_v27 = vpop.eup %12928 }
0x3a02   :  { %v12931_v54 = vpop.eup %12930  ;;  %v7376_v17 = vmul.f32 %v12929_v27, %v7360_v12 }
0x3a03   :  { %v7375_v42 = vmul.f32 %v12931_v54, %v7359_v33 }
0x3a04   :  { %v7384_v14 = vmul.f32 %v11270_v53, %v7376_v17 }
0x3a05   :  { %v7383_v61 = vmul.f32 %v11270_v53, %v7375_v42 }
0x3a06   :  { %v14169_v59 = vadd.f32 %v11271_v60, %v7384_v14 }
0x3a07   :  { %v14167_v62 = vadd.f32 %v11271_v60, %v7383_v61 }
0x3a09   :  { %12258 = vmatprep.mubr.msk.f32.mxu1 %vm166_vm0, %v14167_v62 }
0x3a0a   :  { %12259 = vmatmul.mubr.msk.f32.vlgmr.msra.gmra.mrb[86].mxu1 %vm166_vm0, %v14169_v59 }
0x3a0b   :  { %12263 = vmatprep.mubr.msk.f32.mxu1 %vm13069_vm1, %v13068_v8 }
0x3add   :  { %v12260_v32 = vpop.f32.mrb[86].mxu1 }
0x3ade   :  { %v14178_v63 = vadd.f32 %v12260_v32, %v11277_v29  ;;  %v7478_v0 = vpop.f32.mrb[87].mxu1 }
0x3adf   :  { %v14180_v30 = vadd.f32 %v11277_v29, %v7478_v0 }
0x3ae0   :  { %7568 = vrot.lane.b32.xlu0 %v14178_v63, %s13070_s0  ;;  %v14197_v2 = vmul.f32 0.35355338, %v14178_v63 }
0x3ae1   :  { %7490 = vrot.lane.b32.xlu1 %v14180_v30, %s13070_s0  ;;  %v14188_v1 = vmul.f32 0.35355338, %v14180_v30 }
0x3b52   :  { %v7569_v47 = vpop.permute.xlu0 %7568 }
0x3b53   :  { %v7491_v22 = vpop.permute.xlu1 %7490 }
0x3b54   :  { %12262 = vmatpush3.xpose.msk.msra.mxu1 %vm253_vm2, %v7491_v22 }
0x3b55   :  { %12266 = vmatprep.subr.mxu1 %v13068_v8 }
0x3b57   :  { %12264 = vmatmul.mubr.msk.f32.vlgmr.msra.gmra.mrb[88].mxu1 %vm253_vm2, %v14188_v1 }
0x3b58   :  { %12267 = vmatpush3.xpose.msk.msra.mxu1 %vm253_vm2, %v7569_v47  ;;  %12268 = vmatprep.mubr.msk.f32.mxu1 %vm13069_vm1, %v13068_v8 }
0x3b59   :  { %12276 = vmatprep.subr.mxu1 %v13068_v8 }
0x3b5b   :  { %12269 = vmatmul.mubr.msk.f32.vlgmr.msra.gmra.mrb[90].mxu1 %vm253_vm2, %v14197_v2 }
0x3b5c   :  { %12278 = vmatprep.mubr.msk.f32.mxu1 %vm13069_vm1, %v13068_v8 }
0x3c2a   :  { %v7563_v3 = vpop.f32.mrb[88].mxu1 }
0x3c2b   :  { %v12265_v55 = vpop.f32.mrb[89].mxu1  ;;  %v7645_v4 = vsel %vm253_vm2, %v7563_v3, -inf }
0x3c2c   :  { %7646 = vmax.xlane.f32.xlu1 %v7645_v4 }
0x3c2e   :  { %v7641_v31 = vpop.f32.mrb[90].mxu1 }
0x3c2f   :  { %v12270_v10 = vpop.f32.mrb[91].mxu1  ;;  %v7648_v11 = vsel %vm253_vm2, %v7641_v31, -inf }
0x3c30   :  { %7649 = vmax.xlane.f32.xlu0 %v7648_v11 }
0x3c3d   :  { %7673 = vrot.lane.b32.xlu1 %v14180_v30, %s13071_s5 }
0x3cb9   :  { %v7647_v57 = vpop.xlane.xlu1 %7646 }
0x3cba   :  { %v7651_v19 = vsub.f32 %v7563_v3, %v7647_v57 }
0x3cbc   :  { %v7653_v52 = vmul.f32 1.442695, %v7651_v19 }
0x3cbd   :  { %v7674_v21 = vpop.permute.xlu1 %7673  ;;  %v7650_v16 = vpop.xlane.xlu0 %7649 }
0x3cbe   :  { %12932 = vpow2.f32 %v7653_v52  ;;  %v7652_v20 = vsub.f32 %v7641_v31, %v7650_v16  ;;  %12272 = vmatpush3.msra.mxu0 %v7674_v21 }
0x3cbf   :  { %12281 = vmatprep.subr.mxu0 %v13068_v8 }
0x3cc0   :  { %v7655_v18 = vmul.f32 1.442695, %v7652_v20 }
0x3cc2   :  { %12934 = vpow2.f32 %v7655_v18 }
0x3cc8   :  { %v12933_v15 = vpop.eup %12932 }
0x3cc9   :  { %v7657_v23 = vsel %vm253_vm2, %v12933_v15, 0.0 }
0x3cca   :  { %7658 = vadd.xlane.f32.xlu1 %v7657_v23 }
0x3ccc   :  { %v12935_v24 = vpop.eup %12934 }
0x3ccd   :  { %v7660_v5 = vsel %vm253_vm2, %v12935_v24, 0.0 }
0x3cce   :  { %7661 = vadd.xlane.f32.xlu0 %v7660_v5 }
0x3cdb   :  { %7827 = vrot.lane.b32.xlu1 %v14180_v30, %s13072_s28 }
0x3cdf   :  { %7905 = vrot.lane.b32.xlu1 %v14178_v63, %s13072_s28 }
0x3ce3   :  { %7903 = vrot.lane.b32.xlu1 %v14197_v2, %s13073_s1 }
0x3ce4   :  { %7749 = vrot.lane.b32.xlu0 %v14178_v63, %s13071_s5  ;;  %s14665_s5 = smov 104  }
0x3ce8   :  { %7825 = vrot.lane.b32.xlu0 %v14188_v1, %s13073_s1 }
0x3d57   :  { %v7659_v34 = vpop.xlane.xlu1 %7658 }
0x3d58   :  { %12936 = vrcp.f32 %v7659_v34 }
0x3d5b   :  { %v7662_v26 = vpop.xlane.xlu0 %7661  ;;  %v7828_v12 = vpop.permute.xlu1 %7827 }
0x3d5c   :  { %12938 = vrcp.f32 %v7662_v26 }
0x3d5f   :  { %v7750_v35 = vpop.permute.xlu0 %7749  ;;  %v7906_v38 = vpop.permute.xlu1 %7905 }
0x3d60   :  { %12277 = vmatpush3.msra.mxu1 %v7750_v35 }
0x3d61   :  { %12286 = vmatprep.subr.mxu1 %v13068_v8 }
0x3d62   :  { %v12937_v58 = vpop.eup %12936 }
0x3d63   :  { %v7665_v28 = vmul.f32 %v12937_v58, %v7659_v34  ;;  %v7826_v56 = vpop.permute.xlu0 %7825  ;;  %v7904_v49 = vpop.permute.xlu1 %7903 }
0x3d65   :  { %v7667_v51 = vsub.f32 2.0, %v7665_v28 }
0x3d66   :  { %v12939_v50 = vpop.eup %12938 }
0x3d67   :  { %v7669_v33 = vmul.f32 %v12937_v58, %v7667_v51  ;;  %v7666_v36 = vmul.f32 %v12939_v50, %v7662_v26 }
0x3d69   :  { %v7671_v37 = vmul.f32 %v12933_v15, %v7669_v33  ;;  %v7668_v6 = vsub.f32 2.0, %v7666_v36 }
0x3d6b   :  { %v7670_v9 = vmul.f32 %v12939_v50, %v7668_v6  ;;  %12274 = vmatmul.mubr.msk.f32.vlgmr.msra.gmra.mrb[72].mxu0 %vm253_vm2, %v7671_v37 }
0x3d6c   :  { %12282 = vmatpush3.xpose.msk.msra.mxu0 %vm253_vm2, %v7828_v12  ;;  %12283 = vmatprep.mubr.msk.f32.mxu0 %vm13069_vm1, %v13068_v8 }
0x3d6d   :  { %v7672_v39 = vmul.f32 %v12935_v24, %v7670_v9  ;;  %12291 = vmatprep.subr.mxu0 %v13068_v8 }
0x3d6f   :  { %12279 = vmatmul.mubr.msk.f32.vlgmr.msra.gmra.mrb[92].mxu1 %vm253_vm2, %v7672_v39  ;;  %12284 = vmatmul.mubr.msk.f32.vlgmr.msra.gmra.mrb[74].mxu0 %vm253_vm2, %v7826_v56 }
0x3d70   :  { %12287 = vmatpush3.xpose.msk.msra.mxu1 %vm253_vm2, %v7906_v38  ;;  %12288 = vmatprep.mubr.msk.f32.mxu1 %vm13069_vm1, %v13068_v8 }
0x3d71   :  { %12296 = vmatprep.subr.mxu1 %v13068_v8  ;;  %12293 = vmatprep.mubr.msk.f32.mxu0 %vm13069_vm1, %v13068_v8 }
0x3d73   :  { %12289 = vmatmul.mubr.msk.f32.vlgmr.msra.gmra.mrb[94].mxu1 %vm253_vm2, %v7904_v49 }
0x3d74   :  { %12298 = vmatprep.mubr.msk.f32.mxu1 %vm13069_vm1, %v13068_v8 }
0x3e3e   :  { %v14238_v25 = vpop.f32.mrb[72].mxu0 }
0x3e3f   :  { %v12275_v45 = vpop.f32.mrb[73].mxu0 }
0x3e42   :  { %v14240_v40 = vpop.f32.mrb[92].mxu1  ;;  %v7899_v43 = vpop.f32.mrb[74].mxu0 }
0x3e43   :  { %v12280_v41 = vpop.f32.mrb[93].mxu1  ;;  %v12285_v44 = vpop.f32.mrb[75].mxu0  ;;  %v7981_v46 = vsel %vm253_vm2, %v7899_v43, -inf }
0x3e44   :  { %7982 = vmax.xlane.f32.xlu0 %v7981_v46 }
0x3e46   :  { %v7977_v48 = vpop.f32.mrb[94].mxu1 }
0x3e47   :  { %v12290_v27 = vpop.f32.mrb[95].mxu1  ;;  %v7984_v53 = vsel %vm253_vm2, %v7977_v48, -inf }
0x3e48   :  { %7985 = vmax.xlane.f32.xlu1 %v7984_v53 }
0x3e59   :  { %8009 = vrot.lane.b32.xlu1 %v14180_v30, %s13074_s2 }
0x3e5d   :  { %8163 = vrot.lane.b32.xlu1 %v14180_v30, %s13076_s10 }
0x3e61   :  { %8241 = vrot.lane.b32.xlu1 %v14178_v63, %s13076_s10 }
0x3e65   :  { %8239 = vrot.lane.b32.xlu1 %v14197_v2, %s13075_s7 }
0x3ed1   :  { %v7983_v54 = vpop.xlane.xlu0 %7982 }
0x3ed2   :  { %v7987_v17 = vsub.f32 %v7899_v43, %v7983_v54 }
0x3ed4   :  { %v7989_v42 = vmul.f32 1.442695, %v7987_v17 }
0x3ed5   :  { %v7986_v60 = vpop.xlane.xlu1 %7985 }
0x3ed6   :  { %12940 = vpow2.f32 %v7989_v42  ;;  %v7988_v14 = vsub.f32 %v7977_v48, %v7986_v60 }
0x3ed8   :  { %v7991_v61 = vmul.f32 1.442695, %v7988_v14 }
0x3ed9   :  { %v8010_v29 = vpop.permute.xlu1 %8009 }
0x3eda   :  { %12942 = vpow2.f32 %v7991_v61  ;;  %12292 = vmatpush3.msra.mxu0 %v8010_v29 }
0x3edb   :  { %12301 = vmatprep.subr.mxu0 %v13068_v8 }
0x3edd   :  { %v8164_v19 = vpop.permute.xlu1 %8163 }
0x3ee0   :  { %v12941_v32 = vpop.eup %12940 }
0x3ee1   :  { %v7993_v0 = vsel %vm253_vm2, %v12941_v32, 0.0  ;;  %v8242_v15 = vpop.permute.xlu1 %8241 }
0x3ee2   :  { %7994 = vadd.xlane.f32.xlu0 %v7993_v0 }
0x3ee4   :  { %v12943_v22 = vpop.eup %12942 }
0x3ee5   :  { %v7996_v47 = vsel %vm253_vm2, %v12943_v22, 0.0  ;;  %v8240_v5 = vpop.permute.xlu1 %8239 }
0x3ee6   :  { %7997 = vadd.xlane.f32.xlu0 %v7996_v47 }
0x3efc   :  { %8085 = vrot.lane.b32.xlu0 %v14178_v63, %s13074_s2  ;;  %s14666_s2 = smov 40  }
0x3f00   :  { %8161 = vrot.lane.b32.xlu0 %v14188_v1, %s13075_s7 }
0x3f6f   :  { %v7995_v3 = vpop.xlane.xlu0 %7994 }
0x3f70   :  { %12944 = vrcp.f32 %v7995_v3 }
0x3f73   :  { %v7998_v55 = vpop.xlane.xlu0 %7997 }
0x3f74   :  { %12946 = vrcp.f32 %v7998_v55 }
0x3f77   :  { %v8086_v4 = vpop.permute.xlu0 %8085 }
0x3f78   :  { %12297 = vmatpush3.msra.mxu1 %v8086_v4 }
0x3f79   :  { %12306 = vmatprep.subr.mxu1 %v13068_v8 }
0x3f7a   :  { %v12945_v31 = vpop.eup %12944 }
0x3f7b   :  { %v8001_v10 = vmul.f32 %v12945_v31, %v7995_v3  ;;  %v8162_v24 = vpop.permute.xlu0 %8161 }
0x3f7d   :  { %v8003_v11 = vsub.f32 2.0, %v8001_v10 }
0x3f7e   :  { %v12947_v57 = vpop.eup %12946 }
0x3f7f   :  { %v8005_v52 = vmul.f32 %v12945_v31, %v8003_v11  ;;  %v8002_v21 = vmul.f32 %v12947_v57, %v7998_v55 }
0x3f81   :  { %v8007_v16 = vmul.f32 %v12941_v32, %v8005_v52  ;;  %v8004_v20 = vsub.f32 2.0, %v8002_v21 }
0x3f83   :  { %v8006_v18 = vmul.f32 %v12947_v57, %v8004_v20  ;;  %12294 = vmatmul.mubr.msk.f32.vlgmr.msra.gmra.mrb[76].mxu0 %vm253_vm2, %v8007_v16 }
0x3f84   :  { %12302 = vmatpush3.xpose.msk.msra.mxu0 %vm253_vm2, %v8164_v19  ;;  %12303 = vmatprep.mubr.msk.f32.mxu0 %vm13069_vm1, %v13068_v8 }
0x3f85   :  { %v8008_v23 = vmul.f32 %v12943_v22, %v8006_v18  ;;  %12311 = vmatprep.subr.mxu0 %v13068_v8 }
0x3f87   :  { %12299 = vmatmul.mubr.msk.f32.vlgmr.msra.gmra.mrb[96].mxu1 %vm253_vm2, %v8008_v23  ;;  %12304 = vmatmul.mubr.msk.f32.vlgmr.msra.gmra.mrb[78].mxu0 %vm253_vm2, %v8162_v24 }
0x3f88   :  { %12307 = vmatpush3.xpose.msk.msra.mxu1 %vm253_vm2, %v8242_v15  ;;  %12308 = vmatprep.mubr.msk.f32.mxu1 %vm13069_vm1, %v13068_v8 }
0x3f89   :  { %12316 = vmatprep.subr.mxu1 %v13068_v8  ;;  %12313 = vmatprep.mubr.msk.f32.mxu0 %vm13069_vm1, %v13068_v8 }
0x3f8b   :  { %12309 = vmatmul.mubr.msk.f32.vlgmr.msra.gmra.mrb[98].mxu1 %vm253_vm2, %v8240_v5 }
0x3f8c   :  { %12318 = vmatprep.mubr.msk.f32.mxu1 %vm13069_vm1, %v13068_v8 }
0x4056   :  { %v14276_v34 = vpop.f32.mrb[76].mxu0 }
0x4057   :  { %v12295_v26 = vpop.f32.mrb[77].mxu0 }
0x405a   :  { %v14278_v35 = vpop.f32.mrb[96].mxu1  ;;  %v8235_v58 = vpop.f32.mrb[78].mxu0 }
0x405b   :  { %v12300_v28 = vpop.f32.mrb[97].mxu1  ;;  %v12305_v51 = vpop.f32.mrb[79].mxu0  ;;  %v8317_v50 = vsel %vm253_vm2, %v8235_v58, -inf }
0x405c   :  { %8318 = vmax.xlane.f32.xlu0 %v8317_v50 }
0x405e   :  { %v8313_v12 = vpop.f32.mrb[98].mxu1 }
0x405f   :  { %v12310_v33 = vpop.f32.mrb[99].mxu1  ;;  %v8320_v36 = vsel %vm253_vm2, %v8313_v12, -inf }
0x4060   :  { %8321 = vmax.xlane.f32.xlu1 %v8320_v36 }
0x4071   :  { %8345 = vrot.lane.b32.xlu1 %v14180_v30, %s13077_s11 }
0x4075   :  { %8499 = vrot.lane.b32.xlu1 %v14180_v30, %s14664_s12 }
0x4079   :  { %8577 = vrot.lane.b32.xlu1 %v14178_v63, %s14664_s12 }
0x407d   :  { %8575 = vrot.lane.b32.xlu1 %v14197_v2, %s14665_s5 }
0x40e9   :  { %v8319_v37 = vpop.xlane.xlu0 %8318 }
0x40ea   :  { %v8323_v6 = vsub.f32 %v8235_v58, %v8319_v37 }
0x40ec   :  { %v8325_v9 = vmul.f32 1.442695, %v8323_v6 }
0x40ed   :  { %v8322_v38 = vpop.xlane.xlu1 %8321 }
0x40ee   :  { %12948 = vpow2.f32 %v8325_v9  ;;  %v8324_v39 = vsub.f32 %v8313_v12, %v8322_v38 }
0x40f0   :  { %v8327_v56 = vmul.f32 1.442695, %v8324_v39 }
0x40f1   :  { %v8346_v49 = vpop.permute.xlu1 %8345 }
0x40f2   :  { %12950 = vpow2.f32 %v8327_v56  ;;  %12312 = vmatpush3.msra.mxu0 %v8346_v49  ;;  %v11304_v56 = vld [vmem:[%s14647_s21 + $0x20] sm:$0xff]  ;;  %v11305_v49 = vld [vmem:[%s14647_s21 + $0x28] sm:$0xff] }
0x40f3   :  { %12321 = vmatprep.subr.mxu0 %v13068_v8 }
0x40f5   :  { %v8500_v42 = vpop.permute.xlu1 %8499 }
0x40f8   :  { %v12949_v45 = vpop.eup %12948 }
0x40f9   :  { %v8329_v43 = vsel %vm253_vm2, %v12949_v45, 0.0 }
0x40fa   :  { %8330 = vadd.xlane.f32.xlu0 %v8329_v43  ;;  %v11306_v43 = vld [vmem:[%s14647_s21 + $0x30] sm:$0xff] }
0x40fc   :  { %v12951_v41 = vpop.eup %12950 }
0x40fd   :  { %v8332_v44 = vsel %vm253_vm2, %v12951_v41, 0.0 }
0x40fe   :  { %8333 = vadd.xlane.f32.xlu0 %v8332_v44 }
0x4114   :  { %8421 = vrot.lane.b32.xlu0 %v14178_v63, %s13077_s11  ;;  %s14667_s11 = smov 8  }
0x4118   :  { %8497 = vrot.lane.b32.xlu0 %v14188_v1, %s14665_s5  ;;  %v8578_v1 = vpop.permute.xlu1 %8577 }
0x411c   :  { %v8576_v47 = vpop.permute.xlu1 %8575 }
0x4187   :  { %v8331_v2 = vpop.xlane.xlu0 %8330 }
0x4188   :  { %12952 = vrcp.f32 %v8331_v2 }
0x418b   :  { %v8334_v46 = vpop.xlane.xlu0 %8333 }
0x418c   :  { %12954 = vrcp.f32 %v8334_v46 }
0x418f   :  { %v8422_v48 = vpop.permute.xlu0 %8421 }
0x4190   :  { %12317 = vmatpush3.msra.mxu1 %v8422_v48 }
0x4191   :  { %12326 = vmatprep.subr.mxu1 %v13068_v8 }
0x4192   :  { %v12953_v27 = vpop.eup %12952 }
0x4193   :  { %v8337_v53 = vmul.f32 %v12953_v27, %v8331_v2  ;;  %v8498_v22 = vpop.permute.xlu0 %8497  ;;  %v11324_v2 = vld [vmem:[%s14649_s29 + $0x20] sm:$0xff] }
0x4195   :  { %v8339_v54 = vsub.f32 2.0, %v8337_v53 }
0x4196   :  { %v12955_v17 = vpop.eup %12954 }
0x4197   :  { %v8341_v60 = vmul.f32 %v12953_v27, %v8339_v54  ;;  %v8338_v14 = vmul.f32 %v12955_v17, %v8334_v46  ;;  %v11325_v46 = vld [vmem:[%s14649_s29 + $0x28] sm:$0xff] }
0x4198   :  { %v12674_v48 = vpack.c.bf16 %v11325_v46, %v11324_v2 }
0x4199   :  { %v8343_v61 = vmul.f32 %v12949_v45, %v8341_v60  ;;  %v8340_v29 = vsub.f32 2.0, %v8338_v14  ;;  %v12658_v45 = vpack.c.bf16 %v11305_v49, %v11304_v56  ;;  %v11314_v49 = vld [vmem:[%s14651_s8 + $0x1] ss:$0 sm:$0xff] }
0x419b   :  { %v8342_v32 = vmul.f32 %v12955_v17, %v8340_v29  ;;  %12314 = vmatmul.mubr.msk.f32.vlgmr.msra.gmra.mrb[80].mxu0 %vm253_vm2, %v8343_v61 }
0x419c   :  { %12322 = vmatpush3.xpose.msk.msra.mxu0 %vm253_vm2, %v8500_v42  ;;  %12323 = vmatprep.mubr.msk.f32.mxu0 %vm13069_vm1, %v13068_v8 }
0x419d   :  { %v8344_v0 = vmul.f32 %v12951_v41, %v8342_v32  ;;  %12331 = vmatprep.subr.mxu0 %v13068_v8  ;;  %v11307_v41 = vld [vmem:[%s14647_s21 + $0x38] sm:$0xff] }
0x419e   :  { %v12662_v44 = vpack.c.bf16 %v11307_v41, %v11306_v43  ;;  %v11315_v43 = vld [vmem:[%s14652_s14 + $0x1] ss:$0 sm:$0xff] }
0x419f   :  { %12319 = vmatmul.mubr.msk.f32.vlgmr.msra.gmra.mrb[100].mxu1 %vm253_vm2, %v8344_v0  ;;  %12324 = vmatmul.mubr.msk.f32.vlgmr.msra.gmra.mrb[82].mxu0 %vm253_vm2, %v8498_v22  ;;  %v11326_v22 = vld [vmem:[%s14649_s29 + $0x30] sm:$0xff] }
0x41a0   :  { %12327 = vmatpush3.xpose.msk.msra.mxu1 %vm253_vm2, %v8578_v1  ;;  %12328 = vmatprep.mubr.msk.f32.mxu1 %vm13069_vm1, %v13068_v8 }
0x41a1   :  { %12336 = vmatprep.subr.mxu1 %v13068_v8  ;;  %12333 = vmatprep.mubr.msk.f32.mxu0 %vm13069_vm1, %v13068_v8 }
0x41a3   :  { %12329 = vmatmul.mubr.msk.f32.vlgmr.msra.gmra.mrb[102].mxu1 %vm253_vm2, %v8576_v47  ;;  %v11327_v47 = vld [vmem:[%s14649_s29 + $0x38] sm:$0xff] }
0x41a4   :  { %12338 = vmatprep.mubr.msk.f32.mxu1 %vm13069_vm1, %v13068_v8 }
0x426e   :  { %v8417_v3 = vpop.f32.mrb[80].mxu0 }
0x426f   :  { %v12315_v55 = vpop.f32.mrb[81].mxu0 }
0x4272   :  { %v8493_v4 = vpop.f32.mrb[100].mxu1  ;;  %v8571_v31 = vpop.f32.mrb[82].mxu0 }
0x4273   :  { %v12320_v10 = vpop.f32.mrb[101].mxu1  ;;  %v12325_v11 = vpop.f32.mrb[83].mxu0  ;;  %v8653_v57 = vsel %vm253_vm2, %v8571_v31, -inf }
0x4274   :  { %8654 = vmax.xlane.f32.xlu0 %v8653_v57 }
0x4276   :  { %v8649_v19 = vpop.f32.mrb[102].mxu1 }
0x4277   :  { %v12330_v52 = vpop.f32.mrb[103].mxu1  ;;  %v8656_v21 = vsel %vm253_vm2, %v8649_v19, -inf }
0x4278   :  { %8657 = vmax.xlane.f32.xlu1 %v8656_v21 }
0x4289   :  { %8681 = vrot.lane.b32.xlu1 %v14180_v30, %s14666_s2 }
0x428d   :  { %8835 = vrot.lane.b32.xlu1 %v14276_v34, %s14667_s11 }
0x4291   :  { %8837 = vrot.lane.b32.xlu1 %v14278_v35, %s14667_s11 }
0x4295   :  { %8845 = vrot.lane.b32.xlu1 %v8493_v4, %s14668_s17 }
0x4301   :  { %v8655_v16 = vpop.xlane.xlu0 %8654 }
0x4302   :  { %v8659_v20 = vsub.f32 %v8571_v31, %v8655_v16  ;;  %v12678_v31 = vpack.c.bf16 %v11327_v47, %v11326_v22  ;;  %v11329_v16 = vld [vmem:[%s14653_s19 + $0x1] ss:$0 sm:$0xff] }
0x4304   :  { %v8661_v18 = vmul.f32 1.442695, %v8659_v20 }
0x4305   :  { %v8658_v15 = vpop.xlane.xlu1 %8657 }
0x4306   :  { %12956 = vpow2.f32 %v8661_v18  ;;  %v8660_v23 = vsub.f32 %v8649_v19, %v8658_v15 }
0x4308   :  { %v8663_v24 = vmul.f32 1.442695, %v8660_v23 }
0x4309   :  { %v8682_v5 = vpop.permute.xlu1 %8681 }
0x430a   :  { %12958 = vpow2.f32 %v8663_v24  ;;  %12332 = vmatpush3.msra.mxu0 %v8682_v5 }
0x430b   :  { %12659 = vmatprep.subr.bf16.mxu0 %v12658_v45 }
0x430d   :  { %v8836_v42 = vpop.permute.xlu1 %8835 }
0x430e   :  { %v8857_v61 = vsel %vm253_vm2, %v14238_v25, %v8836_v42 }
0x4310   :  { %v12957_v26 = vpop.eup %12956 }
0x4311   :  { %v8665_v30 = vsel %vm253_vm2, %v12957_v26, 0.0  ;;  %v8838_v60 = vpop.permute.xlu1 %8837 }
0x4312   :  { %8666 = vadd.xlane.f32.xlu0 %v8665_v30 }
0x4314   :  { %v12959_v34 = vpop.eup %12958 }
0x4315   :  { %v8668_v58 = vsel %vm253_vm2, %v12959_v34, 0.0  ;;  %v8846_v29 = vpop.permute.xlu1 %8845 }
0x4316   :  { %8669 = vadd.xlane.f32.xlu0 %v8668_v58 }
0x432c   :  { %8757 = vrot.lane.b32.xlu0 %v14178_v63, %s14666_s2  ;;  %s14669_s2 = smov 24  }
0x4330   :  { %8843 = vrot.lane.b32.xlu0 %v8417_v3, %s14668_s17  ;;  %v8858_v3 = vsel %vm253_vm2, %v14240_v40, %v8838_v60  ;;  %v11309_v40 = vld [vmem:[%s14648_s25 + $0x1] ss:$0 sm:$0xff] }
0x4331   :  { %v8860_v55 = vsel %vm1621_vm4, %v8858_v3, %v8846_v29 }
0x439f   :  { %v8667_v35 = vpop.xlane.xlu0 %8666 }
0x43a0   :  { %12960 = vrcp.f32 %v8667_v35 }
0x43a3   :  { %v8670_v28 = vpop.xlane.xlu0 %8669 }
0x43a4   :  { %12962 = vrcp.f32 %v8670_v28 }
0x43a7   :  { %v8758_v51 = vpop.permute.xlu0 %8757 }
0x43a8   :  { %12337 = vmatpush3.msra.mxu1 %v8758_v51  ;;  %v11317_v51 = vld [vmem:[%s14650_s3 + $0x28] sm:$0xff] }
0x43aa   :  { %v12961_v50 = vpop.eup %12960 }
0x43ab   :  { %v8673_v12 = vmul.f32 %v12961_v50, %v8667_v35  ;;  %v8844_v14 = vpop.permute.xlu0 %8843 }
0x43ac   :  { %v8859_v32 = vsel %vm1621_vm4, %v8857_v61, %v8844_v14 }
0x43ad   :  { %v8675_v33 = vsub.f32 2.0, %v8673_v12  ;;  %v11318_v12 = vld [vmem:[%s14650_s3 + $0x30] sm:$0xff] }
0x43ae   :  { %v12963_v36 = vpop.eup %12962 }
0x43af   :  { %v8677_v37 = vmul.f32 %v12961_v50, %v8675_v33  ;;  %v8674_v6 = vmul.f32 %v12963_v36, %v8670_v28  ;;  %v11316_v28 = vld [vmem:[%s14650_s3 + $0x20] sm:$0xff]  ;;  %v11319_v33 = vld [vmem:[%s14650_s3 + $0x38] sm:$0xff] }
0x43b0   :  { %v12666_v50 = vpack.c.bf16 %v11317_v51, %v11316_v28 }
0x43b1   :  { %v8679_v9 = vmul.f32 %v12957_v26, %v8677_v37  ;;  %v8676_v63 = vsub.f32 2.0, %v8674_v6 }
0x43b2   :  { %12667 = vmatprep.subr.bf16.mxu1 %v12666_v50 }
0x43b3   :  { %v8678_v38 = vmul.f32 %v12963_v36, %v8676_v63  ;;  %12334 = vmatmul.mubr.msk.f32.vlgmr.msra.gmra.mrb[84].mxu0 %vm253_vm2, %v8679_v9  ;;  %v12670_v36 = vpack.c.bf16 %v11319_v33, %v11318_v12 }
0x43b4   :  { %12661 = vmatpush3.bf16.msra.mxu0 %v12658_v45 }
0x43b5   :  { %v8680_v39 = vmul.f32 %v12959_v34, %v8678_v38  ;;  %12663 = vmatprep.subr.bf16.mxu0 %v12662_v44 }
0x43b7   :  { %12339 = vmatmul.mubr.msk.f32.vlgmr.msra.gmra.mrb[104].mxu1 %vm253_vm2, %v8680_v39 }
0x43b8   :  { %12665 = vmatpush3.bf16.msra.mxu0 %v12662_v44  ;;  %12669 = vmatpush3.bf16.msra.mxu1 %v12666_v50 }
0x43b9   :  { %12675 = vmatprep.subr.bf16.mxu0 %v12674_v48  ;;  %12671 = vmatprep.subr.bf16.mxu1 %v12670_v36 }
0x43bc   :  { %12673 = vmatpush3.bf16.msra.mxu1 %v12670_v36 }
0x43bd   :  { %12374 = vmatprep.subr.mxu1 %v13068_v8 }
0x4486   :  { %v8753_v27 = vpop.f32.mrb[84].mxu0 }
0x4487   :  { %8851 = vrot.lane.b32.xlu0 %v8753_v27, %s14669_s2  ;;  %v12335_v53 = vpop.f32.mrb[85].mxu0 }
0x448a   :  { %v8829_v54 = vpop.f32.mrb[104].mxu1 }
0x448b   :  { %8853 = vrot.lane.b32.xlu1 %v8829_v54, %s14669_s2  ;;  %v12340_v17 = vpop.f32.mrb[105].mxu1  ;;  %v11321_v54 = vld [vmem:[%s14654_s24 + $0x1] ss:$0 sm:$0xff] }
0x44f9   :  { %v8852_v1 = vpop.permute.xlu0 %8851 }
0x44fa   :  { %v8861_v0 = vsel %vm1624_vm3, %v8859_v32, %v8852_v1 }
0x44fb   :  { %12349 = vmatprep.mubr.msk.f32.mxu0 %vm166_vm0, %v8861_v0 }
0x44fd   :  { %v8854_v4 = vpop.permute.xlu1 %8853 }
0x44fe   :  { %v8862_v25 = vsel %vm1624_vm3, %v8860_v55, %v8854_v4 }
0x44ff   :  { %12350 = vmatmul.mubr.msk.f32.vlgmr.msra.gmra.mrb[86].mxu0 %vm166_vm0, %v8862_v25 }
0x4500   :  { %12677 = vmatpush3.bf16.msra.mxu0 %v12674_v48  ;;  %12371 = vmatprep.mubr.msk.f32.mxu0 %vm166_vm0, %v13925_v7 }
0x4501   :  { %12679 = vmatprep.subr.bf16.mxu0 %v12678_v31 }
0x4504   :  { %12681 = vmatpush3.bf16.msra.mxu0 %v12678_v31 }
0x4505   :  { %12384 = vmatprep.subr.mxu0 %v13068_v8 }
0x4507   :  { %12372 = vmatmul.mubr.msk.f32.vlgmr.msra.gmra.mrb[88].mxu0 %vm166_vm0, %v13937_v13 }
0x4508   :  { %12386 = vmatprep.mubr.msk.f32.mxu0 %vm13069_vm1, %v13068_v8 }
0x45d2   :  { %v12351_v10 = vpop.f32.mrb[86].mxu0 }
0x45d3   :  { %v8954_v11 = vadd.f32 %v12351_v10, %v11309_v40  ;;  %v8948_v57 = vpop.f32.mrb[87].mxu0 }
0x45d4   :  { %v8949_v19 = vadd.f32 %v11309_v40, %v8948_v57 }
0x45d5   :  { %v8962_v52 = vadd.f32 %v8954_v11, %v14169_v59 }
0x45d6   :  { %v8961_v21 = vadd.f32 %v8949_v19, %v14167_v62 }
0x45d7   :  { %v8966_v7 = vsel %vm166_vm0, %v8962_v52, 0.0 }
0x45d8   :  { %8967 = vadd.xlane.f32.xlu1 %v8966_v7  ;;  %v8963_v20 = vsel %vm166_vm0, %v8961_v21, 0.0 }
0x45d9   :  { %8964 = vadd.xlane.f32.xlu0 %v8963_v20 }
0x45da   :  { %v12373_v13 = vpop.f32.mrb[88].mxu0 }
0x45db   :  { %v14363_v18 = vadd.f32 %v12373_v13, %v11329_v16  ;;  %v9178_v15 = vpop.f32.mrb[89].mxu0 }
0x45dc   :  { %v14380_v53 = vadd.f32 %v11329_v16, %v9178_v15 }
0x4665   :  { %v8968_v23 = vpop.xlane.xlu1 %8967 }
0x4666   :  { %v8970_v24 = vmul.f32 0.03125, %v8968_v23  ;;  %v8965_v5 = vpop.xlane.xlu0 %8964 }
0x4667   :  { %v8969_v59 = vmul.f32 0.03125, %v8965_v5 }
0x4668   :  { %v8972_v62 = vsub.f32 %v8962_v52, %v8970_v24 }
0x4669   :  { %v8971_v26 = vsub.f32 %v8961_v21, %v8969_v59 }
0x466a   :  { %v8974_v58 = vmul.f32 %v8972_v62, %v8972_v62 }
0x466b   :  { %v8973_v30 = vmul.f32 %v8971_v26, %v8971_v26 }
0x466c   :  { %v8978_v35 = vsel %vm166_vm0, %v8974_v58, 0.0 }
0x466d   :  { %v8975_v34 = vsel %vm166_vm0, %v8973_v30, 0.0 }
0x466e   :  { %8976 = vadd.xlane.f32.xlu0 %v8975_v34 }
0x4672   :  { %8979 = vadd.xlane.f32.xlu0 %v8978_v35 }
0x46fb   :  { %v8977_v37 = vpop.xlane.xlu0 %8976 }
0x46fc   :  { %v8981_v6 = vmul.f32 0.03125, %v8977_v37 }
0x46fe   :  { %v8983_v9 = vadd.f32 1e-05, %v8981_v6 }
0x46ff   :  { %v8980_v63 = vpop.xlane.xlu0 %8979 }
0x4700   :  { %12964 = vrsqrt.f32 %v8983_v9  ;;  %v8982_v38 = vmul.f32 0.03125, %v8980_v63 }
0x4702   :  { %v8984_v39 = vadd.f32 1e-05, %v8982_v38 }
0x4704   :  { %12966 = vrsqrt.f32 %v8984_v39 }
0x470a   :  { %v12965_v56 = vpop.eup %12964 }
0x470b   :  { %v8987_v45 = vmul.f32 %v12965_v56, %v8971_v26 }
0x470d   :  { %v8995_v41 = vmul.f32 %v11314_v49, %v8987_v45 }
0x470e   :  { %v12967_v44 = vpop.eup %12966 }
0x470f   :  { %v8988_v2 = vmul.f32 %v12967_v44, %v8972_v62  ;;  %v14374_v46 = vadd.f32 %v11315_v43, %v8995_v41 }
0x4711   :  { %v8996_v48 = vmul.f32 %v11314_v49, %v8988_v2  ;;  %12360 = vmatprep.mubr.msk.f32.mxu1 %vm166_vm0, %v14374_v46 }
0x4713   :  { %v14378_v27 = vadd.f32 %v11315_v43, %v8996_v48 }
0x4715   :  { %12361 = vmatmul.mubr.msk.f32.vlgmr.msra.gmra.mrb[106].mxu1 %vm166_vm0, %v14378_v27 }
0x4716   :  { %12375 = vmatpush3.xpose.msk.msra.mxu1 %vm253_vm2, %v14380_v53  ;;  %12376 = vmatprep.mubr.msk.f32.mxu1 %vm13069_vm1, %v13068_v8 }
0x4717   :  { %12379 = vmatprep.subr.mxu1 %v13068_v8 }
0x47e8   :  { %v12362_v17 = vpop.f32.mrb[106].mxu1 }
0x47e9   :  { %v9090_v42 = vpop.f32.mrb[107].mxu1  ;;  %v9096_v14 = vadd.f32 %v12362_v17, %v11321_v54 }
0x47ea   :  { %v9091_v60 = vadd.f32 %v11321_v54, %v9090_v42 }
0x47eb   :  { %v14398_v29 = vmul.f32 0.35355338, %v9096_v14 }
0x47ec   :  { %v14390_v61 = vmul.f32 0.35355338, %v9091_v60 }
0x47ee   :  { %12377 = vmatmul.mubr.msk.f32.vlgmr.msra.gmra.mrb[108].mxu1 %vm253_vm2, %v14390_v61 }
0x47ef   :  { %12380 = vmatpush3.xpose.msk.msra.mxu1 %vm253_vm2, %v14363_v18  ;;  %12381 = vmatprep.mubr.msk.f32.mxu1 %vm13069_vm1, %v13068_v8 }
0x47f0   :  { %12389 = vmatprep.subr.mxu1 %v13068_v8 }
0x47f2   :  { %12382 = vmatmul.mubr.msk.f32.vlgmr.msra.gmra.mrb[110].mxu1 %vm253_vm2, %v14398_v29 }
0x47f3   :  { %12391 = vmatprep.mubr.msk.f32.mxu1 %vm13069_vm1, %v13068_v8 }
0x48c1   :  { %v9261_v32 = vpop.f32.mrb[108].mxu1 }
0x48c2   :  { %v12378_v1 = vpop.f32.mrb[109].mxu1  ;;  %v9341_v0 = vsel %vm253_vm2, %v9261_v32, -inf }
0x48c3   :  { %9342 = vmax.xlane.f32.xlu1 %v9341_v0 }
0x48c5   :  { %v9337_v22 = vpop.f32.mrb[110].mxu1 }
0x48c6   :  { %v12383_v47 = vpop.f32.mrb[111].mxu1  ;;  %v9344_v3 = vsel %vm253_vm2, %v9337_v22, -inf }
0x48c7   :  { %9345 = vmax.xlane.f32.xlu0 %v9344_v3 }
0x48d4   :  { %9369 = vrot.lane.b32.xlu1 %v14380_v53, %s13070_s0 }
0x4950   :  { %v9343_v55 = vpop.xlane.xlu1 %9342 }
0x4951   :  { %v9347_v4 = vsub.f32 %v9261_v32, %v9343_v55 }
0x4953   :  { %v9349_v31 = vmul.f32 1.442695, %v9347_v4 }
0x4954   :  { %v9370_v25 = vpop.permute.xlu1 %9369  ;;  %v9346_v40 = vpop.xlane.xlu0 %9345 }
0x4955   :  { %12968 = vpow2.f32 %v9349_v31  ;;  %v9348_v10 = vsub.f32 %v9337_v22, %v9346_v40  ;;  %12385 = vmatpush3.msra.mxu0 %v9370_v25 }
0x4956   :  { %12394 = vmatprep.subr.mxu0 %v13068_v8 }
0x4957   :  { %v9351_v11 = vmul.f32 1.442695, %v9348_v10 }
0x4959   :  { %12970 = vpow2.f32 %v9351_v11 }
0x495f   :  { %v12969_v57 = vpop.eup %12968 }
0x4960   :  { %v9353_v19 = vsel %vm253_vm2, %v12969_v57, 0.0 }
0x4961   :  { %9354 = vadd.xlane.f32.xlu1 %v9353_v19 }
0x4963   :  { %v12971_v52 = vpop.eup %12970 }
0x4964   :  { %v9356_v21 = vsel %vm253_vm2, %v12971_v52, 0.0 }
0x4965   :  { %9357 = vadd.xlane.f32.xlu0 %v9356_v21 }
0x4972   :  { %9523 = vrot.lane.b32.xlu1 %v14380_v53, %s13073_s1 }
0x4976   :  { %9601 = vrot.lane.b32.xlu1 %v14363_v18, %s13073_s1 }
0x497a   :  { %9599 = vrot.lane.b32.xlu1 %v14398_v29, %s13073_s1 }
0x497b   :  { %9445 = vrot.lane.b32.xlu0 %v14363_v18, %s13070_s0 }
0x497f   :  { %9521 = vrot.lane.b32.xlu0 %v14390_v61, %s13073_s1 }
0x49ee   :  { %v9355_v7 = vpop.xlane.xlu1 %9354 }
0x49ef   :  { %12972 = vrcp.f32 %v9355_v7 }
0x49f2   :  { %v9358_v16 = vpop.xlane.xlu0 %9357  ;;  %v9524_v5 = vpop.permute.xlu1 %9523 }
0x49f3   :  { %12974 = vrcp.f32 %v9358_v16 }
0x49f6   :  { %v9446_v20 = vpop.permute.xlu0 %9445  ;;  %v9602_v58 = vpop.permute.xlu1 %9601 }
0x49f7   :  { %12390 = vmatpush3.msra.mxu1 %v9446_v20 }
0x49f8   :  { %12399 = vmatprep.subr.mxu1 %v13068_v8 }
0x49f9   :  { %v12973_v13 = vpop.eup %12972 }
0x49fa   :  { %v9361_v15 = vmul.f32 %v12973_v13, %v9355_v7  ;;  %v9522_v28 = vpop.permute.xlu0 %9521  ;;  %v9600_v51 = vpop.permute.xlu1 %9599 }
0x49fc   :  { %v9363_v23 = vsub.f32 2.0, %v9361_v15 }
0x49fd   :  { %v12975_v24 = vpop.eup %12974 }
0x49fe   :  { %v9365_v59 = vmul.f32 %v12973_v13, %v9363_v23  ;;  %v9362_v62 = vmul.f32 %v12975_v24, %v9358_v16 }
0x4a00   :  { %v9367_v26 = vmul.f32 %v12969_v57, %v9365_v59  ;;  %v9364_v30 = vsub.f32 2.0, %v9362_v62 }
0x4a02   :  { %v9366_v34 = vmul.f32 %v12975_v24, %v9364_v30  ;;  %12387 = vmatmul.mubr.msk.f32.vlgmr.msra.gmra.mrb[90].mxu0 %vm253_vm2, %v9367_v26 }
0x4a03   :  { %12395 = vmatpush3.xpose.msk.msra.mxu0 %vm253_vm2, %v9524_v5  ;;  %12396 = vmatprep.mubr.msk.f32.mxu0 %vm13069_vm1, %v13068_v8 }
0x4a04   :  { %v9368_v35 = vmul.f32 %v12971_v52, %v9366_v34  ;;  %12404 = vmatprep.subr.mxu0 %v13068_v8 }
0x4a06   :  { %12392 = vmatmul.mubr.msk.f32.vlgmr.msra.gmra.mrb[112].mxu1 %vm253_vm2, %v9368_v35  ;;  %12397 = vmatmul.mubr.msk.f32.vlgmr.msra.gmra.mrb[92].mxu0 %vm253_vm2, %v9522_v28 }
0x4a07   :  { %12400 = vmatpush3.xpose.msk.msra.mxu1 %vm253_vm2, %v9602_v58  ;;  %12401 = vmatprep.mubr.msk.f32.mxu1 %vm13069_vm1, %v13068_v8 }
0x4a08   :  { %12409 = vmatprep.subr.mxu1 %v13068_v8  ;;  %12406 = vmatprep.mubr.msk.f32.mxu0 %vm13069_vm1, %v13068_v8 }
0x4a0a   :  { %12402 = vmatmul.mubr.msk.f32.vlgmr.msra.gmra.mrb[114].mxu1 %vm253_vm2, %v9600_v51 }
0x4a0b   :  { %12411 = vmatprep.mubr.msk.f32.mxu1 %vm13069_vm1, %v13068_v8 }
0x4ad5   :  { %v14439_v50 = vpop.f32.mrb[90].mxu0 }
0x4ad6   :  { %v12388_v12 = vpop.f32.mrb[91].mxu0 }
0x4ad9   :  { %v14441_v33 = vpop.f32.mrb[112].mxu1  ;;  %v9595_v36 = vpop.f32.mrb[92].mxu0 }
0x4ada   :  { %v12393_v37 = vpop.f32.mrb[113].mxu1  ;;  %v12398_v6 = vpop.f32.mrb[93].mxu0  ;;  %v9677_v9 = vsel %vm253_vm2, %v9595_v36, -inf }
0x4adb   :  { %9678 = vmax.xlane.f32.xlu0 %v9677_v9 }
0x4add   :  { %v9673_v63 = vpop.f32.mrb[114].mxu1 }
0x4ade   :  { %v12403_v38 = vpop.f32.mrb[115].mxu1  ;;  %v9680_v39 = vsel %vm253_vm2, %v9673_v63, -inf }
0x4adf   :  { %9681 = vmax.xlane.f32.xlu1 %v9680_v39 }
0x4af0   :  { %9705 = vrot.lane.b32.xlu1 %v14380_v53, %s13072_s28 }
0x4af4   :  { %9859 = vrot.lane.b32.xlu1 %v14380_v53, %s13075_s7 }
0x4af8   :  { %9937 = vrot.lane.b32.xlu1 %v14363_v18, %s13075_s7 }
0x4afc   :  { %9935 = vrot.lane.b32.xlu1 %v14398_v29, %s13075_s7 }
0x4b68   :  { %v9679_v56 = vpop.xlane.xlu0 %9678 }
0x4b69   :  { %v9683_v49 = vsub.f32 %v9595_v36, %v9679_v56 }
0x4b6b   :  { %v9685_v45 = vmul.f32 1.442695, %v9683_v49 }
0x4b6c   :  { %v9682_v43 = vpop.xlane.xlu1 %9681 }
0x4b6d   :  { %12976 = vpow2.f32 %v9685_v45  ;;  %v9684_v41 = vsub.f32 %v9673_v63, %v9682_v43 }
0x4b6f   :  { %v9687_v44 = vmul.f32 1.442695, %v9684_v41 }
0x4b70   :  { %v9706_v2 = vpop.permute.xlu1 %9705 }
0x4b71   :  { %12978 = vpow2.f32 %v9687_v44  ;;  %12405 = vmatpush3.msra.mxu0 %v9706_v2 }
0x4b72   :  { %12414 = vmatprep.subr.mxu0 %v13068_v8 }
0x4b74   :  { %v9860_v3 = vpop.permute.xlu1 %9859 }
0x4b77   :  { %v12977_v48 = vpop.eup %12976 }
0x4b78   :  { %v9689_v54 = vsel %vm253_vm2, %v12977_v48, 0.0  ;;  %v9938_v10 = vpop.permute.xlu1 %9937 }
0x4b79   :  { %9690 = vadd.xlane.f32.xlu0 %v9689_v54 }
0x4b7b   :  { %v12979_v17 = vpop.eup %12978 }
0x4b7c   :  { %v9692_v42 = vsel %vm253_vm2, %v12979_v17, 0.0  ;;  %v9936_v19 = vpop.permute.xlu1 %9935 }
0x4b7d   :  { %9693 = vadd.xlane.f32.xlu0 %v9692_v42 }
0x4b93   :  { %9781 = vrot.lane.b32.xlu0 %v14363_v18, %s13072_s28 }
0x4b97   :  { %9857 = vrot.lane.b32.xlu0 %v14390_v61, %s13075_s7 }
0x4c06   :  { %v9691_v60 = vpop.xlane.xlu0 %9690 }
0x4c07   :  { %12980 = vrcp.f32 %v9691_v60 }
0x4c0a   :  { %v9694_v14 = vpop.xlane.xlu0 %9693 }
0x4c0b   :  { %12982 = vrcp.f32 %v9694_v14 }
0x4c0e   :  { %v9782_v32 = vpop.permute.xlu0 %9781 }
0x4c0f   :  { %12410 = vmatpush3.msra.mxu1 %v9782_v32 }
0x4c10   :  { %12419 = vmatprep.subr.mxu1 %v13068_v8 }
0x4c11   :  { %v12981_v1 = vpop.eup %12980 }
0x4c12   :  { %v9697_v0 = vmul.f32 %v12981_v1, %v9691_v60  ;;  %v9858_v57 = vpop.permute.xlu0 %9857 }
0x4c14   :  { %v9699_v22 = vsub.f32 2.0, %v9697_v0 }
0x4c15   :  { %v12983_v47 = vpop.eup %12982 }
0x4c16   :  { %v9701_v55 = vmul.f32 %v12981_v1, %v9699_v22  ;;  %v9698_v4 = vmul.f32 %v12983_v47, %v9694_v14 }
0x4c18   :  { %v9703_v31 = vmul.f32 %v12977_v48, %v9701_v55  ;;  %v9700_v25 = vsub.f32 2.0, %v9698_v4 }
0x4c1a   :  { %v9702_v40 = vmul.f32 %v12983_v47, %v9700_v25  ;;  %12407 = vmatmul.mubr.msk.f32.vlgmr.msra.gmra.mrb[94].mxu0 %vm253_vm2, %v9703_v31 }
0x4c1b   :  { %12415 = vmatpush3.xpose.msk.msra.mxu0 %vm253_vm2, %v9860_v3  ;;  %12416 = vmatprep.mubr.msk.f32.mxu0 %vm13069_vm1, %v13068_v8 }
0x4c1c   :  { %v9704_v11 = vmul.f32 %v12979_v17, %v9702_v40  ;;  %12424 = vmatprep.subr.mxu0 %v13068_v8 }
0x4c1e   :  { %12412 = vmatmul.mubr.msk.f32.vlgmr.msra.gmra.mrb[116].mxu1 %vm253_vm2, %v9704_v11  ;;  %12417 = vmatmul.mubr.msk.f32.vlgmr.msra.gmra.mrb[96].mxu0 %vm253_vm2, %v9858_v57 }
0x4c1f   :  { %12420 = vmatpush3.xpose.msk.msra.mxu1 %vm253_vm2, %v9938_v10  ;;  %12421 = vmatprep.mubr.msk.f32.mxu1 %vm13069_vm1, %v13068_v8 }
0x4c20   :  { %12429 = vmatprep.subr.mxu1 %v13068_v8  ;;  %12426 = vmatprep.mubr.msk.f32.mxu0 %vm13069_vm1, %v13068_v8 }
0x4c22   :  { %12422 = vmatmul.mubr.msk.f32.vlgmr.msra.gmra.mrb[118].mxu1 %vm253_vm2, %v9936_v19 }
0x4c23   :  { %12431 = vmatprep.mubr.msk.f32.mxu1 %vm13069_vm1, %v13068_v8 }
0x4ced   :  { %v14477_v52 = vpop.f32.mrb[94].mxu0 }
0x4cee   :  { %v12408_v21 = vpop.f32.mrb[95].mxu0 }
0x4cf1   :  { %v14479_v7 = vpop.f32.mrb[116].mxu1  ;;  %v9931_v16 = vpop.f32.mrb[96].mxu0 }
0x4cf2   :  { %v12413_v20 = vpop.f32.mrb[117].mxu1  ;;  %v12418_v13 = vpop.f32.mrb[97].mxu0  ;;  %v10013_v15 = vsel %vm253_vm2, %v9931_v16, -inf }
0x4cf3   :  { %10014 = vmax.xlane.f32.xlu0 %v10013_v15 }
0x4cf5   :  { %v10009_v23 = vpop.f32.mrb[118].mxu1 }
0x4cf6   :  { %v12423_v24 = vpop.f32.mrb[119].mxu1  ;;  %v10016_v5 = vsel %vm253_vm2, %v10009_v23, -inf }
0x4cf7   :  { %10017 = vmax.xlane.f32.xlu1 %v10016_v5 }
0x4d08   :  { %10041 = vrot.lane.b32.xlu1 %v14380_v53, %s13076_s10 }
0x4d0c   :  { %10195 = vrot.lane.b32.xlu1 %v14380_v53, %s14665_s5 }
0x4d10   :  { %10273 = vrot.lane.b32.xlu1 %v14363_v18, %s14665_s5 }
0x4d14   :  { %10271 = vrot.lane.b32.xlu1 %v14398_v29, %s14665_s5 }
0x4d80   :  { %v10015_v59 = vpop.xlane.xlu0 %10014 }
0x4d81   :  { %v10019_v62 = vsub.f32 %v9931_v16, %v10015_v59 }
0x4d83   :  { %v10021_v26 = vmul.f32 1.442695, %v10019_v62 }
0x4d84   :  { %v10018_v30 = vpop.xlane.xlu1 %10017 }
0x4d85   :  { %12984 = vpow2.f32 %v10021_v26  ;;  %v10020_v34 = vsub.f32 %v10009_v23, %v10018_v30  ;;  %v11356_v26 = vld [vmem:[%s14655_s30 + $0x20] sm:$0xff]  ;;  %v11357_v30 = vld [vmem:[%s14655_s30 + $0x28] sm:$0xff] }
0x4d87   :  { %v10023_v58 = vmul.f32 1.442695, %v10020_v34  ;;  %v12682_v34 = vpack.c.bf16 %v11357_v30, %v11356_v26  ;;  %v11367_v30 = vld [vmem:[%s14660_s22 + $0x1] ss:$0 sm:$0xff] }
0x4d88   :  { %v10042_v35 = vpop.permute.xlu1 %10041 }
0x4d89   :  { %12986 = vpow2.f32 %v10023_v58  ;;  %12425 = vmatpush3.msra.mxu0 %v10042_v35  ;;  %v11358_v58 = vld [vmem:[%s14655_s30 + $0x30] sm:$0xff]  ;;  %v11359_v35 = vld [vmem:[%s14655_s30 + $0x38] sm:$0xff] }
0x4d8a   :  { %12434 = vmatprep.subr.mxu0 %v13068_v8 }
0x4d8c   :  { %v10196_v56 = vpop.permute.xlu1 %10195 }
0x4d8f   :  { %v12985_v28 = vpop.eup %12984 }
0x4d90   :  { %v10025_v51 = vsel %vm253_vm2, %v12985_v28, 0.0 }
0x4d91   :  { %10026 = vadd.xlane.f32.xlu0 %v10025_v51 }
0x4d93   :  { %v12987_v12 = vpop.eup %12986 }
0x4d94   :  { %v10028_v36 = vsel %vm253_vm2, %v12987_v12, 0.0 }
0x4d95   :  { %10029 = vadd.xlane.f32.xlu0 %v10028_v36 }
0x4dab   :  { %10117 = vrot.lane.b32.xlu0 %v14363_v18, %s13076_s10 }
0x4daf   :  { %10193 = vrot.lane.b32.xlu0 %v14390_v61, %s14665_s5  ;;  %v10274_v61 = vpop.permute.xlu1 %10273 }
0x4db3   :  { %v10272_v54 = vpop.permute.xlu1 %10271 }
0x4e1e   :  { %v10027_v29 = vpop.xlane.xlu0 %10026 }
0x4e1f   :  { %12988 = vrcp.f32 %v10027_v29 }
0x4e22   :  { %v10030_v37 = vpop.xlane.xlu0 %10029 }
0x4e23   :  { %12990 = vrcp.f32 %v10030_v37 }
0x4e26   :  { %v10118_v6 = vpop.permute.xlu0 %10117 }
0x4e27   :  { %12430 = vmatpush3.msra.mxu1 %v10118_v6 }
0x4e28   :  { %12439 = vmatprep.subr.mxu1 %v13068_v8 }
0x4e29   :  { %v12989_v9 = vpop.eup %12988 }
0x4e2a   :  { %v10033_v63 = vmul.f32 %v12989_v9, %v10027_v29  ;;  %v10194_v48 = vpop.permute.xlu0 %10193 }
0x4e2c   :  { %v10035_v38 = vsub.f32 2.0, %v10033_v63 }
0x4e2d   :  { %v12991_v39 = vpop.eup %12990 }
0x4e2e   :  { %v10037_v49 = vmul.f32 %v12989_v9, %v10035_v38  ;;  %v10034_v45 = vmul.f32 %v12991_v39, %v10030_v37 }
0x4e30   :  { %v10039_v43 = vmul.f32 %v12985_v28, %v10037_v49  ;;  %v10036_v41 = vsub.f32 2.0, %v10034_v45  ;;  %v12686_v28 = vpack.c.bf16 %v11359_v35, %v11358_v58 }
0x4e32   :  { %v10038_v44 = vmul.f32 %v12991_v39, %v10036_v41  ;;  %12427 = vmatmul.mubr.msk.f32.vlgmr.msra.gmra.mrb[98].mxu0 %vm253_vm2, %v10039_v43 }
0x4e33   :  { %12435 = vmatpush3.xpose.msk.msra.mxu0 %vm253_vm2, %v10196_v56  ;;  %12436 = vmatprep.mubr.msk.f32.mxu0 %vm13069_vm1, %v13068_v8 }
0x4e34   :  { %v10040_v2 = vmul.f32 %v12987_v12, %v10038_v44  ;;  %12444 = vmatprep.subr.mxu0 %v13068_v8 }
0x4e36   :  { %12432 = vmatmul.mubr.msk.f32.vlgmr.msra.gmra.mrb[120].mxu1 %vm253_vm2, %v10040_v2  ;;  %12437 = vmatmul.mubr.msk.f32.vlgmr.msra.gmra.mrb[100].mxu0 %vm253_vm2, %v10194_v48 }
0x4e37   :  { %12440 = vmatpush3.xpose.msk.msra.mxu1 %vm253_vm2, %v10274_v61  ;;  %12441 = vmatprep.mubr.msk.f32.mxu1 %vm13069_vm1, %v13068_v8  ;;  %v11361_v61 = vld [vmem:[%s14656_s6 + $0x1] ss:$0 sm:$0xff] }
0x4e38   :  { %12449 = vmatprep.subr.mxu1 %v13068_v8  ;;  %12446 = vmatprep.mubr.msk.f32.mxu0 %vm13069_vm1, %v13068_v8 }
0x4e3a   :  { %12442 = vmatmul.mubr.msk.f32.vlgmr.msra.gmra.mrb[122].mxu1 %vm253_vm2, %v10272_v54 }
0x4e3b   :  { %12451 = vmatprep.mubr.msk.f32.mxu1 %vm13069_vm1, %v13068_v8 }
0x4f05   :  { %v10113_v17 = vpop.f32.mrb[98].mxu0 }
0x4f06   :  { %v12428_v42 = vpop.f32.mrb[99].mxu0 }
0x4f09   :  { %v10189_v60 = vpop.f32.mrb[120].mxu1  ;;  %v10267_v14 = vpop.f32.mrb[100].mxu0 }
0x4f0a   :  { %v12433_v32 = vpop.f32.mrb[121].mxu1  ;;  %v12438_v1 = vpop.f32.mrb[101].mxu0  ;;  %v10349_v0 = vsel %vm253_vm2, %v10267_v14, -inf }
0x4f0b   :  { %10350 = vmax.xlane.f32.xlu0 %v10349_v0 }
0x4f0d   :  { %v10345_v22 = vpop.f32.mrb[122].mxu1 }
0x4f0e   :  { %v12443_v47 = vpop.f32.mrb[123].mxu1  ;;  %v10352_v3 = vsel %vm253_vm2, %v10345_v22, -inf }
0x4f0f   :  { %10353 = vmax.xlane.f32.xlu1 %v10352_v3 }
0x4f20   :  { %10377 = vrot.lane.b32.xlu1 %v14380_v53, %s14664_s12 }
0x4f24   :  { %10531 = vrot.lane.b32.xlu1 %v14477_v52, %s14667_s11 }
0x4f28   :  { %10533 = vrot.lane.b32.xlu1 %v14479_v7, %s14667_s11 }
0x4f2c   :  { %10541 = vrot.lane.b32.xlu1 %v10189_v60, %s14668_s17 }
0x4f98   :  { %v10351_v8 = vpop.xlane.xlu0 %10350 }
0x4f99   :  { %v10355_v55 = vsub.f32 %v10267_v14, %v10351_v8 }
0x4f9b   :  { %v10357_v4 = vmul.f32 1.442695, %v10355_v55  ;;  %v11368_v55 = vld [vmem:[%s14657_s13 + $0x20] sm:$0xff] }
0x4f9c   :  { %v10354_v31 = vpop.xlane.xlu1 %10353 }
0x4f9d   :  { %12992 = vpow2.f32 %v10357_v4  ;;  %v10356_v25 = vsub.f32 %v10345_v22, %v10354_v31  ;;  %v11369_v4 = vld [vmem:[%s14657_s13 + $0x28] sm:$0xff] }
0x4f9e   :  { %v12690_v31 = vpack.c.bf16 %v11369_v4, %v11368_v55  ;;  %v10946_v55 = vld [vmem:[%s13264_s9 + $0x18] sm:$0xff] }
0x4f9f   :  { %v10359_v40 = vmul.f32 1.442695, %v10356_v25  ;;  %v11370_v25 = vld [vmem:[%s14657_s13 + $0x30] sm:$0xff] }
0x4fa0   :  { %v10378_v10 = vpop.permute.xlu1 %10377 }
0x4fa1   :  { %12994 = vpow2.f32 %v10359_v40  ;;  %12445 = vmatpush3.msra.mxu0 %v10378_v10  ;;  %v11371_v40 = vld [vmem:[%s14657_s13 + $0x38] sm:$0xff] }
0x4fa2   :  { %12683 = vmatprep.subr.bf16.mxu0 %v12682_v34  ;;  %v12694_v10 = vpack.c.bf16 %v11371_v40, %v11370_v25 }
0x4fa4   :  { %v10532_v37 = vpop.permute.xlu1 %10531 }
0x4fa5   :  { %v10553_v63 = vsel %vm253_vm2, %v14439_v50, %v10532_v37 }
0x4fa7   :  { %v12993_v11 = vpop.eup %12992 }
0x4fa8   :  { %v10361_v53 = vsel %vm253_vm2, %v12993_v11, 0.0  ;;  %v10534_v6 = vpop.permute.xlu1 %10533 }
0x4fa9   :  { %10362 = vadd.xlane.f32.xlu0 %v10361_v53  ;;  %v10554_v45 = vsel %vm253_vm2, %v14441_v33, %v10534_v6  ;;  %v11377_v53 = vld [vmem:[%s14658_s26 + $0x48] sm:$0xff]  ;;  %v11373_v6 = vld [vmem:[%s14661_s18 + $0x1] ss:$0 sm:$0xff] }
0x4fab   :  { %v12995_v57 = vpop.eup %12994 }
0x4fac   :  { %v10364_v19 = vsel %vm253_vm2, %v12995_v57, 0.0  ;;  %v10542_v38 = vpop.permute.xlu1 %10541 }
0x4fad   :  { %10365 = vadd.xlane.f32.xlu0 %v10364_v19  ;;  %v10556_v43 = vsel %vm1621_vm4, %v10554_v45, %v10542_v38  ;;  %v11385_v45 = vld [vmem:[%s14662_s16 + $0x1] ss:$0 sm:$0xff] }
0x4fc3   :  { %10453 = vrot.lane.b32.xlu0 %v14363_v18, %s14664_s12 }
0x4fc7   :  { %10539 = vrot.lane.b32.xlu0 %v10113_v17, %s14668_s17 }
0x5036   :  { %v10363_v52 = vpop.xlane.xlu0 %10362 }
0x5037   :  { %12996 = vrcp.f32 %v10363_v52 }
0x503a   :  { %v10366_v21 = vpop.xlane.xlu0 %10365 }
0x503b   :  { %12998 = vrcp.f32 %v10366_v21 }
0x503e   :  { %v10454_v7 = vpop.permute.xlu0 %10453 }
0x503f   :  { %12450 = vmatpush3.msra.mxu1 %v10454_v7  ;;  %v11380_v7 = vld [vmem:[%s14658_s26 + $0x60] sm:$0xff] }
0x5040   :  { %12691 = vmatprep.subr.bf16.mxu1 %v12690_v31 }
0x5041   :  { %v12997_v16 = vpop.eup %12996 }
0x5042   :  { %v10369_v20 = vmul.f32 %v12997_v16, %v10363_v52  ;;  %v10540_v9 = vpop.permute.xlu0 %10539  ;;  %v11379_v52 = vld [vmem:[%s14658_s26 + $0x58] sm:$0xff] }
0x5043   :  { %v10555_v39 = vsel %vm1621_vm4, %v10553_v63, %v10540_v9 }
0x5044   :  { %v10371_v13 = vsub.f32 2.0, %v10369_v20 }
0x5045   :  { %v12999_v15 = vpop.eup %12998 }
0x5046   :  { %v10373_v23 = vmul.f32 %v12997_v16, %v10371_v13  ;;  %v10370_v24 = vmul.f32 %v12999_v15, %v10366_v21  ;;  %v11381_v16 = vld [vmem:[%s14658_s26 + $0x68] sm:$0xff] }
0x5047   :  { %v12706_v20 = vpack.c.bf16 %v11381_v16, %v11380_v7  ;;  %v11391_v16 = vld [vmem:[%s13259_s4 + $0x1] ss:$0 sm:$0xff] }
0x5048   :  { %v10375_v5 = vmul.f32 %v12993_v11, %v10373_v23  ;;  %v10372_v18 = vsub.f32 2.0, %v10370_v24  ;;  %v11376_v11 = vld [vmem:[%s14658_s26 + $0x40] sm:$0xff] }
0x5049   :  { %v12698_v19 = vpack.c.bf16 %v11377_v53, %v11376_v11 }
0x504a   :  { %v10374_v59 = vmul.f32 %v12999_v15, %v10372_v18  ;;  %12447 = vmatmul.mubr.msk.f32.vlgmr.msra.gmra.mrb[102].mxu0 %vm253_vm2, %v10375_v5 }
0x504b   :  { %12685 = vmatpush3.bf16.msra.mxu0 %v12682_v34 }
0x504c   :  { %v10376_v62 = vmul.f32 %v12995_v57, %v10374_v59  ;;  %12687 = vmatprep.subr.bf16.mxu0 %v12686_v28  ;;  %v11378_v57 = vld [vmem:[%s14658_s26 + $0x50] sm:$0xff] }
0x504d   :  { %v12702_v21 = vpack.c.bf16 %v11379_v52, %v11378_v57 }
0x504e   :  { %12452 = vmatmul.mubr.msk.f32.vlgmr.msra.gmra.mrb[124].mxu1 %vm253_vm2, %v10376_v62  ;;  %v11366_v62 = vld [vmem:[%s14659_s23 + $0x1] ss:$0 sm:$0xff] }
0x504f   :  { %12689 = vmatpush3.bf16.msra.mxu0 %v12686_v28  ;;  %12693 = vmatpush3.bf16.msra.mxu1 %v12690_v31 }
0x5050   :  { %12695 = vmatprep.subr.bf16.mxu1 %v12694_v10  ;;  %12699 = vmatprep.subr.bf16.mxu0 %v12698_v19 }
0x5053   :  { %12697 = vmatpush3.bf16.msra.mxu1 %v12694_v10 }
0x511d   :  { %v10449_v51 = vpop.f32.mrb[102].mxu0 }
0x511e   :  { %10547 = vrot.lane.b32.xlu0 %v10449_v51, %s14669_s2  ;;  %v12448_v12 = vpop.f32.mrb[103].mxu0 }
0x5121   :  { %v10525_v36 = vpop.f32.mrb[124].mxu1 }
0x5122   :  { %10549 = vrot.lane.b32.xlu1 %v10525_v36, %s14669_s2  ;;  %v12453_v29 = vpop.f32.mrb[125].mxu1  ;;  %v11382_v36 = vld [vmem:[%s14658_s26 + $0x70] sm:$0xff] }
0x5123   :  { %v11383_v29 = vld [vmem:[%s14658_s26 + $0x78] sm:$0xff] }
0x5124   :  { %v12710_v37 = vpack.c.bf16 %v11383_v29, %v11382_v36 }
0x5190   :  { %v10548_v56 = vpop.permute.xlu0 %10547 }
0x5191   :  { %v10557_v49 = vsel %vm1624_vm3, %v10555_v39, %v10548_v56 }
0x5192   :  { %12462 = vmatprep.mubr.msk.f32.mxu0 %vm166_vm0, %v10557_v49 }
0x5194   :  { %v10550_v41 = vpop.permute.xlu1 %10549 }
0x5195   :  { %v10558_v44 = vsel %vm1624_vm3, %v10556_v43, %v10550_v41 }
0x5196   :  { %12463 = vmatmul.mubr.msk.f32.vlgmr.msra.gmra.mrb[104].mxu0 %vm166_vm0, %v10558_v44 }
0x5197   :  { %12701 = vmatpush3.bf16.msra.mxu0 %v12698_v19  ;;  %v11390_v19 = vld [vmem:[%s14663_s15 + $0x1] ss:$0 sm:$0xff] }
0x5198   :  { %12703 = vmatprep.subr.bf16.mxu0 %v12702_v21 }
0x519b   :  { %12705 = vmatpush3.bf16.msra.mxu0 %v12702_v21 }
0x519c   :  { %12707 = vmatprep.subr.bf16.mxu0 %v12706_v20 }
0x519f   :  { %12709 = vmatpush3.bf16.msra.mxu0 %v12706_v20 }
0x51a0   :  { %12711 = vmatprep.subr.bf16.mxu0 %v12710_v37 }
0x51a3   :  { %12713 = vmatpush3.bf16.msra.mxu0 %v12710_v37 }
0x5269   :  { %v12464_v50 = vpop.f32.mrb[104].mxu0 }
0x526a   :  { %v10650_v2 = vadd.f32 %v12464_v50, %v11361_v61  ;;  %v10644_v48 = vpop.f32.mrb[105].mxu0 }
0x526b   :  { %v10645_v54 = vadd.f32 %v11361_v61, %v10644_v48 }
0x526c   :  { %v10658_v17 = vadd.f32 %v10650_v2, %v14378_v27 }
0x526d   :  { %v10657_v42 = vadd.f32 %v10645_v54, %v14374_v46 }
0x526e   :  { %v10662_v60 = vsel %vm166_vm0, %v10658_v17, 0.0 }
0x526f   :  { %10663 = vadd.xlane.f32.xlu1 %v10662_v60  ;;  %v10659_v33 = vsel %vm166_vm0, %v10657_v42, 0.0 }
0x5270   :  { %10660 = vadd.xlane.f32.xlu0 %v10659_v33 }
0x52fc   :  { %v10664_v14 = vpop.xlane.xlu1 %10663 }
0x52fd   :  { %v10666_v32 = vmul.f32 0.03125, %v10664_v14  ;;  %v10661_v1 = vpop.xlane.xlu0 %10660 }
0x52fe   :  { %v10665_v0 = vmul.f32 0.03125, %v10661_v1 }
0x52ff   :  { %v10668_v22 = vsub.f32 %v10658_v17, %v10666_v32 }
0x5300   :  { %v10667_v47 = vsub.f32 %v10657_v42, %v10665_v0 }
0x5301   :  { %v10670_v27 = vmul.f32 %v10668_v22, %v10668_v22 }
0x5302   :  { %v10669_v3 = vmul.f32 %v10667_v47, %v10667_v47 }
0x5303   :  { %v10674_v8 = vsel %vm166_vm0, %v10670_v27, 0.0 }
0x5304   :  { %v10671_v46 = vsel %vm166_vm0, %v10669_v3, 0.0  ;;  %v10943_v3 = vld [vmem:[%s13264_s9] sm:$0xff] }
0x5305   :  { %10672 = vadd.xlane.f32.xlu0 %v10671_v46  ;;  %v10944_v46 = vld [vmem:[%s13264_s9 + $0x8] sm:$0xff] }
0x5306   :  { %v12714_v27 = vpack.c.bf16 %v10944_v46, %v10943_v3 }
0x5308   :  { %12715 = vmatprep.subr.bf16.mxu1 %v12714_v27 }
0x5309   :  { %10675 = vadd.xlane.f32.xlu0 %v10674_v8  ;;  %v10945_v8 = vld [vmem:[%s13264_s9 + $0x10] sm:$0xff]  ;;  %s13084_s9 = smov [#allocation2]  }
0x530a   :  { %v12718_v4 = vpack.c.bf16 %v10946_v55, %v10945_v8  ;;  %s11042_s0 = sshll.u32 %s13084_s9, 4  ;;  %s11043_s0 = int_to_ptr.vmem [resolvable:$true] %s11042_s0 }
0x530b   :  { %s13008_s4 = scalar_lea.vmem %s11043_s0, 256  ;;  %p13013_p1 = scmp.lt.s32.totalorder %s11043_s0, %s11043_s0 }
0x530c   :  { %p13009_p0 = scmp.ne.s32.totalorder %s11043_s0, %s13008_s4  ;;  %p13014_p2 = scmp.lt.s32.totalorder %s13008_s4, %s13008_s4 }
0x530e   :  { %p13015_p3 = por %p13014_p2, %p13013_p1 }
0x5310   :  { %p13016_p4 = pnand %p13015_p3, %p13009_p0 }
0x5392   :  { %v10673_v13 = vpop.xlane.xlu0 %10672 }
0x5393   :  { %v10677_v15 = vmul.f32 0.03125, %v10673_v13 }
0x5395   :  { %v10679_v23 = vadd.f32 1e-05, %v10677_v15 }
0x5396   :  { %v10676_v24 = vpop.xlane.xlu0 %10675 }
0x5397   :  { %13000 = vrsqrt.f32 %v10679_v23  ;;  %v10678_v5 = vmul.f32 0.03125, %v10676_v24  ;;  %v11392_v24 = vld [vmem:[%s13269_s20] ss:$0 sm:$0xff] }
0x5399   :  { %v10680_v18 = vadd.f32 1e-05, %v10678_v5 }
0x539b   :  { %13002 = vrsqrt.f32 %v10680_v18 }
0x53a1   :  { %v13001_v59 = vpop.eup %13000 }
0x53a2   :  { %v10683_v26 = vmul.f32 %v13001_v59, %v10667_v47 }
0x53a4   :  { %v10691_v34 = vmul.f32 %v11366_v62, %v10683_v26 }
0x53a5   :  { %v13003_v58 = vpop.eup %13002 }
0x53a6   :  { %v10684_v35 = vmul.f32 %v13003_v58, %v10668_v22  ;;  %v10699_v28 = vadd.f32 %v11367_v30, %v10691_v34 }
0x53a8   :  { %v10692_v51 = vmul.f32 %v11366_v62, %v10684_v35  ;;  %12473 = vmatprep.mubr.msk.f32.mxu1 %vm166_vm0, %v10699_v28 }
0x53aa   :  { %v10700_v12 = vadd.f32 %v11367_v30, %v10692_v51 }
0x53ac   :  { %12474 = vmatmul.mubr.msk.f32.vlgmr.msra.gmra.mrb[126].mxu1 %vm166_vm0, %v10700_v12 }
0x53ad   :  { %12717 = vmatpush3.bf16.msra.mxu1 %v12714_v27 }
0x53ae   :  { %12719 = vmatprep.subr.bf16.mxu1 %v12718_v4 }
0x53b1   :  { %12721 = vmatpush3.bf16.msra.mxu1 %v12718_v4 }
0x547f   :  { %v12475_v9 = vpop.f32.mrb[126].mxu1 }
0x5480   :  { %v10792_v63 = vadd.f32 %v12475_v9, %v11373_v6  ;;  %v10786_v38 = vpop.f32.mrb[127].mxu1 }
0x5481   :  { %v10787_v39 = vadd.f32 %v11373_v6, %v10786_v38 }
0x5482   :  { %v10796_v49 = vmax.f32 %v10792_v63, 0.0 }
0x5483   :  { %v10795_v56 = vmax.f32 %v10787_v39, 0.0 }
0x5485   :  { %12492 = vmatprep.mubr.msk.f32.mxu0 %vm1875_vm5, %v10795_v56 }
0x5486   :  { %12493 = vmatmul.mubr.msk.f32.vlgmr.msra.gmra.mrb[106].mxu0 %vm1875_vm5, %v10796_v49 }
0x5559   :  { %v12494_v43 = vpop.f32.mrb[106].mxu0 }
0x555a   :  { %v10892_v41 = vadd.f32 %v12494_v43, %v11385_v45  ;;  %v10886_v44 = vpop.f32.mrb[107].mxu0 }
0x555b   :  { %v10887_v61 = vadd.f32 %v11385_v45, %v10886_v44 }
0x555c   :  { %v10900_v50 = vadd.f32 %v10892_v41, %v10700_v12 }
0x555d   :  { %v10899_v2 = vadd.f32 %v10887_v61, %v10699_v28 }
0x555e   :  { %v10904_v48 = vsel %vm166_vm0, %v10900_v50, 0.0 }
0x555f   :  { %10905 = vadd.xlane.f32.xlu0 %v10904_v48  ;;  %v10901_v54 = vsel %vm166_vm0, %v10899_v2, 0.0 }
0x5560   :  { %10902 = vadd.xlane.f32.xlu1 %v10901_v54 }
0x55ec   :  { %v10906_v17 = vpop.xlane.xlu0 %10905 }
0x55ed   :  { %v10908_v42 = vmul.f32 0.03125, %v10906_v17  ;;  %v10903_v60 = vpop.xlane.xlu1 %10902 }
0x55ee   :  { %v10907_v33 = vmul.f32 0.03125, %v10903_v60 }
0x55ef   :  { %v10910_v14 = vsub.f32 %v10900_v50, %v10908_v42 }
0x55f0   :  { %v10909_v32 = vsub.f32 %v10899_v2, %v10907_v33 }
0x55f1   :  { %v10912_v1 = vmul.f32 %v10910_v14, %v10910_v14 }
0x55f2   :  { %v10911_v0 = vmul.f32 %v10909_v32, %v10909_v32 }
0x55f3   :  { %v10916_v22 = vsel %vm166_vm0, %v10912_v1, 0.0 }
0x55f4   :  { %10917 = vadd.xlane.f32.xlu0 %v10916_v22  ;;  %v10913_v47 = vsel %vm166_vm0, %v10911_v0, 0.0 }
0x55f5   :  { %10914 = vadd.xlane.f32.xlu1 %v10913_v47 }
0x5681   :  { %v10918_v31 = vpop.xlane.xlu0 %10917 }
0x5682   :  { %v10920_v25 = vmul.f32 0.03125, %v10918_v31  ;;  %v10915_v40 = vpop.xlane.xlu1 %10914 }
0x5683   :  { %v10919_v10 = vmul.f32 0.03125, %v10915_v40 }
0x5684   :  { %v10922_v11 = vadd.f32 1e-05, %v10920_v25 }
0x5685   :  { %v10921_v53 = vadd.f32 1e-05, %v10919_v10 }
0x5686   :  { %13004 = vrsqrt.f32 %v10922_v11 }
0x5687   :  { %13006 = vrsqrt.f32 %v10921_v53 }
0x5690   :  { %v13005_v57 = vpop.eup %13004 }
0x5691   :  { %v13007_v52 = vpop.eup %13006  ;;  %v10926_v21 = vmul.f32 %v13005_v57, %v10910_v14 }
0x5692   :  { %v10925_v7 = vmul.f32 %v13007_v52, %v10909_v32 }
0x5693   :  { %v10934_v20 = vmul.f32 %v11390_v19, %v10926_v21 }
0x5694   :  { %v10933_v13 = vmul.f32 %v11390_v19, %v10925_v7 }
0x5695   :  { %v10942_v23 = vadd.f32 %v11391_v16, %v10934_v20 }
0x5696   :  { %v10941_v15 = vadd.f32 %v11391_v16, %v10933_v13 }
0x5698   :  { %12503 = vmatprep.mubr.msk.f32.mxu1 %vm166_vm0, %v10941_v15 }
0x5699   :  { %12504 = vmatmul.mubr.msk.f32.vlgmr.msra.gmra.mrb[128].mxu1 %vm166_vm0, %v10942_v23 }
0x576c   :  { %v12505_v5 = vpop.f32.mrb[128].mxu1 }
0x576d   :  { %v11032_v18 = vadd.f32 %v12505_v5, %v11392_v24  ;;  %v11026_v59 = vpop.f32.mrb[129].mxu1 }
0x576e   :  { %v11027_v62 = vadd.f32 %v11392_v24, %v11026_v59 }
0x576f   :  { %11036 = vst.msk [vmem:[#allocation2 + $0x8] sm:$0xff] %vm1875_vm5, %v11032_v18 }
0x5770   :  { %11035 = vst.msk [vmem:[#allocation2] sm:$0xff] %vm1875_vm5, %v11027_v62 }
0x5771   :  { %13019 = shalt.err (!%p13016_p4)
}
0x5772   :  { %s13020_s20 = scalar_lea.hbm %s13274_s27, 256 }
0x5773   :  { %p13021_p5 = scmp.ne.s32.totalorder %s13274_s27, %s13020_s20  ;;  %p13024_p6 = scmp.lt.u32.totalorder %s13020_s20, %s13274_s27 }
0x5775   :  { %p13026_p7 = pnand %p13024_p6, %p13021_p5 }
0x5777   :  { %13029 = shalt.err (!%p13026_p7)
}
0x5778   :  { %s13085_s28 = smov 128  }
0x5779   :  { %11048 = dma.vmem_to_hbm [thread:$0]  %s11043_s0, 256, %s13274_s27, [#allocation3], %s13085_s28, %s13085_s28, %s14667_s11  }
0x577a   :  { %13030 = dma.done.wait [#allocation3], 256  }
0x577b   :  { %13031 = vsyncadd [#allocation3], 4294967040 }
0x577c   :  { %11052 = vsyncpa [#allocation3], 1 }

</bundles_post_ra>
